<compile_context>
chip_gen: v7x
topology: tpu7x:2x2x1
jax: 0.10.0
libtpu: 0.0.40
codegen_flags: <defaults>
</compile_context>

<pallas_src>
import jax
import jax.numpy as jnp
from jax import lax
from jax.experimental import pallas as pl
from jax.experimental.pallas import tpu as pltpu

PAD = 128      # lane padding for the packed input stream (pts + views)
TILE = 2048    # rows (samples) per grid step for large batches
N_CHUNKS = 2   # independent row chunks interleaved inside the kernel
BF16 = jnp.bfloat16


def _round_up(n, m):
    return ((n + m - 1) // m) * m


# ---------------------------------------------------------------------------
# Deterministic parameter init (mirrors nn.Linear shapes; uniform +-1/sqrt(in))
# ---------------------------------------------------------------------------
def init_nerf_params(key, D=8, W=256, input_ch=3, input_ch_views=3,
                     output_ch=4, skips=(4,), use_viewdirs=False):
    def linear(k, fan_in, fan_out):
        kw, kb = jax.random.split(k)
        bound = 1.0 / (fan_in ** 0.5)
        w = jax.random.uniform(kw, (fan_in, fan_out), jnp.float32, -bound, bound)
        b = jax.random.uniform(kb, (fan_out,), jnp.float32, -bound, bound)
        return w, b

    keys = jax.random.split(key, D + 6)
    pts_in = [input_ch] + [(W + input_ch) if i in skips else W for i in range(D - 1)]
    params = {"pts_w": [], "pts_b": []}
    for j in range(D):
        w, b = linear(keys[j], pts_in[j], W)
        params["pts_w"].append(w)
        params["pts_b"].append(b)
    if use_viewdirs:
        params["feature_w"], params["feature_b"] = linear(keys[D], W, W)
        params["alpha_w"], params["alpha_b"] = linear(keys[D + 1], W, 1)
        params["views_w"], params["views_b"] = linear(keys[D + 2], input_ch_views + W, W // 2)
        params["rgb_w"], params["rgb_b"] = linear(keys[D + 3], W // 2, 3)
    else:
        params["out_w"], params["out_b"] = linear(keys[D], W, output_ch)
    return params


# ---------------------------------------------------------------------------
# Pallas kernels (whole MLP hot path lives in the kernel)
# ---------------------------------------------------------------------------
def _make_kernel(D, skips, use_viewdirs, tile, n_chunks, out_pad):
    skips = tuple(skips)
    n_skip = sum(1 for j in range(1, D) if (j - 1) in skips)
    assert tile % n_chunks == 0
    hm = tile // n_chunks
    assert hm % 8 == 0

    def trunk(xs, w_refs, b_refs, skip_w_refs):
        # xs: list of bf16 [hm, PAD] chunks (independent dataflow chains, so the
        # LLO scheduler can overlap one chunk's MXU dot with the other chunk's
        # f32 bias/ReLU/cast epilogue).  Returns the FINAL layer activations in
        # f32 (for the alpha head); between layers activations are bf16.
        hs = [jnp.maximum(jnp.dot(x, w_refs[0][...],
                                  preferred_element_type=jnp.float32)
                          + b_refs[0][...], 0.0) for x in xs]
        s = 0
        for j in range(1, D):
            hb = [h.astype(BF16) for h in hs]   # bf16 inter-layer activations
            accs = [jnp.dot(h, w_refs[j][...], preferred_element_type=jnp.float32)
                    for h in hb]
            if (j - 1) in skips:
                # skip connection: add the raw-input contribution as a second
                # (accumulating) dot instead of concatenating to a 384-wide h.
                accs = [a + jnp.dot(x, skip_w_refs[s][...],
                                    preferred_element_type=jnp.float32)
                        for a, x in zip(accs, xs)]
                s += 1
            hs = [jnp.maximum(a + b_refs[j][...], 0.0) for a in accs]
        return hs

    if not use_viewdirs:
        def kernel(*refs):
            idx = 0
            in_ref = refs[idx]; idx += 1
            w_refs = refs[idx:idx + D]; idx += D
            b_refs = refs[idx:idx + D]; idx += D
            skip_w_refs = refs[idx:idx + n_skip]; idx += n_skip
            wout_ref, bout_ref = refs[idx], refs[idx + 1]
            o_ref = refs[idx + 2]

            xs = [in_ref[pl.ds(c * hm, hm), :] for c in range(n_chunks)]
            hs = trunk(xs, w_refs, b_refs, skip_w_refs)
            for c in range(n_chunks):
                out = jnp.dot(hs[c].astype(BF16), wout_ref[...],
                              preferred_element_type=jnp.float32) + bout_ref[...]
                # only the first out_pad lanes are meaningful (wout/bout are
                # zero-padded beyond output_ch); store the narrow slab.
                o_ref[pl.ds(c * hm, hm), :] = out[:, :out_pad].astype(o_ref.dtype)
        return kernel

    def kernel(*refs):
        idx = 0
        in_ref = refs[idx]; idx += 1
        w_refs = refs[idx:idx + D]; idx += D
        b_refs = refs[idx:idx + D]; idx += D
        skip_w_refs = refs[idx:idx + n_skip]; idx += n_skip
        (wf_ref, bf_ref, wa_ref, ba_ref,
         wvf_ref, wvv_ref, bv_ref, wr_ref, br_ref) = refs[idx:idx + 9]
        o_ref = refs[idx + 9]

        xs = [in_ref[pl.ds(c * hm, hm), :] for c in range(n_chunks)]
        hs = trunk(xs, w_refs, b_refs, skip_w_refs)

        # lane mask to deposit alpha into lane 3 of the narrow packed output.
        lane = lax.broadcasted_iota(jnp.int32, (1, out_pad), 1)
        alpha_mask = (lane == 3).astype(jnp.float32)

        for c in range(n_chunks):
            h = hs[c]                     # f32 final trunk activation
            hb = h.astype(BF16)
            # alpha head: row-vector weight + lane reduction (VPU/XLU), keeps
            # the MXU free; uses the f32 h for full precision.
            alpha = jnp.sum(h * wa_ref[...], axis=-1, keepdims=True) + ba_ref[...]
            feat = jnp.dot(hb, wf_ref[...],
                           preferred_element_type=jnp.float32) + bf_ref[...]
            # views layer as two accumulating dots (no [feature, views] concat).
            hv = (jnp.dot(feat.astype(BF16), wvf_ref[...],
                          preferred_element_type=jnp.float32)
                  + jnp.dot(xs[c], wvv_ref[...],
                            preferred_element_type=jnp.float32)
                  + bv_ref[...])
            hv = jnp.maximum(hv, 0.0)
            rgb = jnp.dot(hv.astype(BF16), wr_ref[...],
                          preferred_element_type=jnp.float32) + br_ref[...]
            # NOTE: wr/br lanes >= 3 are zero-padded (asserted in the wrapper),
            # so lane 3 of the output carries alpha exactly.
            o_ref[pl.ds(c * hm, hm), :] = (
                rgb[:, :out_pad] + alpha * alpha_mask).astype(o_ref.dtype)
    return kernel


# ---------------------------------------------------------------------------
# Wrapper: pack/pad channels & rows, pre-split weights, call pallas_call
# ---------------------------------------------------------------------------
def nerf_forward(x, params, D=8, W=256, input_ch=3, input_ch_views=3,
                 output_ch=4, skips=(4,), use_viewdirs=False, tile=TILE,
                 n_chunks=N_CHUNKS):
    skips = tuple(skips)
    N = x.shape[0]

    # Clamp the tile for tiny batches (avoids running a full 2048-row tile of
    # padded zero rows); large batches use the full TILE for per-step overhead
    # amortization while keeping plenty of grid steps for megacore sharding.
    tile = max(min(tile, _round_up(max(N, 1), 512)), 8 * n_chunks)
    tile = _round_up(tile, 8 * n_chunks)
    n_pad = _round_up(N, tile)
    x = x.astype(jnp.float32)

    out_pad = max(8, _round_up(output_ch if not use_viewdirs else 4, 8))
    assert out_pad <= PAD

    pts = x[:, :input_ch]
    views = x[:, input_ch:input_ch + input_ch_views]

    # One packed input stream: pts in lanes [0, input_ch), views right after.
    packed = jnp.zeros((n_pad, PAD), jnp.float32)
    packed = packed.at[:N, :input_ch].set(pts)
    if use_viewdirs:
        packed = packed.at[:N, input_ch:input_ch + input_ch_views].set(views)
    packed = packed.astype(BF16)

    # pts_linears weights: pad layer 0, split skip layers into (h-part, pts-part).
    w_list, b_list, skip_w_list = [], [], []
    for j in range(D):
        w = params["pts_w"][j].astype(jnp.float32)
        if j == 0:
            wp = jnp.zeros((PAD, W), jnp.float32).at[:input_ch].set(w)
        elif (j - 1) in skips:
            # torch concat order at previous layer: [input_pts, h]
            wp = w[input_ch:]                                              # multiplies h
            wsk = jnp.zeros((PAD, W), jnp.float32).at[:input_ch].set(w[:input_ch])
            skip_w_list.append(wsk.astype(BF16))
        else:
            wp = w
        w_list.append(wp.astype(BF16))
        b_list.append(params["pts_b"][j].astype(jnp.float32)[None, :])

    in_spec = pl.BlockSpec((tile, PAD), lambda i: (i, 0))
    out_spec = pl.BlockSpec((tile, out_pad), lambda i: (i, 0))

    def const_spec(a):
        nd = a.ndim
        return pl.BlockSpec(a.shape, lambda i, _nd=nd: (0,) * _nd)

    grid = (n_pad // tile,)
    kernel = _make_kernel(D, skips, use_viewdirs, tile, n_chunks, out_pad)
    cparams = pltpu.CompilerParams(
        dimension_semantics=("parallel",),
        # v5e's default scoped VMEM is only 16 MiB; working set at tile=2048 is
        # ~10-14 MiB, so raise the limit explicitly (48 MiB < physical on all
        # of v5e/v6e/v7x).
        vmem_limit_bytes=48 * 1024 * 1024,
    )

    # rough cost estimate (padded MACs), lets XLA schedule around the call.
    macs = PAD * W
    for j in range(1, D):
        macs += W * W
        if (j - 1) in skips:
            macs += PAD * W
    if use_viewdirs:
        Wh = W // 2
        macs += W * W + W + W * Wh + PAD * Wh + Wh * PAD
    else:
        macs += W * PAD

    def make_cost(consts):
        bytes_accessed = int(packed.size) * 2 + n_pad * out_pad * 4
        bytes_accessed += sum(int(c.size) * (2 if c.dtype == BF16 else 4) for c in consts)
        return pl.CostEstimate(flops=2 * n_pad * macs, transcendentals=0,
                               bytes_accessed=bytes_accessed)

    if not use_viewdirs:
        wout_p = jnp.zeros((W, PAD), jnp.float32).at[:, :output_ch].set(
            params["out_w"]).astype(BF16)
        bout_p = jnp.zeros((1, PAD), jnp.float32).at[0, :output_ch].set(params["out_b"])
        consts = w_list + b_list + skip_w_list + [wout_p, bout_p]
        out = pl.pallas_call(
            kernel,
            out_shape=jax.ShapeDtypeStruct((n_pad, out_pad), jnp.float32),
            grid_spec=pltpu.PrefetchScalarGridSpec(
                num_scalar_prefetch=0, grid=grid,
                in_specs=[in_spec] + [const_spec(a) for a in consts],
                out_specs=out_spec),
            compiler_params=cparams,
            cost_estimate=make_cost(consts),
        )(packed, *consts)
        return out[:N, :output_ch]

    # use_viewdirs=True branch
    Wh = W // 2
    assert params["rgb_w"].shape == (Wh, 3)  # alpha-in-lane-3 relies on lanes>=3 of wr_p being zero
    wf = params["feature_w"].astype(BF16)
    bf_ = params["feature_b"].astype(jnp.float32)[None, :]
    wa_row = params["alpha_w"].astype(jnp.float32).reshape(1, W)   # row vector, f32 (VPU head)
    ba = params["alpha_b"].astype(jnp.float32).reshape(1, 1)
    wv = params["views_w"].astype(jnp.float32)                     # [W + input_ch_views, Wh]
    wv_feat = wv[:W].astype(BF16)                                  # multiplies feature
    wv_views = jnp.zeros((PAD, Wh), jnp.float32).at[
        input_ch:input_ch + input_ch_views].set(wv[W:]).astype(BF16)  # multiplies packed views lanes
    bv = params["views_b"].astype(jnp.float32)[None, :]
    wr_p = jnp.zeros((Wh, PAD), jnp.float32).at[:, :3].set(params["rgb_w"]).astype(BF16)
    br_p = jnp.zeros((1, PAD), jnp.float32).at[0, :3].set(params["rgb_b"])

    consts = w_list + b_list + skip_w_list + [wf, bf_, wa_row, ba,
                                              wv_feat, wv_views, bv, wr_p, br_p]
    out = pl.pallas_call(
        kernel,
        out_shape=jax.ShapeDtypeStruct((n_pad, out_pad), jnp.float32),
        grid_spec=pltpu.PrefetchScalarGridSpec(
            num_scalar_prefetch=0, grid=grid,
            in_specs=[in_spec] + [const_spec(a) for a in consts],
            out_specs=out_spec),
        compiler_params=cparams,
        cost_estimate=make_cost(consts),
    )(packed, *consts)
    # lanes 0..2 = rgb, lane 3 = alpha  -> matches torch.cat([rgb, alpha], -1)
    return out[:N, :4]


# ---------------------------------------------------------------------------
# Pure-JAX f32 reference (mirrors the PyTorch forward exactly)
# ---------------------------------------------------------------------------
def nerf_reference(x, params, D=8, W=256, input_ch=3, input_ch_views=3,
                   output_ch=4, skips=(4,), use_viewdirs=False):
    pts = x[:, :input_ch]
    views = x[:, input_ch:input_ch + input_ch_views]
    h = pts
    for j in range(D):
        h = jnp.maximum(h @ params["pts_w"][j] + params["pts_b"][j], 0.0)
        if j in skips:
            h = jnp.concatenate([pts, h], axis=-1)
    if use_viewdirs:
        alpha = h @ params["alpha_w"] + params["alpha_b"]
        feat = h @ params["feature_w"] + params["feature_b"]
        hv = jnp.concatenate([feat, views], axis=-1)
        hv = jnp.maximum(hv @ params["views_w"] + params["views_b"], 0.0)
        rgb = hv @ params["rgb_w"] + params["rgb_b"]
        return jnp.concatenate([rgb, alpha], axis=-1)
    return h @ params["out_w"] + params["out_b"]


if __name__ == "__main__":
    key = jax.random.PRNGKey(0)
    kx, kp, kp2 = jax.random.split(key, 3)

    N, input_ch, input_ch_views = 8, 3, 3
    x = jax.random.normal(kx, (N, input_ch + input_ch_views), jnp.float32)

    # bf16 matmul inputs (f32 accumulation) -> compare against the f32
    # reference with a loosened tolerance.
    TOL = 5e-2

    # Default NeRF config: D=8, W=256, skips=[4], use_viewdirs=False -> output_ch=4
    params = init_nerf_params(kp, use_viewdirs=False)
    out = jax.block_until_ready(nerf_forward(x, params, use_viewdirs=False))
    ref = nerf_reference(x, params, use_viewdirs=False)
    assert out.shape == (N, 4)
    assert jnp.allclose(out, ref, atol=TOL, rtol=TOL), "mismatch (no viewdirs)"

    # use_viewdirs=True branch (rgb + alpha heads)
    params_v = init_nerf_params(kp2, use_viewdirs=True)
    out_v = jax.block_until_ready(nerf_forward(x, params_v, use_viewdirs=True))
    ref_v = nerf_reference(x, params_v, use_viewdirs=True)
    assert out_v.shape == (N, 4)
    assert jnp.allclose(out_v, ref_v, atol=TOL, rtol=TOL), "mismatch (viewdirs)"

    print("KERNEL_OK")
</pallas_src>

<mosaic_0001>
module attributes {stable_mosaic.version = 11 : i64} {
  func.func @kernel(%arg0: i32, %arg1: memref<512x128xbf16, #tpu.memory_space<vmem>>, %arg2: memref<128x256xbf16, #tpu.memory_space<vmem>>, %arg3: memref<256x256xbf16, #tpu.memory_space<vmem>>, %arg4: memref<256x256xbf16, #tpu.memory_space<vmem>>, %arg5: memref<256x256xbf16, #tpu.memory_space<vmem>>, %arg6: memref<256x256xbf16, #tpu.memory_space<vmem>>, %arg7: memref<256x256xbf16, #tpu.memory_space<vmem>>, %arg8: memref<256x256xbf16, #tpu.memory_space<vmem>>, %arg9: memref<256x256xbf16, #tpu.memory_space<vmem>>, %arg10: memref<1x256xf32, #tpu.memory_space<vmem>>, %arg11: memref<1x256xf32, #tpu.memory_space<vmem>>, %arg12: memref<1x256xf32, #tpu.memory_space<vmem>>, %arg13: memref<1x256xf32, #tpu.memory_space<vmem>>, %arg14: memref<1x256xf32, #tpu.memory_space<vmem>>, %arg15: memref<1x256xf32, #tpu.memory_space<vmem>>, %arg16: memref<1x256xf32, #tpu.memory_space<vmem>>, %arg17: memref<1x256xf32, #tpu.memory_space<vmem>>, %arg18: memref<128x256xbf16, #tpu.memory_space<vmem>>, %arg19: memref<256x128xbf16, #tpu.memory_space<vmem>>, %arg20: memref<1x128xf32, #tpu.memory_space<vmem>>, %arg21: memref<512x8xf32, #tpu.memory_space<vmem>>) attributes {dimension_semantics = [#tpu.dimension_semantics<parallel>], iteration_bounds = array<i64: 1>, scalar_prefetch = 0 : i64, scratch_operands = 0 : i64, tpu.core_type = #tpu.core_type<tc>, window_params = [{transform_indices = @transform_0, window_bounds = array<i64: 512, 128>}, {pipeline_mode = #tpu.pipeline_mode<synchronous>, transform_indices = @transform_1, window_bounds = array<i64: 128, 256>}, {pipeline_mode = #tpu.pipeline_mode<synchronous>, transform_indices = @transform_2, window_bounds = array<i64: 256, 256>}, {pipeline_mode = #tpu.pipeline_mode<synchronous>, transform_indices = @transform_3, window_bounds = array<i64: 256, 256>}, {pipeline_mode = #tpu.pipeline_mode<synchronous>, transform_indices = @transform_4, window_bounds = array<i64: 256, 256>}, {pipeline_mode = #tpu.pipeline_mode<synchronous>, transform_indices = @transform_5, window_bounds = array<i64: 256, 256>}, {pipeline_mode = #tpu.pipeline_mode<synchronous>, transform_indices = @transform_6, window_bounds = array<i64: 256, 256>}, {pipeline_mode = #tpu.pipeline_mode<synchronous>, transform_indices = @transform_7, window_bounds = array<i64: 256, 256>}, {pipeline_mode = #tpu.pipeline_mode<synchronous>, transform_indices = @transform_8, window_bounds = array<i64: 256, 256>}, {pipeline_mode = #tpu.pipeline_mode<synchronous>, transform_indices = @transform_9, window_bounds = array<i64: 1, 256>}, {pipeline_mode = #tpu.pipeline_mode<synchronous>, transform_indices = @transform_10, window_bounds = array<i64: 1, 256>}, {pipeline_mode = #tpu.pipeline_mode<synchronous>, transform_indices = @transform_11, window_bounds = array<i64: 1, 256>}, {pipeline_mode = #tpu.pipeline_mode<synchronous>, transform_indices = @transform_12, window_bounds = array<i64: 1, 256>}, {pipeline_mode = #tpu.pipeline_mode<synchronous>, transform_indices = @transform_13, window_bounds = array<i64: 1, 256>}, {pipeline_mode = #tpu.pipeline_mode<synchronous>, transform_indices = @transform_14, window_bounds = array<i64: 1, 256>}, {pipeline_mode = #tpu.pipeline_mode<synchronous>, transform_indices = @transform_15, window_bounds = array<i64: 1, 256>}, {pipeline_mode = #tpu.pipeline_mode<synchronous>, transform_indices = @transform_16, window_bounds = array<i64: 1, 256>}, {pipeline_mode = #tpu.pipeline_mode<synchronous>, transform_indices = @transform_17, window_bounds = array<i64: 128, 256>}, {pipeline_mode = #tpu.pipeline_mode<synchronous>, transform_indices = @transform_18, window_bounds = array<i64: 256, 128>}, {pipeline_mode = #tpu.pipeline_mode<synchronous>, transform_indices = @transform_19, window_bounds = array<i64: 1, 128>}, {transform_indices = @transform_20, window_bounds = array<i64: 512, 8>}]} {
    %c0 = arith.constant 0 : index
    %c0_0 = arith.constant 0 : index
    %0 = vector.load %arg1[%c0, %c0_0] : memref<512x128xbf16, #tpu.memory_space<vmem>>, vector<256x128xbf16>
    %c256 = arith.constant 256 : index
    %c0_1 = arith.constant 0 : index
    %1 = vector.load %arg1[%c256, %c0_1] : memref<512x128xbf16, #tpu.memory_space<vmem>>, vector<256x128xbf16>
    %c0_2 = arith.constant 0 : index
    %c0_3 = arith.constant 0 : index
    %2 = vector.load %arg2[%c0_2, %c0_3] : memref<128x256xbf16, #tpu.memory_space<vmem>>, vector<128x256xbf16>
    %cst = arith.constant dense<0.000000e+00> : vector<256x256xf32>
    %3 = tpu.matmul %0, %2, %cst {dimension_numbers = #tpu.dot_dimension_numbers<[1], [0], [0], [1], [0, 0, 1, 1], [], []>} : vector<256x128xbf16>, vector<128x256xbf16>, vector<256x256xf32> -> vector<256x256xf32>
    %c0_4 = arith.constant 0 : index
    %c0_5 = arith.constant 0 : index
    %4 = vector.load %arg10[%c0_4, %c0_5] : memref<1x256xf32, #tpu.memory_space<vmem>>, vector<1x256xf32>
    %5 = vector.broadcast %4 : vector<1x256xf32> to vector<256x256xf32>
    %6 = arith.addf %3, %5 : vector<256x256xf32>
    %cst_6 = arith.constant 0.000000e+00 : f32
    %7 = vector.broadcast %cst_6 : f32 to vector<256x256xf32>
    %8 = arith.maximumf %6, %7 : vector<256x256xf32>
    %c0_7 = arith.constant 0 : index
    %c0_8 = arith.constant 0 : index
    %9 = vector.load %arg2[%c0_7, %c0_8] : memref<128x256xbf16, #tpu.memory_space<vmem>>, vector<128x256xbf16>
    %cst_9 = arith.constant dense<0.000000e+00> : vector<256x256xf32>
    %10 = tpu.matmul %1, %9, %cst_9 {dimension_numbers = #tpu.dot_dimension_numbers<[1], [0], [0], [1], [0, 0, 1, 1], [], []>} : vector<256x128xbf16>, vector<128x256xbf16>, vector<256x256xf32> -> vector<256x256xf32>
    %c0_10 = arith.constant 0 : index
    %c0_11 = arith.constant 0 : index
    %11 = vector.load %arg10[%c0_10, %c0_11] : memref<1x256xf32, #tpu.memory_space<vmem>>, vector<1x256xf32>
    %12 = vector.broadcast %11 : vector<1x256xf32> to vector<256x256xf32>
    %13 = arith.addf %10, %12 : vector<256x256xf32>
    %cst_12 = arith.constant 0.000000e+00 : f32
    %14 = vector.broadcast %cst_12 : f32 to vector<256x256xf32>
    %15 = arith.maximumf %13, %14 : vector<256x256xf32>
    %16 = arith.truncf %8 : vector<256x256xf32> to vector<256x256xbf16>
    %17 = arith.truncf %15 : vector<256x256xf32> to vector<256x256xbf16>
    %c0_13 = arith.constant 0 : index
    %c0_14 = arith.constant 0 : index
    %18 = vector.load %arg3[%c0_13, %c0_14] : memref<256x256xbf16, #tpu.memory_space<vmem>>, vector<256x256xbf16>
    %cst_15 = arith.constant dense<0.000000e+00> : vector<256x256xf32>
    %19 = tpu.matmul %16, %18, %cst_15 {dimension_numbers = #tpu.dot_dimension_numbers<[1], [0], [0], [1], [0, 0, 1, 1], [], []>} : vector<256x256xbf16>, vector<256x256xbf16>, vector<256x256xf32> -> vector<256x256xf32>
    %c0_16 = arith.constant 0 : index
    %c0_17 = arith.constant 0 : index
    %20 = vector.load %arg3[%c0_16, %c0_17] : memref<256x256xbf16, #tpu.memory_space<vmem>>, vector<256x256xbf16>
    %cst_18 = arith.constant dense<0.000000e+00> : vector<256x256xf32>
    %21 = tpu.matmul %17, %20, %cst_18 {dimension_numbers = #tpu.dot_dimension_numbers<[1], [0], [0], [1], [0, 0, 1, 1], [], []>} : vector<256x256xbf16>, vector<256x256xbf16>, vector<256x256xf32> -> vector<256x256xf32>
    %c0_19 = arith.constant 0 : index
    %c0_20 = arith.constant 0 : index
    %22 = vector.load %arg11[%c0_19, %c0_20] : memref<1x256xf32, #tpu.memory_space<vmem>>, vector<1x256xf32>
    %23 = vector.broadcast %22 : vector<1x256xf32> to vector<256x256xf32>
    %24 = arith.addf %19, %23 : vector<256x256xf32>
    %cst_21 = arith.constant 0.000000e+00 : f32
    %25 = vector.broadcast %cst_21 : f32 to vector<256x256xf32>
    %26 = arith.maximumf %24, %25 : vector<256x256xf32>
    %c0_22 = arith.constant 0 : index
    %c0_23 = arith.constant 0 : index
    %27 = vector.load %arg11[%c0_22, %c0_23] : memref<1x256xf32, #tpu.memory_space<vmem>>, vector<1x256xf32>
    %28 = vector.broadcast %27 : vector<1x256xf32> to vector<256x256xf32>
    %29 = arith.addf %21, %28 : vector<256x256xf32>
    %cst_24 = arith.constant 0.000000e+00 : f32
    %30 = vector.broadcast %cst_24 : f32 to vector<256x256xf32>
    %31 = arith.maximumf %29, %30 : vector<256x256xf32>
    %32 = arith.truncf %26 : vector<256x256xf32> to vector<256x256xbf16>
    %33 = arith.truncf %31 : vector<256x256xf32> to vector<256x256xbf16>
    %c0_25 = arith.constant 0 : index
    %c0_26 = arith.constant 0 : index
    %34 = vector.load %arg4[%c0_25, %c0_26] : memref<256x256xbf16, #tpu.memory_space<vmem>>, vector<256x256xbf16>
    %cst_27 = arith.constant dense<0.000000e+00> : vector<256x256xf32>
    %35 = tpu.matmul %32, %34, %cst_27 {dimension_numbers = #tpu.dot_dimension_numbers<[1], [0], [0], [1], [0, 0, 1, 1], [], []>} : vector<256x256xbf16>, vector<256x256xbf16>, vector<256x256xf32> -> vector<256x256xf32>
    %c0_28 = arith.constant 0 : index
    %c0_29 = arith.constant 0 : index
    %36 = vector.load %arg4[%c0_28, %c0_29] : memref<256x256xbf16, #tpu.memory_space<vmem>>, vector<256x256xbf16>
    %cst_30 = arith.constant dense<0.000000e+00> : vector<256x256xf32>
    %37 = tpu.matmul %33, %36, %cst_30 {dimension_numbers = #tpu.dot_dimension_numbers<[1], [0], [0], [1], [0, 0, 1, 1], [], []>} : vector<256x256xbf16>, vector<256x256xbf16>, vector<256x256xf32> -> vector<256x256xf32>
    %c0_31 = arith.constant 0 : index
    %c0_32 = arith.constant 0 : index
    %38 = vector.load %arg12[%c0_31, %c0_32] : memref<1x256xf32, #tpu.memory_space<vmem>>, vector<1x256xf32>
    %39 = vector.broadcast %38 : vector<1x256xf32> to vector<256x256xf32>
    %40 = arith.addf %35, %39 : vector<256x256xf32>
    %cst_33 = arith.constant 0.000000e+00 : f32
    %41 = vector.broadcast %cst_33 : f32 to vector<256x256xf32>
    %42 = arith.maximumf %40, %41 : vector<256x256xf32>
    %c0_34 = arith.constant 0 : index
    %c0_35 = arith.constant 0 : index
    %43 = vector.load %arg12[%c0_34, %c0_35] : memref<1x256xf32, #tpu.memory_space<vmem>>, vector<1x256xf32>
    %44 = vector.broadcast %43 : vector<1x256xf32> to vector<256x256xf32>
    %45 = arith.addf %37, %44 : vector<256x256xf32>
    %cst_36 = arith.constant 0.000000e+00 : f32
    %46 = vector.broadcast %cst_36 : f32 to vector<256x256xf32>
    %47 = arith.maximumf %45, %46 : vector<256x256xf32>
    %48 = arith.truncf %42 : vector<256x256xf32> to vector<256x256xbf16>
    %49 = arith.truncf %47 : vector<256x256xf32> to vector<256x256xbf16>
    %c0_37 = arith.constant 0 : index
    %c0_38 = arith.constant 0 : index
    %50 = vector.load %arg5[%c0_37, %c0_38] : memref<256x256xbf16, #tpu.memory_space<vmem>>, vector<256x256xbf16>
    %cst_39 = arith.constant dense<0.000000e+00> : vector<256x256xf32>
    %51 = tpu.matmul %48, %50, %cst_39 {dimension_numbers = #tpu.dot_dimension_numbers<[1], [0], [0], [1], [0, 0, 1, 1], [], []>} : vector<256x256xbf16>, vector<256x256xbf16>, vector<256x256xf32> -> vector<256x256xf32>
    %c0_40 = arith.constant 0 : index
    %c0_41 = arith.constant 0 : index
    %52 = vector.load %arg5[%c0_40, %c0_41] : memref<256x256xbf16, #tpu.memory_space<vmem>>, vector<256x256xbf16>
    %cst_42 = arith.constant dense<0.000000e+00> : vector<256x256xf32>
    %53 = tpu.matmul %49, %52, %cst_42 {dimension_numbers = #tpu.dot_dimension_numbers<[1], [0], [0], [1], [0, 0, 1, 1], [], []>} : vector<256x256xbf16>, vector<256x256xbf16>, vector<256x256xf32> -> vector<256x256xf32>
    %c0_43 = arith.constant 0 : index
    %c0_44 = arith.constant 0 : index
    %54 = vector.load %arg13[%c0_43, %c0_44] : memref<1x256xf32, #tpu.memory_space<vmem>>, vector<1x256xf32>
    %55 = vector.broadcast %54 : vector<1x256xf32> to vector<256x256xf32>
    %56 = arith.addf %51, %55 : vector<256x256xf32>
    %cst_45 = arith.constant 0.000000e+00 : f32
    %57 = vector.broadcast %cst_45 : f32 to vector<256x256xf32>
    %58 = arith.maximumf %56, %57 : vector<256x256xf32>
    %c0_46 = arith.constant 0 : index
    %c0_47 = arith.constant 0 : index
    %59 = vector.load %arg13[%c0_46, %c0_47] : memref<1x256xf32, #tpu.memory_space<vmem>>, vector<1x256xf32>
    %60 = vector.broadcast %59 : vector<1x256xf32> to vector<256x256xf32>
    %61 = arith.addf %53, %60 : vector<256x256xf32>
    %cst_48 = arith.constant 0.000000e+00 : f32
    %62 = vector.broadcast %cst_48 : f32 to vector<256x256xf32>
    %63 = arith.maximumf %61, %62 : vector<256x256xf32>
    %64 = arith.truncf %58 : vector<256x256xf32> to vector<256x256xbf16>
    %65 = arith.truncf %63 : vector<256x256xf32> to vector<256x256xbf16>
    %c0_49 = arith.constant 0 : index
    %c0_50 = arith.constant 0 : index
    %66 = vector.load %arg6[%c0_49, %c0_50] : memref<256x256xbf16, #tpu.memory_space<vmem>>, vector<256x256xbf16>
    %cst_51 = arith.constant dense<0.000000e+00> : vector<256x256xf32>
    %67 = tpu.matmul %64, %66, %cst_51 {dimension_numbers = #tpu.dot_dimension_numbers<[1], [0], [0], [1], [0, 0, 1, 1], [], []>} : vector<256x256xbf16>, vector<256x256xbf16>, vector<256x256xf32> -> vector<256x256xf32>
    %c0_52 = arith.constant 0 : index
    %c0_53 = arith.constant 0 : index
    %68 = vector.load %arg6[%c0_52, %c0_53] : memref<256x256xbf16, #tpu.memory_space<vmem>>, vector<256x256xbf16>
    %cst_54 = arith.constant dense<0.000000e+00> : vector<256x256xf32>
    %69 = tpu.matmul %65, %68, %cst_54 {dimension_numbers = #tpu.dot_dimension_numbers<[1], [0], [0], [1], [0, 0, 1, 1], [], []>} : vector<256x256xbf16>, vector<256x256xbf16>, vector<256x256xf32> -> vector<256x256xf32>
    %c0_55 = arith.constant 0 : index
    %c0_56 = arith.constant 0 : index
    %70 = vector.load %arg14[%c0_55, %c0_56] : memref<1x256xf32, #tpu.memory_space<vmem>>, vector<1x256xf32>
    %71 = vector.broadcast %70 : vector<1x256xf32> to vector<256x256xf32>
    %72 = arith.addf %67, %71 : vector<256x256xf32>
    %cst_57 = arith.constant 0.000000e+00 : f32
    %73 = vector.broadcast %cst_57 : f32 to vector<256x256xf32>
    %74 = arith.maximumf %72, %73 : vector<256x256xf32>
    %c0_58 = arith.constant 0 : index
    %c0_59 = arith.constant 0 : index
    %75 = vector.load %arg14[%c0_58, %c0_59] : memref<1x256xf32, #tpu.memory_space<vmem>>, vector<1x256xf32>
    %76 = vector.broadcast %75 : vector<1x256xf32> to vector<256x256xf32>
    %77 = arith.addf %69, %76 : vector<256x256xf32>
    %cst_60 = arith.constant 0.000000e+00 : f32
    %78 = vector.broadcast %cst_60 : f32 to vector<256x256xf32>
    %79 = arith.maximumf %77, %78 : vector<256x256xf32>
    %80 = arith.truncf %74 : vector<256x256xf32> to vector<256x256xbf16>
    %81 = arith.truncf %79 : vector<256x256xf32> to vector<256x256xbf16>
    %c0_61 = arith.constant 0 : index
    %c0_62 = arith.constant 0 : index
    %82 = vector.load %arg7[%c0_61, %c0_62] : memref<256x256xbf16, #tpu.memory_space<vmem>>, vector<256x256xbf16>
    %cst_63 = arith.constant dense<0.000000e+00> : vector<256x256xf32>
    %83 = tpu.matmul %80, %82, %cst_63 {dimension_numbers = #tpu.dot_dimension_numbers<[1], [0], [0], [1], [0, 0, 1, 1], [], []>} : vector<256x256xbf16>, vector<256x256xbf16>, vector<256x256xf32> -> vector<256x256xf32>
    %c0_64 = arith.constant 0 : index
    %c0_65 = arith.constant 0 : index
    %84 = vector.load %arg7[%c0_64, %c0_65] : memref<256x256xbf16, #tpu.memory_space<vmem>>, vector<256x256xbf16>
    %cst_66 = arith.constant dense<0.000000e+00> : vector<256x256xf32>
    %85 = tpu.matmul %81, %84, %cst_66 {dimension_numbers = #tpu.dot_dimension_numbers<[1], [0], [0], [1], [0, 0, 1, 1], [], []>} : vector<256x256xbf16>, vector<256x256xbf16>, vector<256x256xf32> -> vector<256x256xf32>
    %c0_67 = arith.constant 0 : index
    %c0_68 = arith.constant 0 : index
    %86 = vector.load %arg18[%c0_67, %c0_68] : memref<128x256xbf16, #tpu.memory_space<vmem>>, vector<128x256xbf16>
    %cst_69 = arith.constant dense<0.000000e+00> : vector<256x256xf32>
    %87 = tpu.matmul %0, %86, %cst_69 {dimension_numbers = #tpu.dot_dimension_numbers<[1], [0], [0], [1], [0, 0, 1, 1], [], []>} : vector<256x128xbf16>, vector<128x256xbf16>, vector<256x256xf32> -> vector<256x256xf32>
    %88 = arith.addf %83, %87 : vector<256x256xf32>
    %c0_70 = arith.constant 0 : index
    %c0_71 = arith.constant 0 : index
    %89 = vector.load %arg18[%c0_70, %c0_71] : memref<128x256xbf16, #tpu.memory_space<vmem>>, vector<128x256xbf16>
    %cst_72 = arith.constant dense<0.000000e+00> : vector<256x256xf32>
    %90 = tpu.matmul %1, %89, %cst_72 {dimension_numbers = #tpu.dot_dimension_numbers<[1], [0], [0], [1], [0, 0, 1, 1], [], []>} : vector<256x128xbf16>, vector<128x256xbf16>, vector<256x256xf32> -> vector<256x256xf32>
    %91 = arith.addf %85, %90 : vector<256x256xf32>
    %c0_73 = arith.constant 0 : index
    %c0_74 = arith.constant 0 : index
    %92 = vector.load %arg15[%c0_73, %c0_74] : memref<1x256xf32, #tpu.memory_space<vmem>>, vector<1x256xf32>
    %93 = vector.broadcast %92 : vector<1x256xf32> to vector<256x256xf32>
    %94 = arith.addf %88, %93 : vector<256x256xf32>
    %cst_75 = arith.constant 0.000000e+00 : f32
    %95 = vector.broadcast %cst_75 : f32 to vector<256x256xf32>
    %96 = arith.maximumf %94, %95 : vector<256x256xf32>
    %c0_76 = arith.constant 0 : index
    %c0_77 = arith.constant 0 : index
    %97 = vector.load %arg15[%c0_76, %c0_77] : memref<1x256xf32, #tpu.memory_space<vmem>>, vector<1x256xf32>
    %98 = vector.broadcast %97 : vector<1x256xf32> to vector<256x256xf32>
    %99 = arith.addf %91, %98 : vector<256x256xf32>
    %cst_78 = arith.constant 0.000000e+00 : f32
    %100 = vector.broadcast %cst_78 : f32 to vector<256x256xf32>
    %101 = arith.maximumf %99, %100 : vector<256x256xf32>
    %102 = arith.truncf %96 : vector<256x256xf32> to vector<256x256xbf16>
    %103 = arith.truncf %101 : vector<256x256xf32> to vector<256x256xbf16>
    %c0_79 = arith.constant 0 : index
    %c0_80 = arith.constant 0 : index
    %104 = vector.load %arg8[%c0_79, %c0_80] : memref<256x256xbf16, #tpu.memory_space<vmem>>, vector<256x256xbf16>
    %cst_81 = arith.constant dense<0.000000e+00> : vector<256x256xf32>
    %105 = tpu.matmul %102, %104, %cst_81 {dimension_numbers = #tpu.dot_dimension_numbers<[1], [0], [0], [1], [0, 0, 1, 1], [], []>} : vector<256x256xbf16>, vector<256x256xbf16>, vector<256x256xf32> -> vector<256x256xf32>
    %c0_82 = arith.constant 0 : index
    %c0_83 = arith.constant 0 : index
    %106 = vector.load %arg8[%c0_82, %c0_83] : memref<256x256xbf16, #tpu.memory_space<vmem>>, vector<256x256xbf16>
    %cst_84 = arith.constant dense<0.000000e+00> : vector<256x256xf32>
    %107 = tpu.matmul %103, %106, %cst_84 {dimension_numbers = #tpu.dot_dimension_numbers<[1], [0], [0], [1], [0, 0, 1, 1], [], []>} : vector<256x256xbf16>, vector<256x256xbf16>, vector<256x256xf32> -> vector<256x256xf32>
    %c0_85 = arith.constant 0 : index
    %c0_86 = arith.constant 0 : index
    %108 = vector.load %arg16[%c0_85, %c0_86] : memref<1x256xf32, #tpu.memory_space<vmem>>, vector<1x256xf32>
    %109 = vector.broadcast %108 : vector<1x256xf32> to vector<256x256xf32>
    %110 = arith.addf %105, %109 : vector<256x256xf32>
    %cst_87 = arith.constant 0.000000e+00 : f32
    %111 = vector.broadcast %cst_87 : f32 to vector<256x256xf32>
    %112 = arith.maximumf %110, %111 : vector<256x256xf32>
    %c0_88 = arith.constant 0 : index
    %c0_89 = arith.constant 0 : index
    %113 = vector.load %arg16[%c0_88, %c0_89] : memref<1x256xf32, #tpu.memory_space<vmem>>, vector<1x256xf32>
    %114 = vector.broadcast %113 : vector<1x256xf32> to vector<256x256xf32>
    %115 = arith.addf %107, %114 : vector<256x256xf32>
    %cst_90 = arith.constant 0.000000e+00 : f32
    %116 = vector.broadcast %cst_90 : f32 to vector<256x256xf32>
    %117 = arith.maximumf %115, %116 : vector<256x256xf32>
    %118 = arith.truncf %112 : vector<256x256xf32> to vector<256x256xbf16>
    %119 = arith.truncf %117 : vector<256x256xf32> to vector<256x256xbf16>
    %c0_91 = arith.constant 0 : index
    %c0_92 = arith.constant 0 : index
    %120 = vector.load %arg9[%c0_91, %c0_92] : memref<256x256xbf16, #tpu.memory_space<vmem>>, vector<256x256xbf16>
    %cst_93 = arith.constant dense<0.000000e+00> : vector<256x256xf32>
    %121 = tpu.matmul %118, %120, %cst_93 {dimension_numbers = #tpu.dot_dimension_numbers<[1], [0], [0], [1], [0, 0, 1, 1], [], []>} : vector<256x256xbf16>, vector<256x256xbf16>, vector<256x256xf32> -> vector<256x256xf32>
    %c0_94 = arith.constant 0 : index
    %c0_95 = arith.constant 0 : index
    %122 = vector.load %arg9[%c0_94, %c0_95] : memref<256x256xbf16, #tpu.memory_space<vmem>>, vector<256x256xbf16>
    %cst_96 = arith.constant dense<0.000000e+00> : vector<256x256xf32>
    %123 = tpu.matmul %119, %122, %cst_96 {dimension_numbers = #tpu.dot_dimension_numbers<[1], [0], [0], [1], [0, 0, 1, 1], [], []>} : vector<256x256xbf16>, vector<256x256xbf16>, vector<256x256xf32> -> vector<256x256xf32>
    %c0_97 = arith.constant 0 : index
    %c0_98 = arith.constant 0 : index
    %124 = vector.load %arg17[%c0_97, %c0_98] : memref<1x256xf32, #tpu.memory_space<vmem>>, vector<1x256xf32>
    %125 = vector.broadcast %124 : vector<1x256xf32> to vector<256x256xf32>
    %126 = arith.addf %121, %125 : vector<256x256xf32>
    %cst_99 = arith.constant 0.000000e+00 : f32
    %127 = vector.broadcast %cst_99 : f32 to vector<256x256xf32>
    %128 = arith.maximumf %126, %127 : vector<256x256xf32>
    %c0_100 = arith.constant 0 : index
    %c0_101 = arith.constant 0 : index
    %129 = vector.load %arg17[%c0_100, %c0_101] : memref<1x256xf32, #tpu.memory_space<vmem>>, vector<1x256xf32>
    %130 = vector.broadcast %129 : vector<1x256xf32> to vector<256x256xf32>
    %131 = arith.addf %123, %130 : vector<256x256xf32>
    %cst_102 = arith.constant 0.000000e+00 : f32
    %132 = vector.broadcast %cst_102 : f32 to vector<256x256xf32>
    %133 = arith.maximumf %131, %132 : vector<256x256xf32>
    %134 = arith.truncf %128 : vector<256x256xf32> to vector<256x256xbf16>
    %c0_103 = arith.constant 0 : index
    %c0_104 = arith.constant 0 : index
    %135 = vector.load %arg19[%c0_103, %c0_104] : memref<256x128xbf16, #tpu.memory_space<vmem>>, vector<256x128xbf16>
    %cst_105 = arith.constant dense<0.000000e+00> : vector<256x128xf32>
    %136 = tpu.matmul %134, %135, %cst_105 {dimension_numbers = #tpu.dot_dimension_numbers<[1], [0], [0], [1], [0, 0, 1, 1], [], []>} : vector<256x256xbf16>, vector<256x128xbf16>, vector<256x128xf32> -> vector<256x128xf32>
    %c0_106 = arith.constant 0 : index
    %c0_107 = arith.constant 0 : index
    %137 = vector.load %arg20[%c0_106, %c0_107] : memref<1x128xf32, #tpu.memory_space<vmem>>, vector<1x128xf32>
    %138 = vector.broadcast %137 : vector<1x128xf32> to vector<256x128xf32>
    %139 = arith.addf %136, %138 : vector<256x128xf32>
    %140 = vector.extract_strided_slice %139 {offsets = [0, 0], sizes = [256, 8], strides = [1, 1]} : vector<256x128xf32> to vector<256x8xf32>
    %c0_108 = arith.constant 0 : index
    %c0_109 = arith.constant 0 : index
    %141 = vector.load %arg21[%c0_108, %c0_109] : memref<512x8xf32, #tpu.memory_space<vmem>>, vector<256x8xf32>
    tpu.vector_store %arg21[%c0_108, %c0_109], %140 {strides = array<i32>} : memref<512x8xf32, #tpu.memory_space<vmem>>, vector<256x8xf32>,
    %142 = arith.truncf %133 : vector<256x256xf32> to vector<256x256xbf16>
    %c0_110 = arith.constant 0 : index
    %c0_111 = arith.constant 0 : index
    %143 = vector.load %arg19[%c0_110, %c0_111] : memref<256x128xbf16, #tpu.memory_space<vmem>>, vector<256x128xbf16>
    %cst_112 = arith.constant dense<0.000000e+00> : vector<256x128xf32>
    %144 = tpu.matmul %142, %143, %cst_112 {dimension_numbers = #tpu.dot_dimension_numbers<[1], [0], [0], [1], [0, 0, 1, 1], [], []>} : vector<256x256xbf16>, vector<256x128xbf16>, vector<256x128xf32> -> vector<256x128xf32>
    %c0_113 = arith.constant 0 : index
    %c0_114 = arith.constant 0 : index
    %145 = vector.load %arg20[%c0_113, %c0_114] : memref<1x128xf32, #tpu.memory_space<vmem>>, vector<1x128xf32>
    %146 = vector.broadcast %145 : vector<1x128xf32> to vector<256x128xf32>
    %147 = arith.addf %144, %146 : vector<256x128xf32>
    %148 = vector.extract_strided_slice %147 {offsets = [0, 0], sizes = [256, 8], strides = [1, 1]} : vector<256x128xf32> to vector<256x8xf32>
    %c256_115 = arith.constant 256 : index
    %c0_116 = arith.constant 0 : index
    %149 = vector.load %arg21[%c256_115, %c0_116] : memref<512x8xf32, #tpu.memory_space<vmem>>, vector<256x8xf32>
    tpu.vector_store %arg21[%c256_115, %c0_116], %148 {strides = array<i32>} : memref<512x8xf32, #tpu.memory_space<vmem>>, vector<256x8xf32>,
    return
  }
  func.func @transform_0(%arg0: i32) -> (i32, i32) {
    %c0_i32 = arith.constant 0 : i32
    %c0_i32_0 = arith.constant 0 : i32
    return %arg0, %c0_i32 : i32, i32
  }
  func.func @transform_1(%arg0: i32) -> (i32, i32) {
    %c0_i32 = arith.constant 0 : i32
    %c0_i32_0 = arith.constant 0 : i32
    %c0_i32_1 = arith.constant 0 : i32
    return %c0_i32, %c0_i32_0 : i32, i32
  }
  func.func @transform_2(%arg0: i32) -> (i32, i32) {
    %c0_i32 = arith.constant 0 : i32
    %c0_i32_0 = arith.constant 0 : i32
    %c0_i32_1 = arith.constant 0 : i32
    return %c0_i32, %c0_i32_0 : i32, i32
  }
  func.func @transform_3(%arg0: i32) -> (i32, i32) {
    %c0_i32 = arith.constant 0 : i32
    %c0_i32_0 = arith.constant 0 : i32
    %c0_i32_1 = arith.constant 0 : i32
    return %c0_i32, %c0_i32_0 : i32, i32
  }
  func.func @transform_4(%arg0: i32) -> (i32, i32) {
    %c0_i32 = arith.constant 0 : i32
    %c0_i32_0 = arith.constant 0 : i32
    %c0_i32_1 = arith.constant 0 : i32
    return %c0_i32, %c0_i32_0 : i32, i32
  }
  func.func @transform_5(%arg0: i32) -> (i32, i32) {
    %c0_i32 = arith.constant 0 : i32
    %c0_i32_0 = arith.constant 0 : i32
    %c0_i32_1 = arith.constant 0 : i32
    return %c0_i32, %c0_i32_0 : i32, i32
  }
  func.func @transform_6(%arg0: i32) -> (i32, i32) {
    %c0_i32 = arith.constant 0 : i32
    %c0_i32_0 = arith.constant 0 : i32
    %c0_i32_1 = arith.constant 0 : i32
    return %c0_i32, %c0_i32_0 : i32, i32
  }
  func.func @transform_7(%arg0: i32) -> (i32, i32) {
    %c0_i32 = arith.constant 0 : i32
    %c0_i32_0 = arith.constant 0 : i32
    %c0_i32_1 = arith.constant 0 : i32
    return %c0_i32, %c0_i32_0 : i32, i32
  }
  func.func @transform_8(%arg0: i32) -> (i32, i32) {
    %c0_i32 = arith.constant 0 : i32
    %c0_i32_0 = arith.constant 0 : i32
    %c0_i32_1 = arith.constant 0 : i32
    return %c0_i32, %c0_i32_0 : i32, i32
  }
  func.func @transform_9(%arg0: i32) -> (i32, i32) {
    %c0_i32 = arith.constant 0 : i32
    %c0_i32_0 = arith.constant 0 : i32
    %c0_i32_1 = arith.constant 0 : i32
    return %c0_i32, %c0_i32_0 : i32, i32
  }
  func.func @transform_10(%arg0: i32) -> (i32, i32) {
    %c0_i32 = arith.constant 0 : i32
    %c0_i32_0 = arith.constant 0 : i32
    %c0_i32_1 = arith.constant 0 : i32
    return %c0_i32, %c0_i32_0 : i32, i32
  }
  func.func @transform_11(%arg0: i32) -> (i32, i32) {
    %c0_i32 = arith.constant 0 : i32
    %c0_i32_0 = arith.constant 0 : i32
    %c0_i32_1 = arith.constant 0 : i32
    return %c0_i32, %c0_i32_0 : i32, i32
  }
  func.func @transform_12(%arg0: i32) -> (i32, i32) {
    %c0_i32 = arith.constant 0 : i32
    %c0_i32_0 = arith.constant 0 : i32
    %c0_i32_1 = arith.constant 0 : i32
    return %c0_i32, %c0_i32_0 : i32, i32
  }
  func.func @transform_13(%arg0: i32) -> (i32, i32) {
    %c0_i32 = arith.constant 0 : i32
    %c0_i32_0 = arith.constant 0 : i32
    %c0_i32_1 = arith.constant 0 : i32
    return %c0_i32, %c0_i32_0 : i32, i32
  }
  func.func @transform_14(%arg0: i32) -> (i32, i32) {
    %c0_i32 = arith.constant 0 : i32
    %c0_i32_0 = arith.constant 0 : i32
    %c0_i32_1 = arith.constant 0 : i32
    return %c0_i32, %c0_i32_0 : i32, i32
  }
  func.func @transform_15(%arg0: i32) -> (i32, i32) {
    %c0_i32 = arith.constant 0 : i32
    %c0_i32_0 = arith.constant 0 : i32
    %c0_i32_1 = arith.constant 0 : i32
    return %c0_i32, %c0_i32_0 : i32, i32
  }
  func.func @transform_16(%arg0: i32) -> (i32, i32) {
    %c0_i32 = arith.constant 0 : i32
    %c0_i32_0 = arith.constant 0 : i32
    %c0_i32_1 = arith.constant 0 : i32
    return %c0_i32, %c0_i32_0 : i32, i32
  }
  func.func @transform_17(%arg0: i32) -> (i32, i32) {
    %c0_i32 = arith.constant 0 : i32
    %c0_i32_0 = arith.constant 0 : i32
    %c0_i32_1 = arith.constant 0 : i32
    return %c0_i32, %c0_i32_0 : i32, i32
  }
  func.func @transform_18(%arg0: i32) -> (i32, i32) {
    %c0_i32 = arith.constant 0 : i32
    %c0_i32_0 = arith.constant 0 : i32
    %c0_i32_1 = arith.constant 0 : i32
    return %c0_i32, %c0_i32_0 : i32, i32
  }
  func.func @transform_19(%arg0: i32) -> (i32, i32) {
    %c0_i32 = arith.constant 0 : i32
    %c0_i32_0 = arith.constant 0 : i32
    %c0_i32_1 = arith.constant 0 : i32
    return %c0_i32, %c0_i32_0 : i32, i32
  }
  func.func @transform_20(%arg0: i32) -> (i32, i32) {
    %c0_i32 = arith.constant 0 : i32
    %c0_i32_0 = arith.constant 0 : i32
    return %arg0, %c0_i32 : i32, i32
  }
}

</mosaic_0001>

<bundles_post_ra>
// kernel: tpu_custom_call.1
= control target key start
LH: loop header
LB: loop body
LE: loop exit
PB: predicated region body
PF: predicated region fallthrough
CT: control target
= control target key end

     0   :  { %s11289_s0 = inlined_call_operand.hbm [shape: bf16[512,128], index: 0, kind: input, shape index: {}]   ;;  %s11290_s1 = inlined_call_operand.hbm [shape: bf16[128,256], index: 1, kind: input, shape index: {}]   ;;  %s11291_s2 = inlined_call_operand.hbm [shape: bf16[256,256], index: 2, kind: input, shape index: {}]   ;;  %s11292_s3 = inlined_call_operand.hbm [shape: bf16[256,256], index: 3, kind: input, shape index: {}]   ;;  %s11293_s4 = inlined_call_operand.hbm [shape: bf16[256,256], index: 4, kind: input, shape index: {}]   ;;  %s11294_s5 = inlined_call_operand.hbm [shape: bf16[256,256], index: 5, kind: input, shape index: {}]   ;;  %s11295_s6 = inlined_call_operand.hbm [shape: bf16[256,256], index: 6, kind: input, shape index: {}]   ;;  %s11296_s7 = inlined_call_operand.hbm [shape: bf16[256,256], index: 7, kind: input, shape index: {}]   ;;  %s11297_s8 = inlined_call_operand.hbm [shape: bf16[256,256], index: 8, kind: input, shape index: {}]   ;;  %s11298_s9 = inlined_call_operand.vmem [shape: f32[1,256], index: 9, kind: input, shape index: {}]   ;;  %s11299_s10 = inlined_call_operand.vmem [shape: f32[1,256], index: 10, kind: input, shape index: {}]   ;;  %s11300_s11 = inlined_call_operand.vmem [shape: f32[1,256], index: 11, kind: input, shape index: {}]   ;;  %s11301_s12 = inlined_call_operand.vmem [shape: f32[1,256], index: 12, kind: input, shape index: {}]   ;;  %s11302_s13 = inlined_call_operand.vmem [shape: f32[1,256], index: 13, kind: input, shape index: {}]   ;;  %s11303_s14 = inlined_call_operand.vmem [shape: f32[1,256], index: 14, kind: input, shape index: {}]   ;;  %s11304_s15 = inlined_call_operand.vmem [shape: f32[1,256], index: 15, kind: input, shape index: {}]   ;;  %s11305_s16 = inlined_call_operand.vmem [shape: f32[1,256], index: 16, kind: input, shape index: {}]   ;;  %s11306_s17 = inlined_call_operand.hbm [shape: bf16[128,256], index: 17, kind: input, shape index: {}]   ;;  %s11307_s18 = inlined_call_operand.hbm [shape: bf16[256,128], index: 18, kind: input, shape index: {}]   ;;  %s11308_s19 = inlined_call_operand.vmem [shape: f32[1,128], index: 19, kind: input, shape index: {}]   ;;  %s11309_s20 = inlined_call_operand.vmem [shape: f32[512,8], index: 20, kind: output, shape index: {}]  }
   0x1   :  { %11316 = sst [smem:[#allocation25_spill]] %s11289_s0 }
   0x2   :  { %11317 = sst [smem:[#allocation26_spill]] %s11290_s1 }
   0x3   :  { %11318 = sst [smem:[#allocation27_spill]] %s11291_s2 }
   0x4   :  { %11319 = sst [smem:[#allocation28_spill]] %s11292_s3 }
   0x5   :  { %11320 = sst [smem:[#allocation29_spill]] %s11293_s4 }
   0x6   :  { %11321 = sst [smem:[#allocation30_spill]] %s11305_s16 }
   0x7   :  { %11322 = sst [smem:[#allocation31_spill]] %s11308_s19 }
   0x8   :  { %11323 = sst [smem:[#allocation32_spill]] %s11309_s20 }
   0x9   :  { %25 = vsyncpa [#allocation3], 0 }
   0xa   :  { %26 = vsyncpa [#allocation5], 0 }
   0xb   :  { %27 = vsyncpa [#allocation8], 0 }
   0xc   :  { %28 = vsyncpa [#allocation11], 0 }
   0xd   :  { %29 = vsyncpa [#allocation14], 0 }
   0xe   :  { %30 = vsyncpa [#allocation17], 0  ;;  %s9332_s1 = smov [#allocation4]   ;;  %s11324_s2 = sld [smem:[#allocation26_spill]] }
   0xf   :  { %s48_s22 = sshll.u32 %s9332_s1, 4  ;;  %s49_s22 = int_to_ptr.vmem [resolvable:$true] %s48_s22 }
  0x14   :  { %s9078_s25 = scalar_lea.hbm %s11324_s2, 2048 }
  0x15   :  { %p9079_p0 = scmp.ne.s32.totalorder %s11324_s2, %s9078_s25  ;;  %p9082_p1 = scmp.lt.u32.totalorder %s9078_s25, %s11324_s2 }
  0x17   :  { %p9084_p2 = pnand %p9082_p1, %p9079_p0 }
  0x19   :  { %9087 = shalt.err (!%p9084_p2)
}
  0x1a   :  { %s9088_s4 = scalar_lea.vmem %s49_s22, 2048  ;;  %p9093_p4 = scmp.lt.s32.totalorder %s49_s22, %s49_s22 }
  0x1b   :  { %p9089_p3 = scmp.ne.s32.totalorder %s49_s22, %s9088_s4  ;;  %p9094_p5 = scmp.lt.s32.totalorder %s9088_s4, %s9088_s4 }
  0x1d   :  { %p9095_p6 = por %p9094_p5, %p9093_p4 }
  0x1f   :  { %p9096_p7 = pnand %p9095_p6, %p9089_p3 }
  0x21   :  { %9099 = shalt.err (!%p9096_p7)
}
  0x22   :  { %s9333_s29 = smov 128   ;;  %s9334_s30 = smov 8  }
  0x23   :  { %54 = dma.hbm_to_vmem [thread:$0]  %s11324_s2, 2048, %s49_s22, [#allocation5], %s9333_s29, %s9333_s29, %s9334_s30  }
  0x24   :  { %s9335_s1 = smov [#allocation7]   ;;  %s9336_s24 = smov [#allocation10]  }
  0x25   :  { %s72_s23 = sshll.u32 %s9335_s1, 4  ;;  %s96_s25 = sshll.u32 %s9336_s24, 4  ;;  %s73_s23 = int_to_ptr.vmem [resolvable:$true] %s72_s23  ;;  %s97_s25 = int_to_ptr.vmem [resolvable:$true] %s96_s25 }
  0x26   :  { %s11325_s27 = sld [smem:[#allocation28_spill]] }
  0x2c   :  { %s9100_s28 = scalar_lea.hbm %s11325_s27, 4096 }
  0x2d   :  { %p9101_p8 = scmp.ne.s32.totalorder %s11325_s27, %s9100_s28  ;;  %p9104_p9 = scmp.lt.u32.totalorder %s9100_s28, %s11325_s27 }
  0x2f   :  { %p9106_p10 = pnand %p9104_p9, %p9101_p8 }
  0x31   :  { %9109 = shalt.err (!%p9106_p10)
}
  0x32   :  { %s9110_s22 = scalar_lea.vmem %s73_s23, 4096  ;;  %p9115_p12 = scmp.lt.s32.totalorder %s73_s23, %s73_s23 }
  0x33   :  { %p9111_p11 = scmp.ne.s32.totalorder %s73_s23, %s9110_s22  ;;  %p9116_p13 = scmp.lt.s32.totalorder %s9110_s22, %s9110_s22 }
  0x35   :  { %p9117_p0 = por %p9116_p13, %p9115_p12 }
  0x37   :  { %p9118_p1 = pnand %p9117_p0, %p9111_p11 }
  0x39   :  { %9121 = shalt.err (!%p9118_p1)
}
  0x3a   :  { %78 = dma.hbm_to_vmem [thread:$0]  %s11325_s27, 4096, %s73_s23, [#allocation8], %s9333_s29, %s9333_s29, %s9334_s30  }
  0x3b   :  { %s9122_s19 = scalar_lea.hbm %s11294_s5, 4096 }
  0x3c   :  { %p9123_p2 = scmp.ne.s32.totalorder %s11294_s5, %s9122_s19  ;;  %p9126_p3 = scmp.lt.u32.totalorder %s9122_s19, %s11294_s5 }
  0x3e   :  { %p9128_p4 = pnand %p9126_p3, %p9123_p2 }
  0x40   :  { %9131 = shalt.err (!%p9128_p4)
}
  0x41   :  { %s9132_s26 = scalar_lea.vmem %s97_s25, 4096  ;;  %p9137_p6 = scmp.lt.s32.totalorder %s97_s25, %s97_s25 }
  0x42   :  { %p9133_p5 = scmp.ne.s32.totalorder %s97_s25, %s9132_s26  ;;  %p9138_p7 = scmp.lt.s32.totalorder %s9132_s26, %s9132_s26 }
  0x44   :  { %p9139_p8 = por %p9138_p7, %p9137_p6 }
  0x46   :  { %p9140_p9 = pnand %p9139_p8, %p9133_p5 }
  0x48   :  { %9143 = shalt.err (!%p9140_p9)
}
  0x49   :  { %102 = dma.hbm_to_vmem [thread:$0]  %s11294_s5, 4096, %s97_s25, [#allocation11], %s9333_s29, %s9333_s29, %s9334_s30  }
  0x4a   :  { %s9337_s28 = smov [#allocation13]   ;;  %s9338_s22 = smov [#allocation16]  }
  0x4b   :  { %s120_s4 = sshll.u32 %s9337_s28, 4  ;;  %s160_s2 = sshll.u32 %s9338_s22, 4  ;;  %s121_s4 = int_to_ptr.vmem [resolvable:$true] %s120_s4  ;;  %s161_s2 = int_to_ptr.vmem [resolvable:$true] %s160_s2 }
  0x4c   :  { %s9144_s16 = scalar_lea.hbm %s11296_s7, 4096 }
  0x4d   :  { %p9145_p10 = scmp.ne.s32.totalorder %s11296_s7, %s9144_s16  ;;  %p9148_p11 = scmp.lt.u32.totalorder %s9144_s16, %s11296_s7 }
  0x4f   :  { %p9150_p12 = pnand %p9148_p11, %p9145_p10 }
  0x51   :  { %9153 = shalt.err (!%p9150_p12)
}
  0x52   :  { %s9154_s5 = scalar_lea.vmem %s121_s4, 4096  ;;  %p9159_p0 = scmp.lt.s32.totalorder %s121_s4, %s121_s4 }
  0x53   :  { %p9155_p13 = scmp.ne.s32.totalorder %s121_s4, %s9154_s5  ;;  %p9160_p1 = scmp.lt.s32.totalorder %s9154_s5, %s9154_s5 }
  0x55   :  { %p9161_p2 = por %p9160_p1, %p9159_p0 }
  0x57   :  { %p9162_p3 = pnand %p9161_p2, %p9155_p13 }
  0x59   :  { %9165 = shalt.err (!%p9162_p3)
}
  0x5a   :  { %126 = dma.hbm_to_vmem [thread:$0]  %s11296_s7, 4096, %s121_s4, [#allocation14], %s9333_s29, %s9333_s29, %s9334_s30  }
  0x5b   :  { %s9166_s27 = scalar_lea.hbm %s11306_s17, 2048 }
  0x5c   :  { %p9167_p4 = scmp.ne.s32.totalorder %s11306_s17, %s9166_s27  ;;  %p9170_p5 = scmp.lt.u32.totalorder %s9166_s27, %s11306_s17 }
  0x5e   :  { %p9172_p6 = pnand %p9170_p5, %p9167_p4 }
  0x60   :  { %9175 = shalt.err (!%p9172_p6)
}
  0x61   :  { %s9176_s16 = scalar_lea.vmem %s161_s2, 2048  ;;  %p9181_p8 = scmp.lt.s32.totalorder %s161_s2, %s161_s2 }
  0x62   :  { %p9177_p7 = scmp.ne.s32.totalorder %s161_s2, %s9176_s16  ;;  %p9182_p9 = scmp.lt.s32.totalorder %s9176_s16, %s9176_s16 }
  0x64   :  { %p9183_p10 = por %p9182_p9, %p9181_p8 }
  0x66   :  { %p9184_p11 = pnand %p9183_p10, %p9177_p7 }
  0x68   :  { %9187 = shalt.err (!%p9184_p11)
}
  0x69   :  { %166 = dma.hbm_to_vmem [thread:$0]  %s11306_s17, 2048, %s161_s2, [#allocation17], %s9333_s29, %s9333_s29, %s9334_s30  }
  0x6a   :  { %s9339_s19 = smov [#allocation2]   ;;  %s11326_s5 = sld [smem:[#allocation25_spill]] }
  0x6b   :  { %s36_s21 = sshll.u32 %s9339_s19, 4  ;;  %s37_s21 = int_to_ptr.vmem [resolvable:$true] %s36_s21 }
  0x70   :  { %s9188_s25 = scalar_lea.hbm %s11326_s5, 4096 }
  0x71   :  { %p9189_p12 = scmp.ne.s32.totalorder %s11326_s5, %s9188_s25  ;;  %p9192_p13 = scmp.lt.u32.totalorder %s9188_s25, %s11326_s5 }
  0x73   :  { %p9194_p0 = pnand %p9192_p13, %p9189_p12 }
  0x75   :  { %9197 = shalt.err (!%p9194_p0)
}
  0x76   :  { %s9198_s28 = scalar_lea.vmem %s37_s21, 4096  ;;  %p9203_p2 = scmp.lt.s32.totalorder %s37_s21, %s37_s21 }
  0x77   :  { %p9199_p1 = scmp.ne.s32.totalorder %s37_s21, %s9198_s28  ;;  %p9204_p3 = scmp.lt.s32.totalorder %s9198_s28, %s9198_s28 }
  0x79   :  { %p9205_p4 = por %p9204_p3, %p9203_p2 }
  0x7b   :  { %p9206_p5 = pnand %p9205_p4, %p9199_p1 }
  0x7d   :  { %9209 = shalt.err (!%p9206_p5)
}
  0x7e   :  { %s9340_s17 = smov 64   ;;  %s9341_s2 = smov 4  }
  0x7f   :  { %42 = dma.hbm_to_vmem [thread:$0]  %s11326_s5, 4096, %s37_s21, [#allocation3], %s9340_s17, %s9340_s17, %s9341_s2  }
  0x80   :  { %s9342_s20 = smov [#allocation6]   ;;  %s9343_s7 = smov [#allocation9]  }
  0x81   :  { %s60_s16 = sshll.u32 %s9342_s20, 4  ;;  %s84_s4 = sshll.u32 %s9343_s7, 4  ;;  %s61_s16 = int_to_ptr.vmem [resolvable:$true] %s60_s16  ;;  %s9543_s4 = int_to_ptr.vmem [resolvable:$true] %s84_s4 }
  0x82   :  { %s11327_s24 = sld [smem:[#allocation27_spill]] }
  0x88   :  { %s9210_s25 = scalar_lea.hbm %s11327_s24, 4096 }
  0x89   :  { %p9211_p6 = scmp.ne.s32.totalorder %s11327_s24, %s9210_s25  ;;  %p9214_p7 = scmp.lt.u32.totalorder %s9210_s25, %s11327_s24 }
  0x8b   :  { %p9216_p8 = pnand %p9214_p7, %p9211_p6 }
  0x8d   :  { %9219 = shalt.err (!%p9216_p8)
}
  0x8e   :  { %s9220_s21 = scalar_lea.vmem %s61_s16, 4096  ;;  %p9225_p10 = scmp.lt.s32.totalorder %s61_s16, %s61_s16 }
  0x8f   :  { %p9221_p9 = scmp.ne.s32.totalorder %s61_s16, %s9220_s21  ;;  %p9226_p11 = scmp.lt.s32.totalorder %s9220_s21, %s9220_s21 }
  0x91   :  { %p9227_p12 = por %p9226_p11, %p9225_p10 }
  0x93   :  { %p9228_p13 = pnand %p9227_p12, %p9221_p9 }
  0x95   :  { %9231 = shalt.err (!%p9228_p13)
}
  0x96   :  { %66 = dma.hbm_to_vmem [thread:$0]  %s11327_s24, 4096, %s61_s16, [#allocation5], %s9333_s29, %s9333_s29, %s9334_s30  }
  0x97   :  { %s11328_s20 = sld [smem:[#allocation29_spill]] }
  0x9d   :  { %s9232_s7 = scalar_lea.hbm %s11328_s20, 4096 }
  0x9e   :  { %p9233_p0 = scmp.ne.s32.totalorder %s11328_s20, %s9232_s7  ;;  %p9236_p1 = scmp.lt.u32.totalorder %s9232_s7, %s11328_s20 }
  0xa0   :  { %p9238_p2 = pnand %p9236_p1, %p9233_p0 }
  0xa2   :  { %9241 = shalt.err (!%p9238_p2)
}
  0xa3   :  { %s9242_s26 = scalar_lea.vmem %s9543_s4, 4096  ;;  %p9247_p4 = scmp.lt.s32.totalorder %s9543_s4, %s9543_s4 }
  0xa4   :  { %p9243_p3 = scmp.ne.s32.totalorder %s9543_s4, %s9242_s26  ;;  %p9248_p5 = scmp.lt.s32.totalorder %s9242_s26, %s9242_s26 }
  0xa6   :  { %p9249_p6 = por %p9248_p5, %p9247_p4 }
  0xa8   :  { %p9250_p7 = pnand %p9249_p6, %p9243_p3 }
  0xaa   :  { %9253 = shalt.err (!%p9250_p7)
}
  0xab   :  { %90 = dma.hbm_to_vmem [thread:$0]  %s11328_s20, 4096, %s9543_s4, [#allocation8], %s9333_s29, %s9333_s29, %s9334_s30  }
  0xac   :  { %s9344_s23 = smov [#allocation12]   ;;  %s9345_s21 = smov [#allocation15]  }
  0xad   :  { %s108_s27 = sshll.u32 %s9344_s23, 4  ;;  %s132_s5 = sshll.u32 %s9345_s21, 4  ;;  %s109_s27 = int_to_ptr.vmem [resolvable:$true] %s108_s27  ;;  %s9580_s5 = int_to_ptr.vmem [resolvable:$true] %s132_s5 }
  0xae   :  { %s9254_s0 = scalar_lea.hbm %s11295_s6, 4096 }
  0xaf   :  { %p9255_p8 = scmp.ne.s32.totalorder %s11295_s6, %s9254_s0  ;;  %p9258_p9 = scmp.lt.u32.totalorder %s9254_s0, %s11295_s6 }
  0xb1   :  { %p9260_p10 = pnand %p9258_p9, %p9255_p8 }
  0xb3   :  { %9263 = shalt.err (!%p9260_p10)
}
  0xb4   :  { %s9264_s4 = scalar_lea.vmem %s109_s27, 4096  ;;  %p9269_p12 = scmp.lt.s32.totalorder %s109_s27, %s109_s27 }
  0xb5   :  { %p9265_p11 = scmp.ne.s32.totalorder %s109_s27, %s9264_s4  ;;  %p9270_p13 = scmp.lt.s32.totalorder %s9264_s4, %s9264_s4 }
  0xb7   :  { %p9271_p0 = por %p9270_p13, %p9269_p12 }
  0xb9   :  { %p9272_p1 = pnand %p9271_p0, %p9265_p11 }
  0xbb   :  { %9275 = shalt.err (!%p9272_p1)
}
  0xbc   :  { %114 = dma.hbm_to_vmem [thread:$0]  %s11295_s6, 4096, %s109_s27, [#allocation11], %s9333_s29, %s9333_s29, %s9334_s30  }
  0xbd   :  { %s9276_s24 = scalar_lea.hbm %s11297_s8, 4096 }
  0xbe   :  { %p9277_p2 = scmp.ne.s32.totalorder %s11297_s8, %s9276_s24  ;;  %p9280_p3 = scmp.lt.u32.totalorder %s9276_s24, %s11297_s8 }
  0xc0   :  { %p9282_p4 = pnand %p9280_p3, %p9277_p2 }
  0xc2   :  { %9285 = shalt.err (!%p9282_p4)
}
  0xc3   :  { %s9286_s0 = scalar_lea.vmem %s9580_s5, 4096  ;;  %p9291_p6 = scmp.lt.s32.totalorder %s9580_s5, %s9580_s5 }
  0xc4   :  { %p9287_p5 = scmp.ne.s32.totalorder %s9580_s5, %s9286_s0  ;;  %p9292_p7 = scmp.lt.s32.totalorder %s9286_s0, %s9286_s0 }
  0xc6   :  { %p9293_p8 = por %p9292_p7, %p9291_p6 }
  0xc8   :  { %p9294_p9 = pnand %p9293_p8, %p9287_p5 }
  0xca   :  { %9297 = shalt.err (!%p9294_p9)
}
  0xcb   :  { %138 = dma.hbm_to_vmem [thread:$0]  %s11297_s8, 4096, %s9580_s5, [#allocation14], %s9333_s29, %s9333_s29, %s9334_s30  }
  0xcc   :  { %s9346_s7 = smov [#allocation18]   ;;  %s9298_s4 = scalar_lea.hbm %s11307_s18, 2048 }
  0xcd   :  { %s172_s19 = sshll.u32 %s9346_s7, 4  ;;  %p9299_p10 = scmp.ne.s32.totalorder %s11307_s18, %s9298_s4  ;;  %s173_s19 = int_to_ptr.vmem [resolvable:$true] %s172_s19 }
  0xce   :  { %p9302_p11 = scmp.lt.u32.totalorder %s9298_s4, %s11307_s18 }
  0xd0   :  { %p9304_p12 = pnand %p9302_p11, %p9299_p10 }
  0xd2   :  { %9307 = shalt.err (!%p9304_p12)
}
  0xd3   :  { %s9308_s24 = scalar_lea.vmem %s173_s19, 2048  ;;  %p9313_p0 = scmp.lt.s32.totalorder %s173_s19, %s173_s19 }
  0xd4   :  { %p9309_p13 = scmp.ne.s32.totalorder %s173_s19, %s9308_s24  ;;  %p9314_p1 = scmp.lt.s32.totalorder %s9308_s24, %s9308_s24 }
  0xd6   :  { %p9315_p2 = por %p9314_p1, %p9313_p0 }
  0xd8   :  { %p9316_p3 = pnand %p9315_p2, %p9309_p13 }
  0xda   :  { %9319 = shalt.err (!%p9316_p3)
}
  0xdb   :  { %178 = dma.hbm_to_vmem [thread:$0]  %s11307_s18, 2048, %s173_s19, [#allocation17], %s9340_s17, %s9340_s17, %s9341_s2  }
  0xdc   :  { %9320 = dma.done.wait [#allocation3], 4096  }
  0xdd   :  { %9321 = vsyncadd [#allocation3], 4294963200 }
  0xde   :  { %9322 = dma.done.wait [#allocation5], 6144  }
  0xdf   :  { %9323 = vsyncadd [#allocation5], 4294961152 }
  0xe0   :  { %9324 = dma.done.wait [#allocation8], 8192  }
  0xe1   :  { %9325 = vsyncadd [#allocation8], 4294959104 }
  0xe2   :  { %9326 = dma.done.wait [#allocation11], 8192  }
  0xe3   :  { %9327 = vsyncadd [#allocation11], 4294959104 }
  0xe4   :  { %9328 = dma.done.wait [#allocation14], 8192  }
  0xe5   :  { %9329 = vsyncadd [#allocation14], 4294959104 }
  0xe6   :  { %9330 = dma.done.wait [#allocation17], 4096  }
  0xe7   :  { %9331 = vsyncadd [#allocation17], 4294963200  ;;  %v9347_v0 = vmov 0   ;;  %v8598_v1 = vld [vmem:[#allocation4 + $0x4] ss:$8 sps:$4 sm:$0xff]   ;;  %v8626_v27 = vld [vmem:[#allocation2 + $0x10] sm:$0xff]  }
  0xe8   :  { %515 = vmatprep.mubr.bf16.mxu0 %v9347_v0  ;;  %868 = vmatprep.mubr.bf16.mxu1 %v9347_v0  ;;  %v8600_v2 = vld [vmem:[#allocation4] ss:$8 sps:$4 sm:$0xff]   ;;  %v8601_v3 = vld [vmem:[#allocation4 + $0x14] ss:$8 sps:$4 sm:$0xff]   ;;  %v8603_v4 = vld [vmem:[#allocation4 + $0x10] ss:$8 sps:$4 sm:$0xff]  }
  0xe9   :  { %483 = vmatprep.subr.bf16.mxu0 %v8598_v1  ;;  %836 = vmatprep.subr.bf16.mxu1 %v8598_v1  ;;  %v8604_v5 = vld [vmem:[#allocation4 + $0x24] ss:$8 sps:$4 sm:$0xff]   ;;  %v8606_v6 = vld [vmem:[#allocation4 + $0x20] ss:$8 sps:$4 sm:$0xff]   ;;  %v8607_v7 = vld [vmem:[#allocation4 + $0x34] ss:$8 sps:$4 sm:$0xff]  }
  0xea   :  { %484 = vmatpush1.bf16.msra.mxu0 %v8600_v2  ;;  %837 = vmatpush1.bf16.msra.mxu1 %v8600_v2  ;;  %v8609_v8 = vld [vmem:[#allocation4 + $0x30] ss:$8 sps:$4 sm:$0xff]   ;;  %v8610_v9 = vld [vmem:[#allocation4 + $0x44] ss:$8 sps:$4 sm:$0xff]   ;;  %v8612_v10 = vld [vmem:[#allocation4 + $0x40] ss:$8 sps:$4 sm:$0xff]  }
  0xeb   :  { %485 = vmatprep.subr.bf16.mxu0 %v8601_v3  ;;  %838 = vmatprep.subr.bf16.mxu1 %v8601_v3  ;;  %v8613_v11 = vld [vmem:[#allocation4 + $0x54] ss:$8 sps:$4 sm:$0xff]   ;;  %v8615_v12 = vld [vmem:[#allocation4 + $0x50] ss:$8 sps:$4 sm:$0xff]   ;;  %v8616_v13 = vld [vmem:[#allocation4 + $0x64] ss:$8 sps:$4 sm:$0xff]  }
  0xec   :  { %v8618_v14 = vld [vmem:[#allocation4 + $0x60] ss:$8 sps:$4 sm:$0xff]   ;;  %v8619_v15 = vld [vmem:[#allocation4 + $0x74] ss:$8 sps:$4 sm:$0xff]   ;;  %v8621_v16 = vld [vmem:[#allocation4 + $0x70] ss:$8 sps:$4 sm:$0xff]  }
  0xed   :  { %v8622_v17 = vld [vmem:[#allocation2] sm:$0xff]   ;;  %v8624_v21 = vld [vmem:[#allocation2 + $0x8] sm:$0xff]   ;;  %v8653_v23 = vld [vmem:[#allocation6 + $0x14] ss:$8 sps:$4 sm:$0xff]   ;;  %s11329_s0 = sld [smem:[#allocation30_spill]]  ;;  %s11330_s7 = sld [smem:[#allocation31_spill]] }
  0xee   :  { %486 = vmatpush1.bf16.msra.mxu0 %v8603_v4  ;;  %839 = vmatpush1.bf16.msra.mxu1 %v8603_v4  ;;  %v8623_v18 = vld [vmem:[#allocation2 + $0x80] sm:$0xff]   ;;  %v8625_v22 = vld [vmem:[#allocation2 + $0x88] sm:$0xff]   ;;  %v8651_v24 = vld [vmem:[#allocation6 + $0x10] ss:$8 sps:$4 sm:$0xff]   ;;  %vm7505_vm0 = vcmask 64512   ;;  %s11331_s25 = sld [smem:[#allocation32_spill]] }
  0xef   :  { %487 = vmatprep.subr.bf16.mxu0 %v8604_v5  ;;  %840 = vmatprep.subr.bf16.mxu1 %v8604_v5  ;;  %v8646_v19 = vld [vmem:[#allocation6] ss:$8 sps:$4 sm:$0xff]   ;;  %v8648_v20 = vld [vmem:[#allocation6 + $0x4] ss:$8 sps:$4 sm:$0xff]   ;;  %v8663_v28 = vld [vmem:[#allocation6 + $0x34] ss:$8 sps:$4 sm:$0xff]  }
  0xf0   :  { %v8658_v25 = vld [vmem:[#allocation6 + $0x24] ss:$8 sps:$4 sm:$0xff]   ;;  %v8656_v26 = vld [vmem:[#allocation6 + $0x20] ss:$8 sps:$4 sm:$0xff]   ;;  %v8627_v29 = vld [vmem:[#allocation2 + $0x90] sm:$0xff]  }
  0xf1   :  { %v8661_v30 = vld [vmem:[#allocation6 + $0x30] ss:$8 sps:$4 sm:$0xff]   ;;  %v8668_v31 = vld [vmem:[#allocation6 + $0x44] ss:$8 sps:$4 sm:$0xff]   ;;  %v8666_v32 = vld [vmem:[#allocation6 + $0x40] ss:$8 sps:$4 sm:$0xff]  }
  0xf2   :  { %488 = vmatpush1.bf16.msra.mxu0 %v8606_v6  ;;  %841 = vmatpush1.bf16.msra.mxu1 %v8606_v6  ;;  %v8671_v33 = vld [vmem:[#allocation6 + $0x54] ss:$8 sps:$4 sm:$0xff]   ;;  %v8669_v36 = vld [vmem:[#allocation6 + $0x50] ss:$8 sps:$4 sm:$0xff]   ;;  %v8674_v37 = vld [vmem:[#allocation6 + $0x64] ss:$8 sps:$4 sm:$0xff]  }
  0xf3   :  { %489 = vmatprep.subr.bf16.mxu0 %v8607_v7  ;;  %842 = vmatprep.subr.bf16.mxu1 %v8607_v7  ;;  %v8628_v34 = vld [vmem:[#allocation2 + $0x18] sm:$0xff]   ;;  %v8672_v38 = vld [vmem:[#allocation6 + $0x60] ss:$8 sps:$4 sm:$0xff]   ;;  %v8680_v43 = vld [vmem:[#allocation6 + $0x84] ss:$8 sps:$4 sm:$0xff]  }
  0xf4   :  { %v8629_v35 = vld [vmem:[#allocation2 + $0x98] sm:$0xff]   ;;  %v8630_v40 = vld [vmem:[#allocation2 + $0x20] sm:$0xff]   ;;  %v8632_v46 = vld [vmem:[#allocation2 + $0x28] sm:$0xff]  }
  0xf5   :  { %v8677_v39 = vld [vmem:[#allocation6 + $0x74] ss:$8 sps:$4 sm:$0xff]   ;;  %v8631_v41 = vld [vmem:[#allocation2 + $0xa0] sm:$0xff]   ;;  %v8675_v42 = vld [vmem:[#allocation6 + $0x70] ss:$8 sps:$4 sm:$0xff]  }
  0xf6   :  { %490 = vmatpush1.bf16.msra.mxu0 %v8609_v8  ;;  %843 = vmatpush1.bf16.msra.mxu1 %v8609_v8  ;;  %v8678_v44 = vld [vmem:[#allocation6 + $0x80] ss:$8 sps:$4 sm:$0xff]   ;;  %v8683_v45 = vld [vmem:[#allocation6 + $0x94] ss:$8 sps:$4 sm:$0xff]   ;;  %v8681_v48 = vld [vmem:[#allocation6 + $0x90] ss:$8 sps:$4 sm:$0xff]  }
  0xf7   :  { %491 = vmatprep.subr.bf16.mxu0 %v8610_v9  ;;  %844 = vmatprep.subr.bf16.mxu1 %v8610_v9  ;;  %v8633_v47 = vld [vmem:[#allocation2 + $0xa8] sm:$0xff]   ;;  %v8689_v51 = vld [vmem:[#allocation6 + $0xb4] ss:$8 sps:$4 sm:$0xff]   ;;  %v8687_v54 = vld [vmem:[#allocation6 + $0xb0] ss:$8 sps:$4 sm:$0xff]  }
  0xf8   :  { %v8686_v49 = vld [vmem:[#allocation6 + $0xa4] ss:$8 sps:$4 sm:$0xff]   ;;  %v8684_v50 = vld [vmem:[#allocation6 + $0xa0] ss:$8 sps:$4 sm:$0xff]   ;;  %v8634_v52 = vld [vmem:[#allocation2 + $0x30] sm:$0xff]  }
  0xf9   :  { %v8635_v53 = vld [vmem:[#allocation2 + $0xb0] sm:$0xff]   ;;  %v8692_v55 = vld [vmem:[#allocation6 + $0xc4] ss:$8 sps:$4 sm:$0xff]   ;;  %v8690_v56 = vld [vmem:[#allocation6 + $0xc0] ss:$8 sps:$4 sm:$0xff]  }
  0xfa   :  { %492 = vmatpush1.bf16.msra.mxu0 %v8612_v10  ;;  %845 = vmatpush1.bf16.msra.mxu1 %v8612_v10  ;;  %v8695_v57 = vld [vmem:[#allocation6 + $0xd4] ss:$8 sps:$4 sm:$0xff]   ;;  %v8693_v60 = vld [vmem:[#allocation6 + $0xd0] ss:$8 sps:$4 sm:$0xff]   ;;  %v8698_v61 = vld [vmem:[#allocation6 + $0xe4] ss:$8 sps:$4 sm:$0xff]  }
  0xfb   :  { %493 = vmatprep.subr.bf16.mxu0 %v8613_v11  ;;  %846 = vmatprep.subr.bf16.mxu1 %v8613_v11  ;;  %v8636_v58 = vld [vmem:[#allocation2 + $0x38] sm:$0xff]   ;;  %v8696_v62 = vld [vmem:[#allocation6 + $0xe0] ss:$8 sps:$4 sm:$0xff]   ;;  %v8642_v4 = vld [vmem:[#allocation2 + $0x50] sm:$0xff]  }
  0xfc   :  { %v8637_v59 = vld [vmem:[#allocation2 + $0xb8] sm:$0xff]   ;;  %v8638_v63 = vld [vmem:[#allocation2 + $0x40] sm:$0xff]   ;;  %v8640_v2 = vld [vmem:[#allocation2 + $0x48] sm:$0xff]  }
  0xfd   :  { %v8639_v1 = vld [vmem:[#allocation2 + $0xc0] sm:$0xff]   ;;  %v8641_v3 = vld [vmem:[#allocation2 + $0xc8] sm:$0xff]   ;;  %v8643_v5 = vld [vmem:[#allocation2 + $0xd0] sm:$0xff]  }
  0xfe   :  { %494 = vmatpush1.bf16.msra.mxu0 %v8615_v12  ;;  %847 = vmatpush1.bf16.msra.mxu1 %v8615_v12  ;;  %v8644_v6 = vld [vmem:[#allocation2 + $0x58] sm:$0xff]   ;;  %v8649_v10 = vld [vmem:[#allocation2 + $0x60] sm:$0xff]   ;;  %v8654_v12 = vld [vmem:[#allocation2 + $0x68] sm:$0xff]  }
  0xff   :  { %495 = vmatprep.subr.bf16.mxu0 %v8616_v13  ;;  %848 = vmatprep.subr.bf16.mxu1 %v8616_v13  ;;  %v8645_v7 = vld [vmem:[#allocation2 + $0xd8] sm:$0xff]   ;;  %v8650_v11 = vld [vmem:[#allocation2 + $0xe0] sm:$0xff]   ;;  %v8655_v13 = vld [vmem:[#allocation2 + $0xe8] sm:$0xff]  }
 0x100   :  { %v8701_v8 = vld [vmem:[#allocation6 + $0xf4] ss:$8 sps:$4 sm:$0xff]   ;;  %v8699_v9 = vld [vmem:[#allocation6 + $0xf0] ss:$8 sps:$4 sm:$0xff]  }
 0x102   :  { %496 = vmatpush1.bf16.msra.mxu0 %v8618_v14  ;;  %849 = vmatpush1.bf16.msra.mxu1 %v8618_v14  ;;  %v8659_v14 = vld [vmem:[#allocation2 + $0x70] sm:$0xff]  }
 0x103   :  { %497 = vmatprep.subr.bf16.mxu0 %v8619_v15  ;;  %850 = vmatprep.subr.bf16.mxu1 %v8619_v15  ;;  %v8660_v15 = vld [vmem:[#allocation2 + $0xf0] sm:$0xff]  }
 0x106   :  { %498 = vmatpush1.bf16.msra.mxu0 %v8621_v16  ;;  %851 = vmatpush1.bf16.msra.mxu1 %v8621_v16  ;;  %v8664_v16 = vld [vmem:[#allocation2 + $0x78] sm:$0xff]  }
 0x107   :  { %1361 = vmatprep.subr.bf16.mxu0 %v8648_v20  ;;  %1618 = vmatprep.subr.bf16.mxu1 %v8648_v20 }
 0x109   :  { %516 = vmatmul.mubr.bf16.vlgmr.msra.gmra.mrb[0].mxu0 %v8622_v17  ;;  %869 = vmatmul.mubr.bf16.vlgmr.msra.gmra.mrb[0].mxu1 %v8623_v18  ;;  %v8665_v17 = vld [vmem:[#allocation2 + $0xf8] sm:$0xff]   ;;  %v8704_v18 = vld [vmem:[#allocation7 + $0x4] ss:$8 sps:$4 sm:$0xff]  }
 0x10a   :  { %525 = vmatprep.mubr.bf16.mxu0 %v9347_v0  ;;  %878 = vmatprep.mubr.bf16.mxu1 %v9347_v0 }
 0x10b   :  { %1362 = vmatpush1.bf16.msra.mxu0 %v8646_v19  ;;  %1619 = vmatpush1.bf16.msra.mxu1 %v8646_v19  ;;  %v297_v19 = vlaneseq }
 0x10c   :  { %1363 = vmatprep.subr.bf16.mxu0 %v8653_v23  ;;  %1620 = vmatprep.subr.bf16.mxu1 %v8653_v23 }
 0x10d   :  { %v298_v20 = vshrl.u32 %v297_v19, 7 }
 0x10f   :  { %1364 = vmatpush1.bf16.msra.mxu0 %v8651_v24  ;;  %1621 = vmatpush1.bf16.msra.mxu1 %v8651_v24  ;;  %v9669_v23 = vsub.s32 1, %v298_v20 }
 0x110   :  { %1365 = vmatprep.subr.bf16.mxu0 %v8658_v25  ;;  %1622 = vmatprep.subr.bf16.mxu1 %v8658_v25 }
 0x111   :  { %526 = vmatmul.mubr.bf16.gmra.mrb[4].mxu0 %v8624_v21  ;;  %879 = vmatmul.mubr.bf16.gmra.mrb[4].mxu1 %v8625_v22  ;;  %v9664_v21 = vsub.s32 0, %v298_v20  ;;  %v295_v22 = vld [vmem:[%s11298_s9] sm:$0x3] }
 0x112   :  { %535 = vmatprep.mubr.bf16.mxu0 %v9347_v0  ;;  %888 = vmatprep.mubr.bf16.mxu1 %v9347_v0  ;;  %v9675_v25 = vrot.slane %v295_v22, %v9669_v23 }
 0x113   :  { %1366 = vmatpush1.bf16.msra.mxu0 %v8656_v26  ;;  %1623 = vmatpush1.bf16.msra.mxu1 %v8656_v26  ;;  %v9672_v24 = vrot.slane %v295_v22, %v9664_v21 }
 0x114   :  { %1367 = vmatprep.subr.bf16.mxu0 %v8663_v28  ;;  %1624 = vmatprep.subr.bf16.mxu1 %v8663_v28 }
 0x117   :  { %1368 = vmatpush1.bf16.msra.mxu0 %v8661_v30  ;;  %1625 = vmatpush1.bf16.msra.mxu1 %v8661_v30 }
 0x118   :  { %1369 = vmatprep.subr.bf16.mxu0 %v8668_v31  ;;  %1626 = vmatprep.subr.bf16.mxu1 %v8668_v31 }
 0x119   :  { %536 = vmatmul.mubr.bf16.gmra.mrb[8].mxu0 %v8626_v27  ;;  %889 = vmatmul.mubr.bf16.gmra.mrb[8].mxu1 %v8627_v29 }
 0x11a   :  { %545 = vmatprep.mubr.bf16.mxu0 %v9347_v0  ;;  %898 = vmatprep.mubr.bf16.mxu1 %v9347_v0 }
 0x11b   :  { %1370 = vmatpush1.bf16.msra.mxu0 %v8666_v32  ;;  %1627 = vmatpush1.bf16.msra.mxu1 %v8666_v32 }
 0x11c   :  { %1371 = vmatprep.subr.bf16.mxu0 %v8671_v33  ;;  %1628 = vmatprep.subr.bf16.mxu1 %v8671_v33 }
 0x11f   :  { %1372 = vmatpush1.bf16.msra.mxu0 %v8669_v36  ;;  %1629 = vmatpush1.bf16.msra.mxu1 %v8669_v36 }
 0x120   :  { %1373 = vmatprep.subr.bf16.mxu0 %v8674_v37  ;;  %1630 = vmatprep.subr.bf16.mxu1 %v8674_v37 }
 0x121   :  { %546 = vmatmul.mubr.bf16.gmra.mrb[12].mxu0 %v8628_v34  ;;  %899 = vmatmul.mubr.bf16.gmra.mrb[12].mxu1 %v8629_v35 }
 0x122   :  { %555 = vmatprep.mubr.bf16.mxu0 %v9347_v0  ;;  %908 = vmatprep.mubr.bf16.mxu1 %v9347_v0 }
 0x123   :  { %1374 = vmatpush1.bf16.msra.mxu0 %v8672_v38  ;;  %1631 = vmatpush1.bf16.msra.mxu1 %v8672_v38 }
 0x124   :  { %1375 = vmatprep.subr.bf16.mxu0 %v8677_v39  ;;  %1632 = vmatprep.subr.bf16.mxu1 %v8677_v39 }
 0x127   :  { %1376 = vmatpush1.bf16.msra.mxu0 %v8675_v42  ;;  %1633 = vmatpush1.bf16.msra.mxu1 %v8675_v42 }
 0x128   :  { %1377 = vmatprep.subr.bf16.mxu0 %v8680_v43  ;;  %1634 = vmatprep.subr.bf16.mxu1 %v8680_v43 }
 0x129   :  { %556 = vmatmul.mubr.bf16.gmra.mrb[16].mxu0 %v8630_v40  ;;  %909 = vmatmul.mubr.bf16.gmra.mrb[16].mxu1 %v8631_v41 }
 0x12a   :  { %565 = vmatprep.mubr.bf16.mxu0 %v9347_v0  ;;  %918 = vmatprep.mubr.bf16.mxu1 %v9347_v0 }
 0x12b   :  { %1378 = vmatpush1.bf16.msra.mxu0 %v8678_v44  ;;  %1635 = vmatpush1.bf16.msra.mxu1 %v8678_v44 }
 0x12c   :  { %1379 = vmatprep.subr.bf16.mxu0 %v8683_v45  ;;  %1636 = vmatprep.subr.bf16.mxu1 %v8683_v45 }
 0x12f   :  { %1380 = vmatpush1.bf16.msra.mxu0 %v8681_v48  ;;  %1637 = vmatpush1.bf16.msra.mxu1 %v8681_v48 }
 0x130   :  { %1381 = vmatprep.subr.bf16.mxu0 %v8686_v49  ;;  %1638 = vmatprep.subr.bf16.mxu1 %v8686_v49 }
 0x131   :  { %566 = vmatmul.mubr.bf16.gmra.mrb[20].mxu0 %v8632_v46  ;;  %919 = vmatmul.mubr.bf16.gmra.mrb[20].mxu1 %v8633_v47 }
 0x132   :  { %575 = vmatprep.mubr.bf16.mxu0 %v9347_v0  ;;  %928 = vmatprep.mubr.bf16.mxu1 %v9347_v0 }
 0x133   :  { %1382 = vmatpush1.bf16.msra.mxu0 %v8684_v50  ;;  %1639 = vmatpush1.bf16.msra.mxu1 %v8684_v50 }
 0x134   :  { %1383 = vmatprep.subr.bf16.mxu0 %v8689_v51  ;;  %1640 = vmatprep.subr.bf16.mxu1 %v8689_v51 }
 0x137   :  { %1384 = vmatpush1.bf16.msra.mxu0 %v8687_v54  ;;  %1641 = vmatpush1.bf16.msra.mxu1 %v8687_v54 }
 0x138   :  { %1385 = vmatprep.subr.bf16.mxu0 %v8692_v55  ;;  %1642 = vmatprep.subr.bf16.mxu1 %v8692_v55 }
 0x139   :  { %576 = vmatmul.mubr.bf16.gmra.mrb[24].mxu0 %v8634_v52  ;;  %929 = vmatmul.mubr.bf16.gmra.mrb[24].mxu1 %v8635_v53 }
 0x13a   :  { %585 = vmatprep.mubr.bf16.mxu0 %v9347_v0  ;;  %938 = vmatprep.mubr.bf16.mxu1 %v9347_v0 }
 0x13b   :  { %1386 = vmatpush1.bf16.msra.mxu0 %v8690_v56  ;;  %1643 = vmatpush1.bf16.msra.mxu1 %v8690_v56  ;;  %v8702_v56 = vld [vmem:[#allocation7] ss:$8 sps:$4 sm:$0xff]  }
 0x13c   :  { %1387 = vmatprep.subr.bf16.mxu0 %v8695_v57  ;;  %1644 = vmatprep.subr.bf16.mxu1 %v8695_v57 }
 0x13f   :  { %1388 = vmatpush1.bf16.msra.mxu0 %v8693_v60  ;;  %1645 = vmatpush1.bf16.msra.mxu1 %v8693_v60 }
 0x140   :  { %1389 = vmatprep.subr.bf16.mxu0 %v8698_v61  ;;  %1646 = vmatprep.subr.bf16.mxu1 %v8698_v61  ;;  %v8707_v61 = vld [vmem:[#allocation7 + $0x14] ss:$8 sps:$4 sm:$0xff]  }
 0x141   :  { %586 = vmatmul.mubr.bf16.gmra.mrb[28].mxu0 %v8636_v58  ;;  %939 = vmatmul.mubr.bf16.gmra.mrb[28].mxu1 %v8637_v59 }
 0x142   :  { %595 = vmatprep.mubr.bf16.mxu0 %v9347_v0  ;;  %948 = vmatprep.mubr.bf16.mxu1 %v9347_v0 }
 0x143   :  { %1390 = vmatpush1.bf16.msra.mxu0 %v8696_v62  ;;  %1647 = vmatpush1.bf16.msra.mxu1 %v8696_v62 }
 0x144   :  { %1391 = vmatprep.subr.bf16.mxu0 %v8701_v8  ;;  %1648 = vmatprep.subr.bf16.mxu1 %v8701_v8 }
 0x147   :  { %1392 = vmatpush1.bf16.msra.mxu0 %v8699_v9  ;;  %1649 = vmatpush1.bf16.msra.mxu1 %v8699_v9  ;;  %v8705_v9 = vld [vmem:[#allocation7 + $0x10] ss:$8 sps:$4 sm:$0xff]  }
 0x148   :  { %2143 = vmatprep.subr.bf16.mxu0 %v8704_v18  ;;  %2400 = vmatprep.subr.bf16.mxu1 %v8704_v18 }
 0x149   :  { %596 = vmatmul.mubr.bf16.gmra.mrb[32].mxu0 %v8638_v63  ;;  %949 = vmatmul.mubr.bf16.gmra.mrb[32].mxu1 %v8639_v1 }
 0x14a   :  { %605 = vmatprep.mubr.bf16.mxu0 %v9347_v0  ;;  %958 = vmatprep.mubr.bf16.mxu1 %v9347_v0 }
 0x151   :  { %606 = vmatmul.mubr.bf16.gmra.mrb[36].mxu0 %v8640_v2  ;;  %959 = vmatmul.mubr.bf16.gmra.mrb[36].mxu1 %v8641_v3 }
 0x152   :  { %615 = vmatprep.mubr.bf16.mxu0 %v9347_v0  ;;  %968 = vmatprep.mubr.bf16.mxu1 %v9347_v0 }
 0x159   :  { %616 = vmatmul.mubr.bf16.gmra.mrb[40].mxu0 %v8642_v4  ;;  %969 = vmatmul.mubr.bf16.gmra.mrb[40].mxu1 %v8643_v5 }
 0x15a   :  { %625 = vmatprep.mubr.bf16.mxu0 %v9347_v0  ;;  %978 = vmatprep.mubr.bf16.mxu1 %v9347_v0 }
 0x161   :  { %626 = vmatmul.mubr.bf16.gmra.mrb[44].mxu0 %v8644_v6  ;;  %979 = vmatmul.mubr.bf16.gmra.mrb[44].mxu1 %v8645_v7 }
 0x162   :  { %635 = vmatprep.mubr.bf16.mxu0 %v9347_v0  ;;  %988 = vmatprep.mubr.bf16.mxu1 %v9347_v0 }
 0x169   :  { %636 = vmatmul.mubr.bf16.gmra.mrb[48].mxu0 %v8649_v10  ;;  %989 = vmatmul.mubr.bf16.gmra.mrb[48].mxu1 %v8650_v11 }
 0x16a   :  { %645 = vmatprep.mubr.bf16.mxu0 %v9347_v0  ;;  %998 = vmatprep.mubr.bf16.mxu1 %v9347_v0 }
 0x171   :  { %646 = vmatmul.mubr.bf16.gmra.mrb[52].mxu0 %v8654_v12  ;;  %999 = vmatmul.mubr.bf16.gmra.mrb[52].mxu1 %v8655_v13 }
 0x172   :  { %655 = vmatprep.mubr.bf16.mxu0 %v9347_v0  ;;  %1008 = vmatprep.mubr.bf16.mxu1 %v9347_v0 }
 0x179   :  { %656 = vmatmul.mubr.bf16.gmra.mrb[56].mxu0 %v8659_v14  ;;  %1009 = vmatmul.mubr.bf16.gmra.mrb[56].mxu1 %v8660_v15  ;;  %v8710_v14 = vld [vmem:[#allocation7 + $0x24] ss:$8 sps:$4 sm:$0xff]  }
 0x17a   :  { %665 = vmatprep.mubr.bf16.mxu0 %v9347_v0  ;;  %1018 = vmatprep.mubr.bf16.mxu1 %v9347_v0 }
 0x181   :  { %666 = vmatmul.mubr.bf16.gmra.mrb[60].mxu0 %v8664_v16  ;;  %1019 = vmatmul.mubr.bf16.gmra.mrb[60].mxu1 %v8665_v17 }
 0x1dc   :  { %v517_v26 = vpop.f32.mrb[0].mxu0  ;;  %v870_v27 = vpop.f32.mrb[0].mxu1 }
 0x1dd   :  { %v518_v28 = vadd.f32 %v517_v26, %v9672_v24  ;;  %v871_v29 = vadd.f32 %v870_v27, %v9672_v24  ;;  %v519_v30 = vpop.f32.mrb[1].mxu0  ;;  %v872_v31 = vpop.f32.mrb[1].mxu1 }
 0x1de   :  { %v520_v32 = vadd.f32 %v519_v30, %v9675_v25  ;;  %v873_v33 = vadd.f32 %v872_v31, %v9675_v25  ;;  %v521_v34 = vpop.f32.mrb[2].mxu0  ;;  %v874_v35 = vpop.f32.mrb[2].mxu1 }
 0x1df   :  { %v522_v36 = vadd.f32 %v521_v34, %v9672_v24  ;;  %v875_v37 = vadd.f32 %v874_v35, %v9672_v24  ;;  %v523_v38 = vpop.f32.mrb[3].mxu0  ;;  %v876_v39 = vpop.f32.mrb[3].mxu1  ;;  %v676_v42 = vmax.f32 %v518_v28, 0.0  ;;  %v1029_v43 = vmax.f32 %v871_v29, 0.0  ;;  %v8708_v29 = vld [vmem:[#allocation7 + $0x20] ss:$8 sps:$4 sm:$0xff]  }
 0x1e0   :  { %v524_v40 = vadd.f32 %v523_v38, %v9675_v25  ;;  %v877_v41 = vadd.f32 %v876_v39, %v9675_v25  ;;  %v677_v46 = vmax.f32 %v520_v32, 0.0  ;;  %v1030_v47 = vmax.f32 %v873_v33, 0.0  ;;  %v8713_v34 = vld [vmem:[#allocation7 + $0x34] ss:$8 sps:$4 sm:$0xff]  }
 0x1e1   :  { %v678_v44 = vmax.f32 %v522_v36, 0.0  ;;  %v1031_v45 = vmax.f32 %v875_v37, 0.0 }
 0x1e2   :  { %v679_v48 = vmax.f32 %v524_v40, 0.0  ;;  %v1032_v49 = vmax.f32 %v877_v41, 0.0 }
 0x1e3   :  { %v1093_v50 = vpack.c.bf16 %v678_v44, %v676_v42  ;;  %v1125_v51 = vpack.c.bf16 %v1031_v45, %v1029_v43  ;;  %v8711_v45 = vld [vmem:[#allocation7 + $0x30] ss:$8 sps:$4 sm:$0xff]  }
 0x1e4   :  { %v527_v52 = vpop.f32.mrb[4].mxu0  ;;  %v880_v53 = vpop.f32.mrb[4].mxu1  ;;  %v1094_v54 = vpack.c.bf16 %v679_v48, %v677_v46  ;;  %v1126_v55 = vpack.c.bf16 %v1032_v49, %v1030_v47 }
 0x1e5   :  { %v528_v57 = vadd.f32 %v527_v52, %v9672_v24  ;;  %v881_v58 = vadd.f32 %v880_v53, %v9672_v24  ;;  %v529_v59 = vpop.f32.mrb[5].mxu0  ;;  %v882_v60 = vpop.f32.mrb[5].mxu1 }
 0x1e6   :  { %v530_v62 = vadd.f32 %v529_v59, %v9675_v25  ;;  %v883_v63 = vadd.f32 %v882_v60, %v9675_v25  ;;  %v531_v1 = vpop.f32.mrb[6].mxu0  ;;  %v884_v2 = vpop.f32.mrb[6].mxu1  ;;  %1393 = vmatprep.mubr.bf16.mxu0 %v1094_v54  ;;  %1650 = vmatprep.mubr.bf16.mxu1 %v1126_v55 }
 0x1e7   :  { %v532_v3 = vadd.f32 %v531_v1, %v9672_v24  ;;  %v885_v4 = vadd.f32 %v884_v2, %v9672_v24  ;;  %v533_v5 = vpop.f32.mrb[7].mxu0  ;;  %v886_v6 = vpop.f32.mrb[7].mxu1  ;;  %1394 = vmatmul.mubr.bf16.vlgmr.msra.gmra.mrb[64].mxu0 %v1093_v50  ;;  %1651 = vmatmul.mubr.bf16.vlgmr.msra.gmra.mrb[64].mxu1 %v1125_v51  ;;  %v680_v10 = vmax.f32 %v528_v57, 0.0  ;;  %v1033_v11 = vmax.f32 %v881_v58, 0.0  ;;  %v8716_v50 = vld [vmem:[#allocation7 + $0x44] ss:$8 sps:$4 sm:$0xff]  }
 0x1e8   :  { %v534_v7 = vadd.f32 %v533_v5, %v9675_v25  ;;  %v887_v8 = vadd.f32 %v886_v6, %v9675_v25  ;;  %2144 = vmatpush1.bf16.msra.mxu0 %v8702_v56  ;;  %2401 = vmatpush1.bf16.msra.mxu1 %v8702_v56  ;;  %v681_v15 = vmax.f32 %v530_v62, 0.0  ;;  %v1034_v16 = vmax.f32 %v883_v63, 0.0 }
 0x1e9   :  { %v682_v12 = vmax.f32 %v532_v3, 0.0  ;;  %v1035_v13 = vmax.f32 %v885_v4, 0.0  ;;  %2145 = vmatprep.subr.bf16.mxu0 %v8707_v61  ;;  %2402 = vmatprep.subr.bf16.mxu1 %v8707_v61  ;;  %v8714_v61 = vld [vmem:[#allocation7 + $0x40] ss:$8 sps:$4 sm:$0xff]   ;;  %v8719_v3 = vld [vmem:[#allocation7 + $0x54] ss:$8 sps:$4 sm:$0xff]  }
 0x1ea   :  { %v683_v17 = vmax.f32 %v534_v7, 0.0  ;;  %v1036_v18 = vmax.f32 %v887_v8, 0.0 }
 0x1eb   :  { %v1095_v19 = vpack.c.bf16 %v682_v12, %v680_v10  ;;  %v1127_v20 = vpack.c.bf16 %v1035_v13, %v1033_v11 }
 0x1ec   :  { %v537_v22 = vpop.f32.mrb[8].mxu0  ;;  %v890_v26 = vpop.f32.mrb[8].mxu1  ;;  %v1096_v27 = vpack.c.bf16 %v683_v17, %v681_v15  ;;  %v1128_v28 = vpack.c.bf16 %v1036_v18, %v1034_v16  ;;  %2146 = vmatpush1.bf16.msra.mxu0 %v8705_v9  ;;  %2403 = vmatpush1.bf16.msra.mxu1 %v8705_v9 }
 0x1ed   :  { %v538_v30 = vadd.f32 %v537_v22, %v9672_v24  ;;  %v891_v31 = vadd.f32 %v890_v26, %v9672_v24  ;;  %v539_v32 = vpop.f32.mrb[9].mxu0  ;;  %v892_v33 = vpop.f32.mrb[9].mxu1  ;;  %2147 = vmatprep.subr.bf16.mxu0 %v8710_v14  ;;  %2404 = vmatprep.subr.bf16.mxu1 %v8710_v14  ;;  %v8717_v14 = vld [vmem:[#allocation7 + $0x50] ss:$8 sps:$4 sm:$0xff]  }
 0x1ee   :  { %v540_v35 = vadd.f32 %v539_v32, %v9675_v25  ;;  %v893_v36 = vadd.f32 %v892_v33, %v9675_v25  ;;  %v541_v37 = vpop.f32.mrb[10].mxu0  ;;  %v894_v38 = vpop.f32.mrb[10].mxu1  ;;  %1403 = vmatprep.mubr.bf16.mxu0 %v1096_v27  ;;  %1660 = vmatprep.mubr.bf16.mxu1 %v1128_v28 }
 0x1ef   :  { %v542_v39 = vadd.f32 %v541_v37, %v9672_v24  ;;  %v895_v40 = vadd.f32 %v894_v38, %v9672_v24  ;;  %v543_v41 = vpop.f32.mrb[11].mxu0  ;;  %v896_v42 = vpop.f32.mrb[11].mxu1  ;;  %1404 = vmatmul.mubr.bf16.gmra.mrb[68].mxu0 %v1095_v19  ;;  %1661 = vmatmul.mubr.bf16.gmra.mrb[68].mxu1 %v1127_v20  ;;  %v684_v46 = vmax.f32 %v538_v30, 0.0  ;;  %v1037_v47 = vmax.f32 %v891_v31, 0.0  ;;  %v8722_v19 = vld [vmem:[#allocation7 + $0x64] ss:$8 sps:$4 sm:$0xff]  }
 0x1f0   :  { %v544_v43 = vadd.f32 %v543_v41, %v9675_v25  ;;  %v897_v44 = vadd.f32 %v896_v42, %v9675_v25  ;;  %2148 = vmatpush1.bf16.msra.mxu0 %v8708_v29  ;;  %2405 = vmatpush1.bf16.msra.mxu1 %v8708_v29  ;;  %v685_v51 = vmax.f32 %v540_v35, 0.0  ;;  %v1038_v52 = vmax.f32 %v893_v36, 0.0 }
 0x1f1   :  { %v686_v48 = vmax.f32 %v542_v39, 0.0  ;;  %v1039_v49 = vmax.f32 %v895_v40, 0.0  ;;  %2149 = vmatprep.subr.bf16.mxu0 %v8713_v34  ;;  %2406 = vmatprep.subr.bf16.mxu1 %v8713_v34  ;;  %v8720_v34 = vld [vmem:[#allocation7 + $0x60] ss:$8 sps:$4 sm:$0xff]   ;;  %v8725_v39 = vld [vmem:[#allocation7 + $0x74] ss:$8 sps:$4 sm:$0xff]  }
 0x1f2   :  { %v687_v53 = vmax.f32 %v544_v43, 0.0  ;;  %v1040_v54 = vmax.f32 %v897_v44, 0.0 }
 0x1f3   :  { %v1097_v55 = vpack.c.bf16 %v686_v48, %v684_v46  ;;  %v1129_v56 = vpack.c.bf16 %v1039_v49, %v1037_v47 }
 0x1f4   :  { %v547_v57 = vpop.f32.mrb[12].mxu0  ;;  %v900_v58 = vpop.f32.mrb[12].mxu1  ;;  %v1098_v59 = vpack.c.bf16 %v687_v53, %v685_v51  ;;  %v1130_v60 = vpack.c.bf16 %v1040_v54, %v1038_v52  ;;  %2150 = vmatpush1.bf16.msra.mxu0 %v8711_v45  ;;  %2407 = vmatpush1.bf16.msra.mxu1 %v8711_v45 }
 0x1f5   :  { %v548_v62 = vadd.f32 %v547_v57, %v9672_v24  ;;  %v901_v63 = vadd.f32 %v900_v58, %v9672_v24  ;;  %v549_v1 = vpop.f32.mrb[13].mxu0  ;;  %v902_v2 = vpop.f32.mrb[13].mxu1  ;;  %2151 = vmatprep.subr.bf16.mxu0 %v8716_v50  ;;  %2408 = vmatprep.subr.bf16.mxu1 %v8716_v50  ;;  %v8723_v50 = vld [vmem:[#allocation7 + $0x70] ss:$8 sps:$4 sm:$0xff]  }
 0x1f6   :  { %v550_v4 = vadd.f32 %v549_v1, %v9675_v25  ;;  %v903_v5 = vadd.f32 %v902_v2, %v9675_v25  ;;  %v551_v6 = vpop.f32.mrb[14].mxu0  ;;  %v904_v7 = vpop.f32.mrb[14].mxu1  ;;  %1413 = vmatprep.mubr.bf16.mxu0 %v1098_v59  ;;  %1670 = vmatprep.mubr.bf16.mxu1 %v1130_v60 }
 0x1f7   :  { %v552_v8 = vadd.f32 %v551_v6, %v9672_v24  ;;  %v905_v9 = vadd.f32 %v904_v7, %v9672_v24  ;;  %v553_v10 = vpop.f32.mrb[15].mxu0  ;;  %v906_v11 = vpop.f32.mrb[15].mxu1  ;;  %1414 = vmatmul.mubr.bf16.gmra.mrb[72].mxu0 %v1097_v55  ;;  %1671 = vmatmul.mubr.bf16.gmra.mrb[72].mxu1 %v1129_v56  ;;  %v688_v15 = vmax.f32 %v548_v62, 0.0  ;;  %v1041_v16 = vmax.f32 %v901_v63, 0.0  ;;  %v8728_v55 = vld [vmem:[#allocation7 + $0x84] ss:$8 sps:$4 sm:$0xff]  }
 0x1f8   :  { %v554_v12 = vadd.f32 %v553_v10, %v9675_v25  ;;  %v907_v13 = vadd.f32 %v906_v11, %v9675_v25  ;;  %2152 = vmatpush1.bf16.msra.mxu0 %v8714_v61  ;;  %2409 = vmatpush1.bf16.msra.mxu1 %v8714_v61  ;;  %v689_v20 = vmax.f32 %v550_v4, 0.0  ;;  %v1042_v22 = vmax.f32 %v903_v5, 0.0 }
 0x1f9   :  { %v690_v17 = vmax.f32 %v552_v8, 0.0  ;;  %v1043_v18 = vmax.f32 %v905_v9, 0.0  ;;  %2153 = vmatprep.subr.bf16.mxu0 %v8719_v3  ;;  %2410 = vmatprep.subr.bf16.mxu1 %v8719_v3  ;;  %v8726_v3 = vld [vmem:[#allocation7 + $0x80] ss:$8 sps:$4 sm:$0xff]   ;;  %v8731_v8 = vld [vmem:[#allocation7 + $0x94] ss:$8 sps:$4 sm:$0xff]  }
 0x1fa   :  { %v691_v26 = vmax.f32 %v554_v12, 0.0  ;;  %v1044_v27 = vmax.f32 %v907_v13, 0.0 }
 0x1fb   :  { %v1099_v28 = vpack.c.bf16 %v690_v17, %v688_v15  ;;  %v1131_v29 = vpack.c.bf16 %v1043_v18, %v1041_v16 }
 0x1fc   :  { %v557_v30 = vpop.f32.mrb[16].mxu0  ;;  %v910_v31 = vpop.f32.mrb[16].mxu1  ;;  %v1100_v32 = vpack.c.bf16 %v691_v26, %v689_v20  ;;  %v1132_v33 = vpack.c.bf16 %v1044_v27, %v1042_v22  ;;  %2154 = vmatpush1.bf16.msra.mxu0 %v8717_v14  ;;  %2411 = vmatpush1.bf16.msra.mxu1 %v8717_v14 }
 0x1fd   :  { %v558_v35 = vadd.f32 %v557_v30, %v9672_v24  ;;  %v911_v36 = vadd.f32 %v910_v31, %v9672_v24  ;;  %v559_v37 = vpop.f32.mrb[17].mxu0  ;;  %v912_v38 = vpop.f32.mrb[17].mxu1  ;;  %2155 = vmatprep.subr.bf16.mxu0 %v8722_v19  ;;  %2412 = vmatprep.subr.bf16.mxu1 %v8722_v19  ;;  %v8729_v19 = vld [vmem:[#allocation7 + $0x90] ss:$8 sps:$4 sm:$0xff]  }
 0x1fe   :  { %v560_v40 = vadd.f32 %v559_v37, %v9675_v25  ;;  %v913_v41 = vadd.f32 %v912_v38, %v9675_v25  ;;  %v561_v42 = vpop.f32.mrb[18].mxu0  ;;  %v914_v43 = vpop.f32.mrb[18].mxu1  ;;  %1423 = vmatprep.mubr.bf16.mxu0 %v1100_v32  ;;  %1680 = vmatprep.mubr.bf16.mxu1 %v1132_v33 }
 0x1ff   :  { %v562_v44 = vadd.f32 %v561_v42, %v9672_v24  ;;  %v915_v45 = vadd.f32 %v914_v43, %v9672_v24  ;;  %v563_v46 = vpop.f32.mrb[19].mxu0  ;;  %v916_v47 = vpop.f32.mrb[19].mxu1  ;;  %1424 = vmatmul.mubr.bf16.gmra.mrb[76].mxu0 %v1099_v28  ;;  %1681 = vmatmul.mubr.bf16.gmra.mrb[76].mxu1 %v1131_v29  ;;  %v692_v51 = vmax.f32 %v558_v35, 0.0  ;;  %v1045_v52 = vmax.f32 %v911_v36, 0.0  ;;  %v8734_v28 = vld [vmem:[#allocation7 + $0xa4] ss:$8 sps:$4 sm:$0xff]  }
 0x200   :  { %v564_v48 = vadd.f32 %v563_v46, %v9675_v25  ;;  %v917_v49 = vadd.f32 %v916_v47, %v9675_v25  ;;  %2156 = vmatpush1.bf16.msra.mxu0 %v8720_v34  ;;  %2413 = vmatpush1.bf16.msra.mxu1 %v8720_v34  ;;  %v693_v56 = vmax.f32 %v560_v40, 0.0  ;;  %v1046_v57 = vmax.f32 %v913_v41, 0.0 }
 0x201   :  { %v694_v53 = vmax.f32 %v562_v44, 0.0  ;;  %v1047_v54 = vmax.f32 %v915_v45, 0.0  ;;  %2157 = vmatprep.subr.bf16.mxu0 %v8725_v39  ;;  %2414 = vmatprep.subr.bf16.mxu1 %v8725_v39  ;;  %v8732_v39 = vld [vmem:[#allocation7 + $0xa0] ss:$8 sps:$4 sm:$0xff]   ;;  %v8737_v44 = vld [vmem:[#allocation7 + $0xb4] ss:$8 sps:$4 sm:$0xff]  }
 0x202   :  { %v695_v58 = vmax.f32 %v564_v48, 0.0  ;;  %v1048_v59 = vmax.f32 %v917_v49, 0.0 }
 0x203   :  { %v1101_v60 = vpack.c.bf16 %v694_v53, %v692_v51  ;;  %v1133_v61 = vpack.c.bf16 %v1047_v54, %v1045_v52 }
 0x204   :  { %v567_v62 = vpop.f32.mrb[20].mxu0  ;;  %v920_v63 = vpop.f32.mrb[20].mxu1  ;;  %v1102_v1 = vpack.c.bf16 %v695_v58, %v693_v56  ;;  %v1134_v2 = vpack.c.bf16 %v1048_v59, %v1046_v57  ;;  %2158 = vmatpush1.bf16.msra.mxu0 %v8723_v50  ;;  %2415 = vmatpush1.bf16.msra.mxu1 %v8723_v50 }
 0x205   :  { %v568_v4 = vadd.f32 %v567_v62, %v9672_v24  ;;  %v921_v5 = vadd.f32 %v920_v63, %v9672_v24  ;;  %v569_v6 = vpop.f32.mrb[21].mxu0  ;;  %v922_v7 = vpop.f32.mrb[21].mxu1  ;;  %2159 = vmatprep.subr.bf16.mxu0 %v8728_v55  ;;  %2416 = vmatprep.subr.bf16.mxu1 %v8728_v55  ;;  %v8735_v55 = vld [vmem:[#allocation7 + $0xb0] ss:$8 sps:$4 sm:$0xff]  }
 0x206   :  { %v570_v9 = vadd.f32 %v569_v6, %v9675_v25  ;;  %v923_v10 = vadd.f32 %v922_v7, %v9675_v25  ;;  %v571_v11 = vpop.f32.mrb[22].mxu0  ;;  %v924_v12 = vpop.f32.mrb[22].mxu1  ;;  %1433 = vmatprep.mubr.bf16.mxu0 %v1102_v1  ;;  %1690 = vmatprep.mubr.bf16.mxu1 %v1134_v2 }
 0x207   :  { %v572_v13 = vadd.f32 %v571_v11, %v9672_v24  ;;  %v925_v14 = vadd.f32 %v924_v12, %v9672_v24  ;;  %v573_v15 = vpop.f32.mrb[23].mxu0  ;;  %v926_v16 = vpop.f32.mrb[23].mxu1  ;;  %1434 = vmatmul.mubr.bf16.gmra.mrb[80].mxu0 %v1101_v60  ;;  %1691 = vmatmul.mubr.bf16.gmra.mrb[80].mxu1 %v1133_v61  ;;  %v696_v20 = vmax.f32 %v568_v4, 0.0  ;;  %v1049_v22 = vmax.f32 %v921_v5, 0.0  ;;  %v8740_v60 = vld [vmem:[#allocation7 + $0xc4] ss:$8 sps:$4 sm:$0xff]  }
 0x208   :  { %v574_v17 = vadd.f32 %v573_v15, %v9675_v25  ;;  %v927_v18 = vadd.f32 %v926_v16, %v9675_v25  ;;  %2160 = vmatpush1.bf16.msra.mxu0 %v8726_v3  ;;  %2417 = vmatpush1.bf16.msra.mxu1 %v8726_v3  ;;  %v697_v29 = vmax.f32 %v570_v9, 0.0  ;;  %v1050_v30 = vmax.f32 %v923_v10, 0.0 }
 0x209   :  { %v698_v26 = vmax.f32 %v572_v13, 0.0  ;;  %v1051_v27 = vmax.f32 %v925_v14, 0.0  ;;  %2161 = vmatprep.subr.bf16.mxu0 %v8731_v8  ;;  %2418 = vmatprep.subr.bf16.mxu1 %v8731_v8  ;;  %v8738_v8 = vld [vmem:[#allocation7 + $0xc0] ss:$8 sps:$4 sm:$0xff]   ;;  %v8743_v13 = vld [vmem:[#allocation7 + $0xd4] ss:$8 sps:$4 sm:$0xff]  }
 0x20a   :  { %v699_v31 = vmax.f32 %v574_v17, 0.0  ;;  %v1052_v32 = vmax.f32 %v927_v18, 0.0 }
 0x20b   :  { %v1103_v33 = vpack.c.bf16 %v698_v26, %v696_v20  ;;  %v1135_v34 = vpack.c.bf16 %v1051_v27, %v1049_v22 }
 0x20c   :  { %v577_v35 = vpop.f32.mrb[24].mxu0  ;;  %v930_v36 = vpop.f32.mrb[24].mxu1  ;;  %v1104_v37 = vpack.c.bf16 %v699_v31, %v697_v29  ;;  %v1136_v38 = vpack.c.bf16 %v1052_v32, %v1050_v30  ;;  %2162 = vmatpush1.bf16.msra.mxu0 %v8729_v19  ;;  %2419 = vmatpush1.bf16.msra.mxu1 %v8729_v19 }
 0x20d   :  { %v578_v40 = vadd.f32 %v577_v35, %v9672_v24  ;;  %v931_v41 = vadd.f32 %v930_v36, %v9672_v24  ;;  %v579_v42 = vpop.f32.mrb[25].mxu0  ;;  %v932_v43 = vpop.f32.mrb[25].mxu1  ;;  %2163 = vmatprep.subr.bf16.mxu0 %v8734_v28  ;;  %2420 = vmatprep.subr.bf16.mxu1 %v8734_v28  ;;  %v8741_v28 = vld [vmem:[#allocation7 + $0xd0] ss:$8 sps:$4 sm:$0xff]  }
 0x20e   :  { %v580_v45 = vadd.f32 %v579_v42, %v9675_v25  ;;  %v933_v46 = vadd.f32 %v932_v43, %v9675_v25  ;;  %v581_v47 = vpop.f32.mrb[26].mxu0  ;;  %v934_v48 = vpop.f32.mrb[26].mxu1  ;;  %1443 = vmatprep.mubr.bf16.mxu0 %v1104_v37  ;;  %1700 = vmatprep.mubr.bf16.mxu1 %v1136_v38 }
 0x20f   :  { %v582_v49 = vadd.f32 %v581_v47, %v9672_v24  ;;  %v935_v50 = vadd.f32 %v934_v48, %v9672_v24  ;;  %v583_v51 = vpop.f32.mrb[27].mxu0  ;;  %v936_v52 = vpop.f32.mrb[27].mxu1  ;;  %1444 = vmatmul.mubr.bf16.gmra.mrb[84].mxu0 %v1103_v33  ;;  %1701 = vmatmul.mubr.bf16.gmra.mrb[84].mxu1 %v1135_v34  ;;  %v700_v56 = vmax.f32 %v578_v40, 0.0  ;;  %v1053_v57 = vmax.f32 %v931_v41, 0.0  ;;  %v8746_v33 = vld [vmem:[#allocation7 + $0xe4] ss:$8 sps:$4 sm:$0xff]  }
 0x210   :  { %v584_v53 = vadd.f32 %v583_v51, %v9675_v25  ;;  %v937_v54 = vadd.f32 %v936_v52, %v9675_v25  ;;  %2164 = vmatpush1.bf16.msra.mxu0 %v8732_v39  ;;  %2421 = vmatpush1.bf16.msra.mxu1 %v8732_v39  ;;  %v701_v61 = vmax.f32 %v580_v45, 0.0  ;;  %v1054_v62 = vmax.f32 %v933_v46, 0.0 }
 0x211   :  { %v702_v58 = vmax.f32 %v582_v49, 0.0  ;;  %v1055_v59 = vmax.f32 %v935_v50, 0.0  ;;  %2165 = vmatprep.subr.bf16.mxu0 %v8737_v44  ;;  %2422 = vmatprep.subr.bf16.mxu1 %v8737_v44  ;;  %v8744_v44 = vld [vmem:[#allocation7 + $0xe0] ss:$8 sps:$4 sm:$0xff]  }
 0x212   :  { %v703_v63 = vmax.f32 %v584_v53, 0.0  ;;  %v1056_v1 = vmax.f32 %v937_v54, 0.0 }
 0x213   :  { %v1105_v2 = vpack.c.bf16 %v702_v58, %v700_v56  ;;  %v1137_v3 = vpack.c.bf16 %v1055_v59, %v1053_v57 }
 0x214   :  { %v587_v4 = vpop.f32.mrb[28].mxu0  ;;  %v940_v5 = vpop.f32.mrb[28].mxu1  ;;  %v1106_v6 = vpack.c.bf16 %v703_v63, %v701_v61  ;;  %v1138_v7 = vpack.c.bf16 %v1056_v1, %v1054_v62  ;;  %2166 = vmatpush1.bf16.msra.mxu0 %v8735_v55  ;;  %2423 = vmatpush1.bf16.msra.mxu1 %v8735_v55 }
 0x215   :  { %v588_v9 = vadd.f32 %v587_v4, %v9672_v24  ;;  %v941_v10 = vadd.f32 %v940_v5, %v9672_v24  ;;  %v589_v11 = vpop.f32.mrb[29].mxu0  ;;  %v942_v12 = vpop.f32.mrb[29].mxu1  ;;  %2167 = vmatprep.subr.bf16.mxu0 %v8740_v60  ;;  %2424 = vmatprep.subr.bf16.mxu1 %v8740_v60 }
 0x216   :  { %v590_v14 = vadd.f32 %v589_v11, %v9675_v25  ;;  %v943_v15 = vadd.f32 %v942_v12, %v9675_v25  ;;  %v591_v16 = vpop.f32.mrb[30].mxu0  ;;  %v944_v17 = vpop.f32.mrb[30].mxu1  ;;  %1453 = vmatprep.mubr.bf16.mxu0 %v1106_v6  ;;  %1710 = vmatprep.mubr.bf16.mxu1 %v1138_v7 }
 0x217   :  { %v592_v18 = vadd.f32 %v591_v16, %v9672_v24  ;;  %v945_v19 = vadd.f32 %v944_v17, %v9672_v24  ;;  %v593_v20 = vpop.f32.mrb[31].mxu0  ;;  %v946_v22 = vpop.f32.mrb[31].mxu1  ;;  %1454 = vmatmul.mubr.bf16.gmra.mrb[88].mxu0 %v1105_v2  ;;  %1711 = vmatmul.mubr.bf16.gmra.mrb[88].mxu1 %v1137_v3  ;;  %v704_v29 = vmax.f32 %v588_v9, 0.0  ;;  %v1057_v30 = vmax.f32 %v941_v10, 0.0 }
 0x218   :  { %v594_v26 = vadd.f32 %v593_v20, %v9675_v25  ;;  %v947_v27 = vadd.f32 %v946_v22, %v9675_v25  ;;  %2168 = vmatpush1.bf16.msra.mxu0 %v8738_v8  ;;  %2425 = vmatpush1.bf16.msra.mxu1 %v8738_v8  ;;  %v705_v34 = vmax.f32 %v590_v14, 0.0  ;;  %v1058_v35 = vmax.f32 %v943_v15, 0.0 }
 0x219   :  { %v706_v31 = vmax.f32 %v592_v18, 0.0  ;;  %v1059_v32 = vmax.f32 %v945_v19, 0.0  ;;  %2169 = vmatprep.subr.bf16.mxu0 %v8743_v13  ;;  %2426 = vmatprep.subr.bf16.mxu1 %v8743_v13 }
 0x21a   :  { %v707_v36 = vmax.f32 %v594_v26, 0.0  ;;  %v1060_v37 = vmax.f32 %v947_v27, 0.0 }
 0x21b   :  { %v1107_v38 = vpack.c.bf16 %v706_v31, %v704_v29  ;;  %v1139_v39 = vpack.c.bf16 %v1059_v32, %v1057_v30 }
 0x21c   :  { %v597_v40 = vpop.f32.mrb[32].mxu0  ;;  %v950_v41 = vpop.f32.mrb[32].mxu1  ;;  %v1108_v42 = vpack.c.bf16 %v707_v36, %v705_v34  ;;  %v1140_v43 = vpack.c.bf16 %v1060_v37, %v1058_v35  ;;  %2170 = vmatpush1.bf16.msra.mxu0 %v8741_v28  ;;  %2427 = vmatpush1.bf16.msra.mxu1 %v8741_v28 }
 0x21d   :  { %v598_v45 = vadd.f32 %v597_v40, %v9672_v24  ;;  %v951_v46 = vadd.f32 %v950_v41, %v9672_v24  ;;  %v599_v47 = vpop.f32.mrb[33].mxu0  ;;  %v952_v48 = vpop.f32.mrb[33].mxu1  ;;  %2171 = vmatprep.subr.bf16.mxu0 %v8746_v33  ;;  %2428 = vmatprep.subr.bf16.mxu1 %v8746_v33 }
 0x21e   :  { %v600_v49 = vadd.f32 %v599_v47, %v9675_v25  ;;  %v953_v50 = vadd.f32 %v952_v48, %v9675_v25  ;;  %v601_v51 = vpop.f32.mrb[34].mxu0  ;;  %v954_v52 = vpop.f32.mrb[34].mxu1  ;;  %1463 = vmatprep.mubr.bf16.mxu0 %v1108_v42  ;;  %1720 = vmatprep.mubr.bf16.mxu1 %v1140_v43 }
 0x21f   :  { %v602_v53 = vadd.f32 %v601_v51, %v9672_v24  ;;  %v955_v54 = vadd.f32 %v954_v52, %v9672_v24  ;;  %v603_v55 = vpop.f32.mrb[35].mxu0  ;;  %v956_v56 = vpop.f32.mrb[35].mxu1  ;;  %1464 = vmatmul.mubr.bf16.gmra.mrb[92].mxu0 %v1107_v38  ;;  %1721 = vmatmul.mubr.bf16.gmra.mrb[92].mxu1 %v1139_v39  ;;  %v708_v59 = vmax.f32 %v598_v45, 0.0  ;;  %v1061_v60 = vmax.f32 %v951_v46, 0.0 }
 0x220   :  { %v604_v57 = vadd.f32 %v603_v55, %v9675_v25  ;;  %v957_v58 = vadd.f32 %v956_v56, %v9675_v25  ;;  %2172 = vmatpush1.bf16.msra.mxu0 %v8744_v44  ;;  %2429 = vmatpush1.bf16.msra.mxu1 %v8744_v44  ;;  %v709_v63 = vmax.f32 %v600_v49, 0.0  ;;  %v1062_v1 = vmax.f32 %v953_v50, 0.0 }
 0x221   :  { %v710_v61 = vmax.f32 %v602_v53, 0.0  ;;  %v1063_v62 = vmax.f32 %v955_v54, 0.0 }
 0x222   :  { %v711_v2 = vmax.f32 %v604_v57, 0.0  ;;  %v1064_v3 = vmax.f32 %v957_v58, 0.0 }
 0x223   :  { %v1109_v4 = vpack.c.bf16 %v710_v61, %v708_v59  ;;  %v1141_v5 = vpack.c.bf16 %v1063_v62, %v1061_v60 }
 0x224   :  { %v607_v6 = vpop.f32.mrb[36].mxu0  ;;  %v960_v7 = vpop.f32.mrb[36].mxu1  ;;  %v1110_v8 = vpack.c.bf16 %v711_v2, %v709_v63  ;;  %v1142_v9 = vpack.c.bf16 %v1064_v3, %v1062_v1 }
 0x225   :  { %v608_v10 = vadd.f32 %v607_v6, %v9672_v24  ;;  %v961_v11 = vadd.f32 %v960_v7, %v9672_v24  ;;  %v609_v12 = vpop.f32.mrb[37].mxu0  ;;  %v962_v13 = vpop.f32.mrb[37].mxu1 }
 0x226   :  { %v610_v14 = vadd.f32 %v609_v12, %v9675_v25  ;;  %v963_v15 = vadd.f32 %v962_v13, %v9675_v25  ;;  %v611_v16 = vpop.f32.mrb[38].mxu0  ;;  %v964_v17 = vpop.f32.mrb[38].mxu1  ;;  %1473 = vmatprep.mubr.bf16.mxu0 %v1110_v8  ;;  %1730 = vmatprep.mubr.bf16.mxu1 %v1142_v9 }
 0x227   :  { %v612_v18 = vadd.f32 %v611_v16, %v9672_v24  ;;  %v965_v19 = vadd.f32 %v964_v17, %v9672_v24  ;;  %v613_v20 = vpop.f32.mrb[39].mxu0  ;;  %v966_v22 = vpop.f32.mrb[39].mxu1  ;;  %1474 = vmatmul.mubr.bf16.gmra.mrb[96].mxu0 %v1109_v4  ;;  %1731 = vmatmul.mubr.bf16.gmra.mrb[96].mxu1 %v1141_v5  ;;  %v712_v28 = vmax.f32 %v608_v10, 0.0  ;;  %v1065_v29 = vmax.f32 %v961_v11, 0.0 }
 0x228   :  { %v614_v26 = vadd.f32 %v613_v20, %v9675_v25  ;;  %v967_v27 = vadd.f32 %v966_v22, %v9675_v25  ;;  %v713_v32 = vmax.f32 %v610_v14, 0.0  ;;  %v1066_v33 = vmax.f32 %v963_v15, 0.0 }
 0x229   :  { %v714_v30 = vmax.f32 %v612_v18, 0.0  ;;  %v1067_v31 = vmax.f32 %v965_v19, 0.0 }
 0x22a   :  { %v715_v34 = vmax.f32 %v614_v26, 0.0  ;;  %v1068_v35 = vmax.f32 %v967_v27, 0.0 }
 0x22b   :  { %v1111_v36 = vpack.c.bf16 %v714_v30, %v712_v28  ;;  %v1143_v37 = vpack.c.bf16 %v1067_v31, %v1065_v29 }
 0x22c   :  { %v617_v38 = vpop.f32.mrb[40].mxu0  ;;  %v970_v39 = vpop.f32.mrb[40].mxu1  ;;  %v1112_v40 = vpack.c.bf16 %v715_v34, %v713_v32  ;;  %v1144_v41 = vpack.c.bf16 %v1068_v35, %v1066_v33 }
 0x22d   :  { %v618_v42 = vadd.f32 %v617_v38, %v9672_v24  ;;  %v971_v43 = vadd.f32 %v970_v39, %v9672_v24  ;;  %v619_v44 = vpop.f32.mrb[41].mxu0  ;;  %v972_v45 = vpop.f32.mrb[41].mxu1 }
 0x22e   :  { %v620_v46 = vadd.f32 %v619_v44, %v9675_v25  ;;  %v973_v47 = vadd.f32 %v972_v45, %v9675_v25  ;;  %v621_v48 = vpop.f32.mrb[42].mxu0  ;;  %v974_v49 = vpop.f32.mrb[42].mxu1  ;;  %1483 = vmatprep.mubr.bf16.mxu0 %v1112_v40  ;;  %1740 = vmatprep.mubr.bf16.mxu1 %v1144_v41 }
 0x22f   :  { %v622_v50 = vadd.f32 %v621_v48, %v9672_v24  ;;  %v975_v51 = vadd.f32 %v974_v49, %v9672_v24  ;;  %v623_v52 = vpop.f32.mrb[43].mxu0  ;;  %v976_v53 = vpop.f32.mrb[43].mxu1  ;;  %1484 = vmatmul.mubr.bf16.gmra.mrb[100].mxu0 %v1111_v36  ;;  %1741 = vmatmul.mubr.bf16.gmra.mrb[100].mxu1 %v1143_v37  ;;  %v716_v56 = vmax.f32 %v618_v42, 0.0  ;;  %v1069_v57 = vmax.f32 %v971_v43, 0.0 }
 0x230   :  { %v624_v54 = vadd.f32 %v623_v52, %v9675_v25  ;;  %v977_v55 = vadd.f32 %v976_v53, %v9675_v25  ;;  %v717_v60 = vmax.f32 %v620_v46, 0.0  ;;  %v1070_v61 = vmax.f32 %v973_v47, 0.0 }
 0x231   :  { %v718_v58 = vmax.f32 %v622_v50, 0.0  ;;  %v1071_v59 = vmax.f32 %v975_v51, 0.0  ;;  %v8749_v51 = vld [vmem:[#allocation7 + $0xf4] ss:$8 sps:$4 sm:$0xff]  }
 0x232   :  { %v719_v62 = vmax.f32 %v624_v54, 0.0  ;;  %v1072_v63 = vmax.f32 %v977_v55, 0.0  ;;  %v8747_v54 = vld [vmem:[#allocation7 + $0xf0] ss:$8 sps:$4 sm:$0xff]   ;;  %2173 = vmatprep.subr.bf16.mxu0 %v8749_v51  ;;  %2430 = vmatprep.subr.bf16.mxu1 %v8749_v51 }
 0x233   :  { %v1113_v1 = vpack.c.bf16 %v718_v58, %v716_v56  ;;  %v1145_v2 = vpack.c.bf16 %v1071_v59, %v1069_v57  ;;  %2174 = vmatpush1.bf16.msra.mxu0 %v8747_v54  ;;  %2431 = vmatpush1.bf16.msra.mxu1 %v8747_v54 }
 0x234   :  { %v627_v3 = vpop.f32.mrb[44].mxu0  ;;  %v980_v4 = vpop.f32.mrb[44].mxu1  ;;  %v1114_v5 = vpack.c.bf16 %v719_v62, %v717_v60  ;;  %v1146_v6 = vpack.c.bf16 %v1072_v63, %v1070_v61 }
 0x235   :  { %v628_v7 = vadd.f32 %v627_v3, %v9672_v24  ;;  %v981_v8 = vadd.f32 %v980_v4, %v9672_v24  ;;  %v629_v9 = vpop.f32.mrb[45].mxu0  ;;  %v982_v10 = vpop.f32.mrb[45].mxu1 }
 0x236   :  { %v630_v11 = vadd.f32 %v629_v9, %v9675_v25  ;;  %v983_v12 = vadd.f32 %v982_v10, %v9675_v25  ;;  %v631_v13 = vpop.f32.mrb[46].mxu0  ;;  %v984_v14 = vpop.f32.mrb[46].mxu1  ;;  %1493 = vmatprep.mubr.bf16.mxu0 %v1114_v5  ;;  %1750 = vmatprep.mubr.bf16.mxu1 %v1146_v6 }
 0x237   :  { %v632_v15 = vadd.f32 %v631_v13, %v9672_v24  ;;  %v985_v16 = vadd.f32 %v984_v14, %v9672_v24  ;;  %v633_v17 = vpop.f32.mrb[47].mxu0  ;;  %v986_v18 = vpop.f32.mrb[47].mxu1  ;;  %1494 = vmatmul.mubr.bf16.gmra.mrb[104].mxu0 %v1113_v1  ;;  %1751 = vmatmul.mubr.bf16.gmra.mrb[104].mxu1 %v1145_v2  ;;  %v720_v22 = vmax.f32 %v628_v7, 0.0  ;;  %v1073_v26 = vmax.f32 %v981_v8, 0.0 }
 0x238   :  { %v634_v19 = vadd.f32 %v633_v17, %v9675_v25  ;;  %v987_v20 = vadd.f32 %v986_v18, %v9675_v25  ;;  %v721_v29 = vmax.f32 %v630_v11, 0.0  ;;  %v1074_v30 = vmax.f32 %v983_v12, 0.0 }
 0x239   :  { %v722_v27 = vmax.f32 %v632_v15, 0.0  ;;  %v1075_v28 = vmax.f32 %v985_v16, 0.0 }
 0x23a   :  { %v723_v31 = vmax.f32 %v634_v19, 0.0  ;;  %v1076_v32 = vmax.f32 %v987_v20, 0.0 }
 0x23b   :  { %v1115_v33 = vpack.c.bf16 %v722_v27, %v720_v22  ;;  %v1147_v34 = vpack.c.bf16 %v1075_v28, %v1073_v26 }
 0x23c   :  { %v637_v35 = vpop.f32.mrb[48].mxu0  ;;  %v990_v36 = vpop.f32.mrb[48].mxu1  ;;  %v1116_v37 = vpack.c.bf16 %v723_v31, %v721_v29  ;;  %v1148_v38 = vpack.c.bf16 %v1076_v32, %v1074_v30 }
 0x23d   :  { %v638_v39 = vadd.f32 %v637_v35, %v9672_v24  ;;  %v991_v40 = vadd.f32 %v990_v36, %v9672_v24  ;;  %v639_v41 = vpop.f32.mrb[49].mxu0  ;;  %v992_v42 = vpop.f32.mrb[49].mxu1 }
 0x23e   :  { %v640_v43 = vadd.f32 %v639_v41, %v9675_v25  ;;  %v993_v44 = vadd.f32 %v992_v42, %v9675_v25  ;;  %v641_v45 = vpop.f32.mrb[50].mxu0  ;;  %v994_v46 = vpop.f32.mrb[50].mxu1  ;;  %1503 = vmatprep.mubr.bf16.mxu0 %v1116_v37  ;;  %1760 = vmatprep.mubr.bf16.mxu1 %v1148_v38 }
 0x23f   :  { %v642_v47 = vadd.f32 %v641_v45, %v9672_v24  ;;  %v995_v48 = vadd.f32 %v994_v46, %v9672_v24  ;;  %v643_v49 = vpop.f32.mrb[51].mxu0  ;;  %v996_v50 = vpop.f32.mrb[51].mxu1  ;;  %1504 = vmatmul.mubr.bf16.gmra.mrb[108].mxu0 %v1115_v33  ;;  %1761 = vmatmul.mubr.bf16.gmra.mrb[108].mxu1 %v1147_v34  ;;  %v724_v55 = vmax.f32 %v638_v39, 0.0  ;;  %v1077_v56 = vmax.f32 %v991_v40, 0.0 }
 0x240   :  { %v644_v52 = vadd.f32 %v643_v49, %v9675_v25  ;;  %v997_v53 = vadd.f32 %v996_v50, %v9675_v25  ;;  %v725_v59 = vmax.f32 %v640_v43, 0.0  ;;  %v1078_v60 = vmax.f32 %v993_v44, 0.0 }
 0x241   :  { %v726_v57 = vmax.f32 %v642_v47, 0.0  ;;  %v1079_v58 = vmax.f32 %v995_v48, 0.0 }
 0x242   :  { %v727_v61 = vmax.f32 %v644_v52, 0.0  ;;  %v1080_v62 = vmax.f32 %v997_v53, 0.0 }
 0x243   :  { %v1117_v63 = vpack.c.bf16 %v726_v57, %v724_v55  ;;  %v1149_v1 = vpack.c.bf16 %v1079_v58, %v1077_v56 }
 0x244   :  { %v647_v2 = vpop.f32.mrb[52].mxu0  ;;  %v1000_v3 = vpop.f32.mrb[52].mxu1  ;;  %v1118_v4 = vpack.c.bf16 %v727_v61, %v725_v59  ;;  %v1150_v5 = vpack.c.bf16 %v1080_v62, %v1078_v60 }
 0x245   :  { %v648_v6 = vadd.f32 %v647_v2, %v9672_v24  ;;  %v1001_v7 = vadd.f32 %v1000_v3, %v9672_v24  ;;  %v649_v8 = vpop.f32.mrb[53].mxu0  ;;  %v1002_v9 = vpop.f32.mrb[53].mxu1 }
 0x246   :  { %v650_v10 = vadd.f32 %v649_v8, %v9675_v25  ;;  %v1003_v11 = vadd.f32 %v1002_v9, %v9675_v25  ;;  %v651_v12 = vpop.f32.mrb[54].mxu0  ;;  %v1004_v13 = vpop.f32.mrb[54].mxu1  ;;  %1513 = vmatprep.mubr.bf16.mxu0 %v1118_v4  ;;  %1770 = vmatprep.mubr.bf16.mxu1 %v1150_v5 }
 0x247   :  { %v652_v14 = vadd.f32 %v651_v12, %v9672_v24  ;;  %v1005_v15 = vadd.f32 %v1004_v13, %v9672_v24  ;;  %v653_v16 = vpop.f32.mrb[55].mxu0  ;;  %v1006_v17 = vpop.f32.mrb[55].mxu1  ;;  %1514 = vmatmul.mubr.bf16.gmra.mrb[112].mxu0 %v1117_v63  ;;  %1771 = vmatmul.mubr.bf16.gmra.mrb[112].mxu1 %v1149_v1  ;;  %v728_v20 = vmax.f32 %v648_v6, 0.0  ;;  %v1081_v22 = vmax.f32 %v1001_v7, 0.0 }
 0x248   :  { %v654_v18 = vadd.f32 %v653_v16, %v9675_v25  ;;  %v1007_v19 = vadd.f32 %v1006_v17, %v9675_v25  ;;  %v729_v28 = vmax.f32 %v650_v10, 0.0  ;;  %v1082_v29 = vmax.f32 %v1003_v11, 0.0 }
 0x249   :  { %v730_v26 = vmax.f32 %v652_v14, 0.0  ;;  %v1083_v27 = vmax.f32 %v1005_v15, 0.0 }
 0x24a   :  { %v731_v30 = vmax.f32 %v654_v18, 0.0  ;;  %v1084_v31 = vmax.f32 %v1007_v19, 0.0 }
 0x24b   :  { %v1119_v32 = vpack.c.bf16 %v730_v26, %v728_v20  ;;  %v1151_v33 = vpack.c.bf16 %v1083_v27, %v1081_v22 }
 0x24c   :  { %v657_v34 = vpop.f32.mrb[56].mxu0  ;;  %v1010_v35 = vpop.f32.mrb[56].mxu1  ;;  %v1120_v36 = vpack.c.bf16 %v731_v30, %v729_v28  ;;  %v1152_v37 = vpack.c.bf16 %v1084_v31, %v1082_v29 }
 0x24d   :  { %v658_v38 = vadd.f32 %v657_v34, %v9672_v24  ;;  %v1011_v39 = vadd.f32 %v1010_v35, %v9672_v24  ;;  %v659_v40 = vpop.f32.mrb[57].mxu0  ;;  %v1012_v41 = vpop.f32.mrb[57].mxu1 }
 0x24e   :  { %v660_v42 = vadd.f32 %v659_v40, %v9675_v25  ;;  %v1013_v43 = vadd.f32 %v1012_v41, %v9675_v25  ;;  %v661_v44 = vpop.f32.mrb[58].mxu0  ;;  %v1014_v45 = vpop.f32.mrb[58].mxu1  ;;  %1523 = vmatprep.mubr.bf16.mxu0 %v1120_v36  ;;  %1780 = vmatprep.mubr.bf16.mxu1 %v1152_v37 }
 0x24f   :  { %v662_v46 = vadd.f32 %v661_v44, %v9672_v24  ;;  %v1015_v47 = vadd.f32 %v1014_v45, %v9672_v24  ;;  %v663_v48 = vpop.f32.mrb[59].mxu0  ;;  %v1016_v49 = vpop.f32.mrb[59].mxu1  ;;  %1524 = vmatmul.mubr.bf16.gmra.mrb[116].mxu0 %v1119_v32  ;;  %1781 = vmatmul.mubr.bf16.gmra.mrb[116].mxu1 %v1151_v33  ;;  %v732_v52 = vmax.f32 %v658_v38, 0.0  ;;  %v1085_v53 = vmax.f32 %v1011_v39, 0.0  ;;  %v8752_v32 = vld [vmem:[#allocation9 + $0x4] ss:$8 sps:$4 sm:$0xff]  }
 0x250   :  { %v664_v50 = vadd.f32 %v663_v48, %v9675_v25  ;;  %v1017_v51 = vadd.f32 %v1016_v49, %v9675_v25  ;;  %v733_v56 = vmax.f32 %v660_v42, 0.0  ;;  %v1086_v57 = vmax.f32 %v1013_v43, 0.0  ;;  %2925 = vmatprep.subr.bf16.mxu0 %v8752_v32  ;;  %3182 = vmatprep.subr.bf16.mxu1 %v8752_v32 }
 0x251   :  { %v734_v54 = vmax.f32 %v662_v46, 0.0  ;;  %v1087_v55 = vmax.f32 %v1015_v47, 0.0 }
 0x252   :  { %v735_v58 = vmax.f32 %v664_v50, 0.0  ;;  %v1088_v59 = vmax.f32 %v1017_v51, 0.0 }
 0x253   :  { %v1121_v60 = vpack.c.bf16 %v734_v54, %v732_v52  ;;  %v1153_v61 = vpack.c.bf16 %v1087_v55, %v1085_v53 }
 0x254   :  { %v667_v62 = vpop.f32.mrb[60].mxu0  ;;  %v1020_v63 = vpop.f32.mrb[60].mxu1  ;;  %v1122_v1 = vpack.c.bf16 %v735_v58, %v733_v56  ;;  %v1154_v2 = vpack.c.bf16 %v1088_v59, %v1086_v57 }
 0x255   :  { %v668_v3 = vadd.f32 %v667_v62, %v9672_v24  ;;  %v1021_v4 = vadd.f32 %v1020_v63, %v9672_v24  ;;  %v669_v5 = vpop.f32.mrb[61].mxu0  ;;  %v1022_v6 = vpop.f32.mrb[61].mxu1 }
 0x256   :  { %v670_v7 = vadd.f32 %v669_v5, %v9675_v25  ;;  %v1023_v8 = vadd.f32 %v1022_v6, %v9675_v25  ;;  %v671_v9 = vpop.f32.mrb[62].mxu0  ;;  %v1024_v10 = vpop.f32.mrb[62].mxu1  ;;  %1533 = vmatprep.mubr.bf16.mxu0 %v1122_v1  ;;  %1790 = vmatprep.mubr.bf16.mxu1 %v1154_v2  ;;  %v8750_v2 = vld [vmem:[#allocation9] ss:$8 sps:$4 sm:$0xff]  }
 0x257   :  { %v672_v11 = vadd.f32 %v671_v9, %v9672_v24  ;;  %v1025_v12 = vadd.f32 %v1024_v10, %v9672_v24  ;;  %v673_v13 = vpop.f32.mrb[63].mxu0  ;;  %v1026_v14 = vpop.f32.mrb[63].mxu1  ;;  %1534 = vmatmul.mubr.bf16.gmra.mrb[120].mxu0 %v1121_v60  ;;  %1791 = vmatmul.mubr.bf16.gmra.mrb[120].mxu1 %v1153_v61  ;;  %v736_v17 = vmax.f32 %v668_v3, 0.0  ;;  %v1089_v18 = vmax.f32 %v1021_v4, 0.0 }
 0x258   :  { %v674_v15 = vadd.f32 %v673_v13, %v9675_v25  ;;  %v1027_v16 = vadd.f32 %v1026_v14, %v9675_v25  ;;  %v737_v22 = vmax.f32 %v670_v7, 0.0  ;;  %v1090_v26 = vmax.f32 %v1023_v8, 0.0  ;;  %v1189_v25 = vld [vmem:[%s11299_s10] sm:$0x3]  ;;  %v8755_v7 = vld [vmem:[#allocation9 + $0x14] ss:$8 sps:$4 sm:$0xff]  }
 0x259   :  { %v738_v19 = vmax.f32 %v672_v11, 0.0  ;;  %v1091_v20 = vmax.f32 %v1025_v12, 0.0  ;;  %v9809_v33 = vrot.slane %v1189_v25, %v9664_v21  ;;  %v9812_v34 = vrot.slane %v1189_v25, %v9669_v23 }
 0x25a   :  { %v739_v27 = vmax.f32 %v674_v15, 0.0  ;;  %v1092_v28 = vmax.f32 %v1027_v16, 0.0 }
 0x25b   :  { %v1123_v29 = vpack.c.bf16 %v738_v19, %v736_v17  ;;  %v1155_v30 = vpack.c.bf16 %v1091_v20, %v1089_v18  ;;  %v8753_v18 = vld [vmem:[#allocation9 + $0x10] ss:$8 sps:$4 sm:$0xff]  }
 0x25c   :  { %v1124_v31 = vpack.c.bf16 %v739_v27, %v737_v22  ;;  %v1156_v24 = vpack.c.bf16 %v1092_v28, %v1090_v26  ;;  %v8758_v27 = vld [vmem:[#allocation9 + $0x24] ss:$8 sps:$4 sm:$0xff]  }
 0x25e   :  { %1543 = vmatprep.mubr.bf16.mxu0 %v1124_v31  ;;  %1800 = vmatprep.mubr.bf16.mxu1 %v1156_v24 }
 0x25f   :  { %1544 = vmatmul.mubr.bf16.gmra.mrb[124].mxu0 %v1123_v29  ;;  %1801 = vmatmul.mubr.bf16.gmra.mrb[124].mxu1 %v1155_v30 }
 0x2ba   :  { %v1395_v35 = vpop.f32.mrb[64].mxu0  ;;  %v1652_v36 = vpop.f32.mrb[64].mxu1 }
 0x2bb   :  { %v1396_v37 = vadd.f32 %v1395_v35, %v9809_v33  ;;  %v1653_v38 = vadd.f32 %v1652_v36, %v9809_v33  ;;  %v1397_v39 = vpop.f32.mrb[65].mxu0  ;;  %v1654_v40 = vpop.f32.mrb[65].mxu1 }
 0x2bc   :  { %v1398_v41 = vadd.f32 %v1397_v39, %v9812_v34  ;;  %v1655_v42 = vadd.f32 %v1654_v40, %v9812_v34  ;;  %v1399_v43 = vpop.f32.mrb[66].mxu0  ;;  %v1656_v44 = vpop.f32.mrb[66].mxu1 }
 0x2bd   :  { %v1400_v45 = vadd.f32 %v1399_v43, %v9809_v33  ;;  %v1657_v46 = vadd.f32 %v1656_v44, %v9809_v33  ;;  %v1401_v47 = vpop.f32.mrb[67].mxu0  ;;  %v1658_v48 = vpop.f32.mrb[67].mxu1  ;;  %v1554_v51 = vmax.f32 %v1396_v37, 0.0  ;;  %v1811_v52 = vmax.f32 %v1653_v38, 0.0  ;;  %v8756_v38 = vld [vmem:[#allocation9 + $0x20] ss:$8 sps:$4 sm:$0xff]  }
 0x2be   :  { %v1402_v49 = vadd.f32 %v1401_v47, %v9812_v34  ;;  %v1659_v50 = vadd.f32 %v1658_v48, %v9812_v34  ;;  %v1555_v55 = vmax.f32 %v1398_v41, 0.0  ;;  %v1812_v57 = vmax.f32 %v1655_v42, 0.0  ;;  %v8761_v43 = vld [vmem:[#allocation9 + $0x34] ss:$8 sps:$4 sm:$0xff]  }
 0x2bf   :  { %v1556_v53 = vmax.f32 %v1400_v45, 0.0  ;;  %v1813_v54 = vmax.f32 %v1657_v46, 0.0 }
 0x2c0   :  { %v1557_v56 = vmax.f32 %v1402_v49, 0.0  ;;  %v1814_v58 = vmax.f32 %v1659_v50, 0.0 }
 0x2c1   :  { %v1875_v59 = vpack.c.bf16 %v1556_v53, %v1554_v51  ;;  %v1907_v60 = vpack.c.bf16 %v1813_v54, %v1811_v52  ;;  %v8759_v54 = vld [vmem:[#allocation9 + $0x30] ss:$8 sps:$4 sm:$0xff]  }
 0x2c2   :  { %v1405_v61 = vpop.f32.mrb[68].mxu0  ;;  %v1662_v62 = vpop.f32.mrb[68].mxu1  ;;  %v1876_v63 = vpack.c.bf16 %v1557_v56, %v1555_v55  ;;  %v1908_v1 = vpack.c.bf16 %v1814_v58, %v1812_v57 }
 0x2c3   :  { %v1406_v3 = vadd.f32 %v1405_v61, %v9809_v33  ;;  %v1663_v4 = vadd.f32 %v1662_v62, %v9809_v33  ;;  %v1407_v5 = vpop.f32.mrb[69].mxu0  ;;  %v1664_v6 = vpop.f32.mrb[69].mxu1 }
 0x2c4   :  { %v1408_v8 = vadd.f32 %v1407_v5, %v9812_v34  ;;  %v1665_v9 = vadd.f32 %v1664_v6, %v9812_v34  ;;  %v1409_v10 = vpop.f32.mrb[70].mxu0  ;;  %v1666_v11 = vpop.f32.mrb[70].mxu1  ;;  %2175 = vmatprep.mubr.bf16.mxu0 %v1876_v63  ;;  %2432 = vmatprep.mubr.bf16.mxu1 %v1908_v1 }
 0x2c5   :  { %v1410_v12 = vadd.f32 %v1409_v10, %v9809_v33  ;;  %v1667_v13 = vadd.f32 %v1666_v11, %v9809_v33  ;;  %v1411_v14 = vpop.f32.mrb[71].mxu0  ;;  %v1668_v15 = vpop.f32.mrb[71].mxu1  ;;  %2176 = vmatmul.mubr.bf16.vlgmr.msra.gmra.mrb[128].mxu0 %v1875_v59  ;;  %2433 = vmatmul.mubr.bf16.vlgmr.msra.gmra.mrb[128].mxu1 %v1907_v60  ;;  %v1558_v19 = vmax.f32 %v1406_v3, 0.0  ;;  %v1815_v22 = vmax.f32 %v1663_v4, 0.0  ;;  %v8764_v59 = vld [vmem:[#allocation9 + $0x44] ss:$8 sps:$4 sm:$0xff]  }
 0x2c6   :  { %v1412_v16 = vadd.f32 %v1411_v14, %v9812_v34  ;;  %v1669_v17 = vadd.f32 %v1668_v15, %v9812_v34  ;;  %2926 = vmatpush1.bf16.msra.mxu0 %v8750_v2  ;;  %3183 = vmatpush1.bf16.msra.mxu1 %v8750_v2  ;;  %v1559_v28 = vmax.f32 %v1408_v8, 0.0  ;;  %v1816_v30 = vmax.f32 %v1665_v9, 0.0 }
 0x2c7   :  { %v1560_v20 = vmax.f32 %v1410_v12, 0.0  ;;  %v1817_v26 = vmax.f32 %v1667_v13, 0.0  ;;  %2927 = vmatprep.subr.bf16.mxu0 %v8755_v7  ;;  %3184 = vmatprep.subr.bf16.mxu1 %v8755_v7  ;;  %v8762_v7 = vld [vmem:[#allocation9 + $0x40] ss:$8 sps:$4 sm:$0xff]   ;;  %v8767_v12 = vld [vmem:[#allocation9 + $0x54] ss:$8 sps:$4 sm:$0xff]  }
 0x2c8   :  { %v1561_v29 = vmax.f32 %v1412_v16, 0.0  ;;  %v1818_v31 = vmax.f32 %v1669_v17, 0.0 }
 0x2c9   :  { %v1877_v24 = vpack.c.bf16 %v1560_v20, %v1558_v19  ;;  %v1909_v32 = vpack.c.bf16 %v1817_v26, %v1815_v22 }
 0x2ca   :  { %v1415_v25 = vpop.f32.mrb[72].mxu0  ;;  %v1672_v35 = vpop.f32.mrb[72].mxu1  ;;  %v1878_v36 = vpack.c.bf16 %v1561_v29, %v1559_v28  ;;  %v1910_v37 = vpack.c.bf16 %v1818_v31, %v1816_v30  ;;  %2928 = vmatpush1.bf16.msra.mxu0 %v8753_v18  ;;  %3185 = vmatpush1.bf16.msra.mxu1 %v8753_v18 }
 0x2cb   :  { %v1416_v39 = vadd.f32 %v1415_v25, %v9809_v33  ;;  %v1673_v40 = vadd.f32 %v1672_v35, %v9809_v33  ;;  %v1417_v41 = vpop.f32.mrb[73].mxu0  ;;  %v1674_v42 = vpop.f32.mrb[73].mxu1  ;;  %2929 = vmatprep.subr.bf16.mxu0 %v8758_v27  ;;  %3186 = vmatprep.subr.bf16.mxu1 %v8758_v27  ;;  %v8765_v27 = vld [vmem:[#allocation9 + $0x50] ss:$8 sps:$4 sm:$0xff]  }
 0x2cc   :  { %v1418_v44 = vadd.f32 %v1417_v41, %v9812_v34  ;;  %v1675_v45 = vadd.f32 %v1674_v42, %v9812_v34  ;;  %v1419_v46 = vpop.f32.mrb[74].mxu0  ;;  %v1676_v47 = vpop.f32.mrb[74].mxu1  ;;  %2185 = vmatprep.mubr.bf16.mxu0 %v1878_v36  ;;  %2442 = vmatprep.mubr.bf16.mxu1 %v1910_v37 }
 0x2cd   :  { %v1420_v48 = vadd.f32 %v1419_v46, %v9809_v33  ;;  %v1677_v49 = vadd.f32 %v1676_v47, %v9809_v33  ;;  %v1421_v50 = vpop.f32.mrb[75].mxu0  ;;  %v1678_v51 = vpop.f32.mrb[75].mxu1  ;;  %2186 = vmatmul.mubr.bf16.gmra.mrb[132].mxu0 %v1877_v24  ;;  %2443 = vmatmul.mubr.bf16.gmra.mrb[132].mxu1 %v1909_v32  ;;  %v1562_v55 = vmax.f32 %v1416_v39, 0.0  ;;  %v1819_v57 = vmax.f32 %v1673_v40, 0.0  ;;  %v8770_v24 = vld [vmem:[#allocation9 + $0x64] ss:$8 sps:$4 sm:$0xff]  }
 0x2ce   :  { %v1422_v52 = vadd.f32 %v1421_v50, %v9812_v34  ;;  %v1679_v53 = vadd.f32 %v1678_v51, %v9812_v34  ;;  %2930 = vmatpush1.bf16.msra.mxu0 %v8756_v38  ;;  %3187 = vmatpush1.bf16.msra.mxu1 %v8756_v38  ;;  %v1563_v60 = vmax.f32 %v1418_v44, 0.0  ;;  %v1820_v62 = vmax.f32 %v1675_v45, 0.0 }
 0x2cf   :  { %v1564_v56 = vmax.f32 %v1420_v48, 0.0  ;;  %v1821_v58 = vmax.f32 %v1677_v49, 0.0  ;;  %2931 = vmatprep.subr.bf16.mxu0 %v8761_v43  ;;  %3188 = vmatprep.subr.bf16.mxu1 %v8761_v43  ;;  %v8768_v43 = vld [vmem:[#allocation9 + $0x60] ss:$8 sps:$4 sm:$0xff]   ;;  %v8773_v48 = vld [vmem:[#allocation9 + $0x74] ss:$8 sps:$4 sm:$0xff]  }
 0x2d0   :  { %v1565_v61 = vmax.f32 %v1422_v52, 0.0  ;;  %v1822_v63 = vmax.f32 %v1679_v53, 0.0 }
 0x2d1   :  { %v1879_v1 = vpack.c.bf16 %v1564_v56, %v1562_v55  ;;  %v1911_v2 = vpack.c.bf16 %v1821_v58, %v1819_v57 }
 0x2d2   :  { %v1425_v3 = vpop.f32.mrb[76].mxu0  ;;  %v1682_v4 = vpop.f32.mrb[76].mxu1  ;;  %v1880_v5 = vpack.c.bf16 %v1565_v61, %v1563_v60  ;;  %v1912_v6 = vpack.c.bf16 %v1822_v63, %v1820_v62  ;;  %2932 = vmatpush1.bf16.msra.mxu0 %v8759_v54  ;;  %3189 = vmatpush1.bf16.msra.mxu1 %v8759_v54 }
 0x2d3   :  { %v1426_v8 = vadd.f32 %v1425_v3, %v9809_v33  ;;  %v1683_v9 = vadd.f32 %v1682_v4, %v9809_v33  ;;  %v1427_v10 = vpop.f32.mrb[77].mxu0  ;;  %v1684_v11 = vpop.f32.mrb[77].mxu1  ;;  %2933 = vmatprep.subr.bf16.mxu0 %v8764_v59  ;;  %3190 = vmatprep.subr.bf16.mxu1 %v8764_v59  ;;  %v8771_v59 = vld [vmem:[#allocation9 + $0x70] ss:$8 sps:$4 sm:$0xff]  }
 0x2d4   :  { %v1428_v13 = vadd.f32 %v1427_v10, %v9812_v34  ;;  %v1685_v14 = vadd.f32 %v1684_v11, %v9812_v34  ;;  %v1429_v15 = vpop.f32.mrb[78].mxu0  ;;  %v1686_v16 = vpop.f32.mrb[78].mxu1  ;;  %2195 = vmatprep.mubr.bf16.mxu0 %v1880_v5  ;;  %2452 = vmatprep.mubr.bf16.mxu1 %v1912_v6 }
 0x2d5   :  { %v1430_v17 = vadd.f32 %v1429_v15, %v9809_v33  ;;  %v1687_v18 = vadd.f32 %v1686_v16, %v9809_v33  ;;  %v1431_v19 = vpop.f32.mrb[79].mxu0  ;;  %v1688_v20 = vpop.f32.mrb[79].mxu1  ;;  %2196 = vmatmul.mubr.bf16.gmra.mrb[136].mxu0 %v1879_v1  ;;  %2453 = vmatmul.mubr.bf16.gmra.mrb[136].mxu1 %v1911_v2  ;;  %v1566_v28 = vmax.f32 %v1426_v8, 0.0  ;;  %v1823_v30 = vmax.f32 %v1683_v9, 0.0  ;;  %v8776_v1 = vld [vmem:[#allocation9 + $0x84] ss:$8 sps:$4 sm:$0xff]  }
 0x2d6   :  { %v1432_v22 = vadd.f32 %v1431_v19, %v9812_v34  ;;  %v1689_v26 = vadd.f32 %v1688_v20, %v9812_v34  ;;  %2934 = vmatpush1.bf16.msra.mxu0 %v8762_v7  ;;  %3191 = vmatpush1.bf16.msra.mxu1 %v8762_v7  ;;  %v1567_v32 = vmax.f32 %v1428_v13, 0.0  ;;  %v1824_v35 = vmax.f32 %v1685_v14, 0.0 }
 0x2d7   :  { %v1568_v29 = vmax.f32 %v1430_v17, 0.0  ;;  %v1825_v31 = vmax.f32 %v1687_v18, 0.0  ;;  %2935 = vmatprep.subr.bf16.mxu0 %v8767_v12  ;;  %3192 = vmatprep.subr.bf16.mxu1 %v8767_v12  ;;  %v8774_v12 = vld [vmem:[#allocation9 + $0x80] ss:$8 sps:$4 sm:$0xff]   ;;  %v8779_v17 = vld [vmem:[#allocation9 + $0x94] ss:$8 sps:$4 sm:$0xff]  }
 0x2d8   :  { %v1569_v25 = vmax.f32 %v1432_v22, 0.0  ;;  %v1826_v36 = vmax.f32 %v1689_v26, 0.0 }
 0x2d9   :  { %v1881_v37 = vpack.c.bf16 %v1568_v29, %v1566_v28  ;;  %v1913_v38 = vpack.c.bf16 %v1825_v31, %v1823_v30 }
 0x2da   :  { %v1435_v39 = vpop.f32.mrb[80].mxu0  ;;  %v1692_v40 = vpop.f32.mrb[80].mxu1  ;;  %v1882_v41 = vpack.c.bf16 %v1569_v25, %v1567_v32  ;;  %v1914_v42 = vpack.c.bf16 %v1826_v36, %v1824_v35  ;;  %2936 = vmatpush1.bf16.msra.mxu0 %v8765_v27  ;;  %3193 = vmatpush1.bf16.msra.mxu1 %v8765_v27 }
 0x2db   :  { %v1436_v44 = vadd.f32 %v1435_v39, %v9809_v33  ;;  %v1693_v45 = vadd.f32 %v1692_v40, %v9809_v33  ;;  %v1437_v46 = vpop.f32.mrb[81].mxu0  ;;  %v1694_v47 = vpop.f32.mrb[81].mxu1  ;;  %2937 = vmatprep.subr.bf16.mxu0 %v8770_v24  ;;  %3194 = vmatprep.subr.bf16.mxu1 %v8770_v24  ;;  %v8777_v24 = vld [vmem:[#allocation9 + $0x90] ss:$8 sps:$4 sm:$0xff]  }
 0x2dc   :  { %v1438_v49 = vadd.f32 %v1437_v46, %v9812_v34  ;;  %v1695_v50 = vadd.f32 %v1694_v47, %v9812_v34  ;;  %v1439_v51 = vpop.f32.mrb[82].mxu0  ;;  %v1696_v52 = vpop.f32.mrb[82].mxu1  ;;  %2205 = vmatprep.mubr.bf16.mxu0 %v1882_v41  ;;  %2462 = vmatprep.mubr.bf16.mxu1 %v1914_v42 }
 0x2dd   :  { %v1440_v53 = vadd.f32 %v1439_v51, %v9809_v33  ;;  %v1697_v54 = vadd.f32 %v1696_v52, %v9809_v33  ;;  %v1441_v55 = vpop.f32.mrb[83].mxu0  ;;  %v1698_v56 = vpop.f32.mrb[83].mxu1  ;;  %2206 = vmatmul.mubr.bf16.gmra.mrb[140].mxu0 %v1881_v37  ;;  %2463 = vmatmul.mubr.bf16.gmra.mrb[140].mxu1 %v1913_v38  ;;  %v1570_v60 = vmax.f32 %v1436_v44, 0.0  ;;  %v1827_v62 = vmax.f32 %v1693_v45, 0.0  ;;  %v8782_v37 = vld [vmem:[#allocation9 + $0xa4] ss:$8 sps:$4 sm:$0xff]  }
 0x2de   :  { %v1442_v57 = vadd.f32 %v1441_v55, %v9812_v34  ;;  %v1699_v58 = vadd.f32 %v1698_v56, %v9812_v34  ;;  %2938 = vmatpush1.bf16.msra.mxu0 %v8768_v43  ;;  %3195 = vmatpush1.bf16.msra.mxu1 %v8768_v43  ;;  %v1571_v2 = vmax.f32 %v1438_v49, 0.0  ;;  %v1828_v4 = vmax.f32 %v1695_v50, 0.0 }
 0x2df   :  { %v1572_v61 = vmax.f32 %v1440_v53, 0.0  ;;  %v1829_v63 = vmax.f32 %v1697_v54, 0.0  ;;  %2939 = vmatprep.subr.bf16.mxu0 %v8773_v48  ;;  %3196 = vmatprep.subr.bf16.mxu1 %v8773_v48  ;;  %v8780_v48 = vld [vmem:[#allocation9 + $0xa0] ss:$8 sps:$4 sm:$0xff]   ;;  %v8785_v53 = vld [vmem:[#allocation9 + $0xb4] ss:$8 sps:$4 sm:$0xff]  }
 0x2e0   :  { %v1573_v3 = vmax.f32 %v1442_v57, 0.0  ;;  %v1830_v5 = vmax.f32 %v1699_v58, 0.0 }
 0x2e1   :  { %v1883_v6 = vpack.c.bf16 %v1572_v61, %v1570_v60  ;;  %v1915_v7 = vpack.c.bf16 %v1829_v63, %v1827_v62 }
 0x2e2   :  { %v1445_v8 = vpop.f32.mrb[84].mxu0  ;;  %v1702_v9 = vpop.f32.mrb[84].mxu1  ;;  %v1884_v10 = vpack.c.bf16 %v1573_v3, %v1571_v2  ;;  %v1916_v11 = vpack.c.bf16 %v1830_v5, %v1828_v4  ;;  %2940 = vmatpush1.bf16.msra.mxu0 %v8771_v59  ;;  %3197 = vmatpush1.bf16.msra.mxu1 %v8771_v59 }
 0x2e3   :  { %v1446_v13 = vadd.f32 %v1445_v8, %v9809_v33  ;;  %v1703_v14 = vadd.f32 %v1702_v9, %v9809_v33  ;;  %v1447_v15 = vpop.f32.mrb[85].mxu0  ;;  %v1704_v16 = vpop.f32.mrb[85].mxu1  ;;  %2941 = vmatprep.subr.bf16.mxu0 %v8776_v1  ;;  %3198 = vmatprep.subr.bf16.mxu1 %v8776_v1  ;;  %v8783_v1 = vld [vmem:[#allocation9 + $0xb0] ss:$8 sps:$4 sm:$0xff]  }
 0x2e4   :  { %v1448_v18 = vadd.f32 %v1447_v15, %v9812_v34  ;;  %v1705_v19 = vadd.f32 %v1704_v16, %v9812_v34  ;;  %v1449_v20 = vpop.f32.mrb[86].mxu0  ;;  %v1706_v22 = vpop.f32.mrb[86].mxu1  ;;  %2215 = vmatprep.mubr.bf16.mxu0 %v1884_v10  ;;  %2472 = vmatprep.mubr.bf16.mxu1 %v1916_v11 }
 0x2e5   :  { %v1450_v26 = vadd.f32 %v1449_v20, %v9809_v33  ;;  %v1707_v27 = vadd.f32 %v1706_v22, %v9809_v33  ;;  %v1451_v28 = vpop.f32.mrb[87].mxu0  ;;  %v1708_v29 = vpop.f32.mrb[87].mxu1  ;;  %2216 = vmatmul.mubr.bf16.gmra.mrb[144].mxu0 %v1883_v6  ;;  %2473 = vmatmul.mubr.bf16.gmra.mrb[144].mxu1 %v1915_v7  ;;  %v1574_v32 = vmax.f32 %v1446_v13, 0.0  ;;  %v1831_v35 = vmax.f32 %v1703_v14, 0.0  ;;  %v8788_v6 = vld [vmem:[#allocation9 + $0xc4] ss:$8 sps:$4 sm:$0xff]  }
 0x2e6   :  { %v1452_v30 = vadd.f32 %v1451_v28, %v9812_v34  ;;  %v1709_v31 = vadd.f32 %v1708_v29, %v9812_v34  ;;  %2942 = vmatpush1.bf16.msra.mxu0 %v8774_v12  ;;  %3199 = vmatpush1.bf16.msra.mxu1 %v8774_v12  ;;  %v1575_v38 = vmax.f32 %v1448_v18, 0.0  ;;  %v1832_v40 = vmax.f32 %v1705_v19, 0.0 }
 0x2e7   :  { %v1576_v25 = vmax.f32 %v1450_v26, 0.0  ;;  %v1833_v36 = vmax.f32 %v1707_v27, 0.0  ;;  %2943 = vmatprep.subr.bf16.mxu0 %v8779_v17  ;;  %3200 = vmatprep.subr.bf16.mxu1 %v8779_v17  ;;  %v8786_v17 = vld [vmem:[#allocation9 + $0xc0] ss:$8 sps:$4 sm:$0xff]   ;;  %v8791_v26 = vld [vmem:[#allocation9 + $0xd4] ss:$8 sps:$4 sm:$0xff]  }
 0x2e8   :  { %v1577_v39 = vmax.f32 %v1452_v30, 0.0  ;;  %v1834_v41 = vmax.f32 %v1709_v31, 0.0 }
 0x2e9   :  { %v1885_v42 = vpack.c.bf16 %v1576_v25, %v1574_v32  ;;  %v1917_v43 = vpack.c.bf16 %v1833_v36, %v1831_v35 }
 0x2ea   :  { %v1455_v44 = vpop.f32.mrb[88].mxu0  ;;  %v1712_v45 = vpop.f32.mrb[88].mxu1  ;;  %v1886_v46 = vpack.c.bf16 %v1577_v39, %v1575_v38  ;;  %v1918_v47 = vpack.c.bf16 %v1834_v41, %v1832_v40  ;;  %2944 = vmatpush1.bf16.msra.mxu0 %v8777_v24  ;;  %3201 = vmatpush1.bf16.msra.mxu1 %v8777_v24 }
 0x2eb   :  { %v1456_v49 = vadd.f32 %v1455_v44, %v9809_v33  ;;  %v1713_v50 = vadd.f32 %v1712_v45, %v9809_v33  ;;  %v1457_v51 = vpop.f32.mrb[89].mxu0  ;;  %v1714_v52 = vpop.f32.mrb[89].mxu1  ;;  %2945 = vmatprep.subr.bf16.mxu0 %v8782_v37  ;;  %3202 = vmatprep.subr.bf16.mxu1 %v8782_v37  ;;  %v8789_v37 = vld [vmem:[#allocation9 + $0xd0] ss:$8 sps:$4 sm:$0xff]  }
 0x2ec   :  { %v1458_v54 = vadd.f32 %v1457_v51, %v9812_v34  ;;  %v1715_v55 = vadd.f32 %v1714_v52, %v9812_v34  ;;  %v1459_v56 = vpop.f32.mrb[90].mxu0  ;;  %v1716_v57 = vpop.f32.mrb[90].mxu1  ;;  %2225 = vmatprep.mubr.bf16.mxu0 %v1886_v46  ;;  %2482 = vmatprep.mubr.bf16.mxu1 %v1918_v47 }
 0x2ed   :  { %v1460_v58 = vadd.f32 %v1459_v56, %v9809_v33  ;;  %v1717_v59 = vadd.f32 %v1716_v57, %v9809_v33  ;;  %v1461_v60 = vpop.f32.mrb[91].mxu0  ;;  %v1718_v61 = vpop.f32.mrb[91].mxu1  ;;  %2226 = vmatmul.mubr.bf16.gmra.mrb[148].mxu0 %v1885_v42  ;;  %2483 = vmatmul.mubr.bf16.gmra.mrb[148].mxu1 %v1917_v43  ;;  %v1578_v2 = vmax.f32 %v1456_v49, 0.0  ;;  %v1835_v4 = vmax.f32 %v1713_v50, 0.0  ;;  %v8794_v42 = vld [vmem:[#allocation9 + $0xe4] ss:$8 sps:$4 sm:$0xff]  }
 0x2ee   :  { %v1462_v62 = vadd.f32 %v1461_v60, %v9812_v34  ;;  %v1719_v63 = vadd.f32 %v1718_v61, %v9812_v34  ;;  %2946 = vmatpush1.bf16.msra.mxu0 %v8780_v48  ;;  %3203 = vmatpush1.bf16.msra.mxu1 %v8780_v48  ;;  %v1579_v7 = vmax.f32 %v1458_v54, 0.0  ;;  %v1836_v9 = vmax.f32 %v1715_v55, 0.0 }
 0x2ef   :  { %v1580_v3 = vmax.f32 %v1460_v58, 0.0  ;;  %v1837_v5 = vmax.f32 %v1717_v59, 0.0  ;;  %2947 = vmatprep.subr.bf16.mxu0 %v8785_v53  ;;  %3204 = vmatprep.subr.bf16.mxu1 %v8785_v53  ;;  %v8792_v53 = vld [vmem:[#allocation9 + $0xe0] ss:$8 sps:$4 sm:$0xff]  }
 0x2f0   :  { %v1581_v8 = vmax.f32 %v1462_v62, 0.0  ;;  %v1838_v10 = vmax.f32 %v1719_v63, 0.0 }
 0x2f1   :  { %v1887_v11 = vpack.c.bf16 %v1580_v3, %v1578_v2  ;;  %v1919_v12 = vpack.c.bf16 %v1837_v5, %v1835_v4 }
 0x2f2   :  { %v1465_v13 = vpop.f32.mrb[92].mxu0  ;;  %v1722_v14 = vpop.f32.mrb[92].mxu1  ;;  %v1888_v15 = vpack.c.bf16 %v1581_v8, %v1579_v7  ;;  %v1920_v16 = vpack.c.bf16 %v1838_v10, %v1836_v9  ;;  %2948 = vmatpush1.bf16.msra.mxu0 %v8783_v1  ;;  %3205 = vmatpush1.bf16.msra.mxu1 %v8783_v1 }
 0x2f3   :  { %v1466_v18 = vadd.f32 %v1465_v13, %v9809_v33  ;;  %v1723_v19 = vadd.f32 %v1722_v14, %v9809_v33  ;;  %v1467_v20 = vpop.f32.mrb[93].mxu0  ;;  %v1724_v22 = vpop.f32.mrb[93].mxu1  ;;  %2949 = vmatprep.subr.bf16.mxu0 %v8788_v6  ;;  %3206 = vmatprep.subr.bf16.mxu1 %v8788_v6 }
 0x2f4   :  { %v1468_v27 = vadd.f32 %v1467_v20, %v9812_v34  ;;  %v1725_v28 = vadd.f32 %v1724_v22, %v9812_v34  ;;  %v1469_v29 = vpop.f32.mrb[94].mxu0  ;;  %v1726_v30 = vpop.f32.mrb[94].mxu1  ;;  %2235 = vmatprep.mubr.bf16.mxu0 %v1888_v15  ;;  %2492 = vmatprep.mubr.bf16.mxu1 %v1920_v16 }
 0x2f5   :  { %v1470_v31 = vadd.f32 %v1469_v29, %v9809_v33  ;;  %v1727_v24 = vadd.f32 %v1726_v30, %v9809_v33  ;;  %v1471_v32 = vpop.f32.mrb[95].mxu0  ;;  %v1728_v25 = vpop.f32.mrb[95].mxu1  ;;  %2236 = vmatmul.mubr.bf16.gmra.mrb[152].mxu0 %v1887_v11  ;;  %2493 = vmatmul.mubr.bf16.gmra.mrb[152].mxu1 %v1919_v12  ;;  %v1582_v38 = vmax.f32 %v1466_v18, 0.0  ;;  %v1839_v40 = vmax.f32 %v1723_v19, 0.0 }
 0x2f6   :  { %v1472_v35 = vadd.f32 %v1471_v32, %v9812_v34  ;;  %v1729_v36 = vadd.f32 %v1728_v25, %v9812_v34  ;;  %2950 = vmatpush1.bf16.msra.mxu0 %v8786_v17  ;;  %3207 = vmatpush1.bf16.msra.mxu1 %v8786_v17  ;;  %v1583_v43 = vmax.f32 %v1468_v27, 0.0  ;;  %v1840_v45 = vmax.f32 %v1725_v28, 0.0 }
 0x2f7   :  { %v1584_v39 = vmax.f32 %v1470_v31, 0.0  ;;  %v1841_v41 = vmax.f32 %v1727_v24, 0.0  ;;  %2951 = vmatprep.subr.bf16.mxu0 %v8791_v26  ;;  %3208 = vmatprep.subr.bf16.mxu1 %v8791_v26 }
 0x2f8   :  { %v1585_v44 = vmax.f32 %v1472_v35, 0.0  ;;  %v1842_v46 = vmax.f32 %v1729_v36, 0.0 }
 0x2f9   :  { %v1889_v47 = vpack.c.bf16 %v1584_v39, %v1582_v38  ;;  %v1921_v48 = vpack.c.bf16 %v1841_v41, %v1839_v40 }
 0x2fa   :  { %v1475_v49 = vpop.f32.mrb[96].mxu0  ;;  %v1732_v50 = vpop.f32.mrb[96].mxu1  ;;  %v1890_v51 = vpack.c.bf16 %v1585_v44, %v1583_v43  ;;  %v1922_v52 = vpack.c.bf16 %v1842_v46, %v1840_v45  ;;  %2952 = vmatpush1.bf16.msra.mxu0 %v8789_v37  ;;  %3209 = vmatpush1.bf16.msra.mxu1 %v8789_v37 }
 0x2fb   :  { %v1476_v54 = vadd.f32 %v1475_v49, %v9809_v33  ;;  %v1733_v55 = vadd.f32 %v1732_v50, %v9809_v33  ;;  %v1477_v56 = vpop.f32.mrb[97].mxu0  ;;  %v1734_v57 = vpop.f32.mrb[97].mxu1  ;;  %2953 = vmatprep.subr.bf16.mxu0 %v8794_v42  ;;  %3210 = vmatprep.subr.bf16.mxu1 %v8794_v42 }
 0x2fc   :  { %v1478_v58 = vadd.f32 %v1477_v56, %v9812_v34  ;;  %v1735_v59 = vadd.f32 %v1734_v57, %v9812_v34  ;;  %v1479_v60 = vpop.f32.mrb[98].mxu0  ;;  %v1736_v61 = vpop.f32.mrb[98].mxu1  ;;  %2245 = vmatprep.mubr.bf16.mxu0 %v1890_v51  ;;  %2502 = vmatprep.mubr.bf16.mxu1 %v1922_v52 }
 0x2fd   :  { %v1480_v62 = vadd.f32 %v1479_v60, %v9809_v33  ;;  %v1737_v63 = vadd.f32 %v1736_v61, %v9809_v33  ;;  %v1481_v1 = vpop.f32.mrb[99].mxu0  ;;  %v1738_v2 = vpop.f32.mrb[99].mxu1  ;;  %2246 = vmatmul.mubr.bf16.gmra.mrb[156].mxu0 %v1889_v47  ;;  %2503 = vmatmul.mubr.bf16.gmra.mrb[156].mxu1 %v1921_v48  ;;  %v1586_v5 = vmax.f32 %v1476_v54, 0.0  ;;  %v1843_v7 = vmax.f32 %v1733_v55, 0.0 }
 0x2fe   :  { %v1482_v3 = vadd.f32 %v1481_v1, %v9812_v34  ;;  %v1739_v4 = vadd.f32 %v1738_v2, %v9812_v34  ;;  %2954 = vmatpush1.bf16.msra.mxu0 %v8792_v53  ;;  %3211 = vmatpush1.bf16.msra.mxu1 %v8792_v53  ;;  %v1587_v9 = vmax.f32 %v1478_v58, 0.0  ;;  %v1844_v11 = vmax.f32 %v1735_v59, 0.0 }
 0x2ff   :  { %v1588_v6 = vmax.f32 %v1480_v62, 0.0  ;;  %v1845_v8 = vmax.f32 %v1737_v63, 0.0 }
 0x300   :  { %v1589_v10 = vmax.f32 %v1482_v3, 0.0  ;;  %v1846_v12 = vmax.f32 %v1739_v4, 0.0 }
 0x301   :  { %v1891_v13 = vpack.c.bf16 %v1588_v6, %v1586_v5  ;;  %v1923_v14 = vpack.c.bf16 %v1845_v8, %v1843_v7 }
 0x302   :  { %v1485_v15 = vpop.f32.mrb[100].mxu0  ;;  %v1742_v16 = vpop.f32.mrb[100].mxu1  ;;  %v1892_v17 = vpack.c.bf16 %v1589_v10, %v1587_v9  ;;  %v1924_v18 = vpack.c.bf16 %v1846_v12, %v1844_v11 }
 0x303   :  { %v1486_v19 = vadd.f32 %v1485_v15, %v9809_v33  ;;  %v1743_v20 = vadd.f32 %v1742_v16, %v9809_v33  ;;  %v1487_v22 = vpop.f32.mrb[101].mxu0  ;;  %v1744_v26 = vpop.f32.mrb[101].mxu1 }
 0x304   :  { %v1488_v27 = vadd.f32 %v1487_v22, %v9812_v34  ;;  %v1745_v28 = vadd.f32 %v1744_v26, %v9812_v34  ;;  %v1489_v29 = vpop.f32.mrb[102].mxu0  ;;  %v1746_v30 = vpop.f32.mrb[102].mxu1  ;;  %2255 = vmatprep.mubr.bf16.mxu0 %v1892_v17  ;;  %2512 = vmatprep.mubr.bf16.mxu1 %v1924_v18 }
 0x305   :  { %v1490_v31 = vadd.f32 %v1489_v29, %v9809_v33  ;;  %v1747_v24 = vadd.f32 %v1746_v30, %v9809_v33  ;;  %v1491_v32 = vpop.f32.mrb[103].mxu0  ;;  %v1748_v25 = vpop.f32.mrb[103].mxu1  ;;  %2256 = vmatmul.mubr.bf16.gmra.mrb[160].mxu0 %v1891_v13  ;;  %2513 = vmatmul.mubr.bf16.gmra.mrb[160].mxu1 %v1923_v14  ;;  %v1590_v37 = vmax.f32 %v1486_v19, 0.0  ;;  %v1847_v39 = vmax.f32 %v1743_v20, 0.0 }
 0x306   :  { %v1492_v35 = vadd.f32 %v1491_v32, %v9812_v34  ;;  %v1749_v36 = vadd.f32 %v1748_v25, %v9812_v34  ;;  %v1591_v41 = vmax.f32 %v1488_v27, 0.0  ;;  %v1848_v43 = vmax.f32 %v1745_v28, 0.0 }
 0x307   :  { %v1592_v38 = vmax.f32 %v1490_v31, 0.0  ;;  %v1849_v40 = vmax.f32 %v1747_v24, 0.0 }
 0x308   :  { %v1593_v42 = vmax.f32 %v1492_v35, 0.0  ;;  %v1850_v44 = vmax.f32 %v1749_v36, 0.0 }
 0x309   :  { %v1893_v45 = vpack.c.bf16 %v1592_v38, %v1590_v37  ;;  %v1925_v46 = vpack.c.bf16 %v1849_v40, %v1847_v39 }
 0x30a   :  { %v1495_v47 = vpop.f32.mrb[104].mxu0  ;;  %v1752_v48 = vpop.f32.mrb[104].mxu1  ;;  %v1894_v49 = vpack.c.bf16 %v1593_v42, %v1591_v41  ;;  %v1926_v50 = vpack.c.bf16 %v1850_v44, %v1848_v43 }
 0x30b   :  { %v1496_v51 = vadd.f32 %v1495_v47, %v9809_v33  ;;  %v1753_v52 = vadd.f32 %v1752_v48, %v9809_v33  ;;  %v1497_v53 = vpop.f32.mrb[105].mxu0  ;;  %v1754_v54 = vpop.f32.mrb[105].mxu1 }
 0x30c   :  { %v1498_v55 = vadd.f32 %v1497_v53, %v9812_v34  ;;  %v1755_v56 = vadd.f32 %v1754_v54, %v9812_v34  ;;  %v1499_v57 = vpop.f32.mrb[106].mxu0  ;;  %v1756_v58 = vpop.f32.mrb[106].mxu1  ;;  %2265 = vmatprep.mubr.bf16.mxu0 %v1894_v49  ;;  %2522 = vmatprep.mubr.bf16.mxu1 %v1926_v50 }
 0x30d   :  { %v1500_v59 = vadd.f32 %v1499_v57, %v9809_v33  ;;  %v1757_v60 = vadd.f32 %v1756_v58, %v9809_v33  ;;  %v1501_v61 = vpop.f32.mrb[107].mxu0  ;;  %v1758_v62 = vpop.f32.mrb[107].mxu1  ;;  %2266 = vmatmul.mubr.bf16.gmra.mrb[164].mxu0 %v1893_v45  ;;  %2523 = vmatmul.mubr.bf16.gmra.mrb[164].mxu1 %v1925_v46  ;;  %v1594_v2 = vmax.f32 %v1496_v51, 0.0  ;;  %v1851_v4 = vmax.f32 %v1753_v52, 0.0 }
 0x30e   :  { %v1502_v63 = vadd.f32 %v1501_v61, %v9812_v34  ;;  %v1759_v1 = vadd.f32 %v1758_v62, %v9812_v34  ;;  %v1595_v6 = vmax.f32 %v1498_v55, 0.0  ;;  %v1852_v8 = vmax.f32 %v1755_v56, 0.0 }
 0x30f   :  { %v1596_v3 = vmax.f32 %v1500_v59, 0.0  ;;  %v1853_v5 = vmax.f32 %v1757_v60, 0.0  ;;  %v8797_v60 = vld [vmem:[#allocation9 + $0xf4] ss:$8 sps:$4 sm:$0xff]  }
 0x310   :  { %v1597_v7 = vmax.f32 %v1502_v63, 0.0  ;;  %v1854_v9 = vmax.f32 %v1759_v1, 0.0  ;;  %v8795_v63 = vld [vmem:[#allocation9 + $0xf0] ss:$8 sps:$4 sm:$0xff]   ;;  %2955 = vmatprep.subr.bf16.mxu0 %v8797_v60  ;;  %3212 = vmatprep.subr.bf16.mxu1 %v8797_v60 }
 0x311   :  { %v1895_v10 = vpack.c.bf16 %v1596_v3, %v1594_v2  ;;  %v1927_v11 = vpack.c.bf16 %v1853_v5, %v1851_v4  ;;  %2956 = vmatpush1.bf16.msra.mxu0 %v8795_v63  ;;  %3213 = vmatpush1.bf16.msra.mxu1 %v8795_v63 }
 0x312   :  { %v1505_v12 = vpop.f32.mrb[108].mxu0  ;;  %v1762_v13 = vpop.f32.mrb[108].mxu1  ;;  %v1896_v14 = vpack.c.bf16 %v1597_v7, %v1595_v6  ;;  %v1928_v15 = vpack.c.bf16 %v1854_v9, %v1852_v8 }
 0x313   :  { %v1506_v16 = vadd.f32 %v1505_v12, %v9809_v33  ;;  %v1763_v17 = vadd.f32 %v1762_v13, %v9809_v33  ;;  %v1507_v18 = vpop.f32.mrb[109].mxu0  ;;  %v1764_v19 = vpop.f32.mrb[109].mxu1 }
 0x314   :  { %v1508_v20 = vadd.f32 %v1507_v18, %v9812_v34  ;;  %v1765_v22 = vadd.f32 %v1764_v19, %v9812_v34  ;;  %v1509_v26 = vpop.f32.mrb[110].mxu0  ;;  %v1766_v27 = vpop.f32.mrb[110].mxu1  ;;  %2275 = vmatprep.mubr.bf16.mxu0 %v1896_v14  ;;  %2532 = vmatprep.mubr.bf16.mxu1 %v1928_v15 }
 0x315   :  { %v1510_v28 = vadd.f32 %v1509_v26, %v9809_v33  ;;  %v1767_v29 = vadd.f32 %v1766_v27, %v9809_v33  ;;  %v1511_v30 = vpop.f32.mrb[111].mxu0  ;;  %v1768_v31 = vpop.f32.mrb[111].mxu1  ;;  %2276 = vmatmul.mubr.bf16.gmra.mrb[168].mxu0 %v1895_v10  ;;  %2533 = vmatmul.mubr.bf16.gmra.mrb[168].mxu1 %v1927_v11  ;;  %v1598_v25 = vmax.f32 %v1506_v16, 0.0  ;;  %v1855_v36 = vmax.f32 %v1763_v17, 0.0 }
 0x316   :  { %v1512_v24 = vadd.f32 %v1511_v30, %v9812_v34  ;;  %v1769_v32 = vadd.f32 %v1768_v31, %v9812_v34  ;;  %v1599_v38 = vmax.f32 %v1508_v20, 0.0  ;;  %v1856_v40 = vmax.f32 %v1765_v22, 0.0 }
 0x317   :  { %v1600_v35 = vmax.f32 %v1510_v28, 0.0  ;;  %v1857_v37 = vmax.f32 %v1767_v29, 0.0 }
 0x318   :  { %v1601_v39 = vmax.f32 %v1512_v24, 0.0  ;;  %v1858_v41 = vmax.f32 %v1769_v32, 0.0 }
 0x319   :  { %v1897_v42 = vpack.c.bf16 %v1600_v35, %v1598_v25  ;;  %v1929_v43 = vpack.c.bf16 %v1857_v37, %v1855_v36 }
 0x31a   :  { %v1515_v44 = vpop.f32.mrb[112].mxu0  ;;  %v1772_v45 = vpop.f32.mrb[112].mxu1  ;;  %v1898_v46 = vpack.c.bf16 %v1601_v39, %v1599_v38  ;;  %v1930_v47 = vpack.c.bf16 %v1858_v41, %v1856_v40 }
 0x31b   :  { %v1516_v48 = vadd.f32 %v1515_v44, %v9809_v33  ;;  %v1773_v49 = vadd.f32 %v1772_v45, %v9809_v33  ;;  %v1517_v50 = vpop.f32.mrb[113].mxu0  ;;  %v1774_v51 = vpop.f32.mrb[113].mxu1 }
 0x31c   :  { %v1518_v52 = vadd.f32 %v1517_v50, %v9812_v34  ;;  %v1775_v53 = vadd.f32 %v1774_v51, %v9812_v34  ;;  %v1519_v54 = vpop.f32.mrb[114].mxu0  ;;  %v1776_v55 = vpop.f32.mrb[114].mxu1  ;;  %2285 = vmatprep.mubr.bf16.mxu0 %v1898_v46  ;;  %2542 = vmatprep.mubr.bf16.mxu1 %v1930_v47 }
 0x31d   :  { %v1520_v56 = vadd.f32 %v1519_v54, %v9809_v33  ;;  %v1777_v57 = vadd.f32 %v1776_v55, %v9809_v33  ;;  %v1521_v58 = vpop.f32.mrb[115].mxu0  ;;  %v1778_v59 = vpop.f32.mrb[115].mxu1  ;;  %2286 = vmatmul.mubr.bf16.gmra.mrb[172].mxu0 %v1897_v42  ;;  %2543 = vmatmul.mubr.bf16.gmra.mrb[172].mxu1 %v1929_v43  ;;  %v1602_v1 = vmax.f32 %v1516_v48, 0.0  ;;  %v1859_v3 = vmax.f32 %v1773_v49, 0.0 }
 0x31e   :  { %v1522_v61 = vadd.f32 %v1521_v58, %v9812_v34  ;;  %v1779_v62 = vadd.f32 %v1778_v59, %v9812_v34  ;;  %v1603_v5 = vmax.f32 %v1518_v52, 0.0  ;;  %v1860_v7 = vmax.f32 %v1775_v53, 0.0 }
 0x31f   :  { %v1604_v2 = vmax.f32 %v1520_v56, 0.0  ;;  %v1861_v4 = vmax.f32 %v1777_v57, 0.0 }
 0x320   :  { %v1605_v6 = vmax.f32 %v1522_v61, 0.0  ;;  %v1862_v8 = vmax.f32 %v1779_v62, 0.0 }
 0x321   :  { %v1899_v9 = vpack.c.bf16 %v1604_v2, %v1602_v1  ;;  %v1931_v10 = vpack.c.bf16 %v1861_v4, %v1859_v3 }
 0x322   :  { %v1525_v11 = vpop.f32.mrb[116].mxu0  ;;  %v1782_v12 = vpop.f32.mrb[116].mxu1  ;;  %v1900_v13 = vpack.c.bf16 %v1605_v6, %v1603_v5  ;;  %v1932_v14 = vpack.c.bf16 %v1862_v8, %v1860_v7 }
 0x323   :  { %v1526_v15 = vadd.f32 %v1525_v11, %v9809_v33  ;;  %v1783_v16 = vadd.f32 %v1782_v12, %v9809_v33  ;;  %v1527_v17 = vpop.f32.mrb[117].mxu0  ;;  %v1784_v18 = vpop.f32.mrb[117].mxu1 }
 0x324   :  { %v1528_v19 = vadd.f32 %v1527_v17, %v9812_v34  ;;  %v1785_v20 = vadd.f32 %v1784_v18, %v9812_v34  ;;  %v1529_v22 = vpop.f32.mrb[118].mxu0  ;;  %v1786_v26 = vpop.f32.mrb[118].mxu1  ;;  %2295 = vmatprep.mubr.bf16.mxu0 %v1900_v13  ;;  %2552 = vmatprep.mubr.bf16.mxu1 %v1932_v14 }
 0x325   :  { %v1530_v27 = vadd.f32 %v1529_v22, %v9809_v33  ;;  %v1787_v28 = vadd.f32 %v1786_v26, %v9809_v33  ;;  %v1531_v29 = vpop.f32.mrb[119].mxu0  ;;  %v1788_v30 = vpop.f32.mrb[119].mxu1  ;;  %2296 = vmatmul.mubr.bf16.gmra.mrb[176].mxu0 %v1899_v9  ;;  %2553 = vmatmul.mubr.bf16.gmra.mrb[176].mxu1 %v1931_v10  ;;  %v1606_v32 = vmax.f32 %v1526_v15, 0.0  ;;  %v1863_v35 = vmax.f32 %v1783_v16, 0.0 }
 0x326   :  { %v1532_v31 = vadd.f32 %v1531_v29, %v9812_v34  ;;  %v1789_v24 = vadd.f32 %v1788_v30, %v9812_v34  ;;  %v1607_v37 = vmax.f32 %v1528_v19, 0.0  ;;  %v1864_v39 = vmax.f32 %v1785_v20, 0.0 }
 0x327   :  { %v1608_v25 = vmax.f32 %v1530_v27, 0.0  ;;  %v1865_v36 = vmax.f32 %v1787_v28, 0.0 }
 0x328   :  { %v1609_v38 = vmax.f32 %v1532_v31, 0.0  ;;  %v1866_v40 = vmax.f32 %v1789_v24, 0.0 }
 0x329   :  { %v1901_v41 = vpack.c.bf16 %v1608_v25, %v1606_v32  ;;  %v1933_v42 = vpack.c.bf16 %v1865_v36, %v1863_v35 }
 0x32a   :  { %v1535_v43 = vpop.f32.mrb[120].mxu0  ;;  %v1792_v44 = vpop.f32.mrb[120].mxu1  ;;  %v1902_v45 = vpack.c.bf16 %v1609_v38, %v1607_v37  ;;  %v1934_v46 = vpack.c.bf16 %v1866_v40, %v1864_v39 }
 0x32b   :  { %v1536_v47 = vadd.f32 %v1535_v43, %v9809_v33  ;;  %v1793_v48 = vadd.f32 %v1792_v44, %v9809_v33  ;;  %v1537_v49 = vpop.f32.mrb[121].mxu0  ;;  %v1794_v50 = vpop.f32.mrb[121].mxu1 }
 0x32c   :  { %v1538_v51 = vadd.f32 %v1537_v49, %v9812_v34  ;;  %v1795_v52 = vadd.f32 %v1794_v50, %v9812_v34  ;;  %v1539_v53 = vpop.f32.mrb[122].mxu0  ;;  %v1796_v54 = vpop.f32.mrb[122].mxu1  ;;  %2305 = vmatprep.mubr.bf16.mxu0 %v1902_v45  ;;  %2562 = vmatprep.mubr.bf16.mxu1 %v1934_v46 }
 0x32d   :  { %v1540_v55 = vadd.f32 %v1539_v53, %v9809_v33  ;;  %v1797_v56 = vadd.f32 %v1796_v54, %v9809_v33  ;;  %v1541_v57 = vpop.f32.mrb[123].mxu0  ;;  %v1798_v58 = vpop.f32.mrb[123].mxu1  ;;  %2306 = vmatmul.mubr.bf16.gmra.mrb[180].mxu0 %v1901_v41  ;;  %2563 = vmatmul.mubr.bf16.gmra.mrb[180].mxu1 %v1933_v42  ;;  %v1610_v61 = vmax.f32 %v1536_v47, 0.0  ;;  %v1867_v63 = vmax.f32 %v1793_v48, 0.0  ;;  %v8800_v41 = vld [vmem:[#allocation10 + $0x4] ss:$8 sps:$4 sm:$0xff]  }
 0x32e   :  { %v1542_v59 = vadd.f32 %v1541_v57, %v9812_v34  ;;  %v1799_v60 = vadd.f32 %v1798_v58, %v9812_v34  ;;  %v1611_v2 = vmax.f32 %v1538_v51, 0.0  ;;  %v1868_v4 = vmax.f32 %v1795_v52, 0.0  ;;  %3707 = vmatprep.subr.bf16.mxu0 %v8800_v41  ;;  %3964 = vmatprep.subr.bf16.mxu1 %v8800_v41 }
 0x32f   :  { %v1612_v62 = vmax.f32 %v1540_v55, 0.0  ;;  %v1869_v1 = vmax.f32 %v1797_v56, 0.0 }
 0x330   :  { %v1613_v3 = vmax.f32 %v1542_v59, 0.0  ;;  %v1870_v5 = vmax.f32 %v1799_v60, 0.0 }
 0x331   :  { %v1903_v6 = vpack.c.bf16 %v1612_v62, %v1610_v61  ;;  %v1935_v7 = vpack.c.bf16 %v1869_v1, %v1867_v63 }
 0x332   :  { %v1545_v8 = vpop.f32.mrb[124].mxu0  ;;  %v1802_v9 = vpop.f32.mrb[124].mxu1  ;;  %v1904_v10 = vpack.c.bf16 %v1613_v3, %v1611_v2  ;;  %v1936_v11 = vpack.c.bf16 %v1870_v5, %v1868_v4 }
 0x333   :  { %v1546_v12 = vadd.f32 %v1545_v8, %v9809_v33  ;;  %v1803_v13 = vadd.f32 %v1802_v9, %v9809_v33  ;;  %v1547_v14 = vpop.f32.mrb[125].mxu0  ;;  %v1804_v15 = vpop.f32.mrb[125].mxu1 }
 0x334   :  { %v1548_v16 = vadd.f32 %v1547_v14, %v9812_v34  ;;  %v1805_v17 = vadd.f32 %v1804_v15, %v9812_v34  ;;  %v1549_v18 = vpop.f32.mrb[126].mxu0  ;;  %v1806_v19 = vpop.f32.mrb[126].mxu1  ;;  %2315 = vmatprep.mubr.bf16.mxu0 %v1904_v10  ;;  %2572 = vmatprep.mubr.bf16.mxu1 %v1936_v11  ;;  %v8798_v11 = vld [vmem:[#allocation10] ss:$8 sps:$4 sm:$0xff]  }
 0x335   :  { %v1550_v20 = vadd.f32 %v1549_v18, %v9809_v33  ;;  %v1807_v22 = vadd.f32 %v1806_v19, %v9809_v33  ;;  %v1551_v26 = vpop.f32.mrb[127].mxu0  ;;  %v1808_v27 = vpop.f32.mrb[127].mxu1  ;;  %2316 = vmatmul.mubr.bf16.gmra.mrb[184].mxu0 %v1903_v6  ;;  %2573 = vmatmul.mubr.bf16.gmra.mrb[184].mxu1 %v1935_v7  ;;  %v1614_v30 = vmax.f32 %v1546_v12, 0.0  ;;  %v1871_v24 = vmax.f32 %v1803_v13, 0.0 }
 0x336   :  { %v1552_v28 = vadd.f32 %v1551_v26, %v9812_v34  ;;  %v1809_v29 = vadd.f32 %v1808_v27, %v9812_v34  ;;  %v1615_v25 = vmax.f32 %v1548_v16, 0.0  ;;  %v1872_v36 = vmax.f32 %v1805_v17, 0.0  ;;  %v1971_v34 = vld [vmem:[%s11300_s11] sm:$0x3]  ;;  %v8803_v16 = vld [vmem:[#allocation10 + $0x14] ss:$8 sps:$4 sm:$0xff]  }
 0x337   :  { %v1616_v31 = vmax.f32 %v1550_v20, 0.0  ;;  %v1873_v32 = vmax.f32 %v1807_v22, 0.0  ;;  %v9946_v42 = vrot.slane %v1971_v34, %v9664_v21  ;;  %v9949_v43 = vrot.slane %v1971_v34, %v9669_v23 }
 0x338   :  { %v1617_v35 = vmax.f32 %v1552_v28, 0.0  ;;  %v1874_v37 = vmax.f32 %v1809_v29, 0.0 }
 0x339   :  { %v1905_v38 = vpack.c.bf16 %v1616_v31, %v1614_v30  ;;  %v1937_v39 = vpack.c.bf16 %v1873_v32, %v1871_v24  ;;  %v8801_v31 = vld [vmem:[#allocation10 + $0x10] ss:$8 sps:$4 sm:$0xff]  }
 0x33a   :  { %v1906_v40 = vpack.c.bf16 %v1617_v35, %v1615_v25  ;;  %v1938_v33 = vpack.c.bf16 %v1874_v37, %v1872_v36  ;;  %v8806_v36 = vld [vmem:[#allocation10 + $0x24] ss:$8 sps:$4 sm:$0xff]  }
 0x33c   :  { %2325 = vmatprep.mubr.bf16.mxu0 %v1906_v40  ;;  %2582 = vmatprep.mubr.bf16.mxu1 %v1938_v33 }
 0x33d   :  { %2326 = vmatmul.mubr.bf16.gmra.mrb[188].mxu0 %v1905_v38  ;;  %2583 = vmatmul.mubr.bf16.gmra.mrb[188].mxu1 %v1937_v39 }
 0x398   :  { %v2177_v44 = vpop.f32.mrb[128].mxu0  ;;  %v2434_v45 = vpop.f32.mrb[128].mxu1 }
 0x399   :  { %v2178_v46 = vadd.f32 %v2177_v44, %v9946_v42  ;;  %v2435_v47 = vadd.f32 %v2434_v45, %v9946_v42  ;;  %v2179_v48 = vpop.f32.mrb[129].mxu0  ;;  %v2436_v49 = vpop.f32.mrb[129].mxu1 }
 0x39a   :  { %v2180_v50 = vadd.f32 %v2179_v48, %v9949_v43  ;;  %v2437_v51 = vadd.f32 %v2436_v49, %v9949_v43  ;;  %v2181_v52 = vpop.f32.mrb[130].mxu0  ;;  %v2438_v53 = vpop.f32.mrb[130].mxu1 }
 0x39b   :  { %v2182_v54 = vadd.f32 %v2181_v52, %v9946_v42  ;;  %v2439_v55 = vadd.f32 %v2438_v53, %v9946_v42  ;;  %v2183_v56 = vpop.f32.mrb[131].mxu0  ;;  %v2440_v57 = vpop.f32.mrb[131].mxu1  ;;  %v2336_v60 = vmax.f32 %v2178_v46, 0.0  ;;  %v2593_v61 = vmax.f32 %v2435_v47, 0.0  ;;  %v8804_v47 = vld [vmem:[#allocation10 + $0x20] ss:$8 sps:$4 sm:$0xff]  }
 0x39c   :  { %v2184_v58 = vadd.f32 %v2183_v56, %v9949_v43  ;;  %v2441_v59 = vadd.f32 %v2440_v57, %v9949_v43  ;;  %v2337_v1 = vmax.f32 %v2180_v50, 0.0  ;;  %v2594_v2 = vmax.f32 %v2437_v51, 0.0  ;;  %v8809_v52 = vld [vmem:[#allocation10 + $0x34] ss:$8 sps:$4 sm:$0xff]  }
 0x39d   :  { %v2338_v62 = vmax.f32 %v2182_v54, 0.0  ;;  %v2595_v63 = vmax.f32 %v2439_v55, 0.0 }
 0x39e   :  { %v2339_v3 = vmax.f32 %v2184_v58, 0.0  ;;  %v2596_v4 = vmax.f32 %v2441_v59, 0.0 }
 0x39f   :  { %v2657_v5 = vpack.c.bf16 %v2338_v62, %v2336_v60  ;;  %v2689_v6 = vpack.c.bf16 %v2595_v63, %v2593_v61  ;;  %v8807_v63 = vld [vmem:[#allocation10 + $0x30] ss:$8 sps:$4 sm:$0xff]  }
 0x3a0   :  { %v2187_v7 = vpop.f32.mrb[132].mxu0  ;;  %v2444_v8 = vpop.f32.mrb[132].mxu1  ;;  %v2658_v9 = vpack.c.bf16 %v2339_v3, %v2337_v1  ;;  %v2690_v10 = vpack.c.bf16 %v2596_v4, %v2594_v2 }
 0x3a1   :  { %v2188_v12 = vadd.f32 %v2187_v7, %v9946_v42  ;;  %v2445_v13 = vadd.f32 %v2444_v8, %v9946_v42  ;;  %v2189_v14 = vpop.f32.mrb[133].mxu0  ;;  %v2446_v15 = vpop.f32.mrb[133].mxu1 }
 0x3a2   :  { %v2190_v17 = vadd.f32 %v2189_v14, %v9949_v43  ;;  %v2447_v18 = vadd.f32 %v2446_v15, %v9949_v43  ;;  %v2191_v19 = vpop.f32.mrb[134].mxu0  ;;  %v2448_v20 = vpop.f32.mrb[134].mxu1  ;;  %2957 = vmatprep.mubr.bf16.mxu0 %v2658_v9  ;;  %3214 = vmatprep.mubr.bf16.mxu1 %v2690_v10 }
 0x3a3   :  { %v2192_v22 = vadd.f32 %v2191_v19, %v9946_v42  ;;  %v2449_v26 = vadd.f32 %v2448_v20, %v9946_v42  ;;  %v2193_v27 = vpop.f32.mrb[135].mxu0  ;;  %v2450_v28 = vpop.f32.mrb[135].mxu1  ;;  %2958 = vmatmul.mubr.bf16.vlgmr.msra.gmra.mrb[192].mxu0 %v2657_v5  ;;  %3215 = vmatmul.mubr.bf16.vlgmr.msra.gmra.mrb[192].mxu1 %v2689_v6  ;;  %v2340_v24 = vmax.f32 %v2188_v12, 0.0  ;;  %v2597_v32 = vmax.f32 %v2445_v13, 0.0  ;;  %v8812_v5 = vld [vmem:[#allocation10 + $0x44] ss:$8 sps:$4 sm:$0xff]  }
 0x3a4   :  { %v2194_v29 = vadd.f32 %v2193_v27, %v9949_v43  ;;  %v2451_v30 = vadd.f32 %v2450_v28, %v9949_v43  ;;  %3708 = vmatpush1.bf16.msra.mxu0 %v8798_v11  ;;  %3965 = vmatpush1.bf16.msra.mxu1 %v8798_v11  ;;  %v2341_v37 = vmax.f32 %v2190_v17, 0.0  ;;  %v2598_v38 = vmax.f32 %v2447_v18, 0.0 }
 0x3a5   :  { %v2342_v25 = vmax.f32 %v2192_v22, 0.0  ;;  %v2599_v35 = vmax.f32 %v2449_v26, 0.0  ;;  %3709 = vmatprep.subr.bf16.mxu0 %v8803_v16  ;;  %3966 = vmatprep.subr.bf16.mxu1 %v8803_v16  ;;  %v8810_v16 = vld [vmem:[#allocation10 + $0x40] ss:$8 sps:$4 sm:$0xff]   ;;  %v8815_v22 = vld [vmem:[#allocation10 + $0x54] ss:$8 sps:$4 sm:$0xff]  }
 0x3a6   :  { %v2343_v39 = vmax.f32 %v2194_v29, 0.0  ;;  %v2600_v40 = vmax.f32 %v2451_v30, 0.0 }
 0x3a7   :  { %v2659_v33 = vpack.c.bf16 %v2342_v25, %v2340_v24  ;;  %v2691_v41 = vpack.c.bf16 %v2599_v35, %v2597_v32 }
 0x3a8   :  { %v2197_v34 = vpop.f32.mrb[136].mxu0  ;;  %v2454_v44 = vpop.f32.mrb[136].mxu1  ;;  %v2660_v45 = vpack.c.bf16 %v2343_v39, %v2341_v37  ;;  %v2692_v46 = vpack.c.bf16 %v2600_v40, %v2598_v38  ;;  %3710 = vmatpush1.bf16.msra.mxu0 %v8801_v31  ;;  %3967 = vmatpush1.bf16.msra.mxu1 %v8801_v31 }
 0x3a9   :  { %v2198_v48 = vadd.f32 %v2197_v34, %v9946_v42  ;;  %v2455_v49 = vadd.f32 %v2454_v44, %v9946_v42  ;;  %v2199_v50 = vpop.f32.mrb[137].mxu0  ;;  %v2456_v51 = vpop.f32.mrb[137].mxu1  ;;  %3711 = vmatprep.subr.bf16.mxu0 %v8806_v36  ;;  %3968 = vmatprep.subr.bf16.mxu1 %v8806_v36  ;;  %v8813_v36 = vld [vmem:[#allocation10 + $0x50] ss:$8 sps:$4 sm:$0xff]  }
 0x3aa   :  { %v2200_v53 = vadd.f32 %v2199_v50, %v9949_v43  ;;  %v2457_v54 = vadd.f32 %v2456_v51, %v9949_v43  ;;  %v2201_v55 = vpop.f32.mrb[138].mxu0  ;;  %v2458_v56 = vpop.f32.mrb[138].mxu1  ;;  %2967 = vmatprep.mubr.bf16.mxu0 %v2660_v45  ;;  %3224 = vmatprep.mubr.bf16.mxu1 %v2692_v46 }
 0x3ab   :  { %v2202_v57 = vadd.f32 %v2201_v55, %v9946_v42  ;;  %v2459_v58 = vadd.f32 %v2458_v56, %v9946_v42  ;;  %v2203_v59 = vpop.f32.mrb[139].mxu0  ;;  %v2460_v60 = vpop.f32.mrb[139].mxu1  ;;  %2968 = vmatmul.mubr.bf16.gmra.mrb[196].mxu0 %v2659_v33  ;;  %3225 = vmatmul.mubr.bf16.gmra.mrb[196].mxu1 %v2691_v41  ;;  %v2344_v1 = vmax.f32 %v2198_v48, 0.0  ;;  %v2601_v2 = vmax.f32 %v2455_v49, 0.0  ;;  %v8818_v33 = vld [vmem:[#allocation10 + $0x64] ss:$8 sps:$4 sm:$0xff]  }
 0x3ac   :  { %v2204_v61 = vadd.f32 %v2203_v59, %v9949_v43  ;;  %v2461_v62 = vadd.f32 %v2460_v60, %v9949_v43  ;;  %3712 = vmatpush1.bf16.msra.mxu0 %v8804_v47  ;;  %3969 = vmatpush1.bf16.msra.mxu1 %v8804_v47  ;;  %v2345_v6 = vmax.f32 %v2200_v53, 0.0  ;;  %v2602_v7 = vmax.f32 %v2457_v54, 0.0 }
 0x3ad   :  { %v2346_v3 = vmax.f32 %v2202_v57, 0.0  ;;  %v2603_v4 = vmax.f32 %v2459_v58, 0.0  ;;  %3713 = vmatprep.subr.bf16.mxu0 %v8809_v52  ;;  %3970 = vmatprep.subr.bf16.mxu1 %v8809_v52  ;;  %v8816_v52 = vld [vmem:[#allocation10 + $0x60] ss:$8 sps:$4 sm:$0xff]   ;;  %v8821_v57 = vld [vmem:[#allocation10 + $0x74] ss:$8 sps:$4 sm:$0xff]  }
 0x3ae   :  { %v2347_v8 = vmax.f32 %v2204_v61, 0.0  ;;  %v2604_v9 = vmax.f32 %v2461_v62, 0.0 }
 0x3af   :  { %v2661_v10 = vpack.c.bf16 %v2346_v3, %v2344_v1  ;;  %v2693_v11 = vpack.c.bf16 %v2603_v4, %v2601_v2 }
 0x3b0   :  { %v2207_v12 = vpop.f32.mrb[140].mxu0  ;;  %v2464_v13 = vpop.f32.mrb[140].mxu1  ;;  %v2662_v14 = vpack.c.bf16 %v2347_v8, %v2345_v6  ;;  %v2694_v15 = vpack.c.bf16 %v2604_v9, %v2602_v7  ;;  %3714 = vmatpush1.bf16.msra.mxu0 %v8807_v63  ;;  %3971 = vmatpush1.bf16.msra.mxu1 %v8807_v63 }
 0x3b1   :  { %v2208_v17 = vadd.f32 %v2207_v12, %v9946_v42  ;;  %v2465_v18 = vadd.f32 %v2464_v13, %v9946_v42  ;;  %v2209_v19 = vpop.f32.mrb[141].mxu0  ;;  %v2466_v20 = vpop.f32.mrb[141].mxu1  ;;  %3715 = vmatprep.subr.bf16.mxu0 %v8812_v5  ;;  %3972 = vmatprep.subr.bf16.mxu1 %v8812_v5  ;;  %v8819_v5 = vld [vmem:[#allocation10 + $0x70] ss:$8 sps:$4 sm:$0xff]  }
 0x3b2   :  { %v2210_v26 = vadd.f32 %v2209_v19, %v9949_v43  ;;  %v2467_v27 = vadd.f32 %v2466_v20, %v9949_v43  ;;  %v2211_v28 = vpop.f32.mrb[142].mxu0  ;;  %v2468_v29 = vpop.f32.mrb[142].mxu1  ;;  %2977 = vmatprep.mubr.bf16.mxu0 %v2662_v14  ;;  %3234 = vmatprep.mubr.bf16.mxu1 %v2694_v15 }
 0x3b3   :  { %v2212_v30 = vadd.f32 %v2211_v28, %v9946_v42  ;;  %v2469_v31 = vadd.f32 %v2468_v29, %v9946_v42  ;;  %v2213_v24 = vpop.f32.mrb[143].mxu0  ;;  %v2470_v32 = vpop.f32.mrb[143].mxu1  ;;  %2978 = vmatmul.mubr.bf16.gmra.mrb[200].mxu0 %v2661_v10  ;;  %3235 = vmatmul.mubr.bf16.gmra.mrb[200].mxu1 %v2693_v11  ;;  %v2348_v37 = vmax.f32 %v2208_v17, 0.0  ;;  %v2605_v38 = vmax.f32 %v2465_v18, 0.0  ;;  %v8824_v10 = vld [vmem:[#allocation10 + $0x84] ss:$8 sps:$4 sm:$0xff]  }
 0x3b4   :  { %v2214_v25 = vadd.f32 %v2213_v24, %v9949_v43  ;;  %v2471_v35 = vadd.f32 %v2470_v32, %v9949_v43  ;;  %3716 = vmatpush1.bf16.msra.mxu0 %v8810_v16  ;;  %3973 = vmatpush1.bf16.msra.mxu1 %v8810_v16  ;;  %v2349_v41 = vmax.f32 %v2210_v26, 0.0  ;;  %v2606_v34 = vmax.f32 %v2467_v27, 0.0 }
 0x3b5   :  { %v2350_v39 = vmax.f32 %v2212_v30, 0.0  ;;  %v2607_v40 = vmax.f32 %v2469_v31, 0.0  ;;  %3717 = vmatprep.subr.bf16.mxu0 %v8815_v22  ;;  %3974 = vmatprep.subr.bf16.mxu1 %v8815_v22  ;;  %v8822_v22 = vld [vmem:[#allocation10 + $0x80] ss:$8 sps:$4 sm:$0xff]   ;;  %v8827_v30 = vld [vmem:[#allocation10 + $0x94] ss:$8 sps:$4 sm:$0xff]  }
 0x3b6   :  { %v2351_v44 = vmax.f32 %v2214_v25, 0.0  ;;  %v2608_v45 = vmax.f32 %v2471_v35, 0.0 }
 0x3b7   :  { %v2663_v46 = vpack.c.bf16 %v2350_v39, %v2348_v37  ;;  %v2695_v47 = vpack.c.bf16 %v2607_v40, %v2605_v38 }
 0x3b8   :  { %v2217_v48 = vpop.f32.mrb[144].mxu0  ;;  %v2474_v49 = vpop.f32.mrb[144].mxu1  ;;  %v2664_v50 = vpack.c.bf16 %v2351_v44, %v2349_v41  ;;  %v2696_v51 = vpack.c.bf16 %v2608_v45, %v2606_v34  ;;  %3718 = vmatpush1.bf16.msra.mxu0 %v8813_v36  ;;  %3975 = vmatpush1.bf16.msra.mxu1 %v8813_v36 }
 0x3b9   :  { %v2218_v53 = vadd.f32 %v2217_v48, %v9946_v42  ;;  %v2475_v54 = vadd.f32 %v2474_v49, %v9946_v42  ;;  %v2219_v55 = vpop.f32.mrb[145].mxu0  ;;  %v2476_v56 = vpop.f32.mrb[145].mxu1  ;;  %3719 = vmatprep.subr.bf16.mxu0 %v8818_v33  ;;  %3976 = vmatprep.subr.bf16.mxu1 %v8818_v33  ;;  %v8825_v33 = vld [vmem:[#allocation10 + $0x90] ss:$8 sps:$4 sm:$0xff]  }
 0x3ba   :  { %v2220_v58 = vadd.f32 %v2219_v55, %v9949_v43  ;;  %v2477_v59 = vadd.f32 %v2476_v56, %v9949_v43  ;;  %v2221_v60 = vpop.f32.mrb[146].mxu0  ;;  %v2478_v61 = vpop.f32.mrb[146].mxu1  ;;  %2987 = vmatprep.mubr.bf16.mxu0 %v2664_v50  ;;  %3244 = vmatprep.mubr.bf16.mxu1 %v2696_v51 }
 0x3bb   :  { %v2222_v62 = vadd.f32 %v2221_v60, %v9946_v42  ;;  %v2479_v63 = vadd.f32 %v2478_v61, %v9946_v42  ;;  %v2223_v1 = vpop.f32.mrb[147].mxu0  ;;  %v2480_v2 = vpop.f32.mrb[147].mxu1  ;;  %2988 = vmatmul.mubr.bf16.gmra.mrb[204].mxu0 %v2663_v46  ;;  %3245 = vmatmul.mubr.bf16.gmra.mrb[204].mxu1 %v2695_v47  ;;  %v2352_v6 = vmax.f32 %v2218_v53, 0.0  ;;  %v2609_v7 = vmax.f32 %v2475_v54, 0.0  ;;  %v8830_v46 = vld [vmem:[#allocation10 + $0xa4] ss:$8 sps:$4 sm:$0xff]  }
 0x3bc   :  { %v2224_v3 = vadd.f32 %v2223_v1, %v9949_v43  ;;  %v2481_v4 = vadd.f32 %v2480_v2, %v9949_v43  ;;  %3720 = vmatpush1.bf16.msra.mxu0 %v8816_v52  ;;  %3977 = vmatpush1.bf16.msra.mxu1 %v8816_v52  ;;  %v2353_v11 = vmax.f32 %v2220_v58, 0.0  ;;  %v2610_v12 = vmax.f32 %v2477_v59, 0.0 }
 0x3bd   :  { %v2354_v8 = vmax.f32 %v2222_v62, 0.0  ;;  %v2611_v9 = vmax.f32 %v2479_v63, 0.0  ;;  %3721 = vmatprep.subr.bf16.mxu0 %v8821_v57  ;;  %3978 = vmatprep.subr.bf16.mxu1 %v8821_v57  ;;  %v8828_v57 = vld [vmem:[#allocation10 + $0xa0] ss:$8 sps:$4 sm:$0xff]   ;;  %v8833_v62 = vld [vmem:[#allocation10 + $0xb4] ss:$8 sps:$4 sm:$0xff]  }
 0x3be   :  { %v2355_v13 = vmax.f32 %v2224_v3, 0.0  ;;  %v2612_v14 = vmax.f32 %v2481_v4, 0.0 }
 0x3bf   :  { %v2665_v15 = vpack.c.bf16 %v2354_v8, %v2352_v6  ;;  %v2697_v16 = vpack.c.bf16 %v2611_v9, %v2609_v7 }
 0x3c0   :  { %v2227_v17 = vpop.f32.mrb[148].mxu0  ;;  %v2484_v18 = vpop.f32.mrb[148].mxu1  ;;  %v2666_v19 = vpack.c.bf16 %v2355_v13, %v2353_v11  ;;  %v2698_v20 = vpack.c.bf16 %v2612_v14, %v2610_v12  ;;  %3722 = vmatpush1.bf16.msra.mxu0 %v8819_v5  ;;  %3979 = vmatpush1.bf16.msra.mxu1 %v8819_v5 }
 0x3c1   :  { %v2228_v26 = vadd.f32 %v2227_v17, %v9946_v42  ;;  %v2485_v27 = vadd.f32 %v2484_v18, %v9946_v42  ;;  %v2229_v28 = vpop.f32.mrb[149].mxu0  ;;  %v2486_v29 = vpop.f32.mrb[149].mxu1  ;;  %3723 = vmatprep.subr.bf16.mxu0 %v8824_v10  ;;  %3980 = vmatprep.subr.bf16.mxu1 %v8824_v10  ;;  %v8831_v10 = vld [vmem:[#allocation10 + $0xb0] ss:$8 sps:$4 sm:$0xff]  }
 0x3c2   :  { %v2230_v31 = vadd.f32 %v2229_v28, %v9949_v43  ;;  %v2487_v24 = vadd.f32 %v2486_v29, %v9949_v43  ;;  %v2231_v32 = vpop.f32.mrb[150].mxu0  ;;  %v2488_v25 = vpop.f32.mrb[150].mxu1  ;;  %2997 = vmatprep.mubr.bf16.mxu0 %v2666_v19  ;;  %3254 = vmatprep.mubr.bf16.mxu1 %v2698_v20 }
 0x3c3   :  { %v2232_v35 = vadd.f32 %v2231_v32, %v9946_v42  ;;  %v2489_v36 = vadd.f32 %v2488_v25, %v9946_v42  ;;  %v2233_v37 = vpop.f32.mrb[151].mxu0  ;;  %v2490_v38 = vpop.f32.mrb[151].mxu1  ;;  %2998 = vmatmul.mubr.bf16.gmra.mrb[208].mxu0 %v2665_v15  ;;  %3255 = vmatmul.mubr.bf16.gmra.mrb[208].mxu1 %v2697_v16  ;;  %v2356_v41 = vmax.f32 %v2228_v26, 0.0  ;;  %v2613_v34 = vmax.f32 %v2485_v27, 0.0  ;;  %v8836_v15 = vld [vmem:[#allocation10 + $0xc4] ss:$8 sps:$4 sm:$0xff]  }
 0x3c4   :  { %v2234_v39 = vadd.f32 %v2233_v37, %v9949_v43  ;;  %v2491_v40 = vadd.f32 %v2490_v38, %v9949_v43  ;;  %3724 = vmatpush1.bf16.msra.mxu0 %v8822_v22  ;;  %3981 = vmatpush1.bf16.msra.mxu1 %v8822_v22  ;;  %v2357_v47 = vmax.f32 %v2230_v31, 0.0  ;;  %v2614_v48 = vmax.f32 %v2487_v24, 0.0 }
 0x3c5   :  { %v2358_v44 = vmax.f32 %v2232_v35, 0.0  ;;  %v2615_v45 = vmax.f32 %v2489_v36, 0.0  ;;  %3725 = vmatprep.subr.bf16.mxu0 %v8827_v30  ;;  %3982 = vmatprep.subr.bf16.mxu1 %v8827_v30  ;;  %v8834_v30 = vld [vmem:[#allocation10 + $0xc0] ss:$8 sps:$4 sm:$0xff]   ;;  %v8839_v35 = vld [vmem:[#allocation10 + $0xd4] ss:$8 sps:$4 sm:$0xff]  }
 0x3c6   :  { %v2359_v49 = vmax.f32 %v2234_v39, 0.0  ;;  %v2616_v50 = vmax.f32 %v2491_v40, 0.0 }
 0x3c7   :  { %v2667_v51 = vpack.c.bf16 %v2358_v44, %v2356_v41  ;;  %v2699_v52 = vpack.c.bf16 %v2615_v45, %v2613_v34 }
 0x3c8   :  { %v2237_v53 = vpop.f32.mrb[152].mxu0  ;;  %v2494_v54 = vpop.f32.mrb[152].mxu1  ;;  %v2668_v55 = vpack.c.bf16 %v2359_v49, %v2357_v47  ;;  %v2700_v56 = vpack.c.bf16 %v2616_v50, %v2614_v48  ;;  %3726 = vmatpush1.bf16.msra.mxu0 %v8825_v33  ;;  %3983 = vmatpush1.bf16.msra.mxu1 %v8825_v33 }
 0x3c9   :  { %v2238_v58 = vadd.f32 %v2237_v53, %v9946_v42  ;;  %v2495_v59 = vadd.f32 %v2494_v54, %v9946_v42  ;;  %v2239_v60 = vpop.f32.mrb[153].mxu0  ;;  %v2496_v61 = vpop.f32.mrb[153].mxu1  ;;  %3727 = vmatprep.subr.bf16.mxu0 %v8830_v46  ;;  %3984 = vmatprep.subr.bf16.mxu1 %v8830_v46  ;;  %v8837_v46 = vld [vmem:[#allocation10 + $0xd0] ss:$8 sps:$4 sm:$0xff]  }
 0x3ca   :  { %v2240_v63 = vadd.f32 %v2239_v60, %v9949_v43  ;;  %v2497_v1 = vadd.f32 %v2496_v61, %v9949_v43  ;;  %v2241_v2 = vpop.f32.mrb[154].mxu0  ;;  %v2498_v3 = vpop.f32.mrb[154].mxu1  ;;  %3007 = vmatprep.mubr.bf16.mxu0 %v2668_v55  ;;  %3264 = vmatprep.mubr.bf16.mxu1 %v2700_v56 }
 0x3cb   :  { %v2242_v4 = vadd.f32 %v2241_v2, %v9946_v42  ;;  %v2499_v5 = vadd.f32 %v2498_v3, %v9946_v42  ;;  %v2243_v6 = vpop.f32.mrb[155].mxu0  ;;  %v2500_v7 = vpop.f32.mrb[155].mxu1  ;;  %3008 = vmatmul.mubr.bf16.gmra.mrb[212].mxu0 %v2667_v51  ;;  %3265 = vmatmul.mubr.bf16.gmra.mrb[212].mxu1 %v2699_v52  ;;  %v2360_v11 = vmax.f32 %v2238_v58, 0.0  ;;  %v2617_v12 = vmax.f32 %v2495_v59, 0.0  ;;  %v8842_v51 = vld [vmem:[#allocation10 + $0xe4] ss:$8 sps:$4 sm:$0xff]  }
 0x3cc   :  { %v2244_v8 = vadd.f32 %v2243_v6, %v9949_v43  ;;  %v2501_v9 = vadd.f32 %v2500_v7, %v9949_v43  ;;  %3728 = vmatpush1.bf16.msra.mxu0 %v8828_v57  ;;  %3985 = vmatpush1.bf16.msra.mxu1 %v8828_v57  ;;  %v2361_v16 = vmax.f32 %v2240_v63, 0.0  ;;  %v2618_v17 = vmax.f32 %v2497_v1, 0.0 }
 0x3cd   :  { %v2362_v13 = vmax.f32 %v2242_v4, 0.0  ;;  %v2619_v14 = vmax.f32 %v2499_v5, 0.0  ;;  %3729 = vmatprep.subr.bf16.mxu0 %v8833_v62  ;;  %3986 = vmatprep.subr.bf16.mxu1 %v8833_v62  ;;  %v8840_v62 = vld [vmem:[#allocation10 + $0xe0] ss:$8 sps:$4 sm:$0xff]  }
 0x3ce   :  { %v2363_v18 = vmax.f32 %v2244_v8, 0.0  ;;  %v2620_v19 = vmax.f32 %v2501_v9, 0.0 }
 0x3cf   :  { %v2669_v20 = vpack.c.bf16 %v2362_v13, %v2360_v11  ;;  %v2701_v22 = vpack.c.bf16 %v2619_v14, %v2617_v12 }
 0x3d0   :  { %v2247_v26 = vpop.f32.mrb[156].mxu0  ;;  %v2504_v27 = vpop.f32.mrb[156].mxu1  ;;  %v2670_v28 = vpack.c.bf16 %v2363_v18, %v2361_v16  ;;  %v2702_v29 = vpack.c.bf16 %v2620_v19, %v2618_v17  ;;  %3730 = vmatpush1.bf16.msra.mxu0 %v8831_v10  ;;  %3987 = vmatpush1.bf16.msra.mxu1 %v8831_v10 }
 0x3d1   :  { %v2248_v31 = vadd.f32 %v2247_v26, %v9946_v42  ;;  %v2505_v24 = vadd.f32 %v2504_v27, %v9946_v42  ;;  %v2249_v32 = vpop.f32.mrb[157].mxu0  ;;  %v2506_v25 = vpop.f32.mrb[157].mxu1  ;;  %3731 = vmatprep.subr.bf16.mxu0 %v8836_v15  ;;  %3988 = vmatprep.subr.bf16.mxu1 %v8836_v15 }
 0x3d2   :  { %v2250_v36 = vadd.f32 %v2249_v32, %v9949_v43  ;;  %v2507_v37 = vadd.f32 %v2506_v25, %v9949_v43  ;;  %v2251_v38 = vpop.f32.mrb[158].mxu0  ;;  %v2508_v39 = vpop.f32.mrb[158].mxu1  ;;  %3017 = vmatprep.mubr.bf16.mxu0 %v2670_v28  ;;  %3274 = vmatprep.mubr.bf16.mxu1 %v2702_v29 }
 0x3d3   :  { %v2252_v40 = vadd.f32 %v2251_v38, %v9946_v42  ;;  %v2509_v33 = vadd.f32 %v2508_v39, %v9946_v42  ;;  %v2253_v41 = vpop.f32.mrb[159].mxu0  ;;  %v2510_v34 = vpop.f32.mrb[159].mxu1  ;;  %3018 = vmatmul.mubr.bf16.gmra.mrb[216].mxu0 %v2669_v20  ;;  %3275 = vmatmul.mubr.bf16.gmra.mrb[216].mxu1 %v2701_v22  ;;  %v2364_v47 = vmax.f32 %v2248_v31, 0.0  ;;  %v2621_v48 = vmax.f32 %v2505_v24, 0.0 }
 0x3d4   :  { %v2254_v44 = vadd.f32 %v2253_v41, %v9949_v43  ;;  %v2511_v45 = vadd.f32 %v2510_v34, %v9949_v43  ;;  %3732 = vmatpush1.bf16.msra.mxu0 %v8834_v30  ;;  %3989 = vmatpush1.bf16.msra.mxu1 %v8834_v30  ;;  %v2365_v52 = vmax.f32 %v2250_v36, 0.0  ;;  %v2622_v53 = vmax.f32 %v2507_v37, 0.0 }
 0x3d5   :  { %v2366_v49 = vmax.f32 %v2252_v40, 0.0  ;;  %v2623_v50 = vmax.f32 %v2509_v33, 0.0  ;;  %3733 = vmatprep.subr.bf16.mxu0 %v8839_v35  ;;  %3990 = vmatprep.subr.bf16.mxu1 %v8839_v35 }
 0x3d6   :  { %v2367_v54 = vmax.f32 %v2254_v44, 0.0  ;;  %v2624_v55 = vmax.f32 %v2511_v45, 0.0 }
 0x3d7   :  { %v2671_v56 = vpack.c.bf16 %v2366_v49, %v2364_v47  ;;  %v2703_v57 = vpack.c.bf16 %v2623_v50, %v2621_v48 }
 0x3d8   :  { %v2257_v58 = vpop.f32.mrb[160].mxu0  ;;  %v2514_v59 = vpop.f32.mrb[160].mxu1  ;;  %v2672_v60 = vpack.c.bf16 %v2367_v54, %v2365_v52  ;;  %v2704_v61 = vpack.c.bf16 %v2624_v55, %v2622_v53  ;;  %3734 = vmatpush1.bf16.msra.mxu0 %v8837_v46  ;;  %3991 = vmatpush1.bf16.msra.mxu1 %v8837_v46 }
 0x3d9   :  { %v2258_v63 = vadd.f32 %v2257_v58, %v9946_v42  ;;  %v2515_v1 = vadd.f32 %v2514_v59, %v9946_v42  ;;  %v2259_v2 = vpop.f32.mrb[161].mxu0  ;;  %v2516_v3 = vpop.f32.mrb[161].mxu1  ;;  %3735 = vmatprep.subr.bf16.mxu0 %v8842_v51  ;;  %3992 = vmatprep.subr.bf16.mxu1 %v8842_v51 }
 0x3da   :  { %v2260_v4 = vadd.f32 %v2259_v2, %v9949_v43  ;;  %v2517_v5 = vadd.f32 %v2516_v3, %v9949_v43  ;;  %v2261_v6 = vpop.f32.mrb[162].mxu0  ;;  %v2518_v7 = vpop.f32.mrb[162].mxu1  ;;  %3027 = vmatprep.mubr.bf16.mxu0 %v2672_v60  ;;  %3284 = vmatprep.mubr.bf16.mxu1 %v2704_v61 }
 0x3db   :  { %v2262_v8 = vadd.f32 %v2261_v6, %v9946_v42  ;;  %v2519_v9 = vadd.f32 %v2518_v7, %v9946_v42  ;;  %v2263_v10 = vpop.f32.mrb[163].mxu0  ;;  %v2520_v11 = vpop.f32.mrb[163].mxu1  ;;  %3028 = vmatmul.mubr.bf16.gmra.mrb[220].mxu0 %v2671_v56  ;;  %3285 = vmatmul.mubr.bf16.gmra.mrb[220].mxu1 %v2703_v57  ;;  %v2368_v14 = vmax.f32 %v2258_v63, 0.0  ;;  %v2625_v15 = vmax.f32 %v2515_v1, 0.0 }
 0x3dc   :  { %v2264_v12 = vadd.f32 %v2263_v10, %v9949_v43  ;;  %v2521_v13 = vadd.f32 %v2520_v11, %v9949_v43  ;;  %3736 = vmatpush1.bf16.msra.mxu0 %v8840_v62  ;;  %3993 = vmatpush1.bf16.msra.mxu1 %v8840_v62  ;;  %v2369_v18 = vmax.f32 %v2260_v4, 0.0  ;;  %v2626_v19 = vmax.f32 %v2517_v5, 0.0 }
 0x3dd   :  { %v2370_v16 = vmax.f32 %v2262_v8, 0.0  ;;  %v2627_v17 = vmax.f32 %v2519_v9, 0.0 }
 0x3de   :  { %v2371_v20 = vmax.f32 %v2264_v12, 0.0  ;;  %v2628_v22 = vmax.f32 %v2521_v13, 0.0 }
 0x3df   :  { %v2673_v26 = vpack.c.bf16 %v2370_v16, %v2368_v14  ;;  %v2705_v27 = vpack.c.bf16 %v2627_v17, %v2625_v15 }
 0x3e0   :  { %v2267_v28 = vpop.f32.mrb[164].mxu0  ;;  %v2524_v29 = vpop.f32.mrb[164].mxu1  ;;  %v2674_v30 = vpack.c.bf16 %v2371_v20, %v2369_v18  ;;  %v2706_v31 = vpack.c.bf16 %v2628_v22, %v2626_v19 }
 0x3e1   :  { %v2268_v24 = vadd.f32 %v2267_v28, %v9946_v42  ;;  %v2525_v32 = vadd.f32 %v2524_v29, %v9946_v42  ;;  %v2269_v25 = vpop.f32.mrb[165].mxu0  ;;  %v2526_v35 = vpop.f32.mrb[165].mxu1 }
 0x3e2   :  { %v2270_v36 = vadd.f32 %v2269_v25, %v9949_v43  ;;  %v2527_v37 = vadd.f32 %v2526_v35, %v9949_v43  ;;  %v2271_v38 = vpop.f32.mrb[166].mxu0  ;;  %v2528_v39 = vpop.f32.mrb[166].mxu1  ;;  %3037 = vmatprep.mubr.bf16.mxu0 %v2674_v30  ;;  %3294 = vmatprep.mubr.bf16.mxu1 %v2706_v31 }
 0x3e3   :  { %v2272_v40 = vadd.f32 %v2271_v38, %v9946_v42  ;;  %v2529_v33 = vadd.f32 %v2528_v39, %v9946_v42  ;;  %v2273_v41 = vpop.f32.mrb[167].mxu0  ;;  %v2530_v34 = vpop.f32.mrb[167].mxu1  ;;  %3038 = vmatmul.mubr.bf16.gmra.mrb[224].mxu0 %v2673_v26  ;;  %3295 = vmatmul.mubr.bf16.gmra.mrb[224].mxu1 %v2705_v27  ;;  %v2372_v46 = vmax.f32 %v2268_v24, 0.0  ;;  %v2629_v47 = vmax.f32 %v2525_v32, 0.0 }
 0x3e4   :  { %v2274_v44 = vadd.f32 %v2273_v41, %v9949_v43  ;;  %v2531_v45 = vadd.f32 %v2530_v34, %v9949_v43  ;;  %v2373_v50 = vmax.f32 %v2270_v36, 0.0  ;;  %v2630_v51 = vmax.f32 %v2527_v37, 0.0 }
 0x3e5   :  { %v2374_v48 = vmax.f32 %v2272_v40, 0.0  ;;  %v2631_v49 = vmax.f32 %v2529_v33, 0.0 }
 0x3e6   :  { %v2375_v52 = vmax.f32 %v2274_v44, 0.0  ;;  %v2632_v53 = vmax.f32 %v2531_v45, 0.0 }
 0x3e7   :  { %v2675_v54 = vpack.c.bf16 %v2374_v48, %v2372_v46  ;;  %v2707_v55 = vpack.c.bf16 %v2631_v49, %v2629_v47 }
 0x3e8   :  { %v2277_v56 = vpop.f32.mrb[168].mxu0  ;;  %v2534_v57 = vpop.f32.mrb[168].mxu1  ;;  %v2676_v58 = vpack.c.bf16 %v2375_v52, %v2373_v50  ;;  %v2708_v59 = vpack.c.bf16 %v2632_v53, %v2630_v51 }
 0x3e9   :  { %v2278_v60 = vadd.f32 %v2277_v56, %v9946_v42  ;;  %v2535_v61 = vadd.f32 %v2534_v57, %v9946_v42  ;;  %v2279_v62 = vpop.f32.mrb[169].mxu0  ;;  %v2536_v63 = vpop.f32.mrb[169].mxu1 }
 0x3ea   :  { %v2280_v1 = vadd.f32 %v2279_v62, %v9949_v43  ;;  %v2537_v2 = vadd.f32 %v2536_v63, %v9949_v43  ;;  %v2281_v3 = vpop.f32.mrb[170].mxu0  ;;  %v2538_v4 = vpop.f32.mrb[170].mxu1  ;;  %3047 = vmatprep.mubr.bf16.mxu0 %v2676_v58  ;;  %3304 = vmatprep.mubr.bf16.mxu1 %v2708_v59 }
 0x3eb   :  { %v2282_v5 = vadd.f32 %v2281_v3, %v9946_v42  ;;  %v2539_v6 = vadd.f32 %v2538_v4, %v9946_v42  ;;  %v2283_v7 = vpop.f32.mrb[171].mxu0  ;;  %v2540_v8 = vpop.f32.mrb[171].mxu1  ;;  %3048 = vmatmul.mubr.bf16.gmra.mrb[228].mxu0 %v2675_v54  ;;  %3305 = vmatmul.mubr.bf16.gmra.mrb[228].mxu1 %v2707_v55  ;;  %v2376_v11 = vmax.f32 %v2278_v60, 0.0  ;;  %v2633_v12 = vmax.f32 %v2535_v61, 0.0 }
 0x3ec   :  { %v2284_v9 = vadd.f32 %v2283_v7, %v9949_v43  ;;  %v2541_v10 = vadd.f32 %v2540_v8, %v9949_v43  ;;  %v2377_v15 = vmax.f32 %v2280_v1, 0.0  ;;  %v2634_v16 = vmax.f32 %v2537_v2, 0.0 }
 0x3ed   :  { %v2378_v13 = vmax.f32 %v2282_v5, 0.0  ;;  %v2635_v14 = vmax.f32 %v2539_v6, 0.0  ;;  %v8845_v6 = vld [vmem:[#allocation10 + $0xf4] ss:$8 sps:$4 sm:$0xff]  }
 0x3ee   :  { %v2379_v17 = vmax.f32 %v2284_v9, 0.0  ;;  %v2636_v18 = vmax.f32 %v2541_v10, 0.0  ;;  %v8843_v9 = vld [vmem:[#allocation10 + $0xf0] ss:$8 sps:$4 sm:$0xff]   ;;  %3737 = vmatprep.subr.bf16.mxu0 %v8845_v6  ;;  %3994 = vmatprep.subr.bf16.mxu1 %v8845_v6 }
 0x3ef   :  { %v2677_v19 = vpack.c.bf16 %v2378_v13, %v2376_v11  ;;  %v2709_v20 = vpack.c.bf16 %v2635_v14, %v2633_v12  ;;  %3738 = vmatpush1.bf16.msra.mxu0 %v8843_v9  ;;  %3995 = vmatpush1.bf16.msra.mxu1 %v8843_v9 }
 0x3f0   :  { %v2287_v22 = vpop.f32.mrb[172].mxu0  ;;  %v2544_v26 = vpop.f32.mrb[172].mxu1  ;;  %v2678_v27 = vpack.c.bf16 %v2379_v17, %v2377_v15  ;;  %v2710_v28 = vpack.c.bf16 %v2636_v18, %v2634_v16 }
 0x3f1   :  { %v2288_v29 = vadd.f32 %v2287_v22, %v9946_v42  ;;  %v2545_v30 = vadd.f32 %v2544_v26, %v9946_v42  ;;  %v2289_v31 = vpop.f32.mrb[173].mxu0  ;;  %v2546_v24 = vpop.f32.mrb[173].mxu1 }
 0x3f2   :  { %v2290_v32 = vadd.f32 %v2289_v31, %v9949_v43  ;;  %v2547_v25 = vadd.f32 %v2546_v24, %v9949_v43  ;;  %v2291_v35 = vpop.f32.mrb[174].mxu0  ;;  %v2548_v36 = vpop.f32.mrb[174].mxu1  ;;  %3057 = vmatprep.mubr.bf16.mxu0 %v2678_v27  ;;  %3314 = vmatprep.mubr.bf16.mxu1 %v2710_v28 }
 0x3f3   :  { %v2292_v37 = vadd.f32 %v2291_v35, %v9946_v42  ;;  %v2549_v38 = vadd.f32 %v2548_v36, %v9946_v42  ;;  %v2293_v39 = vpop.f32.mrb[175].mxu0  ;;  %v2550_v40 = vpop.f32.mrb[175].mxu1  ;;  %3058 = vmatmul.mubr.bf16.gmra.mrb[232].mxu0 %v2677_v19  ;;  %3315 = vmatmul.mubr.bf16.gmra.mrb[232].mxu1 %v2709_v20  ;;  %v2380_v34 = vmax.f32 %v2288_v29, 0.0  ;;  %v2637_v44 = vmax.f32 %v2545_v30, 0.0 }
 0x3f4   :  { %v2294_v33 = vadd.f32 %v2293_v39, %v9949_v43  ;;  %v2551_v41 = vadd.f32 %v2550_v40, %v9949_v43  ;;  %v2381_v47 = vmax.f32 %v2290_v32, 0.0  ;;  %v2638_v48 = vmax.f32 %v2547_v25, 0.0 }
 0x3f5   :  { %v2382_v45 = vmax.f32 %v2292_v37, 0.0  ;;  %v2639_v46 = vmax.f32 %v2549_v38, 0.0 }
 0x3f6   :  { %v2383_v49 = vmax.f32 %v2294_v33, 0.0  ;;  %v2640_v50 = vmax.f32 %v2551_v41, 0.0 }
 0x3f7   :  { %v2679_v51 = vpack.c.bf16 %v2382_v45, %v2380_v34  ;;  %v2711_v52 = vpack.c.bf16 %v2639_v46, %v2637_v44  ;;  %v8848_v46 = vld [vmem:[#allocation16 + $0x4] ss:$8 sps:$4 sm:$0xff]  }
 0x3f8   :  { %v2297_v53 = vpop.f32.mrb[176].mxu0  ;;  %v2554_v54 = vpop.f32.mrb[176].mxu1  ;;  %v2680_v55 = vpack.c.bf16 %v2383_v49, %v2381_v47  ;;  %v2712_v56 = vpack.c.bf16 %v2640_v50, %v2638_v48  ;;  %4413 = vmatprep.subr.bf16.mxu0 %v8848_v46  ;;  %4959 = vmatprep.subr.bf16.mxu1 %v8848_v46 }
 0x3f9   :  { %v2298_v57 = vadd.f32 %v2297_v53, %v9946_v42  ;;  %v2555_v58 = vadd.f32 %v2554_v54, %v9946_v42  ;;  %v2299_v59 = vpop.f32.mrb[177].mxu0  ;;  %v2556_v60 = vpop.f32.mrb[177].mxu1 }
 0x3fa   :  { %v2300_v61 = vadd.f32 %v2299_v59, %v9949_v43  ;;  %v2557_v62 = vadd.f32 %v2556_v60, %v9949_v43  ;;  %v2301_v63 = vpop.f32.mrb[178].mxu0  ;;  %v2558_v1 = vpop.f32.mrb[178].mxu1  ;;  %3067 = vmatprep.mubr.bf16.mxu0 %v2680_v55  ;;  %3324 = vmatprep.mubr.bf16.mxu1 %v2712_v56 }
 0x3fb   :  { %v2302_v2 = vadd.f32 %v2301_v63, %v9946_v42  ;;  %v2559_v3 = vadd.f32 %v2558_v1, %v9946_v42  ;;  %v2303_v4 = vpop.f32.mrb[179].mxu0  ;;  %v2560_v5 = vpop.f32.mrb[179].mxu1  ;;  %3068 = vmatmul.mubr.bf16.gmra.mrb[236].mxu0 %v2679_v51  ;;  %3325 = vmatmul.mubr.bf16.gmra.mrb[236].mxu1 %v2711_v52  ;;  %v2384_v10 = vmax.f32 %v2298_v57, 0.0  ;;  %v2641_v11 = vmax.f32 %v2555_v58, 0.0 }
 0x3fc   :  { %v2304_v7 = vadd.f32 %v2303_v4, %v9949_v43  ;;  %v2561_v8 = vadd.f32 %v2560_v5, %v9949_v43  ;;  %v2385_v14 = vmax.f32 %v2300_v61, 0.0  ;;  %v2642_v15 = vmax.f32 %v2557_v62, 0.0 }
 0x3fd   :  { %v2386_v12 = vmax.f32 %v2302_v2, 0.0  ;;  %v2643_v13 = vmax.f32 %v2559_v3, 0.0 }
 0x3fe   :  { %v2387_v16 = vmax.f32 %v2304_v7, 0.0  ;;  %v2644_v17 = vmax.f32 %v2561_v8, 0.0 }
 0x3ff   :  { %v2681_v18 = vpack.c.bf16 %v2386_v12, %v2384_v10  ;;  %v2713_v19 = vpack.c.bf16 %v2643_v13, %v2641_v11 }
 0x400   :  { %v2307_v20 = vpop.f32.mrb[180].mxu0  ;;  %v2564_v22 = vpop.f32.mrb[180].mxu1  ;;  %v2682_v26 = vpack.c.bf16 %v2387_v16, %v2385_v14  ;;  %v2714_v27 = vpack.c.bf16 %v2644_v17, %v2642_v15 }
 0x401   :  { %v2308_v28 = vadd.f32 %v2307_v20, %v9946_v42  ;;  %v2565_v29 = vadd.f32 %v2564_v22, %v9946_v42  ;;  %v2309_v30 = vpop.f32.mrb[181].mxu0  ;;  %v2566_v31 = vpop.f32.mrb[181].mxu1 }
 0x402   :  { %v2310_v24 = vadd.f32 %v2309_v30, %v9949_v43  ;;  %v2567_v32 = vadd.f32 %v2566_v31, %v9949_v43  ;;  %v2311_v25 = vpop.f32.mrb[182].mxu0  ;;  %v2568_v35 = vpop.f32.mrb[182].mxu1  ;;  %3077 = vmatprep.mubr.bf16.mxu0 %v2682_v26  ;;  %3334 = vmatprep.mubr.bf16.mxu1 %v2714_v27 }
 0x403   :  { %v2312_v36 = vadd.f32 %v2311_v25, %v9946_v42  ;;  %v2569_v37 = vadd.f32 %v2568_v35, %v9946_v42  ;;  %v2313_v38 = vpop.f32.mrb[183].mxu0  ;;  %v2570_v39 = vpop.f32.mrb[183].mxu1  ;;  %3078 = vmatmul.mubr.bf16.gmra.mrb[240].mxu0 %v2681_v18  ;;  %3335 = vmatmul.mubr.bf16.gmra.mrb[240].mxu1 %v2713_v19  ;;  %v2388_v41 = vmax.f32 %v2308_v28, 0.0  ;;  %v2645_v34 = vmax.f32 %v2565_v29, 0.0 }
 0x404   :  { %v2314_v40 = vadd.f32 %v2313_v38, %v9949_v43  ;;  %v2571_v33 = vadd.f32 %v2570_v39, %v9949_v43  ;;  %v2389_v47 = vmax.f32 %v2310_v24, 0.0  ;;  %v2646_v48 = vmax.f32 %v2567_v32, 0.0 }
 0x405   :  { %v2390_v44 = vmax.f32 %v2312_v36, 0.0  ;;  %v2647_v45 = vmax.f32 %v2569_v37, 0.0 }
 0x406   :  { %v2391_v49 = vmax.f32 %v2314_v40, 0.0  ;;  %v2648_v50 = vmax.f32 %v2571_v33, 0.0 }
 0x407   :  { %v2683_v51 = vpack.c.bf16 %v2390_v44, %v2388_v41  ;;  %v2715_v52 = vpack.c.bf16 %v2647_v45, %v2645_v34 }
 0x408   :  { %v2317_v53 = vpop.f32.mrb[184].mxu0  ;;  %v2574_v54 = vpop.f32.mrb[184].mxu1  ;;  %v2684_v55 = vpack.c.bf16 %v2391_v49, %v2389_v47  ;;  %v2716_v56 = vpack.c.bf16 %v2648_v50, %v2646_v48 }
 0x409   :  { %v2318_v57 = vadd.f32 %v2317_v53, %v9946_v42  ;;  %v2575_v58 = vadd.f32 %v2574_v54, %v9946_v42  ;;  %v2319_v59 = vpop.f32.mrb[185].mxu0  ;;  %v2576_v60 = vpop.f32.mrb[185].mxu1 }
 0x40a   :  { %v2320_v61 = vadd.f32 %v2319_v59, %v9949_v43  ;;  %v2577_v62 = vadd.f32 %v2576_v60, %v9949_v43  ;;  %v2321_v63 = vpop.f32.mrb[186].mxu0  ;;  %v2578_v1 = vpop.f32.mrb[186].mxu1  ;;  %3087 = vmatprep.mubr.bf16.mxu0 %v2684_v55  ;;  %3344 = vmatprep.mubr.bf16.mxu1 %v2716_v56 }
 0x40b   :  { %v2322_v2 = vadd.f32 %v2321_v63, %v9946_v42  ;;  %v2579_v3 = vadd.f32 %v2578_v1, %v9946_v42  ;;  %v2323_v4 = vpop.f32.mrb[187].mxu0  ;;  %v2580_v5 = vpop.f32.mrb[187].mxu1  ;;  %3088 = vmatmul.mubr.bf16.gmra.mrb[244].mxu0 %v2683_v51  ;;  %3345 = vmatmul.mubr.bf16.gmra.mrb[244].mxu1 %v2715_v52  ;;  %v2392_v8 = vmax.f32 %v2318_v57, 0.0  ;;  %v2649_v9 = vmax.f32 %v2575_v58, 0.0 }
 0x40c   :  { %v2324_v6 = vadd.f32 %v2323_v4, %v9949_v43  ;;  %v2581_v7 = vadd.f32 %v2580_v5, %v9949_v43  ;;  %v2393_v12 = vmax.f32 %v2320_v61, 0.0  ;;  %v2650_v13 = vmax.f32 %v2577_v62, 0.0 }
 0x40d   :  { %v2394_v10 = vmax.f32 %v2322_v2, 0.0  ;;  %v2651_v11 = vmax.f32 %v2579_v3, 0.0 }
 0x40e   :  { %v2395_v14 = vmax.f32 %v2324_v6, 0.0  ;;  %v2652_v15 = vmax.f32 %v2581_v7, 0.0 }
 0x40f   :  { %v2685_v16 = vpack.c.bf16 %v2394_v10, %v2392_v8  ;;  %v2717_v17 = vpack.c.bf16 %v2651_v11, %v2649_v9 }
 0x410   :  { %v2327_v18 = vpop.f32.mrb[188].mxu0  ;;  %v2584_v19 = vpop.f32.mrb[188].mxu1  ;;  %v2686_v20 = vpack.c.bf16 %v2395_v14, %v2393_v12  ;;  %v2718_v22 = vpack.c.bf16 %v2652_v15, %v2650_v13 }
 0x411   :  { %v2328_v26 = vadd.f32 %v2327_v18, %v9946_v42  ;;  %v2585_v27 = vadd.f32 %v2584_v19, %v9946_v42  ;;  %v2329_v28 = vpop.f32.mrb[189].mxu0  ;;  %v2586_v29 = vpop.f32.mrb[189].mxu1 }
 0x412   :  { %v2330_v30 = vadd.f32 %v2329_v28, %v9949_v43  ;;  %v2587_v31 = vadd.f32 %v2586_v29, %v9949_v43  ;;  %v2331_v24 = vpop.f32.mrb[190].mxu0  ;;  %v2588_v32 = vpop.f32.mrb[190].mxu1  ;;  %3097 = vmatprep.mubr.bf16.mxu0 %v2686_v20  ;;  %3354 = vmatprep.mubr.bf16.mxu1 %v2718_v22  ;;  %v8846_v20 = vld [vmem:[#allocation16] ss:$8 sps:$4 sm:$0xff]   ;;  %v8851_v29 = vld [vmem:[#allocation16 + $0x14] ss:$8 sps:$4 sm:$0xff]  }
 0x413   :  { %v2332_v25 = vadd.f32 %v2331_v24, %v9946_v42  ;;  %v2589_v35 = vadd.f32 %v2588_v32, %v9946_v42  ;;  %v2333_v36 = vpop.f32.mrb[191].mxu0  ;;  %v2590_v37 = vpop.f32.mrb[191].mxu1  ;;  %3098 = vmatmul.mubr.bf16.gmra.mrb[248].mxu0 %v2685_v16  ;;  %3355 = vmatmul.mubr.bf16.gmra.mrb[248].mxu1 %v2717_v17  ;;  %v2396_v40 = vmax.f32 %v2328_v26, 0.0  ;;  %v2653_v33 = vmax.f32 %v2585_v27, 0.0 }
 0x414   :  { %v2334_v38 = vadd.f32 %v2333_v36, %v9949_v43  ;;  %v2591_v39 = vadd.f32 %v2590_v37, %v9949_v43  ;;  %v2397_v44 = vmax.f32 %v2330_v30, 0.0  ;;  %v2654_v45 = vmax.f32 %v2587_v31, 0.0  ;;  %v2753_v43 = vld [vmem:[%s11301_s12] sm:$0x3] }
 0x415   :  { %v2398_v41 = vmax.f32 %v2332_v25, 0.0  ;;  %v2655_v34 = vmax.f32 %v2589_v35, 0.0  ;;  %v10083_v51 = vrot.slane %v2753_v43, %v9664_v21  ;;  %v10086_v52 = vrot.slane %v2753_v43, %v9669_v23 }
 0x416   :  { %v2399_v46 = vmax.f32 %v2334_v38, 0.0  ;;  %v2656_v47 = vmax.f32 %v2591_v39, 0.0 }
 0x417   :  { %v2687_v48 = vpack.c.bf16 %v2398_v41, %v2396_v40  ;;  %v2719_v49 = vpack.c.bf16 %v2655_v34, %v2653_v33  ;;  %v8849_v40 = vld [vmem:[#allocation16 + $0x10] ss:$8 sps:$4 sm:$0xff]  }
 0x418   :  { %v2688_v50 = vpack.c.bf16 %v2399_v46, %v2397_v44  ;;  %v2720_v42 = vpack.c.bf16 %v2656_v47, %v2654_v45  ;;  %v8854_v45 = vld [vmem:[#allocation16 + $0x24] ss:$8 sps:$4 sm:$0xff]  }
 0x41a   :  { %3107 = vmatprep.mubr.bf16.mxu0 %v2688_v50  ;;  %3364 = vmatprep.mubr.bf16.mxu1 %v2720_v42 }
 0x41b   :  { %3108 = vmatmul.mubr.bf16.gmra.mrb[252].mxu0 %v2687_v48  ;;  %3365 = vmatmul.mubr.bf16.gmra.mrb[252].mxu1 %v2719_v49 }
 0x476   :  { %v2959_v53 = vpop.f32.mrb[192].mxu0  ;;  %v3216_v54 = vpop.f32.mrb[192].mxu1 }
 0x477   :  { %v2960_v55 = vadd.f32 %v2959_v53, %v10083_v51  ;;  %v3217_v56 = vadd.f32 %v3216_v54, %v10083_v51  ;;  %v2961_v57 = vpop.f32.mrb[193].mxu0  ;;  %v3218_v58 = vpop.f32.mrb[193].mxu1 }
 0x478   :  { %v2962_v59 = vadd.f32 %v2961_v57, %v10086_v52  ;;  %v3219_v60 = vadd.f32 %v3218_v58, %v10086_v52  ;;  %v2963_v61 = vpop.f32.mrb[194].mxu0  ;;  %v3220_v62 = vpop.f32.mrb[194].mxu1 }
 0x479   :  { %v2964_v63 = vadd.f32 %v2963_v61, %v10083_v51  ;;  %v3221_v1 = vadd.f32 %v3220_v62, %v10083_v51  ;;  %v2965_v2 = vpop.f32.mrb[195].mxu0  ;;  %v3222_v3 = vpop.f32.mrb[195].mxu1  ;;  %v3118_v6 = vmax.f32 %v2960_v55, 0.0  ;;  %v3375_v7 = vmax.f32 %v3217_v56, 0.0  ;;  %v8852_v56 = vld [vmem:[#allocation16 + $0x20] ss:$8 sps:$4 sm:$0xff]  }
 0x47a   :  { %v2966_v4 = vadd.f32 %v2965_v2, %v10086_v52  ;;  %v3223_v5 = vadd.f32 %v3222_v3, %v10086_v52  ;;  %v3119_v10 = vmax.f32 %v2962_v59, 0.0  ;;  %v3376_v11 = vmax.f32 %v3219_v60, 0.0  ;;  %v8857_v61 = vld [vmem:[#allocation16 + $0x34] ss:$8 sps:$4 sm:$0xff]  }
 0x47b   :  { %v3120_v8 = vmax.f32 %v2964_v63, 0.0  ;;  %v3377_v9 = vmax.f32 %v3221_v1, 0.0 }
 0x47c   :  { %v3121_v12 = vmax.f32 %v2966_v4, 0.0  ;;  %v3378_v13 = vmax.f32 %v3223_v5, 0.0 }
 0x47d   :  { %v3439_v14 = vpack.c.bf16 %v3120_v8, %v3118_v6  ;;  %v3471_v15 = vpack.c.bf16 %v3377_v9, %v3375_v7  ;;  %v8855_v9 = vld [vmem:[#allocation16 + $0x30] ss:$8 sps:$4 sm:$0xff]  }
 0x47e   :  { %v2969_v16 = vpop.f32.mrb[196].mxu0  ;;  %v3226_v17 = vpop.f32.mrb[196].mxu1  ;;  %v3440_v18 = vpack.c.bf16 %v3121_v12, %v3119_v10  ;;  %v3472_v19 = vpack.c.bf16 %v3378_v13, %v3376_v11 }
 0x47f   :  { %v2970_v22 = vadd.f32 %v2969_v16, %v10083_v51  ;;  %v3227_v26 = vadd.f32 %v3226_v17, %v10083_v51  ;;  %v2971_v27 = vpop.f32.mrb[197].mxu0  ;;  %v3228_v28 = vpop.f32.mrb[197].mxu1 }
 0x480   :  { %v2972_v30 = vadd.f32 %v2971_v27, %v10086_v52  ;;  %v3229_v31 = vadd.f32 %v3228_v28, %v10086_v52  ;;  %v2973_v24 = vpop.f32.mrb[198].mxu0  ;;  %v3230_v32 = vpop.f32.mrb[198].mxu1  ;;  %3739 = vmatprep.mubr.bf16.mxu0 %v3440_v18  ;;  %3996 = vmatprep.mubr.bf16.mxu1 %v3472_v19 }
 0x481   :  { %v2974_v25 = vadd.f32 %v2973_v24, %v10083_v51  ;;  %v3231_v35 = vadd.f32 %v3230_v32, %v10083_v51  ;;  %v2975_v36 = vpop.f32.mrb[199].mxu0  ;;  %v3232_v37 = vpop.f32.mrb[199].mxu1  ;;  %3740 = vmatmul.mubr.bf16.vlgmr.msra.gmra.mrb[0].mxu0 %v3439_v14  ;;  %3997 = vmatmul.mubr.bf16.vlgmr.msra.gmra.mrb[0].mxu1 %v3471_v15  ;;  %v3122_v33 = vmax.f32 %v2970_v22, 0.0  ;;  %v3379_v41 = vmax.f32 %v3227_v26, 0.0  ;;  %v8860_v14 = vld [vmem:[#allocation16 + $0x44] ss:$8 sps:$4 sm:$0xff]  }
 0x482   :  { %v2976_v38 = vadd.f32 %v2975_v36, %v10086_v52  ;;  %v3233_v39 = vadd.f32 %v3232_v37, %v10086_v52  ;;  %4414 = vmatpush1.bf16.msra.mxu0 %v8846_v20  ;;  %4960 = vmatpush1.bf16.msra.mxu1 %v8846_v20  ;;  %v3123_v46 = vmax.f32 %v2972_v30, 0.0  ;;  %v3380_v47 = vmax.f32 %v3229_v31, 0.0 }
 0x483   :  { %v3124_v34 = vmax.f32 %v2974_v25, 0.0  ;;  %v3381_v44 = vmax.f32 %v3231_v35, 0.0  ;;  %4415 = vmatprep.subr.bf16.mxu0 %v8851_v29  ;;  %4961 = vmatprep.subr.bf16.mxu1 %v8851_v29  ;;  %v8858_v29 = vld [vmem:[#allocation16 + $0x40] ss:$8 sps:$4 sm:$0xff]   ;;  %v8863_v25 = vld [vmem:[#allocation16 + $0x54] ss:$8 sps:$4 sm:$0xff]  }
 0x484   :  { %v3125_v48 = vmax.f32 %v2976_v38, 0.0  ;;  %v3382_v49 = vmax.f32 %v3233_v39, 0.0 }
 0x485   :  { %v3441_v50 = vpack.c.bf16 %v3124_v34, %v3122_v33  ;;  %v3473_v42 = vpack.c.bf16 %v3381_v44, %v3379_v41 }
 0x486   :  { %v2979_v43 = vpop.f32.mrb[200].mxu0  ;;  %v3236_v53 = vpop.f32.mrb[200].mxu1  ;;  %v3442_v54 = vpack.c.bf16 %v3125_v48, %v3123_v46  ;;  %v3474_v55 = vpack.c.bf16 %v3382_v49, %v3380_v47  ;;  %4416 = vmatpush1.bf16.msra.mxu0 %v8849_v40  ;;  %4962 = vmatpush1.bf16.msra.mxu1 %v8849_v40 }
 0x487   :  { %v2980_v57 = vadd.f32 %v2979_v43, %v10083_v51  ;;  %v3237_v58 = vadd.f32 %v3236_v53, %v10083_v51  ;;  %v2981_v59 = vpop.f32.mrb[201].mxu0  ;;  %v3238_v60 = vpop.f32.mrb[201].mxu1  ;;  %4417 = vmatprep.subr.bf16.mxu0 %v8854_v45  ;;  %4963 = vmatprep.subr.bf16.mxu1 %v8854_v45  ;;  %v8861_v45 = vld [vmem:[#allocation16 + $0x50] ss:$8 sps:$4 sm:$0xff]  }
 0x488   :  { %v2982_v62 = vadd.f32 %v2981_v59, %v10086_v52  ;;  %v3239_v63 = vadd.f32 %v3238_v60, %v10086_v52  ;;  %v2983_v1 = vpop.f32.mrb[202].mxu0  ;;  %v3240_v2 = vpop.f32.mrb[202].mxu1  ;;  %3749 = vmatprep.mubr.bf16.mxu0 %v3442_v54  ;;  %4006 = vmatprep.mubr.bf16.mxu1 %v3474_v55 }
 0x489   :  { %v2984_v3 = vadd.f32 %v2983_v1, %v10083_v51  ;;  %v3241_v4 = vadd.f32 %v3240_v2, %v10083_v51  ;;  %v2985_v5 = vpop.f32.mrb[203].mxu0  ;;  %v3242_v6 = vpop.f32.mrb[203].mxu1  ;;  %3750 = vmatmul.mubr.bf16.gmra.mrb[4].mxu0 %v3441_v50  ;;  %4007 = vmatmul.mubr.bf16.gmra.mrb[4].mxu1 %v3473_v42  ;;  %v3126_v10 = vmax.f32 %v2980_v57, 0.0  ;;  %v3383_v11 = vmax.f32 %v3237_v58, 0.0  ;;  %v8866_v50 = vld [vmem:[#allocation16 + $0x64] ss:$8 sps:$4 sm:$0xff]  }
 0x48a   :  { %v2986_v7 = vadd.f32 %v2985_v5, %v10086_v52  ;;  %v3243_v8 = vadd.f32 %v3242_v6, %v10086_v52  ;;  %4418 = vmatpush1.bf16.msra.mxu0 %v8852_v56  ;;  %4964 = vmatpush1.bf16.msra.mxu1 %v8852_v56  ;;  %v3127_v15 = vmax.f32 %v2982_v62, 0.0  ;;  %v3384_v16 = vmax.f32 %v3239_v63, 0.0 }
 0x48b   :  { %v3128_v12 = vmax.f32 %v2984_v3, 0.0  ;;  %v3385_v13 = vmax.f32 %v3241_v4, 0.0  ;;  %4419 = vmatprep.subr.bf16.mxu0 %v8857_v61  ;;  %4965 = vmatprep.subr.bf16.mxu1 %v8857_v61  ;;  %v8864_v61 = vld [vmem:[#allocation16 + $0x60] ss:$8 sps:$4 sm:$0xff]   ;;  %v8869_v3 = vld [vmem:[#allocation16 + $0x74] ss:$8 sps:$4 sm:$0xff]  }
 0x48c   :  { %v3129_v17 = vmax.f32 %v2986_v7, 0.0  ;;  %v3386_v18 = vmax.f32 %v3243_v8, 0.0 }
 0x48d   :  { %v3443_v19 = vpack.c.bf16 %v3128_v12, %v3126_v10  ;;  %v3475_v20 = vpack.c.bf16 %v3385_v13, %v3383_v11 }
 0x48e   :  { %v2989_v22 = vpop.f32.mrb[204].mxu0  ;;  %v3246_v26 = vpop.f32.mrb[204].mxu1  ;;  %v3444_v27 = vpack.c.bf16 %v3129_v17, %v3127_v15  ;;  %v3476_v28 = vpack.c.bf16 %v3386_v18, %v3384_v16  ;;  %4420 = vmatpush1.bf16.msra.mxu0 %v8855_v9  ;;  %4966 = vmatpush1.bf16.msra.mxu1 %v8855_v9 }
 0x48f   :  { %v2990_v30 = vadd.f32 %v2989_v22, %v10083_v51  ;;  %v3247_v31 = vadd.f32 %v3246_v26, %v10083_v51  ;;  %v2991_v24 = vpop.f32.mrb[205].mxu0  ;;  %v3248_v32 = vpop.f32.mrb[205].mxu1  ;;  %4421 = vmatprep.subr.bf16.mxu0 %v8860_v14  ;;  %4967 = vmatprep.subr.bf16.mxu1 %v8860_v14  ;;  %v8867_v14 = vld [vmem:[#allocation16 + $0x70] ss:$8 sps:$4 sm:$0xff]  }
 0x490   :  { %v2992_v35 = vadd.f32 %v2991_v24, %v10086_v52  ;;  %v3249_v36 = vadd.f32 %v3248_v32, %v10086_v52  ;;  %v2993_v37 = vpop.f32.mrb[206].mxu0  ;;  %v3250_v38 = vpop.f32.mrb[206].mxu1  ;;  %3759 = vmatprep.mubr.bf16.mxu0 %v3444_v27  ;;  %4016 = vmatprep.mubr.bf16.mxu1 %v3476_v28 }
 0x491   :  { %v2994_v39 = vadd.f32 %v2993_v37, %v10083_v51  ;;  %v3251_v40 = vadd.f32 %v3250_v38, %v10083_v51  ;;  %v2995_v33 = vpop.f32.mrb[207].mxu0  ;;  %v3252_v41 = vpop.f32.mrb[207].mxu1  ;;  %3760 = vmatmul.mubr.bf16.gmra.mrb[8].mxu0 %v3443_v19  ;;  %4017 = vmatmul.mubr.bf16.gmra.mrb[8].mxu1 %v3475_v20  ;;  %v3130_v46 = vmax.f32 %v2990_v30, 0.0  ;;  %v3387_v47 = vmax.f32 %v3247_v31, 0.0  ;;  %v8872_v19 = vld [vmem:[#allocation12 + $0x4] ss:$8 sps:$4 sm:$0xff]  }
 0x492   :  { %v2996_v34 = vadd.f32 %v2995_v33, %v10086_v52  ;;  %v3253_v44 = vadd.f32 %v3252_v41, %v10086_v52  ;;  %4422 = vmatpush1.bf16.msra.mxu0 %v8858_v29  ;;  %4968 = vmatpush1.bf16.msra.mxu1 %v8858_v29  ;;  %v3131_v42 = vmax.f32 %v2992_v35, 0.0  ;;  %v3388_v43 = vmax.f32 %v3249_v36, 0.0 }
 0x493   :  { %v3132_v48 = vmax.f32 %v2994_v39, 0.0  ;;  %v3389_v49 = vmax.f32 %v3251_v40, 0.0  ;;  %4423 = vmatprep.subr.bf16.mxu0 %v8863_v25  ;;  %4969 = vmatprep.subr.bf16.mxu1 %v8863_v25 }
 0x494   :  { %v3133_v53 = vmax.f32 %v2996_v34, 0.0  ;;  %v3390_v54 = vmax.f32 %v3253_v44, 0.0 }
 0x495   :  { %v3445_v55 = vpack.c.bf16 %v3132_v48, %v3130_v46  ;;  %v3477_v56 = vpack.c.bf16 %v3389_v49, %v3387_v47 }
 0x496   :  { %v2999_v57 = vpop.f32.mrb[208].mxu0  ;;  %v3256_v58 = vpop.f32.mrb[208].mxu1  ;;  %v3446_v59 = vpack.c.bf16 %v3133_v53, %v3131_v42  ;;  %v3478_v60 = vpack.c.bf16 %v3390_v54, %v3388_v43  ;;  %4424 = vmatpush1.bf16.msra.mxu0 %v8861_v45  ;;  %4970 = vmatpush1.bf16.msra.mxu1 %v8861_v45 }
 0x497   :  { %v3000_v62 = vadd.f32 %v2999_v57, %v10083_v51  ;;  %v3257_v63 = vadd.f32 %v3256_v58, %v10083_v51  ;;  %v3001_v1 = vpop.f32.mrb[209].mxu0  ;;  %v3258_v2 = vpop.f32.mrb[209].mxu1  ;;  %4425 = vmatprep.subr.bf16.mxu0 %v8866_v50  ;;  %4971 = vmatprep.subr.bf16.mxu1 %v8866_v50 }
 0x498   :  { %v3002_v4 = vadd.f32 %v3001_v1, %v10086_v52  ;;  %v3259_v5 = vadd.f32 %v3258_v2, %v10086_v52  ;;  %v3003_v6 = vpop.f32.mrb[210].mxu0  ;;  %v3260_v7 = vpop.f32.mrb[210].mxu1  ;;  %3769 = vmatprep.mubr.bf16.mxu0 %v3446_v59  ;;  %4026 = vmatprep.mubr.bf16.mxu1 %v3478_v60 }
 0x499   :  { %v3004_v8 = vadd.f32 %v3003_v6, %v10083_v51  ;;  %v3261_v9 = vadd.f32 %v3260_v7, %v10083_v51  ;;  %v3005_v10 = vpop.f32.mrb[211].mxu0  ;;  %v3262_v11 = vpop.f32.mrb[211].mxu1  ;;  %3770 = vmatmul.mubr.bf16.gmra.mrb[12].mxu0 %v3445_v55  ;;  %4027 = vmatmul.mubr.bf16.gmra.mrb[12].mxu1 %v3477_v56  ;;  %v3134_v15 = vmax.f32 %v3000_v62, 0.0  ;;  %v3391_v16 = vmax.f32 %v3257_v63, 0.0 }
 0x49a   :  { %v3006_v12 = vadd.f32 %v3005_v10, %v10086_v52  ;;  %v3263_v13 = vadd.f32 %v3262_v11, %v10086_v52  ;;  %4426 = vmatpush1.bf16.msra.mxu0 %v8864_v61  ;;  %4972 = vmatpush1.bf16.msra.mxu1 %v8864_v61  ;;  %v3135_v20 = vmax.f32 %v3002_v4, 0.0  ;;  %v3392_v22 = vmax.f32 %v3259_v5, 0.0 }
 0x49b   :  { %v3136_v17 = vmax.f32 %v3004_v8, 0.0  ;;  %v3393_v18 = vmax.f32 %v3261_v9, 0.0  ;;  %4427 = vmatprep.subr.bf16.mxu0 %v8869_v3  ;;  %4973 = vmatprep.subr.bf16.mxu1 %v8869_v3 }
 0x49c   :  { %v3137_v26 = vmax.f32 %v3006_v12, 0.0  ;;  %v3394_v27 = vmax.f32 %v3263_v13, 0.0 }
 0x49d   :  { %v3447_v28 = vpack.c.bf16 %v3136_v17, %v3134_v15  ;;  %v3479_v29 = vpack.c.bf16 %v3393_v18, %v3391_v16 }
 0x49e   :  { %v3009_v30 = vpop.f32.mrb[212].mxu0  ;;  %v3266_v31 = vpop.f32.mrb[212].mxu1  ;;  %v3448_v24 = vpack.c.bf16 %v3137_v26, %v3135_v20  ;;  %v3480_v32 = vpack.c.bf16 %v3394_v27, %v3392_v22  ;;  %4428 = vmatpush1.bf16.msra.mxu0 %v8867_v14  ;;  %4974 = vmatpush1.bf16.msra.mxu1 %v8867_v14 }
 0x49f   :  { %v3010_v25 = vadd.f32 %v3009_v30, %v10083_v51  ;;  %v3267_v35 = vadd.f32 %v3266_v31, %v10083_v51  ;;  %v3011_v36 = vpop.f32.mrb[213].mxu0  ;;  %v3268_v37 = vpop.f32.mrb[213].mxu1  ;;  %4766 = vmatprep.subr.bf16.mxu0 %v8872_v19  ;;  %5152 = vmatprep.subr.bf16.mxu1 %v8872_v19 }
 0x4a0   :  { %v3012_v38 = vadd.f32 %v3011_v36, %v10086_v52  ;;  %v3269_v39 = vadd.f32 %v3268_v37, %v10086_v52  ;;  %v3013_v40 = vpop.f32.mrb[214].mxu0  ;;  %v3270_v33 = vpop.f32.mrb[214].mxu1  ;;  %3779 = vmatprep.mubr.bf16.mxu0 %v3448_v24  ;;  %4036 = vmatprep.mubr.bf16.mxu1 %v3480_v32 }
 0x4a1   :  { %v3014_v41 = vadd.f32 %v3013_v40, %v10083_v51  ;;  %v3271_v34 = vadd.f32 %v3270_v33, %v10083_v51  ;;  %v3015_v44 = vpop.f32.mrb[215].mxu0  ;;  %v3272_v45 = vpop.f32.mrb[215].mxu1  ;;  %3780 = vmatmul.mubr.bf16.gmra.mrb[16].mxu0 %v3447_v28  ;;  %4037 = vmatmul.mubr.bf16.gmra.mrb[16].mxu1 %v3479_v29  ;;  %v3138_v48 = vmax.f32 %v3010_v25, 0.0  ;;  %v3395_v49 = vmax.f32 %v3267_v35, 0.0 }
 0x4a2   :  { %v3016_v46 = vadd.f32 %v3015_v44, %v10086_v52  ;;  %v3273_v47 = vadd.f32 %v3272_v45, %v10086_v52  ;;  %v3139_v43 = vmax.f32 %v3012_v38, 0.0  ;;  %v3396_v53 = vmax.f32 %v3269_v39, 0.0 }
 0x4a3   :  { %v3140_v50 = vmax.f32 %v3014_v41, 0.0  ;;  %v3397_v42 = vmax.f32 %v3271_v34, 0.0 }
 0x4a4   :  { %v3141_v54 = vmax.f32 %v3016_v46, 0.0  ;;  %v3398_v55 = vmax.f32 %v3273_v47, 0.0 }
 0x4a5   :  { %v3449_v56 = vpack.c.bf16 %v3140_v50, %v3138_v48  ;;  %v3481_v57 = vpack.c.bf16 %v3397_v42, %v3395_v49 }
 0x4a6   :  { %v3019_v58 = vpop.f32.mrb[216].mxu0  ;;  %v3276_v59 = vpop.f32.mrb[216].mxu1  ;;  %v3450_v60 = vpack.c.bf16 %v3141_v54, %v3139_v43  ;;  %v3482_v61 = vpack.c.bf16 %v3398_v55, %v3396_v53 }
 0x4a7   :  { %v3020_v62 = vadd.f32 %v3019_v58, %v10083_v51  ;;  %v3277_v63 = vadd.f32 %v3276_v59, %v10083_v51  ;;  %v3021_v1 = vpop.f32.mrb[217].mxu0  ;;  %v3278_v2 = vpop.f32.mrb[217].mxu1 }
 0x4a8   :  { %v3022_v3 = vadd.f32 %v3021_v1, %v10086_v52  ;;  %v3279_v4 = vadd.f32 %v3278_v2, %v10086_v52  ;;  %v3023_v5 = vpop.f32.mrb[218].mxu0  ;;  %v3280_v6 = vpop.f32.mrb[218].mxu1  ;;  %3789 = vmatprep.mubr.bf16.mxu0 %v3450_v60  ;;  %4046 = vmatprep.mubr.bf16.mxu1 %v3482_v61 }
 0x4a9   :  { %v3024_v7 = vadd.f32 %v3023_v5, %v10083_v51  ;;  %v3281_v8 = vadd.f32 %v3280_v6, %v10083_v51  ;;  %v3025_v9 = vpop.f32.mrb[219].mxu0  ;;  %v3282_v10 = vpop.f32.mrb[219].mxu1  ;;  %3790 = vmatmul.mubr.bf16.gmra.mrb[20].mxu0 %v3449_v56  ;;  %4047 = vmatmul.mubr.bf16.gmra.mrb[20].mxu1 %v3481_v57  ;;  %v3142_v13 = vmax.f32 %v3020_v62, 0.0  ;;  %v3399_v14 = vmax.f32 %v3277_v63, 0.0 }
 0x4aa   :  { %v3026_v11 = vadd.f32 %v3025_v9, %v10086_v52  ;;  %v3283_v12 = vadd.f32 %v3282_v10, %v10086_v52  ;;  %v3143_v17 = vmax.f32 %v3022_v3, 0.0  ;;  %v3400_v18 = vmax.f32 %v3279_v4, 0.0 }
 0x4ab   :  { %v3144_v15 = vmax.f32 %v3024_v7, 0.0  ;;  %v3401_v16 = vmax.f32 %v3281_v8, 0.0 }
 0x4ac   :  { %v3145_v19 = vmax.f32 %v3026_v11, 0.0  ;;  %v3402_v20 = vmax.f32 %v3283_v12, 0.0 }
 0x4ad   :  { %v3451_v22 = vpack.c.bf16 %v3144_v15, %v3142_v13  ;;  %v3483_v26 = vpack.c.bf16 %v3401_v16, %v3399_v14 }
 0x4ae   :  { %v3029_v27 = vpop.f32.mrb[220].mxu0  ;;  %v3286_v28 = vpop.f32.mrb[220].mxu1  ;;  %v3452_v29 = vpack.c.bf16 %v3145_v19, %v3143_v17  ;;  %v3484_v30 = vpack.c.bf16 %v3402_v20, %v3400_v18 }
 0x4af   :  { %v3030_v31 = vadd.f32 %v3029_v27, %v10083_v51  ;;  %v3287_v24 = vadd.f32 %v3286_v28, %v10083_v51  ;;  %v3031_v32 = vpop.f32.mrb[221].mxu0  ;;  %v3288_v25 = vpop.f32.mrb[221].mxu1 }
 0x4b0   :  { %v3032_v35 = vadd.f32 %v3031_v32, %v10086_v52  ;;  %v3289_v36 = vadd.f32 %v3288_v25, %v10086_v52  ;;  %v3033_v37 = vpop.f32.mrb[222].mxu0  ;;  %v3290_v38 = vpop.f32.mrb[222].mxu1  ;;  %3799 = vmatprep.mubr.bf16.mxu0 %v3452_v29  ;;  %4056 = vmatprep.mubr.bf16.mxu1 %v3484_v30 }
 0x4b1   :  { %v3034_v39 = vadd.f32 %v3033_v37, %v10083_v51  ;;  %v3291_v40 = vadd.f32 %v3290_v38, %v10083_v51  ;;  %v3035_v33 = vpop.f32.mrb[223].mxu0  ;;  %v3292_v41 = vpop.f32.mrb[223].mxu1  ;;  %3800 = vmatmul.mubr.bf16.gmra.mrb[24].mxu0 %v3451_v22  ;;  %4057 = vmatmul.mubr.bf16.gmra.mrb[24].mxu1 %v3483_v26  ;;  %v3146_v45 = vmax.f32 %v3030_v31, 0.0  ;;  %v3403_v46 = vmax.f32 %v3287_v24, 0.0 }
 0x4b2   :  { %v3036_v34 = vadd.f32 %v3035_v33, %v10086_v52  ;;  %v3293_v44 = vadd.f32 %v3292_v41, %v10086_v52  ;;  %v3147_v49 = vmax.f32 %v3032_v35, 0.0  ;;  %v3404_v50 = vmax.f32 %v3289_v36, 0.0 }
 0x4b3   :  { %v3148_v47 = vmax.f32 %v3034_v39, 0.0  ;;  %v3405_v48 = vmax.f32 %v3291_v40, 0.0 }
 0x4b4   :  { %v3149_v42 = vmax.f32 %v3036_v34, 0.0  ;;  %v3406_v43 = vmax.f32 %v3293_v44, 0.0 }
 0x4b5   :  { %v3453_v53 = vpack.c.bf16 %v3148_v47, %v3146_v45  ;;  %v3485_v54 = vpack.c.bf16 %v3405_v48, %v3403_v46 }
 0x4b6   :  { %v3039_v55 = vpop.f32.mrb[224].mxu0  ;;  %v3296_v56 = vpop.f32.mrb[224].mxu1  ;;  %v3454_v57 = vpack.c.bf16 %v3149_v42, %v3147_v49  ;;  %v3486_v58 = vpack.c.bf16 %v3406_v43, %v3404_v50 }
 0x4b7   :  { %v3040_v59 = vadd.f32 %v3039_v55, %v10083_v51  ;;  %v3297_v60 = vadd.f32 %v3296_v56, %v10083_v51  ;;  %v3041_v61 = vpop.f32.mrb[225].mxu0  ;;  %v3298_v62 = vpop.f32.mrb[225].mxu1 }
 0x4b8   :  { %v3042_v63 = vadd.f32 %v3041_v61, %v10086_v52  ;;  %v3299_v1 = vadd.f32 %v3298_v62, %v10086_v52  ;;  %v3043_v2 = vpop.f32.mrb[226].mxu0  ;;  %v3300_v3 = vpop.f32.mrb[226].mxu1  ;;  %3809 = vmatprep.mubr.bf16.mxu0 %v3454_v57  ;;  %4066 = vmatprep.mubr.bf16.mxu1 %v3486_v58 }
 0x4b9   :  { %v3044_v4 = vadd.f32 %v3043_v2, %v10083_v51  ;;  %v3301_v5 = vadd.f32 %v3300_v3, %v10083_v51  ;;  %v3045_v6 = vpop.f32.mrb[227].mxu0  ;;  %v3302_v7 = vpop.f32.mrb[227].mxu1  ;;  %3810 = vmatmul.mubr.bf16.gmra.mrb[28].mxu0 %v3453_v53  ;;  %4067 = vmatmul.mubr.bf16.gmra.mrb[28].mxu1 %v3485_v54  ;;  %v3150_v10 = vmax.f32 %v3040_v59, 0.0  ;;  %v3407_v11 = vmax.f32 %v3297_v60, 0.0 }
 0x4ba   :  { %v3046_v8 = vadd.f32 %v3045_v6, %v10086_v52  ;;  %v3303_v9 = vadd.f32 %v3302_v7, %v10086_v52  ;;  %v3151_v14 = vmax.f32 %v3042_v63, 0.0  ;;  %v3408_v15 = vmax.f32 %v3299_v1, 0.0 }
 0x4bb   :  { %v3152_v12 = vmax.f32 %v3044_v4, 0.0  ;;  %v3409_v13 = vmax.f32 %v3301_v5, 0.0 }
 0x4bc   :  { %v3153_v16 = vmax.f32 %v3046_v8, 0.0  ;;  %v3410_v17 = vmax.f32 %v3303_v9, 0.0 }
 0x4bd   :  { %v3455_v18 = vpack.c.bf16 %v3152_v12, %v3150_v10  ;;  %v3487_v19 = vpack.c.bf16 %v3409_v13, %v3407_v11 }
 0x4be   :  { %v3049_v20 = vpop.f32.mrb[228].mxu0  ;;  %v3306_v22 = vpop.f32.mrb[228].mxu1  ;;  %v3456_v26 = vpack.c.bf16 %v3153_v16, %v3151_v14  ;;  %v3488_v27 = vpack.c.bf16 %v3410_v17, %v3408_v15 }
 0x4bf   :  { %v3050_v28 = vadd.f32 %v3049_v20, %v10083_v51  ;;  %v3307_v29 = vadd.f32 %v3306_v22, %v10083_v51  ;;  %v3051_v30 = vpop.f32.mrb[229].mxu0  ;;  %v3308_v31 = vpop.f32.mrb[229].mxu1 }
 0x4c0   :  { %v3052_v24 = vadd.f32 %v3051_v30, %v10086_v52  ;;  %v3309_v32 = vadd.f32 %v3308_v31, %v10086_v52  ;;  %v3053_v25 = vpop.f32.mrb[230].mxu0  ;;  %v3310_v35 = vpop.f32.mrb[230].mxu1  ;;  %3819 = vmatprep.mubr.bf16.mxu0 %v3456_v26  ;;  %4076 = vmatprep.mubr.bf16.mxu1 %v3488_v27 }
 0x4c1   :  { %v3054_v36 = vadd.f32 %v3053_v25, %v10083_v51  ;;  %v3311_v37 = vadd.f32 %v3310_v35, %v10083_v51  ;;  %v3055_v38 = vpop.f32.mrb[231].mxu0  ;;  %v3312_v39 = vpop.f32.mrb[231].mxu1  ;;  %3820 = vmatmul.mubr.bf16.gmra.mrb[32].mxu0 %v3455_v18  ;;  %4077 = vmatmul.mubr.bf16.gmra.mrb[32].mxu1 %v3487_v19  ;;  %v3154_v41 = vmax.f32 %v3050_v28, 0.0  ;;  %v3411_v34 = vmax.f32 %v3307_v29, 0.0 }
 0x4c2   :  { %v3056_v40 = vadd.f32 %v3055_v38, %v10086_v52  ;;  %v3313_v33 = vadd.f32 %v3312_v39, %v10086_v52  ;;  %v3155_v46 = vmax.f32 %v3052_v24, 0.0  ;;  %v3412_v47 = vmax.f32 %v3309_v32, 0.0 }
 0x4c3   :  { %v3156_v44 = vmax.f32 %v3054_v36, 0.0  ;;  %v3413_v45 = vmax.f32 %v3311_v37, 0.0 }
 0x4c4   :  { %v3157_v48 = vmax.f32 %v3056_v40, 0.0  ;;  %v3414_v49 = vmax.f32 %v3313_v33, 0.0 }
 0x4c5   :  { %v3457_v50 = vpack.c.bf16 %v3156_v44, %v3154_v41  ;;  %v3489_v42 = vpack.c.bf16 %v3413_v45, %v3411_v34 }
 0x4c6   :  { %v3059_v43 = vpop.f32.mrb[232].mxu0  ;;  %v3316_v53 = vpop.f32.mrb[232].mxu1  ;;  %v3458_v54 = vpack.c.bf16 %v3157_v48, %v3155_v46  ;;  %v3490_v55 = vpack.c.bf16 %v3414_v49, %v3412_v47 }
 0x4c7   :  { %v3060_v56 = vadd.f32 %v3059_v43, %v10083_v51  ;;  %v3317_v57 = vadd.f32 %v3316_v53, %v10083_v51  ;;  %v3061_v58 = vpop.f32.mrb[233].mxu0  ;;  %v3318_v59 = vpop.f32.mrb[233].mxu1 }
 0x4c8   :  { %v3062_v60 = vadd.f32 %v3061_v58, %v10086_v52  ;;  %v3319_v61 = vadd.f32 %v3318_v59, %v10086_v52  ;;  %v3063_v62 = vpop.f32.mrb[234].mxu0  ;;  %v3320_v63 = vpop.f32.mrb[234].mxu1  ;;  %3829 = vmatprep.mubr.bf16.mxu0 %v3458_v54  ;;  %4086 = vmatprep.mubr.bf16.mxu1 %v3490_v55 }
 0x4c9   :  { %v3064_v1 = vadd.f32 %v3063_v62, %v10083_v51  ;;  %v3321_v2 = vadd.f32 %v3320_v63, %v10083_v51  ;;  %v3065_v3 = vpop.f32.mrb[235].mxu0  ;;  %v3322_v4 = vpop.f32.mrb[235].mxu1  ;;  %3830 = vmatmul.mubr.bf16.gmra.mrb[36].mxu0 %v3457_v50  ;;  %4087 = vmatmul.mubr.bf16.gmra.mrb[36].mxu1 %v3489_v42  ;;  %v3158_v7 = vmax.f32 %v3060_v56, 0.0  ;;  %v3415_v8 = vmax.f32 %v3317_v57, 0.0 }
 0x4ca   :  { %v3066_v5 = vadd.f32 %v3065_v3, %v10086_v52  ;;  %v3323_v6 = vadd.f32 %v3322_v4, %v10086_v52  ;;  %v3159_v11 = vmax.f32 %v3062_v60, 0.0  ;;  %v3416_v12 = vmax.f32 %v3319_v61, 0.0 }
 0x4cb   :  { %v3160_v9 = vmax.f32 %v3064_v1, 0.0  ;;  %v3417_v10 = vmax.f32 %v3321_v2, 0.0 }
 0x4cc   :  { %v3161_v13 = vmax.f32 %v3066_v5, 0.0  ;;  %v3418_v14 = vmax.f32 %v3323_v6, 0.0 }
 0x4cd   :  { %v3459_v15 = vpack.c.bf16 %v3160_v9, %v3158_v7  ;;  %v3491_v16 = vpack.c.bf16 %v3417_v10, %v3415_v8 }
 0x4ce   :  { %v3069_v17 = vpop.f32.mrb[236].mxu0  ;;  %v3326_v18 = vpop.f32.mrb[236].mxu1  ;;  %v3460_v19 = vpack.c.bf16 %v3161_v13, %v3159_v11  ;;  %v3492_v20 = vpack.c.bf16 %v3418_v14, %v3416_v12 }
 0x4cf   :  { %v3070_v22 = vadd.f32 %v3069_v17, %v10083_v51  ;;  %v3327_v26 = vadd.f32 %v3326_v18, %v10083_v51  ;;  %v3071_v27 = vpop.f32.mrb[237].mxu0  ;;  %v3328_v28 = vpop.f32.mrb[237].mxu1 }
 0x4d0   :  { %v3072_v29 = vadd.f32 %v3071_v27, %v10086_v52  ;;  %v3329_v30 = vadd.f32 %v3328_v28, %v10086_v52  ;;  %v3073_v31 = vpop.f32.mrb[238].mxu0  ;;  %v3330_v24 = vpop.f32.mrb[238].mxu1  ;;  %3839 = vmatprep.mubr.bf16.mxu0 %v3460_v19  ;;  %4096 = vmatprep.mubr.bf16.mxu1 %v3492_v20 }
 0x4d1   :  { %v3074_v32 = vadd.f32 %v3073_v31, %v10083_v51  ;;  %v3331_v25 = vadd.f32 %v3330_v24, %v10083_v51  ;;  %v3075_v35 = vpop.f32.mrb[239].mxu0  ;;  %v3332_v36 = vpop.f32.mrb[239].mxu1  ;;  %3840 = vmatmul.mubr.bf16.gmra.mrb[40].mxu0 %v3459_v15  ;;  %4097 = vmatmul.mubr.bf16.gmra.mrb[40].mxu1 %v3491_v16  ;;  %v3162_v39 = vmax.f32 %v3070_v22, 0.0  ;;  %v3419_v40 = vmax.f32 %v3327_v26, 0.0 }
 0x4d2   :  { %v3076_v37 = vadd.f32 %v3075_v35, %v10086_v52  ;;  %v3333_v38 = vadd.f32 %v3332_v36, %v10086_v52  ;;  %v3163_v34 = vmax.f32 %v3072_v29, 0.0  ;;  %v3420_v44 = vmax.f32 %v3329_v30, 0.0 }
 0x4d3   :  { %v3164_v33 = vmax.f32 %v3074_v32, 0.0  ;;  %v3421_v41 = vmax.f32 %v3331_v25, 0.0 }
 0x4d4   :  { %v3165_v45 = vmax.f32 %v3076_v37, 0.0  ;;  %v3422_v46 = vmax.f32 %v3333_v38, 0.0 }
 0x4d5   :  { %v3461_v47 = vpack.c.bf16 %v3164_v33, %v3162_v39  ;;  %v3493_v48 = vpack.c.bf16 %v3421_v41, %v3419_v40 }
 0x4d6   :  { %v3079_v49 = vpop.f32.mrb[240].mxu0  ;;  %v3336_v50 = vpop.f32.mrb[240].mxu1  ;;  %v3462_v42 = vpack.c.bf16 %v3165_v45, %v3163_v34  ;;  %v3494_v43 = vpack.c.bf16 %v3422_v46, %v3420_v44 }
 0x4d7   :  { %v3080_v53 = vadd.f32 %v3079_v49, %v10083_v51  ;;  %v3337_v54 = vadd.f32 %v3336_v50, %v10083_v51  ;;  %v3081_v55 = vpop.f32.mrb[241].mxu0  ;;  %v3338_v56 = vpop.f32.mrb[241].mxu1 }
 0x4d8   :  { %v3082_v57 = vadd.f32 %v3081_v55, %v10086_v52  ;;  %v3339_v58 = vadd.f32 %v3338_v56, %v10086_v52  ;;  %v3083_v59 = vpop.f32.mrb[242].mxu0  ;;  %v3340_v60 = vpop.f32.mrb[242].mxu1  ;;  %3849 = vmatprep.mubr.bf16.mxu0 %v3462_v42  ;;  %4106 = vmatprep.mubr.bf16.mxu1 %v3494_v43 }
 0x4d9   :  { %v3084_v61 = vadd.f32 %v3083_v59, %v10083_v51  ;;  %v3341_v62 = vadd.f32 %v3340_v60, %v10083_v51  ;;  %v3085_v63 = vpop.f32.mrb[243].mxu0  ;;  %v3342_v1 = vpop.f32.mrb[243].mxu1  ;;  %3850 = vmatmul.mubr.bf16.gmra.mrb[44].mxu0 %v3461_v47  ;;  %4107 = vmatmul.mubr.bf16.gmra.mrb[44].mxu1 %v3493_v48  ;;  %v3166_v4 = vmax.f32 %v3080_v53, 0.0  ;;  %v3423_v5 = vmax.f32 %v3337_v54, 0.0 }
 0x4da   :  { %v3086_v2 = vadd.f32 %v3085_v63, %v10086_v52  ;;  %v3343_v3 = vadd.f32 %v3342_v1, %v10086_v52  ;;  %v3167_v8 = vmax.f32 %v3082_v57, 0.0  ;;  %v3424_v9 = vmax.f32 %v3339_v58, 0.0 }
 0x4db   :  { %v3168_v6 = vmax.f32 %v3084_v61, 0.0  ;;  %v3425_v7 = vmax.f32 %v3341_v62, 0.0 }
 0x4dc   :  { %v3169_v10 = vmax.f32 %v3086_v2, 0.0  ;;  %v3426_v11 = vmax.f32 %v3343_v3, 0.0 }
 0x4dd   :  { %v3463_v12 = vpack.c.bf16 %v3168_v6, %v3166_v4  ;;  %v3495_v13 = vpack.c.bf16 %v3425_v7, %v3423_v5 }
 0x4de   :  { %v3089_v14 = vpop.f32.mrb[244].mxu0  ;;  %v3346_v15 = vpop.f32.mrb[244].mxu1  ;;  %v3464_v16 = vpack.c.bf16 %v3169_v10, %v3167_v8  ;;  %v3496_v17 = vpack.c.bf16 %v3426_v11, %v3424_v9 }
 0x4df   :  { %v3090_v18 = vadd.f32 %v3089_v14, %v10083_v51  ;;  %v3347_v19 = vadd.f32 %v3346_v15, %v10083_v51  ;;  %v3091_v20 = vpop.f32.mrb[245].mxu0  ;;  %v3348_v22 = vpop.f32.mrb[245].mxu1 }
 0x4e0   :  { %v3092_v26 = vadd.f32 %v3091_v20, %v10086_v52  ;;  %v3349_v27 = vadd.f32 %v3348_v22, %v10086_v52  ;;  %v3093_v28 = vpop.f32.mrb[246].mxu0  ;;  %v3350_v29 = vpop.f32.mrb[246].mxu1  ;;  %3859 = vmatprep.mubr.bf16.mxu0 %v3464_v16  ;;  %4116 = vmatprep.mubr.bf16.mxu1 %v3496_v17 }
 0x4e1   :  { %v3094_v30 = vadd.f32 %v3093_v28, %v10083_v51  ;;  %v3351_v31 = vadd.f32 %v3350_v29, %v10083_v51  ;;  %v3095_v24 = vpop.f32.mrb[247].mxu0  ;;  %v3352_v32 = vpop.f32.mrb[247].mxu1  ;;  %3860 = vmatmul.mubr.bf16.gmra.mrb[48].mxu0 %v3463_v12  ;;  %4117 = vmatmul.mubr.bf16.gmra.mrb[48].mxu1 %v3495_v13  ;;  %v3170_v36 = vmax.f32 %v3090_v18, 0.0  ;;  %v3427_v37 = vmax.f32 %v3347_v19, 0.0 }
 0x4e2   :  { %v3096_v25 = vadd.f32 %v3095_v24, %v10086_v52  ;;  %v3353_v35 = vadd.f32 %v3352_v32, %v10086_v52  ;;  %v3171_v40 = vmax.f32 %v3092_v26, 0.0  ;;  %v3428_v33 = vmax.f32 %v3349_v27, 0.0 }
 0x4e3   :  { %v3172_v38 = vmax.f32 %v3094_v30, 0.0  ;;  %v3429_v39 = vmax.f32 %v3351_v31, 0.0 }
 0x4e4   :  { %v3173_v41 = vmax.f32 %v3096_v25, 0.0  ;;  %v3430_v34 = vmax.f32 %v3353_v35, 0.0 }
 0x4e5   :  { %v3465_v44 = vpack.c.bf16 %v3172_v38, %v3170_v36  ;;  %v3497_v45 = vpack.c.bf16 %v3429_v39, %v3427_v37 }
 0x4e6   :  { %v3099_v46 = vpop.f32.mrb[248].mxu0  ;;  %v3356_v47 = vpop.f32.mrb[248].mxu1  ;;  %v3466_v48 = vpack.c.bf16 %v3173_v41, %v3171_v40  ;;  %v3498_v49 = vpack.c.bf16 %v3430_v34, %v3428_v33 }
 0x4e7   :  { %v3100_v50 = vadd.f32 %v3099_v46, %v10083_v51  ;;  %v3357_v42 = vadd.f32 %v3356_v47, %v10083_v51  ;;  %v3101_v43 = vpop.f32.mrb[249].mxu0  ;;  %v3358_v53 = vpop.f32.mrb[249].mxu1  ;;  %v9047_v46 = vld [vmem:[#allocation2 + $0x80] sm:$0xff]   ;;  %v8873_v47 = vld [vmem:[#allocation12 + $0x10] ss:$8 sps:$4 sm:$0xff]  }
 0x4e8   :  { %v3102_v54 = vadd.f32 %v3101_v43, %v10086_v52  ;;  %v3359_v55 = vadd.f32 %v3358_v53, %v10086_v52  ;;  %v3103_v56 = vpop.f32.mrb[250].mxu0  ;;  %v3360_v57 = vpop.f32.mrb[250].mxu1  ;;  %3869 = vmatprep.mubr.bf16.mxu0 %v3466_v48  ;;  %4126 = vmatprep.mubr.bf16.mxu1 %v3498_v49  ;;  %v8878_v48 = vld [vmem:[#allocation12 + $0x24] ss:$8 sps:$4 sm:$0xff]   ;;  %v8876_v49 = vld [vmem:[#allocation12 + $0x20] ss:$8 sps:$4 sm:$0xff]  }
 0x4e9   :  { %v3104_v58 = vadd.f32 %v3103_v56, %v10083_v51  ;;  %v3361_v59 = vadd.f32 %v3360_v57, %v10083_v51  ;;  %v3105_v60 = vpop.f32.mrb[251].mxu0  ;;  %v3362_v61 = vpop.f32.mrb[251].mxu1  ;;  %3870 = vmatmul.mubr.bf16.gmra.mrb[52].mxu0 %v3465_v44  ;;  %4127 = vmatmul.mubr.bf16.gmra.mrb[52].mxu1 %v3497_v45  ;;  %v3174_v1 = vmax.f32 %v3100_v50, 0.0  ;;  %v3431_v2 = vmax.f32 %v3357_v42, 0.0  ;;  %v8875_v44 = vld [vmem:[#allocation12 + $0x14] ss:$8 sps:$4 sm:$0xff]  }
 0x4ea   :  { %v3106_v62 = vadd.f32 %v3105_v60, %v10086_v52  ;;  %v3363_v63 = vadd.f32 %v3362_v61, %v10086_v52  ;;  %v3175_v5 = vmax.f32 %v3102_v54, 0.0  ;;  %v3432_v6 = vmax.f32 %v3359_v55, 0.0  ;;  %v9046_v45 = vld [vmem:[#allocation2] sm:$0xff]   ;;  %v8881_v50 = vld [vmem:[#allocation12 + $0x34] ss:$8 sps:$4 sm:$0xff]   ;;  %v9048_v42 = vld [vmem:[#allocation2 + $0x8] sm:$0xff]  }
 0x4eb   :  { %v3176_v3 = vmax.f32 %v3104_v58, 0.0  ;;  %v3433_v4 = vmax.f32 %v3361_v59, 0.0  ;;  %v9049_v43 = vld [vmem:[#allocation2 + $0x88] sm:$0xff]   ;;  %v8879_v53 = vld [vmem:[#allocation12 + $0x30] ss:$8 sps:$4 sm:$0xff]  }
 0x4ec   :  { %v3177_v7 = vmax.f32 %v3106_v62, 0.0  ;;  %v3434_v8 = vmax.f32 %v3363_v63, 0.0  ;;  %v8884_v54 = vld [vmem:[#allocation12 + $0x44] ss:$8 sps:$4 sm:$0xff]   ;;  %v8882_v55 = vld [vmem:[#allocation12 + $0x40] ss:$8 sps:$4 sm:$0xff]  }
 0x4ed   :  { %v3467_v9 = vpack.c.bf16 %v3176_v3, %v3174_v1  ;;  %v3499_v10 = vpack.c.bf16 %v3433_v4, %v3431_v2  ;;  %v8887_v56 = vld [vmem:[#allocation12 + $0x54] ss:$8 sps:$4 sm:$0xff]   ;;  %v8885_v59 = vld [vmem:[#allocation12 + $0x50] ss:$8 sps:$4 sm:$0xff]   ;;  %v8890_v60 = vld [vmem:[#allocation12 + $0x64] ss:$8 sps:$4 sm:$0xff]  }
 0x4ee   :  { %v3109_v11 = vpop.f32.mrb[252].mxu0  ;;  %v3366_v12 = vpop.f32.mrb[252].mxu1  ;;  %v3468_v13 = vpack.c.bf16 %v3177_v7, %v3175_v5  ;;  %v3500_v14 = vpack.c.bf16 %v3434_v8, %v3432_v6  ;;  %v9050_v57 = vld [vmem:[#allocation2 + $0x10] sm:$0xff]   ;;  %v8888_v61 = vld [vmem:[#allocation12 + $0x60] ss:$8 sps:$4 sm:$0xff]   ;;  %v9052_v63 = vld [vmem:[#allocation2 + $0x18] sm:$0xff]  }
 0x4ef   :  { %v3110_v15 = vadd.f32 %v3109_v11, %v10083_v51  ;;  %v3367_v16 = vadd.f32 %v3366_v12, %v10083_v51  ;;  %v3111_v17 = vpop.f32.mrb[253].mxu0  ;;  %v3368_v18 = vpop.f32.mrb[253].mxu1  ;;  %v9051_v58 = vld [vmem:[#allocation2 + $0x90] sm:$0xff]   ;;  %v9053_v1 = vld [vmem:[#allocation2 + $0x98] sm:$0xff]   ;;  %v8896_v3 = vld [vmem:[#allocation12 + $0x84] ss:$8 sps:$4 sm:$0xff]  }
 0x4f0   :  { %v3112_v19 = vadd.f32 %v3111_v17, %v10086_v52  ;;  %v3369_v20 = vadd.f32 %v3368_v18, %v10086_v52  ;;  %v3113_v22 = vpop.f32.mrb[254].mxu0  ;;  %v3370_v26 = vpop.f32.mrb[254].mxu1  ;;  %3879 = vmatprep.mubr.bf16.mxu0 %v3468_v13  ;;  %4136 = vmatprep.mubr.bf16.mxu1 %v3500_v14  ;;  %v8893_v62 = vld [vmem:[#allocation12 + $0x74] ss:$8 sps:$4 sm:$0xff]   ;;  %v8891_v2 = vld [vmem:[#allocation12 + $0x70] ss:$8 sps:$4 sm:$0xff]  }
 0x4f1   :  { %v3114_v27 = vadd.f32 %v3113_v22, %v10083_v51  ;;  %v3371_v28 = vadd.f32 %v3370_v26, %v10083_v51  ;;  %v3115_v29 = vpop.f32.mrb[255].mxu0  ;;  %v3372_v30 = vpop.f32.mrb[255].mxu1  ;;  %3880 = vmatmul.mubr.bf16.gmra.mrb[56].mxu0 %v3467_v9  ;;  %4137 = vmatmul.mubr.bf16.gmra.mrb[56].mxu1 %v3499_v10  ;;  %v3178_v32 = vmax.f32 %v3110_v15, 0.0  ;;  %v3435_v25 = vmax.f32 %v3367_v16, 0.0  ;;  %v8894_v4 = vld [vmem:[#allocation12 + $0x80] ss:$8 sps:$4 sm:$0xff]  }
 0x4f2   :  { %v3116_v31 = vadd.f32 %v3115_v29, %v10086_v52  ;;  %v3373_v24 = vadd.f32 %v3372_v30, %v10086_v52  ;;  %v3179_v37 = vmax.f32 %v3112_v19, 0.0  ;;  %v3436_v38 = vmax.f32 %v3369_v20, 0.0  ;;  %v8870_v52 = vld [vmem:[#allocation12] ss:$8 sps:$4 sm:$0xff]   ;;  %v8899_v5 = vld [vmem:[#allocation12 + $0x94] ss:$8 sps:$4 sm:$0xff]  }
 0x4f3   :  { %v3180_v35 = vmax.f32 %v3114_v27, 0.0  ;;  %v3437_v36 = vmax.f32 %v3371_v28, 0.0  ;;  %v9054_v6 = vld [vmem:[#allocation2 + $0x20] sm:$0xff]   ;;  %v8897_v8 = vld [vmem:[#allocation12 + $0x90] ss:$8 sps:$4 sm:$0xff]   ;;  %v9056_v12 = vld [vmem:[#allocation2 + $0x28] sm:$0xff]  }
 0x4f4   :  { %v3181_v39 = vmax.f32 %v3116_v31, 0.0  ;;  %v3438_v40 = vmax.f32 %v3373_v24, 0.0  ;;  %v9055_v7 = vld [vmem:[#allocation2 + $0xa0] sm:$0xff]   ;;  %v8905_v11 = vld [vmem:[#allocation12 + $0xb4] ss:$8 sps:$4 sm:$0xff]   ;;  %v9057_v13 = vld [vmem:[#allocation2 + $0xa8] sm:$0xff]  }
 0x4f5   :  { %v3469_v33 = vpack.c.bf16 %v3180_v35, %v3178_v32  ;;  %v3501_v41 = vpack.c.bf16 %v3437_v36, %v3435_v25  ;;  %v8902_v9 = vld [vmem:[#allocation12 + $0xa4] ss:$8 sps:$4 sm:$0xff]   ;;  %v8900_v10 = vld [vmem:[#allocation12 + $0xa0] ss:$8 sps:$4 sm:$0xff]   ;;  %v8903_v14 = vld [vmem:[#allocation12 + $0xb0] ss:$8 sps:$4 sm:$0xff]  }
 0x4f6   :  { %v3470_v34 = vpack.c.bf16 %v3181_v39, %v3179_v37  ;;  %v3502_v51 = vpack.c.bf16 %v3438_v40, %v3436_v38  ;;  %v8908_v15 = vld [vmem:[#allocation12 + $0xc4] ss:$8 sps:$4 sm:$0xff]   ;;  %v8906_v16 = vld [vmem:[#allocation12 + $0xc0] ss:$8 sps:$4 sm:$0xff]   ;;  %v8911_v17 = vld [vmem:[#allocation12 + $0xd4] ss:$8 sps:$4 sm:$0xff]  }
 0x4f7   :  { %v9058_v18 = vld [vmem:[#allocation2 + $0x30] sm:$0xff]   ;;  %v8914_v22 = vld [vmem:[#allocation12 + $0xe4] ss:$8 sps:$4 sm:$0xff]   ;;  %v8912_v26 = vld [vmem:[#allocation12 + $0xe0] ss:$8 sps:$4 sm:$0xff]  }
 0x4f8   :  { %3889 = vmatprep.mubr.bf16.mxu0 %v3470_v34  ;;  %4146 = vmatprep.mubr.bf16.mxu1 %v3502_v51  ;;  %v9059_v19 = vld [vmem:[#allocation2 + $0xb0] sm:$0xff]   ;;  %v9060_v28 = vld [vmem:[#allocation2 + $0x38] sm:$0xff]   ;;  %v9062_v31 = vld [vmem:[#allocation2 + $0x40] sm:$0xff]  }
 0x4f9   :  { %3890 = vmatmul.mubr.bf16.gmra.mrb[60].mxu0 %v3469_v33  ;;  %4147 = vmatmul.mubr.bf16.gmra.mrb[60].mxu1 %v3501_v41  ;;  %v8909_v20 = vld [vmem:[#allocation12 + $0xd0] ss:$8 sps:$4 sm:$0xff]   ;;  %v8917_v27 = vld [vmem:[#allocation12 + $0xf4] ss:$8 sps:$4 sm:$0xff]   ;;  %v9063_v24 = vld [vmem:[#allocation2 + $0xc0] sm:$0xff]  }
 0x4fa   :  { %4445 = vmatprep.mubr.bf16.mxu0 %v9347_v0  ;;  %4991 = vmatprep.mubr.bf16.mxu1 %v9347_v0  ;;  %v9061_v29 = vld [vmem:[#allocation2 + $0xb8] sm:$0xff]   ;;  %v9064_v32 = vld [vmem:[#allocation2 + $0x48] sm:$0xff]   ;;  %v3535_v35 = vld [vmem:[%s11302_s13] sm:$0x3] }
 0x4fb   :  { %v8915_v30 = vld [vmem:[#allocation12 + $0xf0] ss:$8 sps:$4 sm:$0xff]   ;;  %v9065_v25 = vld [vmem:[#allocation2 + $0xc8] sm:$0xff]   ;;  %v10242_v38 = vrot.slane %v3535_v35, %v9664_v21  ;;  %v10245_v39 = vrot.slane %v3535_v35, %v9669_v23 }
 0x4fc   :  { %v9066_v36 = vld [vmem:[#allocation2 + $0x50] sm:$0xff]  }
 0x4fd   :  { %v9067_v37 = vld [vmem:[#allocation2 + $0xd0] sm:$0xff]  }
 0x501   :  { %4446 = vmatmul.mubr.bf16.vlgmr.msra.gmra.mrb[64].mxu0 %v9046_v45  ;;  %4992 = vmatmul.mubr.bf16.vlgmr.msra.gmra.mrb[64].mxu1 %v9047_v46 }
 0x502   :  { %4767 = vmatpush1.bf16.msra.mxu0 %v8870_v52  ;;  %5153 = vmatpush1.bf16.msra.mxu1 %v8870_v52 }
 0x503   :  { %4455 = vmatprep.mubr.bf16.mxu0 %v9347_v0  ;;  %4768 = vmatprep.subr.bf16.mxu0 %v8875_v44 }
 0x504   :  { %5001 = vmatprep.mubr.bf16.mxu1 %v9347_v0  ;;  %5154 = vmatprep.subr.bf16.mxu1 %v8875_v44 }
 0x506   :  { %4769 = vmatpush1.bf16.msra.mxu0 %v8873_v47  ;;  %5155 = vmatpush1.bf16.msra.mxu1 %v8873_v47 }
 0x507   :  { %4770 = vmatprep.subr.bf16.mxu0 %v8878_v48  ;;  %5156 = vmatprep.subr.bf16.mxu1 %v8878_v48 }
 0x509   :  { %4456 = vmatmul.mubr.bf16.gmra.mrb[68].mxu0 %v9048_v42  ;;  %5002 = vmatmul.mubr.bf16.gmra.mrb[68].mxu1 %v9049_v43 }
 0x50a   :  { %4465 = vmatprep.mubr.bf16.mxu0 %v9347_v0  ;;  %5011 = vmatprep.mubr.bf16.mxu1 %v9347_v0 }
 0x50b   :  { %4771 = vmatpush1.bf16.msra.mxu0 %v8876_v49  ;;  %5157 = vmatpush1.bf16.msra.mxu1 %v8876_v49 }
 0x50c   :  { %4772 = vmatprep.subr.bf16.mxu0 %v8881_v50  ;;  %5158 = vmatprep.subr.bf16.mxu1 %v8881_v50 }
 0x50f   :  { %4773 = vmatpush1.bf16.msra.mxu0 %v8879_v53  ;;  %5159 = vmatpush1.bf16.msra.mxu1 %v8879_v53 }
 0x510   :  { %4774 = vmatprep.subr.bf16.mxu0 %v8884_v54  ;;  %5160 = vmatprep.subr.bf16.mxu1 %v8884_v54 }
 0x511   :  { %4466 = vmatmul.mubr.bf16.gmra.mrb[72].mxu0 %v9050_v57  ;;  %5012 = vmatmul.mubr.bf16.gmra.mrb[72].mxu1 %v9051_v58  ;;  %v9068_v58 = vld [vmem:[#allocation2 + $0x58] sm:$0xff]  }
 0x512   :  { %4475 = vmatprep.mubr.bf16.mxu0 %v9347_v0  ;;  %5021 = vmatprep.mubr.bf16.mxu1 %v9347_v0 }
 0x513   :  { %4775 = vmatpush1.bf16.msra.mxu0 %v8882_v55  ;;  %5161 = vmatpush1.bf16.msra.mxu1 %v8882_v55 }
 0x514   :  { %4776 = vmatprep.subr.bf16.mxu0 %v8887_v56  ;;  %5162 = vmatprep.subr.bf16.mxu1 %v8887_v56 }
 0x517   :  { %4777 = vmatpush1.bf16.msra.mxu0 %v8885_v59  ;;  %5163 = vmatpush1.bf16.msra.mxu1 %v8885_v59  ;;  %v9069_v59 = vld [vmem:[#allocation2 + $0xd8] sm:$0xff]  }
 0x518   :  { %4778 = vmatprep.subr.bf16.mxu0 %v8890_v60  ;;  %5164 = vmatprep.subr.bf16.mxu1 %v8890_v60 }
 0x519   :  { %4476 = vmatmul.mubr.bf16.gmra.mrb[76].mxu0 %v9052_v63  ;;  %5022 = vmatmul.mubr.bf16.gmra.mrb[76].mxu1 %v9053_v1  ;;  %v8920_v1 = vld [vmem:[#allocation13 + $0x4] ss:$8 sps:$4 sm:$0xff]  }
 0x51a   :  { %4485 = vmatprep.mubr.bf16.mxu0 %v9347_v0  ;;  %5031 = vmatprep.mubr.bf16.mxu1 %v9347_v0 }
 0x51b   :  { %4779 = vmatpush1.bf16.msra.mxu0 %v8888_v61  ;;  %5165 = vmatpush1.bf16.msra.mxu1 %v8888_v61 }
 0x51c   :  { %4780 = vmatprep.subr.bf16.mxu0 %v8893_v62  ;;  %5166 = vmatprep.subr.bf16.mxu1 %v8893_v62 }
 0x51f   :  { %4781 = vmatpush1.bf16.msra.mxu0 %v8891_v2  ;;  %5167 = vmatpush1.bf16.msra.mxu1 %v8891_v2 }
 0x520   :  { %4782 = vmatprep.subr.bf16.mxu0 %v8896_v3  ;;  %5168 = vmatprep.subr.bf16.mxu1 %v8896_v3 }
 0x521   :  { %4486 = vmatmul.mubr.bf16.gmra.mrb[80].mxu0 %v9054_v6  ;;  %5032 = vmatmul.mubr.bf16.gmra.mrb[80].mxu1 %v9055_v7 }
 0x522   :  { %4495 = vmatprep.mubr.bf16.mxu0 %v9347_v0  ;;  %5041 = vmatprep.mubr.bf16.mxu1 %v9347_v0 }
 0x523   :  { %4783 = vmatpush1.bf16.msra.mxu0 %v8894_v4  ;;  %5169 = vmatpush1.bf16.msra.mxu1 %v8894_v4 }
 0x524   :  { %4784 = vmatprep.subr.bf16.mxu0 %v8899_v5  ;;  %5170 = vmatprep.subr.bf16.mxu1 %v8899_v5 }
 0x527   :  { %4785 = vmatpush1.bf16.msra.mxu0 %v8897_v8  ;;  %5171 = vmatpush1.bf16.msra.mxu1 %v8897_v8 }
 0x528   :  { %4786 = vmatprep.subr.bf16.mxu0 %v8902_v9  ;;  %5172 = vmatprep.subr.bf16.mxu1 %v8902_v9 }
 0x529   :  { %4496 = vmatmul.mubr.bf16.gmra.mrb[84].mxu0 %v9056_v12  ;;  %5042 = vmatmul.mubr.bf16.gmra.mrb[84].mxu1 %v9057_v13 }
 0x52a   :  { %4505 = vmatprep.mubr.bf16.mxu0 %v9347_v0  ;;  %5051 = vmatprep.mubr.bf16.mxu1 %v9347_v0 }
 0x52b   :  { %4787 = vmatpush1.bf16.msra.mxu0 %v8900_v10  ;;  %5173 = vmatpush1.bf16.msra.mxu1 %v8900_v10 }
 0x52c   :  { %4788 = vmatprep.subr.bf16.mxu0 %v8905_v11  ;;  %5174 = vmatprep.subr.bf16.mxu1 %v8905_v11 }
 0x52f   :  { %4789 = vmatpush1.bf16.msra.mxu0 %v8903_v14  ;;  %5175 = vmatpush1.bf16.msra.mxu1 %v8903_v14 }
 0x530   :  { %4790 = vmatprep.subr.bf16.mxu0 %v8908_v15  ;;  %5176 = vmatprep.subr.bf16.mxu1 %v8908_v15 }
 0x531   :  { %4506 = vmatmul.mubr.bf16.gmra.mrb[88].mxu0 %v9058_v18  ;;  %5052 = vmatmul.mubr.bf16.gmra.mrb[88].mxu1 %v9059_v19 }
 0x532   :  { %4515 = vmatprep.mubr.bf16.mxu0 %v9347_v0  ;;  %5061 = vmatprep.mubr.bf16.mxu1 %v9347_v0 }
 0x533   :  { %4791 = vmatpush1.bf16.msra.mxu0 %v8906_v16  ;;  %5177 = vmatpush1.bf16.msra.mxu1 %v8906_v16 }
 0x534   :  { %4792 = vmatprep.subr.bf16.mxu0 %v8911_v17  ;;  %5178 = vmatprep.subr.bf16.mxu1 %v8911_v17 }
 0x537   :  { %4793 = vmatpush1.bf16.msra.mxu0 %v8909_v20  ;;  %5179 = vmatpush1.bf16.msra.mxu1 %v8909_v20 }
 0x538   :  { %4794 = vmatprep.subr.bf16.mxu0 %v8914_v22  ;;  %5180 = vmatprep.subr.bf16.mxu1 %v8914_v22 }
 0x539   :  { %4516 = vmatmul.mubr.bf16.gmra.mrb[92].mxu0 %v9060_v28  ;;  %5062 = vmatmul.mubr.bf16.gmra.mrb[92].mxu1 %v9061_v29 }
 0x53a   :  { %4525 = vmatprep.mubr.bf16.mxu0 %v9347_v0  ;;  %5071 = vmatprep.mubr.bf16.mxu1 %v9347_v0 }
 0x53b   :  { %4795 = vmatpush1.bf16.msra.mxu0 %v8912_v26  ;;  %5181 = vmatpush1.bf16.msra.mxu1 %v8912_v26 }
 0x53c   :  { %4796 = vmatprep.subr.bf16.mxu0 %v8917_v27  ;;  %5182 = vmatprep.subr.bf16.mxu1 %v8917_v27 }
 0x53f   :  { %4797 = vmatpush1.bf16.msra.mxu0 %v8915_v30  ;;  %5183 = vmatpush1.bf16.msra.mxu1 %v8915_v30  ;;  %v9070_v30 = vld [vmem:[#allocation2 + $0x60] sm:$0xff]  }
 0x540   :  { %5881 = vmatprep.subr.bf16.mxu0 %v8920_v1  ;;  %6138 = vmatprep.subr.bf16.mxu1 %v8920_v1 }
 0x541   :  { %4526 = vmatmul.mubr.bf16.gmra.mrb[96].mxu0 %v9062_v31  ;;  %5072 = vmatmul.mubr.bf16.gmra.mrb[96].mxu1 %v9063_v24  ;;  %v9071_v31 = vld [vmem:[#allocation2 + $0xe0] sm:$0xff]  }
 0x542   :  { %4535 = vmatprep.mubr.bf16.mxu0 %v9347_v0  ;;  %5081 = vmatprep.mubr.bf16.mxu1 %v9347_v0 }
 0x549   :  { %4536 = vmatmul.mubr.bf16.gmra.mrb[100].mxu0 %v9064_v32  ;;  %5082 = vmatmul.mubr.bf16.gmra.mrb[100].mxu1 %v9065_v25 }
 0x54a   :  { %4545 = vmatprep.mubr.bf16.mxu0 %v9347_v0  ;;  %5091 = vmatprep.mubr.bf16.mxu1 %v9347_v0 }
 0x551   :  { %4546 = vmatmul.mubr.bf16.gmra.mrb[104].mxu0 %v9066_v36  ;;  %5092 = vmatmul.mubr.bf16.gmra.mrb[104].mxu1 %v9067_v37 }
 0x552   :  { %4555 = vmatprep.mubr.bf16.mxu0 %v9347_v0  ;;  %5101 = vmatprep.mubr.bf16.mxu1 %v9347_v0 }
 0x554   :  { %v3741_v40 = vpop.f32.mrb[0].mxu0  ;;  %v3998_v33 = vpop.f32.mrb[0].mxu1 }
 0x555   :  { %v3742_v41 = vadd.f32 %v3741_v40, %v10242_v38  ;;  %v3999_v34 = vadd.f32 %v3998_v33, %v10242_v38  ;;  %v3743_v51 = vpop.f32.mrb[1].mxu0  ;;  %v4000_v52 = vpop.f32.mrb[1].mxu1 }
 0x556   :  { %v3744_v44 = vadd.f32 %v3743_v51, %v10245_v39  ;;  %v4001_v45 = vadd.f32 %v4000_v52, %v10245_v39  ;;  %v3745_v46 = vpop.f32.mrb[2].mxu0  ;;  %v4002_v47 = vpop.f32.mrb[2].mxu1 }
 0x557   :  { %v3746_v48 = vadd.f32 %v3745_v46, %v10242_v38  ;;  %v4003_v49 = vadd.f32 %v4002_v47, %v10242_v38  ;;  %v3747_v50 = vpop.f32.mrb[3].mxu0  ;;  %v4004_v42 = vpop.f32.mrb[3].mxu1  ;;  %v3900_v54 = vmax.f32 %v3742_v41, 0.0  ;;  %v4157_v55 = vmax.f32 %v3999_v34, 0.0 }
 0x558   :  { %v3748_v43 = vadd.f32 %v3747_v50, %v10245_v39  ;;  %v4005_v53 = vadd.f32 %v4004_v42, %v10245_v39  ;;  %v3901_v60 = vmax.f32 %v3744_v44, 0.0  ;;  %v4158_v61 = vmax.f32 %v4001_v45, 0.0 }
 0x559   :  { %v3902_v56 = vmax.f32 %v3746_v48, 0.0  ;;  %v4159_v57 = vmax.f32 %v4003_v49, 0.0  ;;  %4556 = vmatmul.mubr.bf16.gmra.mrb[108].mxu0 %v9068_v58  ;;  %5102 = vmatmul.mubr.bf16.gmra.mrb[108].mxu1 %v9069_v59 }
 0x55a   :  { %v3903_v62 = vmax.f32 %v3748_v43, 0.0  ;;  %v4160_v63 = vmax.f32 %v4005_v53, 0.0  ;;  %4565 = vmatprep.mubr.bf16.mxu0 %v9347_v0  ;;  %5111 = vmatprep.mubr.bf16.mxu1 %v9347_v0 }
 0x55b   :  { %v10259_v2 = vpack.c.bf16 %v3902_v56, %v3900_v54  ;;  %v10261_v3 = vpack.c.bf16 %v4159_v57, %v4157_v55 }
 0x55c   :  { %v3751_v4 = vpop.f32.mrb[4].mxu0  ;;  %v4008_v5 = vpop.f32.mrb[4].mxu1  ;;  %v10263_v6 = vpack.c.bf16 %v3903_v62, %v3901_v60  ;;  %v10265_v7 = vpack.c.bf16 %v4160_v63, %v4158_v61  ;;  %v9072_v60 = vld [vmem:[#allocation2 + $0x68] sm:$0xff]  }
 0x55d   :  { %v3752_v8 = vadd.f32 %v3751_v4, %v10242_v38  ;;  %v4009_v9 = vadd.f32 %v4008_v5, %v10242_v38  ;;  %v3753_v10 = vpop.f32.mrb[5].mxu0  ;;  %v4010_v11 = vpop.f32.mrb[5].mxu1  ;;  %v9073_v61 = vld [vmem:[#allocation2 + $0xe8] sm:$0xff]  }
 0x55e   :  { %v3754_v12 = vadd.f32 %v3753_v10, %v10245_v39  ;;  %v4011_v13 = vadd.f32 %v4010_v11, %v10245_v39  ;;  %v3755_v14 = vpop.f32.mrb[6].mxu0  ;;  %v4012_v15 = vpop.f32.mrb[6].mxu1 }
 0x55f   :  { %v3756_v16 = vadd.f32 %v3755_v14, %v10242_v38  ;;  %v4013_v17 = vadd.f32 %v4012_v15, %v10242_v38  ;;  %v3757_v18 = vpop.f32.mrb[7].mxu0  ;;  %v4014_v19 = vpop.f32.mrb[7].mxu1  ;;  %v3904_v26 = vmax.f32 %v3752_v8, 0.0  ;;  %v4161_v27 = vmax.f32 %v4009_v9, 0.0 }
 0x560   :  { %v3758_v20 = vadd.f32 %v3757_v18, %v10245_v39  ;;  %v4015_v22 = vadd.f32 %v4014_v19, %v10245_v39  ;;  %v3905_v24 = vmax.f32 %v3754_v12, 0.0  ;;  %v4162_v32 = vmax.f32 %v4011_v13, 0.0 }
 0x561   :  { %v3906_v28 = vmax.f32 %v3756_v16, 0.0  ;;  %v4163_v29 = vmax.f32 %v4013_v17, 0.0  ;;  %4566 = vmatmul.mubr.bf16.gmra.mrb[112].mxu0 %v9070_v30  ;;  %5112 = vmatmul.mubr.bf16.gmra.mrb[112].mxu1 %v9071_v31 }
 0x562   :  { %v3907_v25 = vmax.f32 %v3758_v20, 0.0  ;;  %v4164_v35 = vmax.f32 %v4015_v22, 0.0  ;;  %4575 = vmatprep.mubr.bf16.mxu0 %v9347_v0  ;;  %5121 = vmatprep.mubr.bf16.mxu1 %v9347_v0 }
 0x563   :  { %v10277_v36 = vpack.c.bf16 %v3906_v28, %v3904_v26  ;;  %v10279_v37 = vpack.c.bf16 %v4163_v29, %v4161_v27 }
 0x564   :  { %v3761_v40 = vpop.f32.mrb[8].mxu0  ;;  %v4018_v33 = vpop.f32.mrb[8].mxu1  ;;  %v10281_v41 = vpack.c.bf16 %v3907_v25, %v3905_v24  ;;  %v10283_v34 = vpack.c.bf16 %v4164_v35, %v4162_v32  ;;  %v9074_v35 = vld [vmem:[#allocation2 + $0x70] sm:$0xff]  }
 0x565   :  { %v3762_v51 = vadd.f32 %v3761_v40, %v10242_v38  ;;  %v4019_v52 = vadd.f32 %v4018_v33, %v10242_v38  ;;  %v3763_v44 = vpop.f32.mrb[9].mxu0  ;;  %v4020_v45 = vpop.f32.mrb[9].mxu1  ;;  %v9075_v40 = vld [vmem:[#allocation2 + $0xf0] sm:$0xff]  }
 0x566   :  { %v3764_v46 = vadd.f32 %v3763_v44, %v10245_v39  ;;  %v4021_v47 = vadd.f32 %v4020_v45, %v10245_v39  ;;  %v3765_v48 = vpop.f32.mrb[10].mxu0  ;;  %v4022_v49 = vpop.f32.mrb[10].mxu1 }
 0x567   :  { %v3766_v50 = vadd.f32 %v3765_v48, %v10242_v38  ;;  %v4023_v42 = vadd.f32 %v4022_v49, %v10242_v38  ;;  %v3767_v43 = vpop.f32.mrb[11].mxu0  ;;  %v4024_v53 = vpop.f32.mrb[11].mxu1  ;;  %v3908_v56 = vmax.f32 %v3762_v51, 0.0  ;;  %v4165_v57 = vmax.f32 %v4019_v52, 0.0 }
 0x568   :  { %v3768_v54 = vadd.f32 %v3767_v43, %v10245_v39  ;;  %v4025_v55 = vadd.f32 %v4024_v53, %v10245_v39  ;;  %v3909_v62 = vmax.f32 %v3764_v46, 0.0  ;;  %v4166_v63 = vmax.f32 %v4021_v47, 0.0 }
 0x569   :  { %v3910_v58 = vmax.f32 %v3766_v50, 0.0  ;;  %v4167_v59 = vmax.f32 %v4023_v42, 0.0  ;;  %4576 = vmatmul.mubr.bf16.gmra.mrb[116].mxu0 %v9072_v60  ;;  %5122 = vmatmul.mubr.bf16.gmra.mrb[116].mxu1 %v9073_v61 }
 0x56a   :  { %v3911_v1 = vmax.f32 %v3768_v54, 0.0  ;;  %v4168_v4 = vmax.f32 %v4025_v55, 0.0  ;;  %4585 = vmatprep.mubr.bf16.mxu0 %v9347_v0  ;;  %5131 = vmatprep.mubr.bf16.mxu1 %v9347_v0 }
 0x56b   :  { %v10295_v5 = vpack.c.bf16 %v3910_v58, %v3908_v56  ;;  %v10297_v8 = vpack.c.bf16 %v4167_v59, %v4165_v57 }
 0x56c   :  { %v3771_v9 = vpop.f32.mrb[12].mxu0  ;;  %v4028_v10 = vpop.f32.mrb[12].mxu1  ;;  %v10299_v11 = vpack.c.bf16 %v3911_v1, %v3909_v62  ;;  %v10301_v12 = vpack.c.bf16 %v4168_v4, %v4166_v63 }
 0x56d   :  { %v3772_v13 = vadd.f32 %v3771_v9, %v10242_v38  ;;  %v4029_v14 = vadd.f32 %v4028_v10, %v10242_v38  ;;  %v3773_v15 = vpop.f32.mrb[13].mxu0  ;;  %v4030_v16 = vpop.f32.mrb[13].mxu1 }
 0x56e   :  { %v3774_v17 = vadd.f32 %v3773_v15, %v10245_v39  ;;  %v4031_v18 = vadd.f32 %v4030_v16, %v10245_v39  ;;  %v3775_v19 = vpop.f32.mrb[14].mxu0  ;;  %v4032_v20 = vpop.f32.mrb[14].mxu1 }
 0x56f   :  { %v3776_v22 = vadd.f32 %v3775_v19, %v10242_v38  ;;  %v4033_v26 = vadd.f32 %v4032_v20, %v10242_v38  ;;  %v3777_v27 = vpop.f32.mrb[15].mxu0  ;;  %v4034_v28 = vpop.f32.mrb[15].mxu1  ;;  %v3912_v31 = vmax.f32 %v3772_v13, 0.0  ;;  %v4169_v24 = vmax.f32 %v4029_v14, 0.0  ;;  %v9076_v13 = vld [vmem:[#allocation2 + $0x78] sm:$0xff]  }
 0x570   :  { %v3778_v29 = vadd.f32 %v3777_v27, %v10245_v39  ;;  %v4035_v30 = vadd.f32 %v4034_v28, %v10245_v39  ;;  %v3913_v33 = vmax.f32 %v3774_v17, 0.0  ;;  %v4170_v51 = vmax.f32 %v4031_v18, 0.0  ;;  %v9077_v14 = vld [vmem:[#allocation2 + $0xf8] sm:$0xff]  }
 0x571   :  { %v3914_v32 = vmax.f32 %v3776_v22, 0.0  ;;  %v4171_v25 = vmax.f32 %v4033_v26, 0.0  ;;  %4586 = vmatmul.mubr.bf16.gmra.mrb[120].mxu0 %v9074_v35  ;;  %5132 = vmatmul.mubr.bf16.gmra.mrb[120].mxu1 %v9075_v40 }
 0x572   :  { %v3915_v52 = vmax.f32 %v3778_v29, 0.0  ;;  %v4172_v44 = vmax.f32 %v4035_v30, 0.0  ;;  %4595 = vmatprep.mubr.bf16.mxu0 %v9347_v0  ;;  %5141 = vmatprep.mubr.bf16.mxu1 %v9347_v0 }
 0x573   :  { %v10313_v45 = vpack.c.bf16 %v3914_v32, %v3912_v31  ;;  %v10315_v46 = vpack.c.bf16 %v4171_v25, %v4169_v24 }
 0x574   :  { %v3781_v47 = vpop.f32.mrb[16].mxu0  ;;  %v4038_v48 = vpop.f32.mrb[16].mxu1  ;;  %v10317_v49 = vpack.c.bf16 %v3915_v52, %v3913_v33  ;;  %v10319_v50 = vpack.c.bf16 %v4172_v44, %v4170_v51  ;;  %v8918_v52 = vld [vmem:[#allocation13] ss:$8 sps:$4 sm:$0xff]  }
 0x575   :  { %v3782_v42 = vadd.f32 %v3781_v47, %v10242_v38  ;;  %v4039_v43 = vadd.f32 %v4038_v48, %v10242_v38  ;;  %v3783_v53 = vpop.f32.mrb[17].mxu0  ;;  %v4040_v54 = vpop.f32.mrb[17].mxu1  ;;  %v8923_v48 = vld [vmem:[#allocation13 + $0x14] ss:$8 sps:$4 sm:$0xff]  }
 0x576   :  { %v3784_v55 = vadd.f32 %v3783_v53, %v10245_v39  ;;  %v4041_v0 = vadd.f32 %v4040_v54, %v10245_v39  ;;  %v3785_v56 = vpop.f32.mrb[18].mxu0  ;;  %v4042_v57 = vpop.f32.mrb[18].mxu1 }
 0x577   :  { %v3786_v58 = vadd.f32 %v3785_v56, %v10242_v38  ;;  %v4043_v59 = vadd.f32 %v4042_v57, %v10242_v38  ;;  %v3787_v60 = vpop.f32.mrb[19].mxu0  ;;  %v4044_v61 = vpop.f32.mrb[19].mxu1  ;;  %v3916_v1 = vmax.f32 %v3782_v42, 0.0  ;;  %v4173_v4 = vmax.f32 %v4039_v43, 0.0 }
 0x578   :  { %v3788_v62 = vadd.f32 %v3787_v60, %v10245_v39  ;;  %v4045_v63 = vadd.f32 %v4044_v61, %v10245_v39  ;;  %v3917_v15 = vmax.f32 %v3784_v55, 0.0  ;;  %v4174_v16 = vmax.f32 %v4041_v0, 0.0  ;;  %v8921_v60 = vld [vmem:[#allocation13 + $0x10] ss:$8 sps:$4 sm:$0xff]  }
 0x579   :  { %v3918_v9 = vmax.f32 %v3786_v58, 0.0  ;;  %v4175_v10 = vmax.f32 %v4043_v59, 0.0  ;;  %4596 = vmatmul.mubr.bf16.gmra.mrb[124].mxu0 %v9076_v13  ;;  %5142 = vmatmul.mubr.bf16.gmra.mrb[124].mxu1 %v9077_v14 }
 0x57a   :  { %v3919_v17 = vmax.f32 %v3788_v62, 0.0  ;;  %v4176_v18 = vmax.f32 %v4045_v63, 0.0  ;;  %4798 = vmatprep.mubr.bf16.mxu0 %v10263_v6  ;;  %5184 = vmatprep.mubr.bf16.mxu1 %v10265_v7  ;;  %v8926_v63 = vld [vmem:[#allocation13 + $0x24] ss:$8 sps:$4 sm:$0xff]  }
 0x57b   :  { %v10331_v19 = vpack.c.bf16 %v3918_v9, %v3916_v1  ;;  %v10333_v20 = vpack.c.bf16 %v4175_v10, %v4173_v4 }
 0x57c   :  { %v3791_v22 = vpop.f32.mrb[20].mxu0  ;;  %v4048_v26 = vpop.f32.mrb[20].mxu1  ;;  %v10335_v27 = vpack.c.bf16 %v3919_v17, %v3917_v15  ;;  %v10337_v28 = vpack.c.bf16 %v4176_v18, %v4174_v16 }
 0x57d   :  { %v3792_v29 = vadd.f32 %v3791_v22, %v10242_v38  ;;  %v4049_v30 = vadd.f32 %v4048_v26, %v10242_v38  ;;  %v3793_v31 = vpop.f32.mrb[21].mxu0  ;;  %v4050_v24 = vpop.f32.mrb[21].mxu1  ;;  %v8924_v22 = vld [vmem:[#allocation13 + $0x20] ss:$8 sps:$4 sm:$0xff]  }
 0x57e   :  { %v3794_v6 = vadd.f32 %v3793_v31, %v10245_v39  ;;  %v4051_v7 = vadd.f32 %v4050_v24, %v10245_v39  ;;  %v3795_v32 = vpop.f32.mrb[22].mxu0  ;;  %v4052_v25 = vpop.f32.mrb[22].mxu1 }
 0x57f   :  { %v3796_v35 = vadd.f32 %v3795_v32, %v10242_v38  ;;  %v4053_v40 = vadd.f32 %v4052_v25, %v10242_v38  ;;  %v3797_v33 = vpop.f32.mrb[23].mxu0  ;;  %v4054_v51 = vpop.f32.mrb[23].mxu1  ;;  %v3920_v42 = vmax.f32 %v3792_v29, 0.0  ;;  %v4177_v43 = vmax.f32 %v4049_v30, 0.0  ;;  %v8929_v30 = vld [vmem:[#allocation13 + $0x34] ss:$8 sps:$4 sm:$0xff]  }
 0x580   :  { %v3798_v44 = vadd.f32 %v3797_v33, %v10245_v39  ;;  %v4055_v47 = vadd.f32 %v4054_v51, %v10245_v39  ;;  %v3921_v55 = vmax.f32 %v3794_v6, 0.0  ;;  %v4178_v0 = vmax.f32 %v4051_v7, 0.0 }
 0x581   :  { %v3922_v53 = vmax.f32 %v3796_v35, 0.0  ;;  %v4179_v54 = vmax.f32 %v4053_v40, 0.0  ;;  %4799 = vmatmul.mubr.bf16.vlgmr.msra.gmra.mrb[64].mxu0 %v10259_v2  ;;  %5185 = vmatmul.mubr.bf16.vlgmr.msra.gmra.mrb[64].mxu1 %v10261_v3 }
 0x582   :  { %v3923_v56 = vmax.f32 %v3798_v44, 0.0  ;;  %v4180_v57 = vmax.f32 %v4055_v47, 0.0  ;;  %4808 = vmatprep.mubr.bf16.mxu0 %v10281_v41  ;;  %5194 = vmatprep.mubr.bf16.mxu1 %v10283_v34 }
 0x583   :  { %v10351_v58 = vpack.c.bf16 %v3922_v53, %v3920_v42  ;;  %v10353_v59 = vpack.c.bf16 %v4179_v54, %v4177_v43  ;;  %5882 = vmatpush1.bf16.msra.mxu0 %v8918_v52  ;;  %6139 = vmatpush1.bf16.msra.mxu1 %v8918_v52  ;;  %v8927_v52 = vld [vmem:[#allocation13 + $0x30] ss:$8 sps:$4 sm:$0xff]  }
 0x584   :  { %v3801_v61 = vpop.f32.mrb[24].mxu0  ;;  %v4058_v62 = vpop.f32.mrb[24].mxu1  ;;  %v10355_v2 = vpack.c.bf16 %v3923_v56, %v3921_v55  ;;  %v10357_v3 = vpack.c.bf16 %v4180_v57, %v4178_v0  ;;  %5883 = vmatprep.subr.bf16.mxu0 %v8923_v48  ;;  %6140 = vmatprep.subr.bf16.mxu1 %v8923_v48  ;;  %v8932_v48 = vld [vmem:[#allocation13 + $0x44] ss:$8 sps:$4 sm:$0xff]  }
 0x585   :  { %v3802_v41 = vadd.f32 %v3801_v61, %v10242_v38  ;;  %v4059_v34 = vadd.f32 %v4058_v62, %v10242_v38  ;;  %v3803_v1 = vpop.f32.mrb[25].mxu0  ;;  %v4060_v4 = vpop.f32.mrb[25].mxu1  ;;  %v8930_v62 = vld [vmem:[#allocation13 + $0x40] ss:$8 sps:$4 sm:$0xff]  }
 0x586   :  { %v3804_v9 = vadd.f32 %v3803_v1, %v10245_v39  ;;  %v4061_v10 = vadd.f32 %v4060_v4, %v10245_v39  ;;  %v3805_v13 = vpop.f32.mrb[26].mxu0  ;;  %v4062_v14 = vpop.f32.mrb[26].mxu1 }
 0x587   :  { %v3806_v15 = vadd.f32 %v3805_v13, %v10242_v38  ;;  %v4063_v16 = vadd.f32 %v4062_v14, %v10242_v38  ;;  %v3807_v17 = vpop.f32.mrb[27].mxu0  ;;  %v4064_v18 = vpop.f32.mrb[27].mxu1  ;;  %5884 = vmatpush1.bf16.msra.mxu0 %v8921_v60  ;;  %6141 = vmatpush1.bf16.msra.mxu1 %v8921_v60  ;;  %v3924_v31 = vmax.f32 %v3802_v41, 0.0  ;;  %v4181_v24 = vmax.f32 %v4059_v34, 0.0  ;;  %v8935_v34 = vld [vmem:[#allocation13 + $0x54] ss:$8 sps:$4 sm:$0xff]  }
 0x588   :  { %v3808_v26 = vadd.f32 %v3807_v17, %v10245_v39  ;;  %v4065_v29 = vadd.f32 %v4064_v18, %v10245_v39  ;;  %5885 = vmatprep.subr.bf16.mxu0 %v8926_v63  ;;  %6142 = vmatprep.subr.bf16.mxu1 %v8926_v63  ;;  %v3925_v32 = vmax.f32 %v3804_v9, 0.0  ;;  %v4182_v25 = vmax.f32 %v4061_v10, 0.0 }
 0x589   :  { %v3926_v6 = vmax.f32 %v3806_v15, 0.0  ;;  %v4183_v7 = vmax.f32 %v4063_v16, 0.0  ;;  %4809 = vmatmul.mubr.bf16.gmra.mrb[68].mxu0 %v10277_v36  ;;  %5195 = vmatmul.mubr.bf16.gmra.mrb[68].mxu1 %v10279_v37 }
 0x58a   :  { %v3927_v35 = vmax.f32 %v3808_v26, 0.0  ;;  %v4184_v40 = vmax.f32 %v4065_v29, 0.0  ;;  %4818 = vmatprep.mubr.bf16.mxu0 %v10299_v11  ;;  %5204 = vmatprep.mubr.bf16.mxu1 %v10301_v12 }
 0x58b   :  { %v10371_v33 = vpack.c.bf16 %v3926_v6, %v3924_v31  ;;  %v10373_v51 = vpack.c.bf16 %v4183_v7, %v4181_v24  ;;  %5886 = vmatpush1.bf16.msra.mxu0 %v8924_v22  ;;  %6143 = vmatpush1.bf16.msra.mxu1 %v8924_v22  ;;  %v8933_v22 = vld [vmem:[#allocation13 + $0x50] ss:$8 sps:$4 sm:$0xff]  }
 0x58c   :  { %v3811_v44 = vpop.f32.mrb[28].mxu0  ;;  %v4068_v47 = vpop.f32.mrb[28].mxu1  ;;  %v10375_v36 = vpack.c.bf16 %v3927_v35, %v3925_v32  ;;  %v10377_v37 = vpack.c.bf16 %v4184_v40, %v4182_v25  ;;  %5887 = vmatprep.subr.bf16.mxu0 %v8929_v30  ;;  %6144 = vmatprep.subr.bf16.mxu1 %v8929_v30  ;;  %v8938_v30 = vld [vmem:[#allocation13 + $0x64] ss:$8 sps:$4 sm:$0xff]  }
 0x58d   :  { %v3812_v11 = vadd.f32 %v3811_v44, %v10242_v38  ;;  %v4069_v12 = vadd.f32 %v4068_v47, %v10242_v38  ;;  %v3813_v42 = vpop.f32.mrb[29].mxu0  ;;  %v4070_v43 = vpop.f32.mrb[29].mxu1  ;;  %v8936_v47 = vld [vmem:[#allocation13 + $0x60] ss:$8 sps:$4 sm:$0xff]  }
 0x58e   :  { %v3814_v53 = vadd.f32 %v3813_v42, %v10245_v39  ;;  %v4071_v54 = vadd.f32 %v4070_v43, %v10245_v39  ;;  %v3815_v55 = vpop.f32.mrb[30].mxu0  ;;  %v4072_v0 = vpop.f32.mrb[30].mxu1 }
 0x58f   :  { %v3816_v56 = vadd.f32 %v3815_v55, %v10242_v38  ;;  %v4073_v57 = vadd.f32 %v4072_v0, %v10242_v38  ;;  %v3817_v60 = vpop.f32.mrb[31].mxu0  ;;  %v4074_v61 = vpop.f32.mrb[31].mxu1  ;;  %5888 = vmatpush1.bf16.msra.mxu0 %v8927_v52  ;;  %6145 = vmatpush1.bf16.msra.mxu1 %v8927_v52  ;;  %v3928_v1 = vmax.f32 %v3812_v11, 0.0  ;;  %v4185_v4 = vmax.f32 %v4069_v12, 0.0  ;;  %v8941_v12 = vld [vmem:[#allocation13 + $0x74] ss:$8 sps:$4 sm:$0xff]  }
 0x590   :  { %v3818_v63 = vadd.f32 %v3817_v60, %v10245_v39  ;;  %v4075_v41 = vadd.f32 %v4074_v61, %v10245_v39  ;;  %5889 = vmatprep.subr.bf16.mxu0 %v8932_v48  ;;  %6146 = vmatprep.subr.bf16.mxu1 %v8932_v48  ;;  %v3929_v13 = vmax.f32 %v3814_v53, 0.0  ;;  %v4186_v14 = vmax.f32 %v4071_v54, 0.0 }
 0x591   :  { %v3930_v9 = vmax.f32 %v3816_v56, 0.0  ;;  %v4187_v10 = vmax.f32 %v4073_v57, 0.0  ;;  %4819 = vmatmul.mubr.bf16.gmra.mrb[72].mxu0 %v10295_v5  ;;  %5205 = vmatmul.mubr.bf16.gmra.mrb[72].mxu1 %v10297_v8 }
 0x592   :  { %v3931_v15 = vmax.f32 %v3818_v63, 0.0  ;;  %v4188_v16 = vmax.f32 %v4075_v41, 0.0  ;;  %4828 = vmatprep.mubr.bf16.mxu0 %v10317_v49  ;;  %5214 = vmatprep.mubr.bf16.mxu1 %v10319_v50 }
 0x593   :  { %v10391_v17 = vpack.c.bf16 %v3930_v9, %v3928_v1  ;;  %v10393_v18 = vpack.c.bf16 %v4187_v10, %v4185_v4  ;;  %5890 = vmatpush1.bf16.msra.mxu0 %v8930_v62  ;;  %6147 = vmatpush1.bf16.msra.mxu1 %v8930_v62  ;;  %v8939_v62 = vld [vmem:[#allocation13 + $0x70] ss:$8 sps:$4 sm:$0xff]  }
 0x594   :  { %v3821_v26 = vpop.f32.mrb[32].mxu0  ;;  %v4078_v29 = vpop.f32.mrb[32].mxu1  ;;  %v10395_v5 = vpack.c.bf16 %v3931_v15, %v3929_v13  ;;  %v10397_v8 = vpack.c.bf16 %v4188_v16, %v4186_v14  ;;  %5891 = vmatprep.subr.bf16.mxu0 %v8935_v34  ;;  %6148 = vmatprep.subr.bf16.mxu1 %v8935_v34  ;;  %v8944_v34 = vld [vmem:[#allocation13 + $0x84] ss:$8 sps:$4 sm:$0xff]  }
 0x595   :  { %v3822_v49 = vadd.f32 %v3821_v26, %v10242_v38  ;;  %v4079_v50 = vadd.f32 %v4078_v29, %v10242_v38  ;;  %v3823_v31 = vpop.f32.mrb[33].mxu0  ;;  %v4080_v24 = vpop.f32.mrb[33].mxu1  ;;  %v8942_v29 = vld [vmem:[#allocation13 + $0x80] ss:$8 sps:$4 sm:$0xff]  }
 0x596   :  { %v3824_v6 = vadd.f32 %v3823_v31, %v10245_v39  ;;  %v4081_v7 = vadd.f32 %v4080_v24, %v10245_v39  ;;  %v3825_v32 = vpop.f32.mrb[34].mxu0  ;;  %v4082_v25 = vpop.f32.mrb[34].mxu1 }
 0x597   :  { %v3826_v35 = vadd.f32 %v3825_v32, %v10242_v38  ;;  %v4083_v40 = vadd.f32 %v4082_v25, %v10242_v38  ;;  %v3827_v52 = vpop.f32.mrb[35].mxu0  ;;  %v4084_v44 = vpop.f32.mrb[35].mxu1  ;;  %5892 = vmatpush1.bf16.msra.mxu0 %v8933_v22  ;;  %6149 = vmatpush1.bf16.msra.mxu1 %v8933_v22  ;;  %v3932_v42 = vmax.f32 %v3822_v49, 0.0  ;;  %v4189_v43 = vmax.f32 %v4079_v50, 0.0  ;;  %v8947_v50 = vld [vmem:[#allocation13 + $0x94] ss:$8 sps:$4 sm:$0xff]  }
 0x598   :  { %v3828_v48 = vadd.f32 %v3827_v52, %v10245_v39  ;;  %v4085_v11 = vadd.f32 %v4084_v44, %v10245_v39  ;;  %5893 = vmatprep.subr.bf16.mxu0 %v8938_v30  ;;  %6150 = vmatprep.subr.bf16.mxu1 %v8938_v30  ;;  %v3933_v55 = vmax.f32 %v3824_v6, 0.0  ;;  %v4190_v0 = vmax.f32 %v4081_v7, 0.0 }
 0x599   :  { %v3934_v53 = vmax.f32 %v3826_v35, 0.0  ;;  %v4191_v54 = vmax.f32 %v4083_v40, 0.0  ;;  %4829 = vmatmul.mubr.bf16.gmra.mrb[76].mxu0 %v10313_v45  ;;  %5215 = vmatmul.mubr.bf16.gmra.mrb[76].mxu1 %v10315_v46 }
 0x59a   :  { %v3935_v56 = vmax.f32 %v3828_v48, 0.0  ;;  %v4192_v57 = vmax.f32 %v4085_v11, 0.0  ;;  %4838 = vmatprep.mubr.bf16.mxu0 %v10335_v27  ;;  %5224 = vmatprep.mubr.bf16.mxu1 %v10337_v28 }
 0x59b   :  { %v10411_v60 = vpack.c.bf16 %v3934_v53, %v3932_v42  ;;  %v10413_v61 = vpack.c.bf16 %v4191_v54, %v4189_v43  ;;  %5894 = vmatpush1.bf16.msra.mxu0 %v8936_v47  ;;  %6151 = vmatpush1.bf16.msra.mxu1 %v8936_v47  ;;  %v8945_v47 = vld [vmem:[#allocation13 + $0x90] ss:$8 sps:$4 sm:$0xff]  }
 0x59c   :  { %v3831_v63 = vpop.f32.mrb[36].mxu0  ;;  %v4088_v41 = vpop.f32.mrb[36].mxu1  ;;  %v10415_v45 = vpack.c.bf16 %v3935_v56, %v3933_v55  ;;  %v10417_v46 = vpack.c.bf16 %v4192_v57, %v4190_v0  ;;  %5895 = vmatprep.subr.bf16.mxu0 %v8941_v12  ;;  %6152 = vmatprep.subr.bf16.mxu1 %v8941_v12  ;;  %v8950_v12 = vld [vmem:[#allocation13 + $0xa4] ss:$8 sps:$4 sm:$0xff]  }
 0x59d   :  { %v3832_v27 = vadd.f32 %v3831_v63, %v10242_v38  ;;  %v4089_v28 = vadd.f32 %v4088_v41, %v10242_v38  ;;  %v3833_v1 = vpop.f32.mrb[37].mxu0  ;;  %v4090_v4 = vpop.f32.mrb[37].mxu1  ;;  %v8948_v41 = vld [vmem:[#allocation13 + $0xa0] ss:$8 sps:$4 sm:$0xff]  }
 0x59e   :  { %v3834_v9 = vadd.f32 %v3833_v1, %v10245_v39  ;;  %v4091_v10 = vadd.f32 %v4090_v4, %v10245_v39  ;;  %v3835_v13 = vpop.f32.mrb[38].mxu0  ;;  %v4092_v14 = vpop.f32.mrb[38].mxu1 }
 0x59f   :  { %v3836_v15 = vadd.f32 %v3835_v13, %v10242_v38  ;;  %v4093_v16 = vadd.f32 %v4092_v14, %v10242_v38  ;;  %v3837_v22 = vpop.f32.mrb[39].mxu0  ;;  %v4094_v26 = vpop.f32.mrb[39].mxu1  ;;  %5896 = vmatpush1.bf16.msra.mxu0 %v8939_v62  ;;  %6153 = vmatpush1.bf16.msra.mxu1 %v8939_v62  ;;  %v3936_v31 = vmax.f32 %v3832_v27, 0.0  ;;  %v4193_v24 = vmax.f32 %v4089_v28, 0.0  ;;  %v8953_v28 = vld [vmem:[#allocation13 + $0xb4] ss:$8 sps:$4 sm:$0xff]  }
 0x5a0   :  { %v3838_v30 = vadd.f32 %v3837_v22, %v10245_v39  ;;  %v4095_v49 = vadd.f32 %v4094_v26, %v10245_v39  ;;  %5897 = vmatprep.subr.bf16.mxu0 %v8944_v34  ;;  %6154 = vmatprep.subr.bf16.mxu1 %v8944_v34  ;;  %v3937_v32 = vmax.f32 %v3834_v9, 0.0  ;;  %v4194_v25 = vmax.f32 %v4091_v10, 0.0 }
 0x5a1   :  { %v3938_v6 = vmax.f32 %v3836_v15, 0.0  ;;  %v4195_v7 = vmax.f32 %v4093_v16, 0.0  ;;  %4839 = vmatmul.mubr.bf16.gmra.mrb[80].mxu0 %v10331_v19  ;;  %5225 = vmatmul.mubr.bf16.gmra.mrb[80].mxu1 %v10333_v20 }
 0x5a2   :  { %v3939_v35 = vmax.f32 %v3838_v30, 0.0  ;;  %v4196_v40 = vmax.f32 %v4095_v49, 0.0  ;;  %4848 = vmatprep.mubr.bf16.mxu0 %v10355_v2  ;;  %5234 = vmatprep.mubr.bf16.mxu1 %v10357_v3 }
 0x5a3   :  { %v10431_v52 = vpack.c.bf16 %v3938_v6, %v3936_v31  ;;  %v10433_v44 = vpack.c.bf16 %v4195_v7, %v4193_v24  ;;  %5898 = vmatpush1.bf16.msra.mxu0 %v8942_v29  ;;  %6155 = vmatpush1.bf16.msra.mxu1 %v8942_v29  ;;  %v8951_v29 = vld [vmem:[#allocation13 + $0xb0] ss:$8 sps:$4 sm:$0xff]  }
 0x5a4   :  { %v3841_v48 = vpop.f32.mrb[40].mxu0  ;;  %v4098_v11 = vpop.f32.mrb[40].mxu1  ;;  %v10435_v19 = vpack.c.bf16 %v3939_v35, %v3937_v32  ;;  %v10437_v20 = vpack.c.bf16 %v4196_v40, %v4194_v25  ;;  %5899 = vmatprep.subr.bf16.mxu0 %v8947_v50  ;;  %6156 = vmatprep.subr.bf16.mxu1 %v8947_v50  ;;  %v8956_v50 = vld [vmem:[#allocation13 + $0xc4] ss:$8 sps:$4 sm:$0xff]  }
 0x5a5   :  { %v3842_v2 = vadd.f32 %v3841_v48, %v10242_v38  ;;  %v4099_v3 = vadd.f32 %v4098_v11, %v10242_v38  ;;  %v3843_v42 = vpop.f32.mrb[41].mxu0  ;;  %v4100_v43 = vpop.f32.mrb[41].mxu1  ;;  %v8954_v11 = vld [vmem:[#allocation13 + $0xc0] ss:$8 sps:$4 sm:$0xff]  }
 0x5a6   :  { %v3844_v53 = vadd.f32 %v3843_v42, %v10245_v39  ;;  %v4101_v54 = vadd.f32 %v4100_v43, %v10245_v39  ;;  %v3845_v55 = vpop.f32.mrb[42].mxu0  ;;  %v4102_v0 = vpop.f32.mrb[42].mxu1 }
 0x5a7   :  { %v3846_v56 = vadd.f32 %v3845_v55, %v10242_v38  ;;  %v4103_v57 = vadd.f32 %v4102_v0, %v10242_v38  ;;  %v3847_v62 = vpop.f32.mrb[43].mxu0  ;;  %v4104_v63 = vpop.f32.mrb[43].mxu1  ;;  %5900 = vmatpush1.bf16.msra.mxu0 %v8945_v47  ;;  %6157 = vmatpush1.bf16.msra.mxu1 %v8945_v47  ;;  %v3940_v1 = vmax.f32 %v3842_v2, 0.0  ;;  %v4197_v4 = vmax.f32 %v4099_v3, 0.0  ;;  %v8959_v3 = vld [vmem:[#allocation13 + $0xd4] ss:$8 sps:$4 sm:$0xff]  }
 0x5a8   :  { %v3848_v34 = vadd.f32 %v3847_v62, %v10245_v39  ;;  %v4105_v27 = vadd.f32 %v4104_v63, %v10245_v39  ;;  %5901 = vmatprep.subr.bf16.mxu0 %v8950_v12  ;;  %6158 = vmatprep.subr.bf16.mxu1 %v8950_v12  ;;  %v3941_v13 = vmax.f32 %v3844_v53, 0.0  ;;  %v4198_v14 = vmax.f32 %v4101_v54, 0.0 }
 0x5a9   :  { %v3942_v9 = vmax.f32 %v3846_v56, 0.0  ;;  %v4199_v10 = vmax.f32 %v4103_v57, 0.0  ;;  %4849 = vmatmul.mubr.bf16.gmra.mrb[84].mxu0 %v10351_v58  ;;  %5235 = vmatmul.mubr.bf16.gmra.mrb[84].mxu1 %v10353_v59 }
 0x5aa   :  { %v3943_v15 = vmax.f32 %v3848_v34, 0.0  ;;  %v4200_v16 = vmax.f32 %v4105_v27, 0.0  ;;  %4858 = vmatprep.mubr.bf16.mxu0 %v10375_v36  ;;  %5244 = vmatprep.mubr.bf16.mxu1 %v10377_v37 }
 0x5ab   :  { %v10451_v22 = vpack.c.bf16 %v3942_v9, %v3940_v1  ;;  %v10453_v26 = vpack.c.bf16 %v4199_v10, %v4197_v4  ;;  %5902 = vmatpush1.bf16.msra.mxu0 %v8948_v41  ;;  %6159 = vmatpush1.bf16.msra.mxu1 %v8948_v41  ;;  %v8957_v41 = vld [vmem:[#allocation13 + $0xd0] ss:$8 sps:$4 sm:$0xff]  }
 0x5ac   :  { %v3851_v30 = vpop.f32.mrb[44].mxu0  ;;  %v4108_v49 = vpop.f32.mrb[44].mxu1  ;;  %v10455_v58 = vpack.c.bf16 %v3943_v15, %v3941_v13  ;;  %v10457_v59 = vpack.c.bf16 %v4200_v16, %v4198_v14  ;;  %5903 = vmatprep.subr.bf16.mxu0 %v8953_v28  ;;  %6160 = vmatprep.subr.bf16.mxu1 %v8953_v28  ;;  %v8962_v28 = vld [vmem:[#allocation13 + $0xe4] ss:$8 sps:$4 sm:$0xff]  }
 0x5ad   :  { %v3852_v36 = vadd.f32 %v3851_v30, %v10242_v38  ;;  %v4109_v37 = vadd.f32 %v4108_v49, %v10242_v38  ;;  %v3853_v31 = vpop.f32.mrb[45].mxu0  ;;  %v4110_v24 = vpop.f32.mrb[45].mxu1  ;;  %v8960_v49 = vld [vmem:[#allocation13 + $0xe0] ss:$8 sps:$4 sm:$0xff]  }
 0x5ae   :  { %v3854_v6 = vadd.f32 %v3853_v31, %v10245_v39  ;;  %v4111_v7 = vadd.f32 %v4110_v24, %v10245_v39  ;;  %v3855_v32 = vpop.f32.mrb[46].mxu0  ;;  %v4112_v25 = vpop.f32.mrb[46].mxu1 }
 0x5af   :  { %v3856_v35 = vadd.f32 %v3855_v32, %v10242_v38  ;;  %v4113_v40 = vadd.f32 %v4112_v25, %v10242_v38  ;;  %v3857_v47 = vpop.f32.mrb[47].mxu0  ;;  %v4114_v48 = vpop.f32.mrb[47].mxu1  ;;  %5904 = vmatpush1.bf16.msra.mxu0 %v8951_v29  ;;  %6161 = vmatpush1.bf16.msra.mxu1 %v8951_v29  ;;  %v3944_v42 = vmax.f32 %v3852_v36, 0.0  ;;  %v4201_v43 = vmax.f32 %v4109_v37, 0.0 }
 0x5b0   :  { %v3858_v12 = vadd.f32 %v3857_v47, %v10245_v39  ;;  %v4115_v2 = vadd.f32 %v4114_v48, %v10245_v39  ;;  %5905 = vmatprep.subr.bf16.mxu0 %v8956_v50  ;;  %6162 = vmatprep.subr.bf16.mxu1 %v8956_v50  ;;  %v3945_v55 = vmax.f32 %v3854_v6, 0.0  ;;  %v4202_v0 = vmax.f32 %v4111_v7, 0.0 }
 0x5b1   :  { %v3946_v53 = vmax.f32 %v3856_v35, 0.0  ;;  %v4203_v54 = vmax.f32 %v4113_v40, 0.0  ;;  %4859 = vmatmul.mubr.bf16.gmra.mrb[88].mxu0 %v10371_v33  ;;  %5245 = vmatmul.mubr.bf16.gmra.mrb[88].mxu1 %v10373_v51 }
 0x5b2   :  { %v3947_v56 = vmax.f32 %v3858_v12, 0.0  ;;  %v4204_v57 = vmax.f32 %v4115_v2, 0.0  ;;  %4868 = vmatprep.mubr.bf16.mxu0 %v10395_v5  ;;  %5254 = vmatprep.mubr.bf16.mxu1 %v10397_v8 }
 0x5b3   :  { %v10471_v62 = vpack.c.bf16 %v3946_v53, %v3944_v42  ;;  %v10473_v63 = vpack.c.bf16 %v4203_v54, %v4201_v43  ;;  %5906 = vmatpush1.bf16.msra.mxu0 %v8954_v11  ;;  %6163 = vmatpush1.bf16.msra.mxu1 %v8954_v11 }
 0x5b4   :  { %v3861_v34 = vpop.f32.mrb[48].mxu0  ;;  %v4118_v27 = vpop.f32.mrb[48].mxu1  ;;  %v10475_v33 = vpack.c.bf16 %v3947_v56, %v3945_v55  ;;  %v10477_v51 = vpack.c.bf16 %v4204_v57, %v4202_v0  ;;  %5907 = vmatprep.subr.bf16.mxu0 %v8959_v3  ;;  %6164 = vmatprep.subr.bf16.mxu1 %v8959_v3 }
 0x5b5   :  { %v3862_v5 = vadd.f32 %v3861_v34, %v10242_v38  ;;  %v4119_v8 = vadd.f32 %v4118_v27, %v10242_v38  ;;  %v3863_v1 = vpop.f32.mrb[49].mxu0  ;;  %v4120_v4 = vpop.f32.mrb[49].mxu1 }
 0x5b6   :  { %v3864_v9 = vadd.f32 %v3863_v1, %v10245_v39  ;;  %v4121_v10 = vadd.f32 %v4120_v4, %v10245_v39  ;;  %v3865_v13 = vpop.f32.mrb[50].mxu0  ;;  %v4122_v14 = vpop.f32.mrb[50].mxu1 }
 0x5b7   :  { %v3866_v15 = vadd.f32 %v3865_v13, %v10242_v38  ;;  %v4123_v16 = vadd.f32 %v4122_v14, %v10242_v38  ;;  %v3867_v29 = vpop.f32.mrb[51].mxu0  ;;  %v4124_v30 = vpop.f32.mrb[51].mxu1  ;;  %5908 = vmatpush1.bf16.msra.mxu0 %v8957_v41  ;;  %6165 = vmatpush1.bf16.msra.mxu1 %v8957_v41  ;;  %v3948_v37 = vmax.f32 %v3862_v5, 0.0  ;;  %v4205_v31 = vmax.f32 %v4119_v8, 0.0 }
 0x5b8   :  { %v3868_v50 = vadd.f32 %v3867_v29, %v10245_v39  ;;  %v4125_v36 = vadd.f32 %v4124_v30, %v10245_v39  ;;  %5909 = vmatprep.subr.bf16.mxu0 %v8962_v28  ;;  %6166 = vmatprep.subr.bf16.mxu1 %v8962_v28  ;;  %v3949_v7 = vmax.f32 %v3864_v9, 0.0  ;;  %v4206_v32 = vmax.f32 %v4121_v10, 0.0 }
 0x5b9   :  { %v3950_v24 = vmax.f32 %v3866_v15, 0.0  ;;  %v4207_v6 = vmax.f32 %v4123_v16, 0.0  ;;  %4869 = vmatmul.mubr.bf16.gmra.mrb[92].mxu0 %v10391_v17  ;;  %5255 = vmatmul.mubr.bf16.gmra.mrb[92].mxu1 %v10393_v18 }
 0x5ba   :  { %v3951_v25 = vmax.f32 %v3868_v50, 0.0  ;;  %v4208_v35 = vmax.f32 %v4125_v36, 0.0  ;;  %4878 = vmatprep.mubr.bf16.mxu0 %v10415_v45  ;;  %5264 = vmatprep.mubr.bf16.mxu1 %v10417_v46 }
 0x5bb   :  { %v10491_v40 = vpack.c.bf16 %v3950_v24, %v3948_v37  ;;  %v10493_v47 = vpack.c.bf16 %v4207_v6, %v4205_v31  ;;  %5910 = vmatpush1.bf16.msra.mxu0 %v8960_v49  ;;  %6167 = vmatpush1.bf16.msra.mxu1 %v8960_v49 }
 0x5bc   :  { %v3871_v48 = vpop.f32.mrb[52].mxu0  ;;  %v4128_v11 = vpop.f32.mrb[52].mxu1  ;;  %v10495_v12 = vpack.c.bf16 %v3951_v25, %v3949_v7  ;;  %v10497_v17 = vpack.c.bf16 %v4208_v35, %v4206_v32 }
 0x5bd   :  { %v3872_v18 = vadd.f32 %v3871_v48, %v10242_v38  ;;  %v4129_v2 = vadd.f32 %v4128_v11, %v10242_v38  ;;  %v3873_v3 = vpop.f32.mrb[53].mxu0  ;;  %v4130_v45 = vpop.f32.mrb[53].mxu1 }
 0x5be   :  { %v3874_v46 = vadd.f32 %v3873_v3, %v10245_v39  ;;  %v4131_v42 = vadd.f32 %v4130_v45, %v10245_v39  ;;  %v3875_v43 = vpop.f32.mrb[54].mxu0  ;;  %v4132_v53 = vpop.f32.mrb[54].mxu1 }
 0x5bf   :  { %v3876_v54 = vadd.f32 %v3875_v43, %v10242_v38  ;;  %v4133_v55 = vadd.f32 %v4132_v53, %v10242_v38  ;;  %v3877_v0 = vpop.f32.mrb[55].mxu0  ;;  %v4134_v56 = vpop.f32.mrb[55].mxu1  ;;  %v3952_v34 = vmax.f32 %v3872_v18, 0.0  ;;  %v4209_v27 = vmax.f32 %v4129_v2, 0.0 }
 0x5c0   :  { %v3878_v57 = vadd.f32 %v3877_v0, %v10245_v39  ;;  %v4135_v41 = vadd.f32 %v4134_v56, %v10245_v39  ;;  %v3953_v8 = vmax.f32 %v3874_v46, 0.0  ;;  %v4210_v1 = vmax.f32 %v4131_v42, 0.0 }
 0x5c1   :  { %v3954_v28 = vmax.f32 %v3876_v54, 0.0  ;;  %v4211_v5 = vmax.f32 %v4133_v55, 0.0  ;;  %4879 = vmatmul.mubr.bf16.gmra.mrb[96].mxu0 %v10411_v60  ;;  %5265 = vmatmul.mubr.bf16.gmra.mrb[96].mxu1 %v10413_v61 }
 0x5c2   :  { %v3955_v4 = vmax.f32 %v3878_v57, 0.0  ;;  %v4212_v9 = vmax.f32 %v4135_v41, 0.0  ;;  %4888 = vmatprep.mubr.bf16.mxu0 %v10435_v19  ;;  %5274 = vmatprep.mubr.bf16.mxu1 %v10437_v20 }
 0x5c3   :  { %v10511_v10 = vpack.c.bf16 %v3954_v28, %v3952_v34  ;;  %v10513_v13 = vpack.c.bf16 %v4211_v5, %v4209_v27 }
 0x5c4   :  { %v3881_v14 = vpop.f32.mrb[56].mxu0  ;;  %v4138_v15 = vpop.f32.mrb[56].mxu1  ;;  %v10515_v16 = vpack.c.bf16 %v3955_v4, %v3953_v8  ;;  %v10517_v29 = vpack.c.bf16 %v4212_v9, %v4210_v1 }
 0x5c5   :  { %v3882_v60 = vadd.f32 %v3881_v14, %v10242_v38  ;;  %v4139_v61 = vadd.f32 %v4138_v15, %v10242_v38  ;;  %v3883_v30 = vpop.f32.mrb[57].mxu0  ;;  %v4140_v49 = vpop.f32.mrb[57].mxu1 }
 0x5c6   :  { %v3884_v19 = vadd.f32 %v3883_v30, %v10245_v39  ;;  %v4141_v20 = vadd.f32 %v4140_v49, %v10245_v39  ;;  %v3885_v50 = vpop.f32.mrb[58].mxu0  ;;  %v4142_v36 = vpop.f32.mrb[58].mxu1 }
 0x5c7   :  { %v3886_v37 = vadd.f32 %v3885_v50, %v10242_v38  ;;  %v4143_v31 = vadd.f32 %v4142_v36, %v10242_v38  ;;  %v3887_v24 = vpop.f32.mrb[59].mxu0  ;;  %v4144_v6 = vpop.f32.mrb[59].mxu1  ;;  %v3956_v25 = vmax.f32 %v3882_v60, 0.0  ;;  %v4213_v35 = vmax.f32 %v4139_v61, 0.0  ;;  %v8965_v50 = vld [vmem:[#allocation13 + $0xf4] ss:$8 sps:$4 sm:$0xff]  }
 0x5c8   :  { %v3888_v7 = vadd.f32 %v3887_v24, %v10245_v39  ;;  %v4145_v32 = vadd.f32 %v4144_v6, %v10245_v39  ;;  %v3957_v18 = vmax.f32 %v3884_v19, 0.0  ;;  %v4214_v2 = vmax.f32 %v4141_v20, 0.0  ;;  %5911 = vmatprep.subr.bf16.mxu0 %v8965_v50  ;;  %6168 = vmatprep.subr.bf16.mxu1 %v8965_v50 }
 0x5c9   :  { %v3958_v48 = vmax.f32 %v3886_v37, 0.0  ;;  %v4215_v11 = vmax.f32 %v4143_v31, 0.0  ;;  %4889 = vmatmul.mubr.bf16.gmra.mrb[100].mxu0 %v10431_v52  ;;  %5275 = vmatmul.mubr.bf16.gmra.mrb[100].mxu1 %v10433_v44 }
 0x5ca   :  { %v3959_v3 = vmax.f32 %v3888_v7, 0.0  ;;  %v4216_v45 = vmax.f32 %v4145_v32, 0.0  ;;  %4898 = vmatprep.mubr.bf16.mxu0 %v10455_v58  ;;  %5284 = vmatprep.mubr.bf16.mxu1 %v10457_v59 }
 0x5cb   :  { %v4249_v46 = vpack.c.bf16 %v3958_v48, %v3956_v25  ;;  %v4281_v42 = vpack.c.bf16 %v4215_v11, %v4213_v35 }
 0x5cc   :  { %v3891_v43 = vpop.f32.mrb[60].mxu0  ;;  %v4148_v53 = vpop.f32.mrb[60].mxu1  ;;  %v4250_v54 = vpack.c.bf16 %v3959_v3, %v3957_v18  ;;  %v4282_v55 = vpack.c.bf16 %v4216_v45, %v4214_v2 }
 0x5cd   :  { %v3892_v0 = vadd.f32 %v3891_v43, %v10242_v38  ;;  %v4149_v52 = vadd.f32 %v4148_v53, %v10242_v38  ;;  %v3893_v56 = vpop.f32.mrb[61].mxu0  ;;  %v4150_v44 = vpop.f32.mrb[61].mxu1 }
 0x5ce   :  { %v3894_v57 = vadd.f32 %v3893_v56, %v10245_v39  ;;  %v4151_v41 = vadd.f32 %v4150_v44, %v10245_v39  ;;  %v3895_v34 = vpop.f32.mrb[62].mxu0  ;;  %v4152_v58 = vpop.f32.mrb[62].mxu1 }
 0x5cf   :  { %v3896_v59 = vadd.f32 %v3895_v34, %v10242_v38  ;;  %v4153_v27 = vadd.f32 %v4152_v58, %v10242_v38  ;;  %v3897_v28 = vpop.f32.mrb[63].mxu0  ;;  %v4154_v5 = vpop.f32.mrb[63].mxu1  ;;  %v3960_v4 = vmax.f32 %v3892_v0, 0.0  ;;  %v4217_v9 = vmax.f32 %v4149_v52, 0.0  ;;  %v8966_v0 = vld [vmem:[#allocation15] ss:$8 sps:$4 sm:$0xff]  }
 0x5d0   :  { %v3898_v8 = vadd.f32 %v3897_v28, %v10245_v39  ;;  %v4155_v1 = vadd.f32 %v4154_v5, %v10245_v39  ;;  %v3961_v60 = vmax.f32 %v3894_v57, 0.0  ;;  %v4218_v61 = vmax.f32 %v4151_v41, 0.0  ;;  %v8971_v41 = vld [vmem:[#allocation15 + $0x14] ss:$8 sps:$4 sm:$0xff]  }
 0x5d1   :  { %v3962_v14 = vmax.f32 %v3896_v59, 0.0  ;;  %v4219_v15 = vmax.f32 %v4153_v27, 0.0  ;;  %4899 = vmatmul.mubr.bf16.gmra.mrb[104].mxu0 %v10451_v22  ;;  %5285 = vmatmul.mubr.bf16.gmra.mrb[104].mxu1 %v10453_v26  ;;  %v8963_v22 = vld [vmem:[#allocation13 + $0xf0] ss:$8 sps:$4 sm:$0xff]   ;;  %v8968_v26 = vld [vmem:[#allocation15 + $0x4] ss:$8 sps:$4 sm:$0xff]  }
 0x5d2   :  { %v3963_v30 = vmax.f32 %v3898_v8, 0.0  ;;  %v4220_v49 = vmax.f32 %v4155_v1, 0.0  ;;  %4908 = vmatprep.mubr.bf16.mxu0 %v10475_v33  ;;  %5294 = vmatprep.mubr.bf16.mxu1 %v10477_v51 }
 0x5d3   :  { %v4251_v38 = vpack.c.bf16 %v3962_v14, %v3960_v4  ;;  %v4283_v19 = vpack.c.bf16 %v4219_v15, %v4217_v9  ;;  %5912 = vmatpush1.bf16.msra.mxu0 %v8963_v22  ;;  %6169 = vmatpush1.bf16.msra.mxu1 %v8963_v22  ;;  %v8969_v14 = vld [vmem:[#allocation15 + $0x10] ss:$8 sps:$4 sm:$0xff]  }
 0x5d4   :  { %v4252_v20 = vpack.c.bf16 %v3963_v30, %v3961_v60  ;;  %v4284_v39 = vpack.c.bf16 %v4220_v49, %v4218_v61  ;;  %6663 = vmatprep.subr.bf16.mxu0 %v8968_v26  ;;  %6920 = vmatprep.subr.bf16.mxu1 %v8968_v26  ;;  %v8974_v49 = vld [vmem:[#allocation15 + $0x24] ss:$8 sps:$4 sm:$0xff]  }
 0x5d9   :  { %4909 = vmatmul.mubr.bf16.gmra.mrb[108].mxu0 %v10471_v62  ;;  %5295 = vmatmul.mubr.bf16.gmra.mrb[108].mxu1 %v10473_v63  ;;  %v5345_v62 = vld [vmem:[%s11303_s14] sm:$0x3] }
 0x5da   :  { %4918 = vmatprep.mubr.bf16.mxu0 %v10495_v12  ;;  %5304 = vmatprep.mubr.bf16.mxu1 %v10497_v17  ;;  %v10557_v63 = vrot.slane %v5345_v62, %v9664_v21  ;;  %v10560_v33 = vrot.slane %v5345_v62, %v9669_v23 }
 0x5e1   :  { %4919 = vmatmul.mubr.bf16.gmra.mrb[112].mxu0 %v10491_v40  ;;  %5305 = vmatmul.mubr.bf16.gmra.mrb[112].mxu1 %v10493_v47 }
 0x5e2   :  { %4928 = vmatprep.mubr.bf16.mxu0 %v10515_v16  ;;  %5314 = vmatprep.mubr.bf16.mxu1 %v10517_v29 }
 0x5e9   :  { %4929 = vmatmul.mubr.bf16.gmra.mrb[116].mxu0 %v10511_v10  ;;  %5315 = vmatmul.mubr.bf16.gmra.mrb[116].mxu1 %v10513_v13 }
 0x5ea   :  { %4938 = vmatprep.mubr.bf16.mxu0 %v4250_v54  ;;  %5324 = vmatprep.mubr.bf16.mxu1 %v4282_v55 }
 0x5f1   :  { %4939 = vmatmul.mubr.bf16.gmra.mrb[120].mxu0 %v4249_v46  ;;  %5325 = vmatmul.mubr.bf16.gmra.mrb[120].mxu1 %v4281_v42 }
 0x5f2   :  { %4948 = vmatprep.mubr.bf16.mxu0 %v4252_v20  ;;  %5334 = vmatprep.mubr.bf16.mxu1 %v4284_v39 }
 0x5f9   :  { %4949 = vmatmul.mubr.bf16.gmra.mrb[124].mxu0 %v4251_v38  ;;  %5335 = vmatmul.mubr.bf16.gmra.mrb[124].mxu1 %v4283_v19 }
 0x654   :  { %v4800_v51 = vpop.f32.mrb[64].mxu0  ;;  %v5186_v40 = vpop.f32.mrb[64].mxu1 }
 0x655   :  { %v5357_v47 = vadd.f32 %v10557_v63, %v4800_v51  ;;  %v5485_v12 = vadd.f32 %v10557_v63, %v5186_v40  ;;  %v4802_v17 = vpop.f32.mrb[65].mxu0  ;;  %v5188_v10 = vpop.f32.mrb[65].mxu1 }
 0x656   :  { %v5358_v13 = vadd.f32 %v10560_v33, %v4802_v17  ;;  %v5486_v16 = vadd.f32 %v10560_v33, %v5188_v10  ;;  %v4804_v29 = vpop.f32.mrb[66].mxu0  ;;  %v5190_v36 = vpop.f32.mrb[66].mxu1 }
 0x657   :  { %v5359_v37 = vadd.f32 %v10557_v63, %v4804_v29  ;;  %v5487_v31 = vadd.f32 %v10557_v63, %v5190_v36  ;;  %v4806_v24 = vpop.f32.mrb[67].mxu0  ;;  %v5192_v6 = vpop.f32.mrb[67].mxu1  ;;  %v5421_v25 = vmax.f32 %v5357_v47, 0.0  ;;  %v5549_v35 = vmax.f32 %v5485_v12, 0.0  ;;  %v8972_v47 = vld [vmem:[#allocation15 + $0x20] ss:$8 sps:$4 sm:$0xff]  }
 0x658   :  { %v5360_v7 = vadd.f32 %v10560_v33, %v4806_v24  ;;  %v5488_v32 = vadd.f32 %v10560_v33, %v5192_v6  ;;  %v5422_v18 = vmax.f32 %v5358_v13, 0.0  ;;  %v5550_v2 = vmax.f32 %v5486_v16, 0.0  ;;  %v8977_v16 = vld [vmem:[#allocation15 + $0x34] ss:$8 sps:$4 sm:$0xff]  }
 0x659   :  { %v5423_v48 = vmax.f32 %v5359_v37, 0.0  ;;  %v5551_v11 = vmax.f32 %v5487_v31, 0.0 }
 0x65a   :  { %v5424_v3 = vmax.f32 %v5360_v7, 0.0  ;;  %v5552_v45 = vmax.f32 %v5488_v32, 0.0 }
 0x65b   :  { %v5613_v46 = vpack.c.bf16 %v5423_v48, %v5421_v25  ;;  %v5645_v42 = vpack.c.bf16 %v5551_v11, %v5549_v35  ;;  %v8975_v48 = vld [vmem:[#allocation15 + $0x30] ss:$8 sps:$4 sm:$0xff]  }
 0x65c   :  { %v5614_v43 = vpack.c.bf16 %v5424_v3, %v5422_v18  ;;  %v5646_v53 = vpack.c.bf16 %v5552_v45, %v5550_v2  ;;  %v4810_v54 = vpop.f32.mrb[68].mxu0  ;;  %v5196_v55 = vpop.f32.mrb[68].mxu1  ;;  %v8980_v45 = vld [vmem:[#allocation15 + $0x44] ss:$8 sps:$4 sm:$0xff]  }
 0x65d   :  { %v5361_v52 = vadd.f32 %v10557_v63, %v4810_v54  ;;  %v5489_v56 = vadd.f32 %v10557_v63, %v5196_v55  ;;  %v4812_v44 = vpop.f32.mrb[69].mxu0  ;;  %v5198_v57 = vpop.f32.mrb[69].mxu1 }
 0x65e   :  { %v5362_v34 = vadd.f32 %v10560_v33, %v4812_v44  ;;  %v5490_v58 = vadd.f32 %v10560_v33, %v5198_v57  ;;  %v4814_v59 = vpop.f32.mrb[70].mxu0  ;;  %v5200_v27 = vpop.f32.mrb[70].mxu1  ;;  %5913 = vmatprep.mubr.bf16.mxu0 %v5614_v43  ;;  %6170 = vmatprep.mubr.bf16.mxu1 %v5646_v53  ;;  %v8978_v57 = vld [vmem:[#allocation15 + $0x40] ss:$8 sps:$4 sm:$0xff]  }
 0x65f   :  { %v5363_v28 = vadd.f32 %v10557_v63, %v4814_v59  ;;  %v5491_v5 = vadd.f32 %v10557_v63, %v5200_v27  ;;  %v4816_v8 = vpop.f32.mrb[71].mxu0  ;;  %v5202_v1 = vpop.f32.mrb[71].mxu1  ;;  %5914 = vmatmul.mubr.bf16.vlgmr.msra.gmra.mrb[128].mxu0 %v5613_v46  ;;  %6171 = vmatmul.mubr.bf16.vlgmr.msra.gmra.mrb[128].mxu1 %v5645_v42  ;;  %v5425_v15 = vmax.f32 %v5361_v52, 0.0  ;;  %v5553_v60 = vmax.f32 %v5489_v56, 0.0  ;;  %v8983_v27 = vld [vmem:[#allocation15 + $0x54] ss:$8 sps:$4 sm:$0xff]  }
 0x660   :  { %v5364_v4 = vadd.f32 %v10560_v33, %v4816_v8  ;;  %v5492_v9 = vadd.f32 %v10560_v33, %v5202_v1  ;;  %6664 = vmatpush1.bf16.msra.mxu0 %v8966_v0  ;;  %6921 = vmatpush1.bf16.msra.mxu1 %v8966_v0  ;;  %v5426_v38 = vmax.f32 %v5362_v34, 0.0  ;;  %v5554_v19 = vmax.f32 %v5490_v58, 0.0 }
 0x661   :  { %v5427_v61 = vmax.f32 %v5363_v28, 0.0  ;;  %v5555_v30 = vmax.f32 %v5491_v5, 0.0  ;;  %6665 = vmatprep.subr.bf16.mxu0 %v8971_v41  ;;  %6922 = vmatprep.subr.bf16.mxu1 %v8971_v41 }
 0x662   :  { %v5428_v20 = vmax.f32 %v5364_v4, 0.0  ;;  %v5556_v39 = vmax.f32 %v5492_v9, 0.0 }
 0x663   :  { %v5615_v50 = vpack.c.bf16 %v5427_v61, %v5425_v15  ;;  %v5647_v22 = vpack.c.bf16 %v5555_v30, %v5553_v60  ;;  %v8981_v30 = vld [vmem:[#allocation15 + $0x50] ss:$8 sps:$4 sm:$0xff]  }
 0x664   :  { %v5616_v26 = vpack.c.bf16 %v5428_v20, %v5426_v38  ;;  %v5648_v62 = vpack.c.bf16 %v5556_v39, %v5554_v19  ;;  %v4820_v51 = vpop.f32.mrb[72].mxu0  ;;  %v5206_v40 = vpop.f32.mrb[72].mxu1  ;;  %6666 = vmatpush1.bf16.msra.mxu0 %v8969_v14  ;;  %6923 = vmatpush1.bf16.msra.mxu1 %v8969_v14  ;;  %v8986_v39 = vld [vmem:[#allocation15 + $0x64] ss:$8 sps:$4 sm:$0xff]  }
 0x665   :  { %v5365_v12 = vadd.f32 %v10557_v63, %v4820_v51  ;;  %v5493_v17 = vadd.f32 %v10557_v63, %v5206_v40  ;;  %v4822_v10 = vpop.f32.mrb[73].mxu0  ;;  %v5208_v13 = vpop.f32.mrb[73].mxu1  ;;  %6667 = vmatprep.subr.bf16.mxu0 %v8974_v49  ;;  %6924 = vmatprep.subr.bf16.mxu1 %v8974_v49 }
 0x666   :  { %v5366_v29 = vadd.f32 %v10560_v33, %v4822_v10  ;;  %v5494_v36 = vadd.f32 %v10560_v33, %v5208_v13  ;;  %v4824_v37 = vpop.f32.mrb[74].mxu0  ;;  %v5210_v31 = vpop.f32.mrb[74].mxu1  ;;  %5923 = vmatprep.mubr.bf16.mxu0 %v5616_v26  ;;  %6180 = vmatprep.mubr.bf16.mxu1 %v5648_v62  ;;  %v8984_v13 = vld [vmem:[#allocation15 + $0x60] ss:$8 sps:$4 sm:$0xff]  }
 0x667   :  { %v5367_v24 = vadd.f32 %v10557_v63, %v4824_v37  ;;  %v5495_v6 = vadd.f32 %v10557_v63, %v5210_v31  ;;  %v4826_v7 = vpop.f32.mrb[75].mxu0  ;;  %v5212_v32 = vpop.f32.mrb[75].mxu1  ;;  %5924 = vmatmul.mubr.bf16.gmra.mrb[132].mxu0 %v5615_v50  ;;  %6181 = vmatmul.mubr.bf16.gmra.mrb[132].mxu1 %v5647_v22  ;;  %v5429_v11 = vmax.f32 %v5365_v12, 0.0  ;;  %v5557_v18 = vmax.f32 %v5493_v17, 0.0  ;;  %v8989_v31 = vld [vmem:[#allocation15 + $0x74] ss:$8 sps:$4 sm:$0xff]  }
 0x668   :  { %v5368_v25 = vadd.f32 %v10560_v33, %v4826_v7  ;;  %v5496_v35 = vadd.f32 %v10560_v33, %v5212_v32  ;;  %6668 = vmatpush1.bf16.msra.mxu0 %v8972_v47  ;;  %6925 = vmatpush1.bf16.msra.mxu1 %v8972_v47  ;;  %v5430_v46 = vmax.f32 %v5366_v29, 0.0  ;;  %v5558_v42 = vmax.f32 %v5494_v36, 0.0 }
 0x669   :  { %v5431_v2 = vmax.f32 %v5367_v24, 0.0  ;;  %v5559_v3 = vmax.f32 %v5495_v6, 0.0  ;;  %6669 = vmatprep.subr.bf16.mxu0 %v8977_v16  ;;  %6926 = vmatprep.subr.bf16.mxu1 %v8977_v16 }
 0x66a   :  { %v5432_v43 = vmax.f32 %v5368_v25, 0.0  ;;  %v5560_v53 = vmax.f32 %v5496_v35, 0.0 }
 0x66b   :  { %v5617_v54 = vpack.c.bf16 %v5431_v2, %v5429_v11  ;;  %v5649_v55 = vpack.c.bf16 %v5559_v3, %v5557_v18  ;;  %v8987_v3 = vld [vmem:[#allocation15 + $0x70] ss:$8 sps:$4 sm:$0xff]  }
 0x66c   :  { %v5618_v0 = vpack.c.bf16 %v5432_v43, %v5430_v46  ;;  %v5650_v52 = vpack.c.bf16 %v5560_v53, %v5558_v42  ;;  %v4830_v56 = vpop.f32.mrb[76].mxu0  ;;  %v5216_v44 = vpop.f32.mrb[76].mxu1  ;;  %6670 = vmatpush1.bf16.msra.mxu0 %v8975_v48  ;;  %6927 = vmatpush1.bf16.msra.mxu1 %v8975_v48  ;;  %v8992_v53 = vld [vmem:[#allocation15 + $0x84] ss:$8 sps:$4 sm:$0xff]  }
 0x66d   :  { %v5369_v41 = vadd.f32 %v10557_v63, %v4830_v56  ;;  %v5497_v34 = vadd.f32 %v10557_v63, %v5216_v44  ;;  %v4832_v58 = vpop.f32.mrb[77].mxu0  ;;  %v5218_v59 = vpop.f32.mrb[77].mxu1  ;;  %6671 = vmatprep.subr.bf16.mxu0 %v8980_v45  ;;  %6928 = vmatprep.subr.bf16.mxu1 %v8980_v45 }
 0x66e   :  { %v5370_v28 = vadd.f32 %v10560_v33, %v4832_v58  ;;  %v5498_v5 = vadd.f32 %v10560_v33, %v5218_v59  ;;  %v4834_v8 = vpop.f32.mrb[78].mxu0  ;;  %v5220_v1 = vpop.f32.mrb[78].mxu1  ;;  %5933 = vmatprep.mubr.bf16.mxu0 %v5618_v0  ;;  %6190 = vmatprep.mubr.bf16.mxu1 %v5650_v52  ;;  %v8990_v59 = vld [vmem:[#allocation15 + $0x80] ss:$8 sps:$4 sm:$0xff]  }
 0x66f   :  { %v5371_v4 = vadd.f32 %v10557_v63, %v4834_v8  ;;  %v5499_v9 = vadd.f32 %v10557_v63, %v5220_v1  ;;  %v4836_v14 = vpop.f32.mrb[79].mxu0  ;;  %v5222_v15 = vpop.f32.mrb[79].mxu1  ;;  %5934 = vmatmul.mubr.bf16.gmra.mrb[136].mxu0 %v5617_v54  ;;  %6191 = vmatmul.mubr.bf16.gmra.mrb[136].mxu1 %v5649_v55  ;;  %v5433_v49 = vmax.f32 %v5369_v41, 0.0  ;;  %v5561_v38 = vmax.f32 %v5497_v34, 0.0  ;;  %v8995_v1 = vld [vmem:[#allocation15 + $0x94] ss:$8 sps:$4 sm:$0xff]  }
 0x670   :  { %v5372_v60 = vadd.f32 %v10560_v33, %v4836_v14  ;;  %v5500_v61 = vadd.f32 %v10560_v33, %v5222_v15  ;;  %6672 = vmatpush1.bf16.msra.mxu0 %v8978_v57  ;;  %6929 = vmatpush1.bf16.msra.mxu1 %v8978_v57  ;;  %v5434_v50 = vmax.f32 %v5370_v28, 0.0  ;;  %v5562_v22 = vmax.f32 %v5498_v5, 0.0 }
 0x671   :  { %v5435_v19 = vmax.f32 %v5371_v4, 0.0  ;;  %v5563_v20 = vmax.f32 %v5499_v9, 0.0  ;;  %6673 = vmatprep.subr.bf16.mxu0 %v8983_v27  ;;  %6930 = vmatprep.subr.bf16.mxu1 %v8983_v27 }
 0x672   :  { %v5436_v26 = vmax.f32 %v5372_v60, 0.0  ;;  %v5564_v62 = vmax.f32 %v5500_v61, 0.0 }
 0x673   :  { %v5619_v51 = vpack.c.bf16 %v5435_v19, %v5433_v49  ;;  %v5651_v40 = vpack.c.bf16 %v5563_v20, %v5561_v38  ;;  %v8993_v20 = vld [vmem:[#allocation15 + $0x90] ss:$8 sps:$4 sm:$0xff]  }
 0x674   :  { %v5620_v47 = vpack.c.bf16 %v5436_v26, %v5434_v50  ;;  %v5652_v12 = vpack.c.bf16 %v5564_v62, %v5562_v22  ;;  %v4840_v17 = vpop.f32.mrb[80].mxu0  ;;  %v5226_v10 = vpop.f32.mrb[80].mxu1  ;;  %6674 = vmatpush1.bf16.msra.mxu0 %v8981_v30  ;;  %6931 = vmatpush1.bf16.msra.mxu1 %v8981_v30  ;;  %v8998_v62 = vld [vmem:[#allocation15 + $0xa4] ss:$8 sps:$4 sm:$0xff]  }
 0x675   :  { %v5373_v16 = vadd.f32 %v10557_v63, %v4840_v17  ;;  %v5501_v29 = vadd.f32 %v10557_v63, %v5226_v10  ;;  %v4842_v36 = vpop.f32.mrb[81].mxu0  ;;  %v5228_v37 = vpop.f32.mrb[81].mxu1  ;;  %6675 = vmatprep.subr.bf16.mxu0 %v8986_v39  ;;  %6932 = vmatprep.subr.bf16.mxu1 %v8986_v39 }
 0x676   :  { %v5374_v24 = vadd.f32 %v10560_v33, %v4842_v36  ;;  %v5502_v6 = vadd.f32 %v10560_v33, %v5228_v37  ;;  %v4844_v7 = vpop.f32.mrb[82].mxu0  ;;  %v5230_v32 = vpop.f32.mrb[82].mxu1  ;;  %5943 = vmatprep.mubr.bf16.mxu0 %v5620_v47  ;;  %6200 = vmatprep.mubr.bf16.mxu1 %v5652_v12  ;;  %v8996_v37 = vld [vmem:[#allocation15 + $0xa0] ss:$8 sps:$4 sm:$0xff]  }
 0x677   :  { %v5375_v25 = vadd.f32 %v10557_v63, %v4844_v7  ;;  %v5503_v35 = vadd.f32 %v10557_v63, %v5230_v32  ;;  %v4846_v48 = vpop.f32.mrb[83].mxu0  ;;  %v5232_v11 = vpop.f32.mrb[83].mxu1  ;;  %5944 = vmatmul.mubr.bf16.gmra.mrb[140].mxu0 %v5619_v51  ;;  %6201 = vmatmul.mubr.bf16.gmra.mrb[140].mxu1 %v5651_v40  ;;  %v5437_v45 = vmax.f32 %v5373_v16, 0.0  ;;  %v5565_v46 = vmax.f32 %v5501_v29, 0.0  ;;  %v9001_v32 = vld [vmem:[#allocation15 + $0xb4] ss:$8 sps:$4 sm:$0xff]  }
 0x678   :  { %v5376_v18 = vadd.f32 %v10560_v33, %v4846_v48  ;;  %v5504_v2 = vadd.f32 %v10560_v33, %v5232_v11  ;;  %6676 = vmatpush1.bf16.msra.mxu0 %v8984_v13  ;;  %6933 = vmatpush1.bf16.msra.mxu1 %v8984_v13  ;;  %v5438_v54 = vmax.f32 %v5374_v24, 0.0  ;;  %v5566_v55 = vmax.f32 %v5502_v6, 0.0 }
 0x679   :  { %v5439_v42 = vmax.f32 %v5375_v25, 0.0  ;;  %v5567_v43 = vmax.f32 %v5503_v35, 0.0  ;;  %6677 = vmatprep.subr.bf16.mxu0 %v8989_v31  ;;  %6934 = vmatprep.subr.bf16.mxu1 %v8989_v31 }
 0x67a   :  { %v5440_v0 = vmax.f32 %v5376_v18, 0.0  ;;  %v5568_v52 = vmax.f32 %v5504_v2, 0.0 }
 0x67b   :  { %v5621_v56 = vpack.c.bf16 %v5439_v42, %v5437_v45  ;;  %v5653_v44 = vpack.c.bf16 %v5567_v43, %v5565_v46  ;;  %v8999_v43 = vld [vmem:[#allocation15 + $0xb0] ss:$8 sps:$4 sm:$0xff]  }
 0x67c   :  { %v5622_v57 = vpack.c.bf16 %v5440_v0, %v5438_v54  ;;  %v5654_v41 = vpack.c.bf16 %v5568_v52, %v5566_v55  ;;  %v4850_v34 = vpop.f32.mrb[84].mxu0  ;;  %v5236_v58 = vpop.f32.mrb[84].mxu1  ;;  %6678 = vmatpush1.bf16.msra.mxu0 %v8987_v3  ;;  %6935 = vmatpush1.bf16.msra.mxu1 %v8987_v3  ;;  %v9004_v52 = vld [vmem:[#allocation15 + $0xc4] ss:$8 sps:$4 sm:$0xff]  }
 0x67d   :  { %v5377_v27 = vadd.f32 %v10557_v63, %v4850_v34  ;;  %v5505_v28 = vadd.f32 %v10557_v63, %v5236_v58  ;;  %v4852_v5 = vpop.f32.mrb[85].mxu0  ;;  %v5238_v8 = vpop.f32.mrb[85].mxu1  ;;  %6679 = vmatprep.subr.bf16.mxu0 %v8992_v53  ;;  %6936 = vmatprep.subr.bf16.mxu1 %v8992_v53 }
 0x67e   :  { %v5378_v4 = vadd.f32 %v10560_v33, %v4852_v5  ;;  %v5506_v9 = vadd.f32 %v10560_v33, %v5238_v8  ;;  %v4854_v14 = vpop.f32.mrb[86].mxu0  ;;  %v5240_v15 = vpop.f32.mrb[86].mxu1  ;;  %5953 = vmatprep.mubr.bf16.mxu0 %v5622_v57  ;;  %6210 = vmatprep.mubr.bf16.mxu1 %v5654_v41  ;;  %v9002_v8 = vld [vmem:[#allocation15 + $0xc0] ss:$8 sps:$4 sm:$0xff]  }
 0x67f   :  { %v5379_v60 = vadd.f32 %v10557_v63, %v4854_v14  ;;  %v5507_v61 = vadd.f32 %v10557_v63, %v5240_v15  ;;  %v4856_v30 = vpop.f32.mrb[87].mxu0  ;;  %v5242_v49 = vpop.f32.mrb[87].mxu1  ;;  %5954 = vmatmul.mubr.bf16.gmra.mrb[144].mxu0 %v5621_v56  ;;  %6211 = vmatmul.mubr.bf16.gmra.mrb[144].mxu1 %v5653_v44  ;;  %v5441_v39 = vmax.f32 %v5377_v27, 0.0  ;;  %v5569_v50 = vmax.f32 %v5505_v28, 0.0  ;;  %v9007_v15 = vld [vmem:[#allocation15 + $0xd4] ss:$8 sps:$4 sm:$0xff]  }
 0x680   :  { %v5380_v38 = vadd.f32 %v10560_v33, %v4856_v30  ;;  %v5508_v19 = vadd.f32 %v10560_v33, %v5242_v49  ;;  %6680 = vmatpush1.bf16.msra.mxu0 %v8990_v59  ;;  %6937 = vmatpush1.bf16.msra.mxu1 %v8990_v59  ;;  %v5442_v51 = vmax.f32 %v5378_v4, 0.0  ;;  %v5570_v40 = vmax.f32 %v5506_v9, 0.0 }
 0x681   :  { %v5443_v22 = vmax.f32 %v5379_v60, 0.0  ;;  %v5571_v26 = vmax.f32 %v5507_v61, 0.0  ;;  %6681 = vmatprep.subr.bf16.mxu0 %v8995_v1  ;;  %6938 = vmatprep.subr.bf16.mxu1 %v8995_v1 }
 0x682   :  { %v5444_v47 = vmax.f32 %v5380_v38, 0.0  ;;  %v5572_v12 = vmax.f32 %v5508_v19, 0.0 }
 0x683   :  { %v5623_v17 = vpack.c.bf16 %v5443_v22, %v5441_v39  ;;  %v5655_v10 = vpack.c.bf16 %v5571_v26, %v5569_v50  ;;  %v9005_v26 = vld [vmem:[#allocation15 + $0xd0] ss:$8 sps:$4 sm:$0xff]  }
 0x684   :  { %v5624_v13 = vpack.c.bf16 %v5444_v47, %v5442_v51  ;;  %v5656_v16 = vpack.c.bf16 %v5572_v12, %v5570_v40  ;;  %v4860_v29 = vpop.f32.mrb[88].mxu0  ;;  %v5246_v36 = vpop.f32.mrb[88].mxu1  ;;  %6682 = vmatpush1.bf16.msra.mxu0 %v8993_v20  ;;  %6939 = vmatpush1.bf16.msra.mxu1 %v8993_v20  ;;  %v9010_v12 = vld [vmem:[#allocation15 + $0xe4] ss:$8 sps:$4 sm:$0xff]  }
 0x685   :  { %v5381_v31 = vadd.f32 %v10557_v63, %v4860_v29  ;;  %v5509_v24 = vadd.f32 %v10557_v63, %v5246_v36  ;;  %v4862_v6 = vpop.f32.mrb[89].mxu0  ;;  %v5248_v7 = vpop.f32.mrb[89].mxu1  ;;  %6683 = vmatprep.subr.bf16.mxu0 %v8998_v62  ;;  %6940 = vmatprep.subr.bf16.mxu1 %v8998_v62 }
 0x686   :  { %v5382_v25 = vadd.f32 %v10560_v33, %v4862_v6  ;;  %v5510_v35 = vadd.f32 %v10560_v33, %v5248_v7  ;;  %v4864_v48 = vpop.f32.mrb[90].mxu0  ;;  %v5250_v11 = vpop.f32.mrb[90].mxu1  ;;  %5963 = vmatprep.mubr.bf16.mxu0 %v5624_v13  ;;  %6220 = vmatprep.mubr.bf16.mxu1 %v5656_v16  ;;  %v9008_v7 = vld [vmem:[#allocation15 + $0xe0] ss:$8 sps:$4 sm:$0xff]  }
 0x687   :  { %v5383_v18 = vadd.f32 %v10557_v63, %v4864_v48  ;;  %v5511_v2 = vadd.f32 %v10557_v63, %v5250_v11  ;;  %v4866_v3 = vpop.f32.mrb[91].mxu0  ;;  %v5252_v45 = vpop.f32.mrb[91].mxu1  ;;  %5964 = vmatmul.mubr.bf16.gmra.mrb[148].mxu0 %v5623_v17  ;;  %6221 = vmatmul.mubr.bf16.gmra.mrb[148].mxu1 %v5655_v10  ;;  %v5445_v53 = vmax.f32 %v5381_v31, 0.0  ;;  %v5573_v54 = vmax.f32 %v5509_v24, 0.0 }
 0x688   :  { %v5384_v46 = vadd.f32 %v10560_v33, %v4866_v3  ;;  %v5512_v42 = vadd.f32 %v10560_v33, %v5252_v45  ;;  %6684 = vmatpush1.bf16.msra.mxu0 %v8996_v37  ;;  %6941 = vmatpush1.bf16.msra.mxu1 %v8996_v37  ;;  %v5446_v56 = vmax.f32 %v5382_v25, 0.0  ;;  %v5574_v44 = vmax.f32 %v5510_v35, 0.0 }
 0x689   :  { %v5447_v55 = vmax.f32 %v5383_v18, 0.0  ;;  %v5575_v0 = vmax.f32 %v5511_v2, 0.0  ;;  %6685 = vmatprep.subr.bf16.mxu0 %v9001_v32  ;;  %6942 = vmatprep.subr.bf16.mxu1 %v9001_v32 }
 0x68a   :  { %v5448_v57 = vmax.f32 %v5384_v46, 0.0  ;;  %v5576_v41 = vmax.f32 %v5512_v42, 0.0 }
 0x68b   :  { %v5625_v34 = vpack.c.bf16 %v5447_v55, %v5445_v53  ;;  %v5657_v58 = vpack.c.bf16 %v5575_v0, %v5573_v54 }
 0x68c   :  { %v5626_v59 = vpack.c.bf16 %v5448_v57, %v5446_v56  ;;  %v5658_v27 = vpack.c.bf16 %v5576_v41, %v5574_v44  ;;  %v4870_v28 = vpop.f32.mrb[92].mxu0  ;;  %v5256_v5 = vpop.f32.mrb[92].mxu1  ;;  %6686 = vmatpush1.bf16.msra.mxu0 %v8999_v43  ;;  %6943 = vmatpush1.bf16.msra.mxu1 %v8999_v43 }
 0x68d   :  { %v5385_v1 = vadd.f32 %v10557_v63, %v4870_v28  ;;  %v5513_v4 = vadd.f32 %v10557_v63, %v5256_v5  ;;  %v4872_v9 = vpop.f32.mrb[93].mxu0  ;;  %v5258_v14 = vpop.f32.mrb[93].mxu1  ;;  %6687 = vmatprep.subr.bf16.mxu0 %v9004_v52  ;;  %6944 = vmatprep.subr.bf16.mxu1 %v9004_v52 }
 0x68e   :  { %v5386_v60 = vadd.f32 %v10560_v33, %v4872_v9  ;;  %v5514_v61 = vadd.f32 %v10560_v33, %v5258_v14  ;;  %v4874_v30 = vpop.f32.mrb[94].mxu0  ;;  %v5260_v49 = vpop.f32.mrb[94].mxu1  ;;  %5973 = vmatprep.mubr.bf16.mxu0 %v5626_v59  ;;  %6230 = vmatprep.mubr.bf16.mxu1 %v5658_v27 }
 0x68f   :  { %v5387_v38 = vadd.f32 %v10557_v63, %v4874_v30  ;;  %v5515_v19 = vadd.f32 %v10557_v63, %v5260_v49  ;;  %v4876_v20 = vpop.f32.mrb[95].mxu0  ;;  %v5262_v39 = vpop.f32.mrb[95].mxu1  ;;  %5974 = vmatmul.mubr.bf16.gmra.mrb[152].mxu0 %v5625_v34  ;;  %6231 = vmatmul.mubr.bf16.gmra.mrb[152].mxu1 %v5657_v58  ;;  %v5449_v62 = vmax.f32 %v5385_v1, 0.0  ;;  %v5577_v51 = vmax.f32 %v5513_v4, 0.0 }
 0x690   :  { %v5388_v50 = vadd.f32 %v10560_v33, %v4876_v20  ;;  %v5516_v22 = vadd.f32 %v10560_v33, %v5262_v39  ;;  %6688 = vmatpush1.bf16.msra.mxu0 %v9002_v8  ;;  %6945 = vmatpush1.bf16.msra.mxu1 %v9002_v8  ;;  %v5450_v17 = vmax.f32 %v5386_v60, 0.0  ;;  %v5578_v10 = vmax.f32 %v5514_v61, 0.0 }
 0x691   :  { %v5451_v40 = vmax.f32 %v5387_v38, 0.0  ;;  %v5579_v47 = vmax.f32 %v5515_v19, 0.0  ;;  %6689 = vmatprep.subr.bf16.mxu0 %v9007_v15  ;;  %6946 = vmatprep.subr.bf16.mxu1 %v9007_v15 }
 0x692   :  { %v5452_v13 = vmax.f32 %v5388_v50, 0.0  ;;  %v5580_v16 = vmax.f32 %v5516_v22, 0.0 }
 0x693   :  { %v5627_v29 = vpack.c.bf16 %v5451_v40, %v5449_v62  ;;  %v5659_v36 = vpack.c.bf16 %v5579_v47, %v5577_v51 }
 0x694   :  { %v5628_v37 = vpack.c.bf16 %v5452_v13, %v5450_v17  ;;  %v5660_v31 = vpack.c.bf16 %v5580_v16, %v5578_v10  ;;  %v4880_v24 = vpop.f32.mrb[96].mxu0  ;;  %v5266_v6 = vpop.f32.mrb[96].mxu1  ;;  %6690 = vmatpush1.bf16.msra.mxu0 %v9005_v26  ;;  %6947 = vmatpush1.bf16.msra.mxu1 %v9005_v26 }
 0x695   :  { %v5389_v32 = vadd.f32 %v10557_v63, %v4880_v24  ;;  %v5517_v25 = vadd.f32 %v10557_v63, %v5266_v6  ;;  %v4882_v35 = vpop.f32.mrb[97].mxu0  ;;  %v5268_v48 = vpop.f32.mrb[97].mxu1  ;;  %6691 = vmatprep.subr.bf16.mxu0 %v9010_v12  ;;  %6948 = vmatprep.subr.bf16.mxu1 %v9010_v12 }
 0x696   :  { %v5390_v11 = vadd.f32 %v10560_v33, %v4882_v35  ;;  %v5518_v18 = vadd.f32 %v10560_v33, %v5268_v48  ;;  %v4884_v2 = vpop.f32.mrb[98].mxu0  ;;  %v5270_v3 = vpop.f32.mrb[98].mxu1  ;;  %5983 = vmatprep.mubr.bf16.mxu0 %v5628_v37  ;;  %6240 = vmatprep.mubr.bf16.mxu1 %v5660_v31 }
 0x697   :  { %v5391_v45 = vadd.f32 %v10557_v63, %v4884_v2  ;;  %v5519_v46 = vadd.f32 %v10557_v63, %v5270_v3  ;;  %v4886_v42 = vpop.f32.mrb[99].mxu0  ;;  %v5272_v43 = vpop.f32.mrb[99].mxu1  ;;  %5984 = vmatmul.mubr.bf16.gmra.mrb[156].mxu0 %v5627_v29  ;;  %6241 = vmatmul.mubr.bf16.gmra.mrb[156].mxu1 %v5659_v36  ;;  %v5453_v55 = vmax.f32 %v5389_v32, 0.0  ;;  %v5581_v0 = vmax.f32 %v5517_v25, 0.0 }
 0x698   :  { %v5392_v53 = vadd.f32 %v10560_v33, %v4886_v42  ;;  %v5520_v54 = vadd.f32 %v10560_v33, %v5272_v43  ;;  %6692 = vmatpush1.bf16.msra.mxu0 %v9008_v7  ;;  %6949 = vmatpush1.bf16.msra.mxu1 %v9008_v7  ;;  %v5454_v44 = vmax.f32 %v5390_v11, 0.0  ;;  %v5582_v57 = vmax.f32 %v5518_v18, 0.0 }
 0x699   :  { %v5455_v52 = vmax.f32 %v5391_v45, 0.0  ;;  %v5583_v56 = vmax.f32 %v5519_v46, 0.0 }
 0x69a   :  { %v5456_v41 = vmax.f32 %v5392_v53, 0.0  ;;  %v5584_v34 = vmax.f32 %v5520_v54, 0.0 }
 0x69b   :  { %v5629_v58 = vpack.c.bf16 %v5455_v52, %v5453_v55  ;;  %v5661_v59 = vpack.c.bf16 %v5583_v56, %v5581_v0 }
 0x69c   :  { %v5630_v27 = vpack.c.bf16 %v5456_v41, %v5454_v44  ;;  %v5662_v28 = vpack.c.bf16 %v5584_v34, %v5582_v57  ;;  %v4890_v5 = vpop.f32.mrb[100].mxu0  ;;  %v5276_v8 = vpop.f32.mrb[100].mxu1 }
 0x69d   :  { %v5393_v1 = vadd.f32 %v10557_v63, %v4890_v5  ;;  %v5521_v4 = vadd.f32 %v10557_v63, %v5276_v8  ;;  %v4892_v9 = vpop.f32.mrb[101].mxu0  ;;  %v5278_v14 = vpop.f32.mrb[101].mxu1 }
 0x69e   :  { %v5394_v15 = vadd.f32 %v10560_v33, %v4892_v9  ;;  %v5522_v60 = vadd.f32 %v10560_v33, %v5278_v14  ;;  %v4894_v61 = vpop.f32.mrb[102].mxu0  ;;  %v5280_v30 = vpop.f32.mrb[102].mxu1  ;;  %5993 = vmatprep.mubr.bf16.mxu0 %v5630_v27  ;;  %6250 = vmatprep.mubr.bf16.mxu1 %v5662_v28 }
 0x69f   :  { %v5395_v49 = vadd.f32 %v10557_v63, %v4894_v61  ;;  %v5523_v38 = vadd.f32 %v10557_v63, %v5280_v30  ;;  %v4896_v19 = vpop.f32.mrb[103].mxu0  ;;  %v5282_v20 = vpop.f32.mrb[103].mxu1  ;;  %5994 = vmatmul.mubr.bf16.gmra.mrb[160].mxu0 %v5629_v58  ;;  %6251 = vmatmul.mubr.bf16.gmra.mrb[160].mxu1 %v5661_v59  ;;  %v5457_v22 = vmax.f32 %v5393_v1, 0.0  ;;  %v5585_v26 = vmax.f32 %v5521_v4, 0.0 }
 0x6a0   :  { %v5396_v39 = vadd.f32 %v10560_v33, %v4896_v19  ;;  %v5524_v50 = vadd.f32 %v10560_v33, %v5282_v20  ;;  %v5458_v40 = vmax.f32 %v5394_v15, 0.0  ;;  %v5586_v47 = vmax.f32 %v5522_v60, 0.0 }
 0x6a1   :  { %v5459_v62 = vmax.f32 %v5395_v49, 0.0  ;;  %v5587_v51 = vmax.f32 %v5523_v38, 0.0 }
 0x6a2   :  { %v5460_v12 = vmax.f32 %v5396_v39, 0.0  ;;  %v5588_v17 = vmax.f32 %v5524_v50, 0.0 }
 0x6a3   :  { %v5631_v10 = vpack.c.bf16 %v5459_v62, %v5457_v22  ;;  %v5663_v13 = vpack.c.bf16 %v5587_v51, %v5585_v26 }
 0x6a4   :  { %v5632_v16 = vpack.c.bf16 %v5460_v12, %v5458_v40  ;;  %v5664_v29 = vpack.c.bf16 %v5588_v17, %v5586_v47  ;;  %v4900_v36 = vpop.f32.mrb[104].mxu0  ;;  %v5286_v37 = vpop.f32.mrb[104].mxu1 }
 0x6a5   :  { %v5397_v31 = vadd.f32 %v10557_v63, %v4900_v36  ;;  %v5525_v24 = vadd.f32 %v10557_v63, %v5286_v37  ;;  %v4902_v6 = vpop.f32.mrb[105].mxu0  ;;  %v5288_v7 = vpop.f32.mrb[105].mxu1 }
 0x6a6   :  { %v5398_v32 = vadd.f32 %v10560_v33, %v4902_v6  ;;  %v5526_v25 = vadd.f32 %v10560_v33, %v5288_v7  ;;  %v4904_v35 = vpop.f32.mrb[106].mxu0  ;;  %v5290_v48 = vpop.f32.mrb[106].mxu1  ;;  %6003 = vmatprep.mubr.bf16.mxu0 %v5632_v16  ;;  %6260 = vmatprep.mubr.bf16.mxu1 %v5664_v29 }
 0x6a7   :  { %v5399_v11 = vadd.f32 %v10557_v63, %v4904_v35  ;;  %v5527_v18 = vadd.f32 %v10557_v63, %v5290_v48  ;;  %v4906_v2 = vpop.f32.mrb[107].mxu0  ;;  %v5292_v3 = vpop.f32.mrb[107].mxu1  ;;  %6004 = vmatmul.mubr.bf16.gmra.mrb[164].mxu0 %v5631_v10  ;;  %6261 = vmatmul.mubr.bf16.gmra.mrb[164].mxu1 %v5663_v13  ;;  %v5461_v42 = vmax.f32 %v5397_v31, 0.0  ;;  %v5589_v43 = vmax.f32 %v5525_v24, 0.0 }
 0x6a8   :  { %v5400_v45 = vadd.f32 %v10560_v33, %v4906_v2  ;;  %v5528_v46 = vadd.f32 %v10560_v33, %v5292_v3  ;;  %v5462_v55 = vmax.f32 %v5398_v32, 0.0  ;;  %v5590_v0 = vmax.f32 %v5526_v25, 0.0  ;;  %v9011_v3 = vld [vmem:[#allocation15 + $0xf0] ss:$8 sps:$4 sm:$0xff]  }
 0x6a9   :  { %v5463_v53 = vmax.f32 %v5399_v11, 0.0  ;;  %v5591_v54 = vmax.f32 %v5527_v18, 0.0  ;;  %v9013_v11 = vld [vmem:[#allocation15 + $0xf4] ss:$8 sps:$4 sm:$0xff]  }
 0x6aa   :  { %v5464_v52 = vmax.f32 %v5400_v45, 0.0  ;;  %v5592_v56 = vmax.f32 %v5528_v46, 0.0  ;;  %6693 = vmatprep.subr.bf16.mxu0 %v9013_v11  ;;  %6950 = vmatprep.subr.bf16.mxu1 %v9013_v11 }
 0x6ab   :  { %v5633_v44 = vpack.c.bf16 %v5463_v53, %v5461_v42  ;;  %v5665_v57 = vpack.c.bf16 %v5591_v54, %v5589_v43  ;;  %6694 = vmatpush1.bf16.msra.mxu0 %v9011_v3  ;;  %6951 = vmatpush1.bf16.msra.mxu1 %v9011_v3 }
 0x6ac   :  { %v5634_v41 = vpack.c.bf16 %v5464_v52, %v5462_v55  ;;  %v5666_v34 = vpack.c.bf16 %v5592_v56, %v5590_v0  ;;  %v4910_v58 = vpop.f32.mrb[108].mxu0  ;;  %v5296_v59 = vpop.f32.mrb[108].mxu1 }
 0x6ad   :  { %v5401_v27 = vadd.f32 %v10557_v63, %v4910_v58  ;;  %v5529_v28 = vadd.f32 %v10557_v63, %v5296_v59  ;;  %v4912_v5 = vpop.f32.mrb[109].mxu0  ;;  %v5298_v8 = vpop.f32.mrb[109].mxu1 }
 0x6ae   :  { %v5402_v1 = vadd.f32 %v10560_v33, %v4912_v5  ;;  %v5530_v4 = vadd.f32 %v10560_v33, %v5298_v8  ;;  %v4914_v9 = vpop.f32.mrb[110].mxu0  ;;  %v5300_v14 = vpop.f32.mrb[110].mxu1  ;;  %6013 = vmatprep.mubr.bf16.mxu0 %v5634_v41  ;;  %6270 = vmatprep.mubr.bf16.mxu1 %v5666_v34 }
 0x6af   :  { %v5403_v15 = vadd.f32 %v10557_v63, %v4914_v9  ;;  %v5531_v60 = vadd.f32 %v10557_v63, %v5300_v14  ;;  %v4916_v61 = vpop.f32.mrb[111].mxu0  ;;  %v5302_v30 = vpop.f32.mrb[111].mxu1  ;;  %6014 = vmatmul.mubr.bf16.gmra.mrb[168].mxu0 %v5633_v44  ;;  %6271 = vmatmul.mubr.bf16.gmra.mrb[168].mxu1 %v5665_v57  ;;  %v5465_v19 = vmax.f32 %v5401_v27, 0.0  ;;  %v5593_v20 = vmax.f32 %v5529_v28, 0.0 }
 0x6b0   :  { %v5404_v49 = vadd.f32 %v10560_v33, %v4916_v61  ;;  %v5532_v38 = vadd.f32 %v10560_v33, %v5302_v30  ;;  %v5466_v22 = vmax.f32 %v5402_v1, 0.0  ;;  %v5594_v26 = vmax.f32 %v5530_v4, 0.0 }
 0x6b1   :  { %v5467_v39 = vmax.f32 %v5403_v15, 0.0  ;;  %v5595_v50 = vmax.f32 %v5531_v60, 0.0 }
 0x6b2   :  { %v5468_v62 = vmax.f32 %v5404_v49, 0.0  ;;  %v5596_v51 = vmax.f32 %v5532_v38, 0.0 }
 0x6b3   :  { %v5635_v40 = vpack.c.bf16 %v5467_v39, %v5465_v19  ;;  %v5667_v47 = vpack.c.bf16 %v5595_v50, %v5593_v20 }
 0x6b4   :  { %v5636_v12 = vpack.c.bf16 %v5468_v62, %v5466_v22  ;;  %v5668_v17 = vpack.c.bf16 %v5596_v51, %v5594_v26  ;;  %v4920_v10 = vpop.f32.mrb[112].mxu0  ;;  %v5306_v13 = vpop.f32.mrb[112].mxu1 }
 0x6b5   :  { %v5405_v16 = vadd.f32 %v10557_v63, %v4920_v10  ;;  %v5533_v29 = vadd.f32 %v10557_v63, %v5306_v13  ;;  %v4922_v36 = vpop.f32.mrb[113].mxu0  ;;  %v5308_v37 = vpop.f32.mrb[113].mxu1 }
 0x6b6   :  { %v5406_v31 = vadd.f32 %v10560_v33, %v4922_v36  ;;  %v5534_v24 = vadd.f32 %v10560_v33, %v5308_v37  ;;  %v4924_v6 = vpop.f32.mrb[114].mxu0  ;;  %v5310_v7 = vpop.f32.mrb[114].mxu1  ;;  %6023 = vmatprep.mubr.bf16.mxu0 %v5636_v12  ;;  %6280 = vmatprep.mubr.bf16.mxu1 %v5668_v17 }
 0x6b7   :  { %v5407_v32 = vadd.f32 %v10557_v63, %v4924_v6  ;;  %v5535_v25 = vadd.f32 %v10557_v63, %v5310_v7  ;;  %v4926_v35 = vpop.f32.mrb[115].mxu0  ;;  %v5312_v48 = vpop.f32.mrb[115].mxu1  ;;  %6024 = vmatmul.mubr.bf16.gmra.mrb[172].mxu0 %v5635_v40  ;;  %6281 = vmatmul.mubr.bf16.gmra.mrb[172].mxu1 %v5667_v47  ;;  %v5469_v45 = vmax.f32 %v5405_v16, 0.0  ;;  %v5597_v46 = vmax.f32 %v5533_v29, 0.0 }
 0x6b8   :  { %v5408_v18 = vadd.f32 %v10560_v33, %v4926_v35  ;;  %v5536_v2 = vadd.f32 %v10560_v33, %v5312_v48  ;;  %v5470_v53 = vmax.f32 %v5406_v31, 0.0  ;;  %v5598_v54 = vmax.f32 %v5534_v24, 0.0 }
 0x6b9   :  { %v5471_v42 = vmax.f32 %v5407_v32, 0.0  ;;  %v5599_v43 = vmax.f32 %v5535_v25, 0.0 }
 0x6ba   :  { %v5472_v55 = vmax.f32 %v5408_v18, 0.0  ;;  %v5600_v0 = vmax.f32 %v5536_v2, 0.0 }
 0x6bb   :  { %v5637_v52 = vpack.c.bf16 %v5471_v42, %v5469_v45  ;;  %v5669_v56 = vpack.c.bf16 %v5599_v43, %v5597_v46 }
 0x6bc   :  { %v5638_v44 = vpack.c.bf16 %v5472_v55, %v5470_v53  ;;  %v5670_v57 = vpack.c.bf16 %v5600_v0, %v5598_v54  ;;  %v4930_v41 = vpop.f32.mrb[116].mxu0  ;;  %v5316_v34 = vpop.f32.mrb[116].mxu1 }
 0x6bd   :  { %v5409_v58 = vadd.f32 %v10557_v63, %v4930_v41  ;;  %v5537_v59 = vadd.f32 %v10557_v63, %v5316_v34  ;;  %v4932_v27 = vpop.f32.mrb[117].mxu0  ;;  %v5318_v28 = vpop.f32.mrb[117].mxu1 }
 0x6be   :  { %v5410_v5 = vadd.f32 %v10560_v33, %v4932_v27  ;;  %v5538_v8 = vadd.f32 %v10560_v33, %v5318_v28  ;;  %v4934_v1 = vpop.f32.mrb[118].mxu0  ;;  %v5320_v4 = vpop.f32.mrb[118].mxu1  ;;  %6033 = vmatprep.mubr.bf16.mxu0 %v5638_v44  ;;  %6290 = vmatprep.mubr.bf16.mxu1 %v5670_v57 }
 0x6bf   :  { %v5411_v9 = vadd.f32 %v10557_v63, %v4934_v1  ;;  %v5539_v14 = vadd.f32 %v10557_v63, %v5320_v4  ;;  %v4936_v15 = vpop.f32.mrb[119].mxu0  ;;  %v5322_v60 = vpop.f32.mrb[119].mxu1  ;;  %6034 = vmatmul.mubr.bf16.gmra.mrb[176].mxu0 %v5637_v52  ;;  %6291 = vmatmul.mubr.bf16.gmra.mrb[176].mxu1 %v5669_v56  ;;  %v5473_v49 = vmax.f32 %v5409_v58, 0.0  ;;  %v5601_v38 = vmax.f32 %v5537_v59, 0.0 }
 0x6c0   :  { %v5412_v61 = vadd.f32 %v10560_v33, %v4936_v15  ;;  %v5540_v30 = vadd.f32 %v10560_v33, %v5322_v60  ;;  %v5474_v39 = vmax.f32 %v5410_v5, 0.0  ;;  %v5602_v50 = vmax.f32 %v5538_v8, 0.0 }
 0x6c1   :  { %v5475_v19 = vmax.f32 %v5411_v9, 0.0  ;;  %v5603_v20 = vmax.f32 %v5539_v14, 0.0 }
 0x6c2   :  { %v5476_v22 = vmax.f32 %v5412_v61, 0.0  ;;  %v5604_v26 = vmax.f32 %v5540_v30, 0.0 }
 0x6c3   :  { %v5639_v62 = vpack.c.bf16 %v5475_v19, %v5473_v49  ;;  %v5671_v51 = vpack.c.bf16 %v5603_v20, %v5601_v38 }
 0x6c4   :  { %v5640_v40 = vpack.c.bf16 %v5476_v22, %v5474_v39  ;;  %v5672_v47 = vpack.c.bf16 %v5604_v26, %v5602_v50  ;;  %v4940_v12 = vpop.f32.mrb[120].mxu0  ;;  %v5326_v17 = vpop.f32.mrb[120].mxu1  ;;  %v9014_v26 = vld [vmem:[#allocation18 + $0x40] sm:$0xff]  }
 0x6c5   :  { %v5413_v10 = vadd.f32 %v10557_v63, %v4940_v12  ;;  %v5541_v13 = vadd.f32 %v10557_v63, %v5326_v17  ;;  %v4942_v16 = vpop.f32.mrb[121].mxu0  ;;  %v5328_v29 = vpop.f32.mrb[121].mxu1  ;;  %8230 = vmatprep.subr.bf16.mxu0 %v9014_v26 }
 0x6c6   :  { %v5414_v36 = vadd.f32 %v10560_v33, %v4942_v16  ;;  %v5542_v37 = vadd.f32 %v10560_v33, %v5328_v29  ;;  %v4944_v31 = vpop.f32.mrb[122].mxu0  ;;  %v5330_v24 = vpop.f32.mrb[122].mxu1  ;;  %6043 = vmatprep.mubr.bf16.mxu0 %v5640_v40  ;;  %6300 = vmatprep.mubr.bf16.mxu1 %v5672_v47 }
 0x6c7   :  { %v5415_v6 = vadd.f32 %v10557_v63, %v4944_v31  ;;  %v5543_v7 = vadd.f32 %v10557_v63, %v5330_v24  ;;  %v4946_v32 = vpop.f32.mrb[123].mxu0  ;;  %v5332_v25 = vpop.f32.mrb[123].mxu1  ;;  %6044 = vmatmul.mubr.bf16.gmra.mrb[180].mxu0 %v5639_v62  ;;  %6301 = vmatmul.mubr.bf16.gmra.mrb[180].mxu1 %v5671_v51  ;;  %v5477_v11 = vmax.f32 %v5413_v10, 0.0  ;;  %v5605_v18 = vmax.f32 %v5541_v13, 0.0  ;;  %v9015_v62 = vld [vmem:[#allocation18 + $0x40] sm:$0xff]  }
 0x6c8   :  { %v5416_v35 = vadd.f32 %v10560_v33, %v4946_v32  ;;  %v5544_v48 = vadd.f32 %v10560_v33, %v5332_v25  ;;  %v5478_v45 = vmax.f32 %v5414_v36, 0.0  ;;  %v5606_v46 = vmax.f32 %v5542_v37, 0.0  ;;  %8342 = vmatprep.subr.bf16.mxu1 %v9015_v62 }
 0x6c9   :  { %v5479_v2 = vmax.f32 %v5415_v6, 0.0  ;;  %v5607_v3 = vmax.f32 %v5543_v7, 0.0 }
 0x6ca   :  { %v5480_v42 = vmax.f32 %v5416_v35, 0.0  ;;  %v5608_v43 = vmax.f32 %v5544_v48, 0.0 }
 0x6cb   :  { %v5641_v53 = vpack.c.bf16 %v5479_v2, %v5477_v11  ;;  %v5673_v54 = vpack.c.bf16 %v5607_v3, %v5605_v18 }
 0x6cc   :  { %v5642_v55 = vpack.c.bf16 %v5480_v42, %v5478_v45  ;;  %v5674_v0 = vpack.c.bf16 %v5608_v43, %v5606_v46  ;;  %v4950_v52 = vpop.f32.mrb[124].mxu0  ;;  %v5336_v56 = vpop.f32.mrb[124].mxu1 }
 0x6cd   :  { %v5417_v44 = vadd.f32 %v10557_v63, %v4950_v52  ;;  %v5545_v57 = vadd.f32 %v10557_v63, %v5336_v56  ;;  %v4952_v41 = vpop.f32.mrb[125].mxu0  ;;  %v5338_v34 = vpop.f32.mrb[125].mxu1  ;;  %v9016_v56 = vld [vmem:[#allocation18] sm:$0xff]  }
 0x6ce   :  { %v5418_v58 = vadd.f32 %v10560_v33, %v4952_v41  ;;  %v5546_v59 = vadd.f32 %v10560_v33, %v5338_v34  ;;  %v4954_v27 = vpop.f32.mrb[126].mxu0  ;;  %v5340_v28 = vpop.f32.mrb[126].mxu1  ;;  %6053 = vmatprep.mubr.bf16.mxu0 %v5642_v55  ;;  %6310 = vmatprep.mubr.bf16.mxu1 %v5674_v0 }
 0x6cf   :  { %v5419_v5 = vadd.f32 %v10557_v63, %v4954_v27  ;;  %v5547_v8 = vadd.f32 %v10557_v63, %v5340_v28  ;;  %v4956_v1 = vpop.f32.mrb[127].mxu0  ;;  %v5342_v4 = vpop.f32.mrb[127].mxu1  ;;  %6054 = vmatmul.mubr.bf16.gmra.mrb[184].mxu0 %v5641_v53  ;;  %6311 = vmatmul.mubr.bf16.gmra.mrb[184].mxu1 %v5673_v54  ;;  %v5481_v15 = vmax.f32 %v5417_v44, 0.0  ;;  %v5609_v60 = vmax.f32 %v5545_v57, 0.0  ;;  %v9017_v44 = vld [vmem:[#allocation18] sm:$0xff]   ;;  %v9019_v27 = vld [vmem:[#allocation18 + $0x48] sm:$0xff]  }
 0x6d0   :  { %v5420_v9 = vadd.f32 %v10560_v33, %v4956_v1  ;;  %v5548_v14 = vadd.f32 %v10560_v33, %v5342_v4  ;;  %v5482_v49 = vmax.f32 %v5418_v58, 0.0  ;;  %v5610_v38 = vmax.f32 %v5546_v59, 0.0  ;;  %v5709_v33 = vld [vmem:[%s11304_s15] sm:$0x3]  ;;  %v9018_v59 = vld [vmem:[#allocation18 + $0x48] sm:$0xff]  }
 0x6d1   :  { %v5483_v61 = vmax.f32 %v5419_v5, 0.0  ;;  %v5611_v30 = vmax.f32 %v5547_v8, 0.0  ;;  %v10694_v51 = vrot.slane %v5709_v33, %v9664_v21  ;;  %v10697_v40 = vrot.slane %v5709_v33, %v9669_v23 }
 0x6d2   :  { %v5484_v19 = vmax.f32 %v5420_v9, 0.0  ;;  %v5612_v20 = vmax.f32 %v5548_v14, 0.0 }
 0x6d3   :  { %v5643_v39 = vpack.c.bf16 %v5483_v61, %v5481_v15  ;;  %v5675_v50 = vpack.c.bf16 %v5611_v30, %v5609_v60  ;;  %v9020_v30 = vld [vmem:[#allocation18 + $0x8] sm:$0xff]  }
 0x6d4   :  { %v5644_v22 = vpack.c.bf16 %v5484_v19, %v5482_v49  ;;  %v5676_v63 = vpack.c.bf16 %v5612_v20, %v5610_v38  ;;  %v9021_v49 = vld [vmem:[#allocation18 + $0x8] sm:$0xff]  }
 0x6d6   :  { %6063 = vmatprep.mubr.bf16.mxu0 %v5644_v22  ;;  %6320 = vmatprep.mubr.bf16.mxu1 %v5676_v63  ;;  %v9023_v22 = vld [vmem:[#allocation18 + $0x50] sm:$0xff]  }
 0x6d7   :  { %6064 = vmatmul.mubr.bf16.gmra.mrb[188].mxu0 %v5643_v39  ;;  %6321 = vmatmul.mubr.bf16.gmra.mrb[188].mxu1 %v5675_v50  ;;  %v9022_v50 = vld [vmem:[#allocation18 + $0x50] sm:$0xff]  }
 0x732   :  { %v5915_v47 = vpop.f32.mrb[128].mxu0  ;;  %v6172_v12 = vpop.f32.mrb[128].mxu1 }
 0x733   :  { %v5916_v17 = vadd.f32 %v5915_v47, %v10694_v51  ;;  %v6173_v10 = vadd.f32 %v6172_v12, %v10694_v51  ;;  %v5917_v13 = vpop.f32.mrb[129].mxu0  ;;  %v6174_v16 = vpop.f32.mrb[129].mxu1 }
 0x734   :  { %v5918_v29 = vadd.f32 %v5917_v13, %v10697_v40  ;;  %v6175_v36 = vadd.f32 %v6174_v16, %v10697_v40  ;;  %v5919_v37 = vpop.f32.mrb[130].mxu0  ;;  %v6176_v31 = vpop.f32.mrb[130].mxu1 }
 0x735   :  { %v5920_v24 = vadd.f32 %v5919_v37, %v10694_v51  ;;  %v6177_v6 = vadd.f32 %v6176_v31, %v10694_v51  ;;  %v5921_v7 = vpop.f32.mrb[131].mxu0  ;;  %v6178_v32 = vpop.f32.mrb[131].mxu1  ;;  %v6074_v48 = vmax.f32 %v5916_v17, 0.0  ;;  %v6331_v11 = vmax.f32 %v6173_v10, 0.0 }
 0x736   :  { %v5922_v25 = vadd.f32 %v5921_v7, %v10697_v40  ;;  %v6179_v35 = vadd.f32 %v6178_v32, %v10697_v40  ;;  %v6075_v3 = vmax.f32 %v5918_v29, 0.0  ;;  %v6332_v45 = vmax.f32 %v6175_v36, 0.0  ;;  %v9024_v29 = vld [vmem:[#allocation18 + $0x10] sm:$0xff]   ;;  %v9026_v7 = vld [vmem:[#allocation18 + $0x58] sm:$0xff]  }
 0x737   :  { %v6076_v18 = vmax.f32 %v5920_v24, 0.0  ;;  %v6333_v2 = vmax.f32 %v6177_v6, 0.0  ;;  %v9025_v36 = vld [vmem:[#allocation18 + $0x10] sm:$0xff]   ;;  %v9027_v32 = vld [vmem:[#allocation18 + $0x58] sm:$0xff]  }
 0x738   :  { %v6077_v46 = vmax.f32 %v5922_v25, 0.0  ;;  %v6334_v42 = vmax.f32 %v6179_v35, 0.0 }
 0x739   :  { %v6395_v43 = vpack.c.bf16 %v6076_v18, %v6074_v48  ;;  %v6427_v53 = vpack.c.bf16 %v6333_v2, %v6331_v11 }
 0x73a   :  { %v6396_v54 = vpack.c.bf16 %v6077_v46, %v6075_v3  ;;  %v6428_v55 = vpack.c.bf16 %v6334_v42, %v6332_v45  ;;  %v5925_v0 = vpop.f32.mrb[132].mxu0  ;;  %v6182_v52 = vpop.f32.mrb[132].mxu1 }
 0x73b   :  { %v5926_v57 = vadd.f32 %v5925_v0, %v10694_v51  ;;  %v6183_v41 = vadd.f32 %v6182_v52, %v10694_v51  ;;  %v5927_v34 = vpop.f32.mrb[133].mxu0  ;;  %v6184_v58 = vpop.f32.mrb[133].mxu1 }
 0x73c   :  { %v5928_v28 = vadd.f32 %v5927_v34, %v10697_v40  ;;  %v6185_v5 = vadd.f32 %v6184_v58, %v10697_v40  ;;  %v5929_v8 = vpop.f32.mrb[134].mxu0  ;;  %v6186_v1 = vpop.f32.mrb[134].mxu1  ;;  %6695 = vmatprep.mubr.bf16.mxu0 %v6396_v54  ;;  %6952 = vmatprep.mubr.bf16.mxu1 %v6428_v55 }
 0x73d   :  { %v5930_v4 = vadd.f32 %v5929_v8, %v10694_v51  ;;  %v6187_v9 = vadd.f32 %v6186_v1, %v10694_v51  ;;  %v5931_v14 = vpop.f32.mrb[135].mxu0  ;;  %v6188_v15 = vpop.f32.mrb[135].mxu1  ;;  %6696 = vmatmul.mubr.bf16.vlgmr.msra.gmra.mrb[192].mxu0 %v6395_v43  ;;  %6953 = vmatmul.mubr.bf16.vlgmr.msra.gmra.mrb[192].mxu1 %v6427_v53  ;;  %v6078_v38 = vmax.f32 %v5926_v57, 0.0  ;;  %v6335_v19 = vmax.f32 %v6183_v41, 0.0  ;;  %v9028_v43 = vld [vmem:[#allocation18 + $0x18] sm:$0xff]  }
 0x73e   :  { %v5932_v60 = vadd.f32 %v5931_v14, %v10697_v40  ;;  %v6189_v61 = vadd.f32 %v6188_v15, %v10697_v40  ;;  %8231 = vmatpush3.bf16.msra.mxu0 %v9016_v56  ;;  %8343 = vmatpush3.bf16.msra.mxu1 %v9017_v44  ;;  %v6079_v63 = vmax.f32 %v5928_v28, 0.0  ;;  %v6336_v26 = vmax.f32 %v6185_v5, 0.0  ;;  %v9029_v53 = vld [vmem:[#allocation18 + $0x18] sm:$0xff]   ;;  %v9030_v56 = vld [vmem:[#allocation18 + $0x60] sm:$0xff]  }
 0x73f   :  { %v6080_v20 = vmax.f32 %v5930_v4, 0.0  ;;  %v6337_v39 = vmax.f32 %v6187_v9, 0.0  ;;  %8232 = vmatprep.subr.bf16.mxu0 %v9018_v59  ;;  %8344 = vmatprep.subr.bf16.mxu1 %v9019_v27  ;;  %v9031_v44 = vld [vmem:[#allocation18 + $0x60] sm:$0xff]  }
 0x740   :  { %v6081_v62 = vmax.f32 %v5932_v60, 0.0  ;;  %v6338_v33 = vmax.f32 %v6189_v61, 0.0  ;;  %v9032_v4 = vld [vmem:[#allocation18 + $0x20] sm:$0xff]  }
 0x741   :  { %v6397_v47 = vpack.c.bf16 %v6080_v20, %v6078_v38  ;;  %v6429_v12 = vpack.c.bf16 %v6337_v39, %v6335_v19  ;;  %v9033_v9 = vld [vmem:[#allocation18 + $0x20] sm:$0xff]  }
 0x742   :  { %v6398_v17 = vpack.c.bf16 %v6081_v62, %v6079_v63  ;;  %v6430_v10 = vpack.c.bf16 %v6338_v33, %v6336_v26  ;;  %v5935_v13 = vpop.f32.mrb[136].mxu0  ;;  %v6192_v16 = vpop.f32.mrb[136].mxu1  ;;  %8233 = vmatpush3.bf16.msra.mxu0 %v9020_v30  ;;  %8345 = vmatpush3.bf16.msra.mxu1 %v9021_v49  ;;  %v9034_v30 = vld [vmem:[#allocation18 + $0x68] sm:$0xff]  }
 0x743   :  { %v5936_v37 = vadd.f32 %v5935_v13, %v10694_v51  ;;  %v6193_v31 = vadd.f32 %v6192_v16, %v10694_v51  ;;  %v5937_v24 = vpop.f32.mrb[137].mxu0  ;;  %v6194_v6 = vpop.f32.mrb[137].mxu1  ;;  %8234 = vmatprep.subr.bf16.mxu0 %v9022_v50  ;;  %8346 = vmatprep.subr.bf16.mxu1 %v9023_v22  ;;  %v9035_v49 = vld [vmem:[#allocation18 + $0x68] sm:$0xff]  }
 0x744   :  { %v5938_v25 = vadd.f32 %v5937_v24, %v10697_v40  ;;  %v6195_v35 = vadd.f32 %v6194_v6, %v10697_v40  ;;  %v5939_v48 = vpop.f32.mrb[138].mxu0  ;;  %v6196_v11 = vpop.f32.mrb[138].mxu1  ;;  %6705 = vmatprep.mubr.bf16.mxu0 %v6398_v17  ;;  %6962 = vmatprep.mubr.bf16.mxu1 %v6430_v10 }
 0x745   :  { %v5940_v18 = vadd.f32 %v5939_v48, %v10694_v51  ;;  %v6197_v2 = vadd.f32 %v6196_v11, %v10694_v51  ;;  %v5941_v3 = vpop.f32.mrb[139].mxu0  ;;  %v6198_v45 = vpop.f32.mrb[139].mxu1  ;;  %6706 = vmatmul.mubr.bf16.gmra.mrb[196].mxu0 %v6397_v47  ;;  %6963 = vmatmul.mubr.bf16.gmra.mrb[196].mxu1 %v6429_v12  ;;  %v6082_v54 = vmax.f32 %v5936_v37, 0.0  ;;  %v6339_v55 = vmax.f32 %v6193_v31, 0.0  ;;  %v9036_v47 = vld [vmem:[#allocation18 + $0x28] sm:$0xff]  }
 0x746   :  { %v5942_v46 = vadd.f32 %v5941_v3, %v10697_v40  ;;  %v6199_v42 = vadd.f32 %v6198_v45, %v10697_v40  ;;  %8235 = vmatpush3.bf16.msra.mxu0 %v9024_v29  ;;  %8347 = vmatpush3.bf16.msra.mxu1 %v9025_v36  ;;  %v6083_v57 = vmax.f32 %v5938_v25, 0.0  ;;  %v6340_v41 = vmax.f32 %v6195_v35, 0.0  ;;  %v9037_v12 = vld [vmem:[#allocation18 + $0x28] sm:$0xff]   ;;  %v9038_v29 = vld [vmem:[#allocation18 + $0x70] sm:$0xff]  }
 0x747   :  { %v6084_v0 = vmax.f32 %v5940_v18, 0.0  ;;  %v6341_v52 = vmax.f32 %v6197_v2, 0.0  ;;  %8236 = vmatprep.subr.bf16.mxu0 %v9026_v7  ;;  %8348 = vmatprep.subr.bf16.mxu1 %v9027_v32  ;;  %v9039_v36 = vld [vmem:[#allocation18 + $0x70] sm:$0xff]  }
 0x748   :  { %v6085_v34 = vmax.f32 %v5942_v46, 0.0  ;;  %v6342_v58 = vmax.f32 %v6199_v42, 0.0  ;;  %v9040_v18 = vld [vmem:[#allocation18 + $0x30] sm:$0xff]  }
 0x749   :  { %v6399_v59 = vpack.c.bf16 %v6084_v0, %v6082_v54  ;;  %v6431_v27 = vpack.c.bf16 %v6341_v52, %v6339_v55  ;;  %v9041_v2 = vld [vmem:[#allocation18 + $0x30] sm:$0xff]  }
 0x74a   :  { %v6400_v28 = vpack.c.bf16 %v6085_v34, %v6083_v57  ;;  %v6432_v5 = vpack.c.bf16 %v6342_v58, %v6340_v41  ;;  %v5945_v8 = vpop.f32.mrb[140].mxu0  ;;  %v6202_v1 = vpop.f32.mrb[140].mxu1  ;;  %8237 = vmatpush3.bf16.msra.mxu0 %v9028_v43  ;;  %8349 = vmatpush3.bf16.msra.mxu1 %v9029_v53  ;;  %v9042_v43 = vld [vmem:[#allocation18 + $0x78] sm:$0xff]  }
 0x74b   :  { %v5946_v14 = vadd.f32 %v5945_v8, %v10694_v51  ;;  %v6203_v15 = vadd.f32 %v6202_v1, %v10694_v51  ;;  %v5947_v60 = vpop.f32.mrb[141].mxu0  ;;  %v6204_v61 = vpop.f32.mrb[141].mxu1  ;;  %8238 = vmatprep.subr.bf16.mxu0 %v9030_v56  ;;  %8350 = vmatprep.subr.bf16.mxu1 %v9031_v44  ;;  %v9043_v53 = vld [vmem:[#allocation18 + $0x78] sm:$0xff]  }
 0x74c   :  { %v5948_v38 = vadd.f32 %v5947_v60, %v10697_v40  ;;  %v6205_v19 = vadd.f32 %v6204_v61, %v10697_v40  ;;  %v5949_v20 = vpop.f32.mrb[142].mxu0  ;;  %v6206_v39 = vpop.f32.mrb[142].mxu1  ;;  %6715 = vmatprep.mubr.bf16.mxu0 %v6400_v28  ;;  %6972 = vmatprep.mubr.bf16.mxu1 %v6432_v5 }
 0x74d   :  { %v5950_v50 = vadd.f32 %v5949_v20, %v10694_v51  ;;  %v6207_v22 = vadd.f32 %v6206_v39, %v10694_v51  ;;  %v5951_v63 = vpop.f32.mrb[143].mxu0  ;;  %v6208_v26 = vpop.f32.mrb[143].mxu1  ;;  %6716 = vmatmul.mubr.bf16.gmra.mrb[200].mxu0 %v6399_v59  ;;  %6973 = vmatmul.mubr.bf16.gmra.mrb[200].mxu1 %v6431_v27  ;;  %v6086_v17 = vmax.f32 %v5946_v14, 0.0  ;;  %v6343_v10 = vmax.f32 %v6203_v15, 0.0  ;;  %v9044_v59 = vld [vmem:[#allocation18 + $0x38] sm:$0xff]  }
 0x74e   :  { %v5952_v62 = vadd.f32 %v5951_v63, %v10697_v40  ;;  %v6209_v33 = vadd.f32 %v6208_v26, %v10697_v40  ;;  %8239 = vmatpush3.bf16.msra.mxu0 %v9032_v4  ;;  %8351 = vmatpush3.bf16.msra.mxu1 %v9033_v9  ;;  %v6087_v37 = vmax.f32 %v5948_v38, 0.0  ;;  %v6344_v31 = vmax.f32 %v6205_v19, 0.0  ;;  %v9045_v27 = vld [vmem:[#allocation18 + $0x38] sm:$0xff]  }
 0x74f   :  { %v6088_v13 = vmax.f32 %v5950_v50, 0.0  ;;  %v6345_v16 = vmax.f32 %v6207_v22, 0.0  ;;  %8240 = vmatprep.subr.bf16.mxu0 %v9034_v30  ;;  %8352 = vmatprep.subr.bf16.mxu1 %v9035_v49 }
 0x750   :  { %v6089_v24 = vmax.f32 %v5952_v62, 0.0  ;;  %v6346_v6 = vmax.f32 %v6209_v33, 0.0 }
 0x751   :  { %v6401_v7 = vpack.c.bf16 %v6088_v13, %v6086_v17  ;;  %v6433_v32 = vpack.c.bf16 %v6345_v16, %v6343_v10 }
 0x752   :  { %v6402_v25 = vpack.c.bf16 %v6089_v24, %v6087_v37  ;;  %v6434_v35 = vpack.c.bf16 %v6346_v6, %v6344_v31  ;;  %v5955_v48 = vpop.f32.mrb[144].mxu0  ;;  %v6212_v11 = vpop.f32.mrb[144].mxu1  ;;  %8241 = vmatpush3.bf16.msra.mxu0 %v9036_v47  ;;  %8353 = vmatpush3.bf16.msra.mxu1 %v9037_v12 }
 0x753   :  { %v5956_v3 = vadd.f32 %v5955_v48, %v10694_v51  ;;  %v6213_v45 = vadd.f32 %v6212_v11, %v10694_v51  ;;  %v5957_v46 = vpop.f32.mrb[145].mxu0  ;;  %v6214_v42 = vpop.f32.mrb[145].mxu1  ;;  %8242 = vmatprep.subr.bf16.mxu0 %v9038_v29  ;;  %8354 = vmatprep.subr.bf16.mxu1 %v9039_v36 }
 0x754   :  { %v5958_v54 = vadd.f32 %v5957_v46, %v10697_v40  ;;  %v6215_v55 = vadd.f32 %v6214_v42, %v10697_v40  ;;  %v5959_v0 = vpop.f32.mrb[146].mxu0  ;;  %v6216_v52 = vpop.f32.mrb[146].mxu1  ;;  %6725 = vmatprep.mubr.bf16.mxu0 %v6402_v25  ;;  %6982 = vmatprep.mubr.bf16.mxu1 %v6434_v35 }
 0x755   :  { %v5960_v56 = vadd.f32 %v5959_v0, %v10694_v51  ;;  %v6217_v44 = vadd.f32 %v6216_v52, %v10694_v51  ;;  %v5961_v57 = vpop.f32.mrb[147].mxu0  ;;  %v6218_v41 = vpop.f32.mrb[147].mxu1  ;;  %6726 = vmatmul.mubr.bf16.gmra.mrb[204].mxu0 %v6401_v7  ;;  %6983 = vmatmul.mubr.bf16.gmra.mrb[204].mxu1 %v6433_v32  ;;  %v6090_v28 = vmax.f32 %v5956_v3, 0.0  ;;  %v6347_v5 = vmax.f32 %v6213_v45, 0.0 }
 0x756   :  { %v5962_v34 = vadd.f32 %v5961_v57, %v10697_v40  ;;  %v6219_v58 = vadd.f32 %v6218_v41, %v10697_v40  ;;  %8243 = vmatpush3.bf16.msra.mxu0 %v9040_v18  ;;  %8355 = vmatpush3.bf16.msra.mxu1 %v9041_v2  ;;  %v6091_v4 = vmax.f32 %v5958_v54, 0.0  ;;  %v6348_v9 = vmax.f32 %v6215_v55, 0.0 }
 0x757   :  { %v6092_v8 = vmax.f32 %v5960_v56, 0.0  ;;  %v6349_v1 = vmax.f32 %v6217_v44, 0.0  ;;  %8244 = vmatprep.subr.bf16.mxu0 %v9042_v43  ;;  %8356 = vmatprep.subr.bf16.mxu1 %v9043_v53 }
 0x758   :  { %v6093_v14 = vmax.f32 %v5962_v34, 0.0  ;;  %v6350_v15 = vmax.f32 %v6219_v58, 0.0 }
 0x759   :  { %v6403_v60 = vpack.c.bf16 %v6092_v8, %v6090_v28  ;;  %v6435_v61 = vpack.c.bf16 %v6349_v1, %v6347_v5 }
 0x75a   :  { %v6404_v30 = vpack.c.bf16 %v6093_v14, %v6091_v4  ;;  %v6436_v49 = vpack.c.bf16 %v6350_v15, %v6348_v9  ;;  %v5965_v38 = vpop.f32.mrb[148].mxu0  ;;  %v6222_v19 = vpop.f32.mrb[148].mxu1  ;;  %8245 = vmatpush3.bf16.msra.mxu0 %v9044_v59  ;;  %8357 = vmatpush3.bf16.msra.mxu1 %v9045_v27 }
 0x75b   :  { %v5966_v20 = vadd.f32 %v5965_v38, %v10694_v51  ;;  %v6223_v39 = vadd.f32 %v6222_v19, %v10694_v51  ;;  %v5967_v50 = vpop.f32.mrb[149].mxu0  ;;  %v6224_v22 = vpop.f32.mrb[149].mxu1 }
 0x75c   :  { %v5968_v63 = vadd.f32 %v5967_v50, %v10697_v40  ;;  %v6225_v26 = vadd.f32 %v6224_v22, %v10697_v40  ;;  %v5969_v62 = vpop.f32.mrb[150].mxu0  ;;  %v6226_v33 = vpop.f32.mrb[150].mxu1  ;;  %6735 = vmatprep.mubr.bf16.mxu0 %v6404_v30  ;;  %6992 = vmatprep.mubr.bf16.mxu1 %v6436_v49 }
 0x75d   :  { %v5970_v47 = vadd.f32 %v5969_v62, %v10694_v51  ;;  %v6227_v12 = vadd.f32 %v6226_v33, %v10694_v51  ;;  %v5971_v17 = vpop.f32.mrb[151].mxu0  ;;  %v6228_v10 = vpop.f32.mrb[151].mxu1  ;;  %6736 = vmatmul.mubr.bf16.gmra.mrb[208].mxu0 %v6403_v60  ;;  %6993 = vmatmul.mubr.bf16.gmra.mrb[208].mxu1 %v6435_v61  ;;  %v6094_v29 = vmax.f32 %v5966_v20, 0.0  ;;  %v6351_v36 = vmax.f32 %v6223_v39, 0.0 }
 0x75e   :  { %v5972_v13 = vadd.f32 %v5971_v17, %v10697_v40  ;;  %v6229_v16 = vadd.f32 %v6228_v10, %v10697_v40  ;;  %v6095_v24 = vmax.f32 %v5968_v63, 0.0  ;;  %v6352_v6 = vmax.f32 %v6225_v26, 0.0 }
 0x75f   :  { %v6096_v37 = vmax.f32 %v5970_v47, 0.0  ;;  %v6353_v31 = vmax.f32 %v6227_v12, 0.0 }
 0x760   :  { %v6097_v7 = vmax.f32 %v5972_v13, 0.0  ;;  %v6354_v32 = vmax.f32 %v6229_v16, 0.0 }
 0x761   :  { %v6405_v25 = vpack.c.bf16 %v6096_v37, %v6094_v29  ;;  %v6437_v35 = vpack.c.bf16 %v6353_v31, %v6351_v36 }
 0x762   :  { %v6406_v48 = vpack.c.bf16 %v6097_v7, %v6095_v24  ;;  %v6438_v11 = vpack.c.bf16 %v6354_v32, %v6352_v6  ;;  %v5975_v18 = vpop.f32.mrb[152].mxu0  ;;  %v6232_v2 = vpop.f32.mrb[152].mxu1 }
 0x763   :  { %v5976_v3 = vadd.f32 %v5975_v18, %v10694_v51  ;;  %v6233_v45 = vadd.f32 %v6232_v2, %v10694_v51  ;;  %v5977_v46 = vpop.f32.mrb[153].mxu0  ;;  %v6234_v42 = vpop.f32.mrb[153].mxu1 }
 0x764   :  { %v5978_v43 = vadd.f32 %v5977_v46, %v10697_v40  ;;  %v6235_v53 = vadd.f32 %v6234_v42, %v10697_v40  ;;  %v5979_v54 = vpop.f32.mrb[154].mxu0  ;;  %v6236_v55 = vpop.f32.mrb[154].mxu1  ;;  %6745 = vmatprep.mubr.bf16.mxu0 %v6406_v48  ;;  %7002 = vmatprep.mubr.bf16.mxu1 %v6438_v11 }
 0x765   :  { %v5980_v0 = vadd.f32 %v5979_v54, %v10694_v51  ;;  %v6237_v52 = vadd.f32 %v6236_v55, %v10694_v51  ;;  %v5981_v56 = vpop.f32.mrb[155].mxu0  ;;  %v6238_v44 = vpop.f32.mrb[155].mxu1  ;;  %6746 = vmatmul.mubr.bf16.gmra.mrb[212].mxu0 %v6405_v25  ;;  %7003 = vmatmul.mubr.bf16.gmra.mrb[212].mxu1 %v6437_v35  ;;  %v6098_v34 = vmax.f32 %v5976_v3, 0.0  ;;  %v6355_v58 = vmax.f32 %v6233_v45, 0.0 }
 0x766   :  { %v5982_v57 = vadd.f32 %v5981_v56, %v10697_v40  ;;  %v6239_v41 = vadd.f32 %v6238_v44, %v10697_v40  ;;  %v6099_v28 = vmax.f32 %v5978_v43, 0.0  ;;  %v6356_v5 = vmax.f32 %v6235_v53, 0.0 }
 0x767   :  { %v6100_v59 = vmax.f32 %v5980_v0, 0.0  ;;  %v6357_v27 = vmax.f32 %v6237_v52, 0.0 }
 0x768   :  { %v6101_v8 = vmax.f32 %v5982_v57, 0.0  ;;  %v6358_v1 = vmax.f32 %v6239_v41, 0.0 }
 0x769   :  { %v6407_v4 = vpack.c.bf16 %v6100_v59, %v6098_v34  ;;  %v6439_v9 = vpack.c.bf16 %v6357_v27, %v6355_v58 }
 0x76a   :  { %v6408_v14 = vpack.c.bf16 %v6101_v8, %v6099_v28  ;;  %v6440_v15 = vpack.c.bf16 %v6358_v1, %v6356_v5  ;;  %v5985_v60 = vpop.f32.mrb[156].mxu0  ;;  %v6242_v61 = vpop.f32.mrb[156].mxu1 }
 0x76b   :  { %v5986_v30 = vadd.f32 %v5985_v60, %v10694_v51  ;;  %v6243_v49 = vadd.f32 %v6242_v61, %v10694_v51  ;;  %v5987_v38 = vpop.f32.mrb[157].mxu0  ;;  %v6244_v19 = vpop.f32.mrb[157].mxu1 }
 0x76c   :  { %v5988_v20 = vadd.f32 %v5987_v38, %v10697_v40  ;;  %v6245_v39 = vadd.f32 %v6244_v19, %v10697_v40  ;;  %v5989_v50 = vpop.f32.mrb[158].mxu0  ;;  %v6246_v22 = vpop.f32.mrb[158].mxu1  ;;  %6755 = vmatprep.mubr.bf16.mxu0 %v6408_v14  ;;  %7012 = vmatprep.mubr.bf16.mxu1 %v6440_v15 }
 0x76d   :  { %v5990_v63 = vadd.f32 %v5989_v50, %v10694_v51  ;;  %v6247_v26 = vadd.f32 %v6246_v22, %v10694_v51  ;;  %v5991_v62 = vpop.f32.mrb[159].mxu0  ;;  %v6248_v33 = vpop.f32.mrb[159].mxu1  ;;  %6756 = vmatmul.mubr.bf16.gmra.mrb[216].mxu0 %v6407_v4  ;;  %7013 = vmatmul.mubr.bf16.gmra.mrb[216].mxu1 %v6439_v9  ;;  %v6102_v17 = vmax.f32 %v5986_v30, 0.0  ;;  %v6359_v10 = vmax.f32 %v6243_v49, 0.0 }
 0x76e   :  { %v5992_v47 = vadd.f32 %v5991_v62, %v10697_v40  ;;  %v6249_v12 = vadd.f32 %v6248_v33, %v10697_v40  ;;  %v6103_v29 = vmax.f32 %v5988_v20, 0.0  ;;  %v6360_v36 = vmax.f32 %v6245_v39, 0.0 }
 0x76f   :  { %v6104_v13 = vmax.f32 %v5990_v63, 0.0  ;;  %v6361_v16 = vmax.f32 %v6247_v26, 0.0 }
 0x770   :  { %v6105_v37 = vmax.f32 %v5992_v47, 0.0  ;;  %v6362_v31 = vmax.f32 %v6249_v12, 0.0 }
 0x771   :  { %v6409_v24 = vpack.c.bf16 %v6104_v13, %v6102_v17  ;;  %v6441_v6 = vpack.c.bf16 %v6361_v16, %v6359_v10 }
 0x772   :  { %v6410_v7 = vpack.c.bf16 %v6105_v37, %v6103_v29  ;;  %v6442_v32 = vpack.c.bf16 %v6362_v31, %v6360_v36  ;;  %v5995_v25 = vpop.f32.mrb[160].mxu0  ;;  %v6252_v35 = vpop.f32.mrb[160].mxu1 }
 0x773   :  { %v5996_v48 = vadd.f32 %v5995_v25, %v10694_v51  ;;  %v6253_v11 = vadd.f32 %v6252_v35, %v10694_v51  ;;  %v5997_v18 = vpop.f32.mrb[161].mxu0  ;;  %v6254_v2 = vpop.f32.mrb[161].mxu1 }
 0x774   :  { %v5998_v3 = vadd.f32 %v5997_v18, %v10697_v40  ;;  %v6255_v45 = vadd.f32 %v6254_v2, %v10697_v40  ;;  %v5999_v46 = vpop.f32.mrb[162].mxu0  ;;  %v6256_v42 = vpop.f32.mrb[162].mxu1  ;;  %6765 = vmatprep.mubr.bf16.mxu0 %v6410_v7  ;;  %7022 = vmatprep.mubr.bf16.mxu1 %v6442_v32 }
 0x775   :  { %v6000_v43 = vadd.f32 %v5999_v46, %v10694_v51  ;;  %v6257_v53 = vadd.f32 %v6256_v42, %v10694_v51  ;;  %v6001_v54 = vpop.f32.mrb[163].mxu0  ;;  %v6258_v55 = vpop.f32.mrb[163].mxu1  ;;  %6766 = vmatmul.mubr.bf16.gmra.mrb[220].mxu0 %v6409_v24  ;;  %7023 = vmatmul.mubr.bf16.gmra.mrb[220].mxu1 %v6441_v6  ;;  %v6106_v56 = vmax.f32 %v5996_v48, 0.0  ;;  %v6363_v44 = vmax.f32 %v6253_v11, 0.0 }
 0x776   :  { %v6002_v0 = vadd.f32 %v6001_v54, %v10697_v40  ;;  %v6259_v52 = vadd.f32 %v6258_v55, %v10697_v40  ;;  %v6107_v34 = vmax.f32 %v5998_v3, 0.0  ;;  %v6364_v58 = vmax.f32 %v6255_v45, 0.0 }
 0x777   :  { %v6108_v57 = vmax.f32 %v6000_v43, 0.0  ;;  %v6365_v41 = vmax.f32 %v6257_v53, 0.0 }
 0x778   :  { %v6109_v59 = vmax.f32 %v6002_v0, 0.0  ;;  %v6366_v27 = vmax.f32 %v6259_v52, 0.0 }
 0x779   :  { %v6411_v28 = vpack.c.bf16 %v6108_v57, %v6106_v56  ;;  %v6443_v5 = vpack.c.bf16 %v6365_v41, %v6363_v44 }
 0x77a   :  { %v6412_v8 = vpack.c.bf16 %v6109_v59, %v6107_v34  ;;  %v6444_v1 = vpack.c.bf16 %v6366_v27, %v6364_v58  ;;  %v6005_v4 = vpop.f32.mrb[164].mxu0  ;;  %v6262_v9 = vpop.f32.mrb[164].mxu1 }
 0x77b   :  { %v6006_v14 = vadd.f32 %v6005_v4, %v10694_v51  ;;  %v6263_v15 = vadd.f32 %v6262_v9, %v10694_v51  ;;  %v6007_v60 = vpop.f32.mrb[165].mxu0  ;;  %v6264_v61 = vpop.f32.mrb[165].mxu1 }
 0x77c   :  { %v6008_v30 = vadd.f32 %v6007_v60, %v10697_v40  ;;  %v6265_v49 = vadd.f32 %v6264_v61, %v10697_v40  ;;  %v6009_v38 = vpop.f32.mrb[166].mxu0  ;;  %v6266_v19 = vpop.f32.mrb[166].mxu1  ;;  %6775 = vmatprep.mubr.bf16.mxu0 %v6412_v8  ;;  %7032 = vmatprep.mubr.bf16.mxu1 %v6444_v1 }
 0x77d   :  { %v6010_v20 = vadd.f32 %v6009_v38, %v10694_v51  ;;  %v6267_v39 = vadd.f32 %v6266_v19, %v10694_v51  ;;  %v6011_v50 = vpop.f32.mrb[167].mxu0  ;;  %v6268_v22 = vpop.f32.mrb[167].mxu1  ;;  %6776 = vmatmul.mubr.bf16.gmra.mrb[224].mxu0 %v6411_v28  ;;  %7033 = vmatmul.mubr.bf16.gmra.mrb[224].mxu1 %v6443_v5  ;;  %v6110_v62 = vmax.f32 %v6006_v14, 0.0  ;;  %v6367_v33 = vmax.f32 %v6263_v15, 0.0 }
 0x77e   :  { %v6012_v63 = vadd.f32 %v6011_v50, %v10697_v40  ;;  %v6269_v26 = vadd.f32 %v6268_v22, %v10697_v40  ;;  %v6111_v17 = vmax.f32 %v6008_v30, 0.0  ;;  %v6368_v10 = vmax.f32 %v6265_v49, 0.0 }
 0x77f   :  { %v6112_v47 = vmax.f32 %v6010_v20, 0.0  ;;  %v6369_v12 = vmax.f32 %v6267_v39, 0.0 }
 0x780   :  { %v6113_v13 = vmax.f32 %v6012_v63, 0.0  ;;  %v6370_v16 = vmax.f32 %v6269_v26, 0.0 }
 0x781   :  { %v6413_v29 = vpack.c.bf16 %v6112_v47, %v6110_v62  ;;  %v6445_v36 = vpack.c.bf16 %v6369_v12, %v6367_v33 }
 0x782   :  { %v6414_v37 = vpack.c.bf16 %v6113_v13, %v6111_v17  ;;  %v6446_v31 = vpack.c.bf16 %v6370_v16, %v6368_v10  ;;  %v6015_v24 = vpop.f32.mrb[168].mxu0  ;;  %v6272_v6 = vpop.f32.mrb[168].mxu1 }
 0x783   :  { %v6016_v7 = vadd.f32 %v6015_v24, %v10694_v51  ;;  %v6273_v32 = vadd.f32 %v6272_v6, %v10694_v51  ;;  %v6017_v25 = vpop.f32.mrb[169].mxu0  ;;  %v6274_v35 = vpop.f32.mrb[169].mxu1 }
 0x784   :  { %v6018_v48 = vadd.f32 %v6017_v25, %v10697_v40  ;;  %v6275_v11 = vadd.f32 %v6274_v35, %v10697_v40  ;;  %v6019_v18 = vpop.f32.mrb[170].mxu0  ;;  %v6276_v2 = vpop.f32.mrb[170].mxu1  ;;  %6785 = vmatprep.mubr.bf16.mxu0 %v6414_v37  ;;  %7042 = vmatprep.mubr.bf16.mxu1 %v6446_v31 }
 0x785   :  { %v6020_v3 = vadd.f32 %v6019_v18, %v10694_v51  ;;  %v6277_v45 = vadd.f32 %v6276_v2, %v10694_v51  ;;  %v6021_v46 = vpop.f32.mrb[171].mxu0  ;;  %v6278_v42 = vpop.f32.mrb[171].mxu1  ;;  %6786 = vmatmul.mubr.bf16.gmra.mrb[228].mxu0 %v6413_v29  ;;  %7043 = vmatmul.mubr.bf16.gmra.mrb[228].mxu1 %v6445_v36  ;;  %v6114_v54 = vmax.f32 %v6016_v7, 0.0  ;;  %v6371_v55 = vmax.f32 %v6273_v32, 0.0 }
 0x786   :  { %v6022_v43 = vadd.f32 %v6021_v46, %v10697_v40  ;;  %v6279_v53 = vadd.f32 %v6278_v42, %v10697_v40  ;;  %v6115_v56 = vmax.f32 %v6018_v48, 0.0  ;;  %v6372_v44 = vmax.f32 %v6275_v11, 0.0 }
 0x787   :  { %v6116_v0 = vmax.f32 %v6020_v3, 0.0  ;;  %v6373_v52 = vmax.f32 %v6277_v45, 0.0 }
 0x788   :  { %v6117_v57 = vmax.f32 %v6022_v43, 0.0  ;;  %v6374_v41 = vmax.f32 %v6279_v53, 0.0 }
 0x789   :  { %v6415_v34 = vpack.c.bf16 %v6116_v0, %v6114_v54  ;;  %v6447_v58 = vpack.c.bf16 %v6373_v52, %v6371_v55 }
 0x78a   :  { %v6416_v59 = vpack.c.bf16 %v6117_v57, %v6115_v56  ;;  %v6448_v27 = vpack.c.bf16 %v6374_v41, %v6372_v44  ;;  %v6025_v28 = vpop.f32.mrb[172].mxu0  ;;  %v6282_v5 = vpop.f32.mrb[172].mxu1 }
 0x78b   :  { %v6026_v8 = vadd.f32 %v6025_v28, %v10694_v51  ;;  %v6283_v1 = vadd.f32 %v6282_v5, %v10694_v51  ;;  %v6027_v4 = vpop.f32.mrb[173].mxu0  ;;  %v6284_v9 = vpop.f32.mrb[173].mxu1 }
 0x78c   :  { %v6028_v14 = vadd.f32 %v6027_v4, %v10697_v40  ;;  %v6285_v15 = vadd.f32 %v6284_v9, %v10697_v40  ;;  %v6029_v60 = vpop.f32.mrb[174].mxu0  ;;  %v6286_v61 = vpop.f32.mrb[174].mxu1  ;;  %6795 = vmatprep.mubr.bf16.mxu0 %v6416_v59  ;;  %7052 = vmatprep.mubr.bf16.mxu1 %v6448_v27 }
 0x78d   :  { %v6030_v30 = vadd.f32 %v6029_v60, %v10694_v51  ;;  %v6287_v49 = vadd.f32 %v6286_v61, %v10694_v51  ;;  %v6031_v38 = vpop.f32.mrb[175].mxu0  ;;  %v6288_v19 = vpop.f32.mrb[175].mxu1  ;;  %6796 = vmatmul.mubr.bf16.gmra.mrb[232].mxu0 %v6415_v34  ;;  %7053 = vmatmul.mubr.bf16.gmra.mrb[232].mxu1 %v6447_v58  ;;  %v6118_v50 = vmax.f32 %v6026_v8, 0.0  ;;  %v6375_v22 = vmax.f32 %v6283_v1, 0.0 }
 0x78e   :  { %v6032_v20 = vadd.f32 %v6031_v38, %v10697_v40  ;;  %v6289_v39 = vadd.f32 %v6288_v19, %v10697_v40  ;;  %v6119_v62 = vmax.f32 %v6028_v14, 0.0  ;;  %v6376_v33 = vmax.f32 %v6285_v15, 0.0 }
 0x78f   :  { %v6120_v63 = vmax.f32 %v6030_v30, 0.0  ;;  %v6377_v26 = vmax.f32 %v6287_v49, 0.0 }
 0x790   :  { %v6121_v47 = vmax.f32 %v6032_v20, 0.0  ;;  %v6378_v12 = vmax.f32 %v6289_v39, 0.0 }
 0x791   :  { %v6417_v17 = vpack.c.bf16 %v6120_v63, %v6118_v50  ;;  %v6449_v10 = vpack.c.bf16 %v6377_v26, %v6375_v22 }
 0x792   :  { %v6418_v13 = vpack.c.bf16 %v6121_v47, %v6119_v62  ;;  %v6450_v16 = vpack.c.bf16 %v6378_v12, %v6376_v33  ;;  %v6035_v29 = vpop.f32.mrb[176].mxu0  ;;  %v6292_v36 = vpop.f32.mrb[176].mxu1 }
 0x793   :  { %v6036_v37 = vadd.f32 %v6035_v29, %v10694_v51  ;;  %v6293_v31 = vadd.f32 %v6292_v36, %v10694_v51  ;;  %v6037_v24 = vpop.f32.mrb[177].mxu0  ;;  %v6294_v6 = vpop.f32.mrb[177].mxu1 }
 0x794   :  { %v6038_v7 = vadd.f32 %v6037_v24, %v10697_v40  ;;  %v6295_v32 = vadd.f32 %v6294_v6, %v10697_v40  ;;  %v6039_v25 = vpop.f32.mrb[178].mxu0  ;;  %v6296_v35 = vpop.f32.mrb[178].mxu1  ;;  %6805 = vmatprep.mubr.bf16.mxu0 %v6418_v13  ;;  %7062 = vmatprep.mubr.bf16.mxu1 %v6450_v16 }
 0x795   :  { %v6040_v48 = vadd.f32 %v6039_v25, %v10694_v51  ;;  %v6297_v11 = vadd.f32 %v6296_v35, %v10694_v51  ;;  %v6041_v18 = vpop.f32.mrb[179].mxu0  ;;  %v6298_v2 = vpop.f32.mrb[179].mxu1  ;;  %6806 = vmatmul.mubr.bf16.gmra.mrb[236].mxu0 %v6417_v17  ;;  %7063 = vmatmul.mubr.bf16.gmra.mrb[236].mxu1 %v6449_v10  ;;  %v6122_v46 = vmax.f32 %v6036_v37, 0.0  ;;  %v6379_v42 = vmax.f32 %v6293_v31, 0.0 }
 0x796   :  { %v6042_v3 = vadd.f32 %v6041_v18, %v10697_v40  ;;  %v6299_v45 = vadd.f32 %v6298_v2, %v10697_v40  ;;  %v6123_v54 = vmax.f32 %v6038_v7, 0.0  ;;  %v6380_v55 = vmax.f32 %v6295_v32, 0.0 }
 0x797   :  { %v6124_v43 = vmax.f32 %v6040_v48, 0.0  ;;  %v6381_v53 = vmax.f32 %v6297_v11, 0.0 }
 0x798   :  { %v6125_v0 = vmax.f32 %v6042_v3, 0.0  ;;  %v6382_v52 = vmax.f32 %v6299_v45, 0.0 }
 0x799   :  { %v6419_v56 = vpack.c.bf16 %v6124_v43, %v6122_v46  ;;  %v6451_v44 = vpack.c.bf16 %v6381_v53, %v6379_v42 }
 0x79a   :  { %v6420_v57 = vpack.c.bf16 %v6125_v0, %v6123_v54  ;;  %v6452_v41 = vpack.c.bf16 %v6382_v52, %v6380_v55  ;;  %v6045_v34 = vpop.f32.mrb[180].mxu0  ;;  %v6302_v58 = vpop.f32.mrb[180].mxu1 }
 0x79b   :  { %v6046_v59 = vadd.f32 %v6045_v34, %v10694_v51  ;;  %v6303_v27 = vadd.f32 %v6302_v58, %v10694_v51  ;;  %v6047_v28 = vpop.f32.mrb[181].mxu0  ;;  %v6304_v5 = vpop.f32.mrb[181].mxu1 }
 0x79c   :  { %v6048_v8 = vadd.f32 %v6047_v28, %v10697_v40  ;;  %v6305_v1 = vadd.f32 %v6304_v5, %v10697_v40  ;;  %v6049_v4 = vpop.f32.mrb[182].mxu0  ;;  %v6306_v9 = vpop.f32.mrb[182].mxu1  ;;  %6815 = vmatprep.mubr.bf16.mxu0 %v6420_v57  ;;  %7072 = vmatprep.mubr.bf16.mxu1 %v6452_v41 }
 0x79d   :  { %v6050_v14 = vadd.f32 %v6049_v4, %v10694_v51  ;;  %v6307_v15 = vadd.f32 %v6306_v9, %v10694_v51  ;;  %v6051_v60 = vpop.f32.mrb[183].mxu0  ;;  %v6308_v61 = vpop.f32.mrb[183].mxu1  ;;  %6816 = vmatmul.mubr.bf16.gmra.mrb[240].mxu0 %v6419_v56  ;;  %7073 = vmatmul.mubr.bf16.gmra.mrb[240].mxu1 %v6451_v44  ;;  %v6126_v38 = vmax.f32 %v6046_v59, 0.0  ;;  %v6383_v19 = vmax.f32 %v6303_v27, 0.0 }
 0x79e   :  { %v6052_v30 = vadd.f32 %v6051_v60, %v10697_v40  ;;  %v6309_v49 = vadd.f32 %v6308_v61, %v10697_v40  ;;  %v6127_v50 = vmax.f32 %v6048_v8, 0.0  ;;  %v6384_v22 = vmax.f32 %v6305_v1, 0.0 }
 0x79f   :  { %v6128_v20 = vmax.f32 %v6050_v14, 0.0  ;;  %v6385_v39 = vmax.f32 %v6307_v15, 0.0 }
 0x7a0   :  { %v6129_v63 = vmax.f32 %v6052_v30, 0.0  ;;  %v6386_v26 = vmax.f32 %v6309_v49, 0.0 }
 0x7a1   :  { %v6421_v62 = vpack.c.bf16 %v6128_v20, %v6126_v38  ;;  %v6453_v33 = vpack.c.bf16 %v6385_v39, %v6383_v19 }
 0x7a2   :  { %v6422_v47 = vpack.c.bf16 %v6129_v63, %v6127_v50  ;;  %v6454_v12 = vpack.c.bf16 %v6386_v26, %v6384_v22  ;;  %v6055_v17 = vpop.f32.mrb[184].mxu0  ;;  %v6312_v10 = vpop.f32.mrb[184].mxu1 }
 0x7a3   :  { %v6056_v13 = vadd.f32 %v6055_v17, %v10694_v51  ;;  %v6313_v16 = vadd.f32 %v6312_v10, %v10694_v51  ;;  %v6057_v29 = vpop.f32.mrb[185].mxu0  ;;  %v6314_v36 = vpop.f32.mrb[185].mxu1 }
 0x7a4   :  { %v6058_v37 = vadd.f32 %v6057_v29, %v10697_v40  ;;  %v6315_v31 = vadd.f32 %v6314_v36, %v10697_v40  ;;  %v6059_v24 = vpop.f32.mrb[186].mxu0  ;;  %v6316_v6 = vpop.f32.mrb[186].mxu1  ;;  %6825 = vmatprep.mubr.bf16.mxu0 %v6422_v47  ;;  %7082 = vmatprep.mubr.bf16.mxu1 %v6454_v12 }
 0x7a5   :  { %v6060_v7 = vadd.f32 %v6059_v24, %v10694_v51  ;;  %v6317_v32 = vadd.f32 %v6316_v6, %v10694_v51  ;;  %v6061_v25 = vpop.f32.mrb[187].mxu0  ;;  %v6318_v35 = vpop.f32.mrb[187].mxu1  ;;  %6826 = vmatmul.mubr.bf16.gmra.mrb[244].mxu0 %v6421_v62  ;;  %7083 = vmatmul.mubr.bf16.gmra.mrb[244].mxu1 %v6453_v33  ;;  %v6130_v18 = vmax.f32 %v6056_v13, 0.0  ;;  %v6387_v2 = vmax.f32 %v6313_v16, 0.0 }
 0x7a6   :  { %v6062_v48 = vadd.f32 %v6061_v25, %v10697_v40  ;;  %v6319_v11 = vadd.f32 %v6318_v35, %v10697_v40  ;;  %v6131_v46 = vmax.f32 %v6058_v37, 0.0  ;;  %v6388_v42 = vmax.f32 %v6315_v31, 0.0 }
 0x7a7   :  { %v6132_v3 = vmax.f32 %v6060_v7, 0.0  ;;  %v6389_v45 = vmax.f32 %v6317_v32, 0.0 }
 0x7a8   :  { %v6133_v43 = vmax.f32 %v6062_v48, 0.0  ;;  %v6390_v53 = vmax.f32 %v6319_v11, 0.0 }
 0x7a9   :  { %v6423_v54 = vpack.c.bf16 %v6132_v3, %v6130_v18  ;;  %v6455_v55 = vpack.c.bf16 %v6389_v45, %v6387_v2 }
 0x7aa   :  { %v6424_v0 = vpack.c.bf16 %v6133_v43, %v6131_v46  ;;  %v6456_v52 = vpack.c.bf16 %v6390_v53, %v6388_v42  ;;  %v6065_v56 = vpop.f32.mrb[188].mxu0  ;;  %v6322_v44 = vpop.f32.mrb[188].mxu1 }
 0x7ab   :  { %v6066_v57 = vadd.f32 %v6065_v56, %v10694_v51  ;;  %v6323_v41 = vadd.f32 %v6322_v44, %v10694_v51  ;;  %v6067_v34 = vpop.f32.mrb[189].mxu0  ;;  %v6324_v58 = vpop.f32.mrb[189].mxu1 }
 0x7ac   :  { %v6068_v59 = vadd.f32 %v6067_v34, %v10697_v40  ;;  %v6325_v27 = vadd.f32 %v6324_v58, %v10697_v40  ;;  %v6069_v28 = vpop.f32.mrb[190].mxu0  ;;  %v6326_v5 = vpop.f32.mrb[190].mxu1  ;;  %6835 = vmatprep.mubr.bf16.mxu0 %v6424_v0  ;;  %7092 = vmatprep.mubr.bf16.mxu1 %v6456_v52 }
 0x7ad   :  { %v6070_v8 = vadd.f32 %v6069_v28, %v10694_v51  ;;  %v6327_v1 = vadd.f32 %v6326_v5, %v10694_v51  ;;  %v6071_v4 = vpop.f32.mrb[191].mxu0  ;;  %v6328_v9 = vpop.f32.mrb[191].mxu1  ;;  %6836 = vmatmul.mubr.bf16.gmra.mrb[248].mxu0 %v6423_v54  ;;  %7093 = vmatmul.mubr.bf16.gmra.mrb[248].mxu1 %v6455_v55  ;;  %v6134_v60 = vmax.f32 %v6066_v57, 0.0  ;;  %v6391_v61 = vmax.f32 %v6323_v41, 0.0 }
 0x7ae   :  { %v6072_v14 = vadd.f32 %v6071_v4, %v10697_v40  ;;  %v6329_v15 = vadd.f32 %v6328_v9, %v10697_v40  ;;  %v6135_v38 = vmax.f32 %v6068_v59, 0.0  ;;  %v6392_v19 = vmax.f32 %v6325_v27, 0.0  ;;  %v6491_v40 = vld [vmem:[%s11329_s0] sm:$0x3] }
 0x7af   :  { %v6136_v30 = vmax.f32 %v6070_v8, 0.0  ;;  %v6393_v49 = vmax.f32 %v6327_v1, 0.0  ;;  %v10831_v26 = vrot.slane %v6491_v40, %v9664_v21  ;;  %v10834_v62 = vrot.slane %v6491_v40, %v9669_v23 }
 0x7b0   :  { %v6137_v20 = vmax.f32 %v6072_v14, 0.0  ;;  %v6394_v39 = vmax.f32 %v6329_v15, 0.0 }
 0x7b1   :  { %v6425_v50 = vpack.c.bf16 %v6136_v30, %v6134_v60  ;;  %v6457_v22 = vpack.c.bf16 %v6393_v49, %v6391_v61 }
 0x7b2   :  { %v6426_v63 = vpack.c.bf16 %v6137_v20, %v6135_v38  ;;  %v6458_v51 = vpack.c.bf16 %v6394_v39, %v6392_v19 }
 0x7b4   :  { %6845 = vmatprep.mubr.bf16.mxu0 %v6426_v63  ;;  %7102 = vmatprep.mubr.bf16.mxu1 %v6458_v51 }
 0x7b5   :  { %6846 = vmatmul.mubr.bf16.gmra.mrb[252].mxu0 %v6425_v50  ;;  %7103 = vmatmul.mubr.bf16.gmra.mrb[252].mxu1 %v6457_v22 }
 0x810   :  { %v6697_v33 = vpop.f32.mrb[192].mxu0  ;;  %v6954_v47 = vpop.f32.mrb[192].mxu1 }
 0x811   :  { %v6698_v12 = vadd.f32 %v6697_v33, %v10831_v26  ;;  %v6955_v17 = vadd.f32 %v6954_v47, %v10831_v26  ;;  %v6699_v10 = vpop.f32.mrb[193].mxu0  ;;  %v6956_v13 = vpop.f32.mrb[193].mxu1 }
 0x812   :  { %v6700_v16 = vadd.f32 %v6699_v10, %v10834_v62  ;;  %v6957_v29 = vadd.f32 %v6956_v13, %v10834_v62  ;;  %v6701_v36 = vpop.f32.mrb[194].mxu0  ;;  %v6958_v37 = vpop.f32.mrb[194].mxu1 }
 0x813   :  { %v6702_v21 = vadd.f32 %v6701_v36, %v10831_v26  ;;  %v6959_v31 = vadd.f32 %v6958_v37, %v10831_v26  ;;  %v6703_v23 = vpop.f32.mrb[195].mxu0  ;;  %v6960_v24 = vpop.f32.mrb[195].mxu1  ;;  %v6856_v32 = vmax.f32 %v6698_v12, 0.0  ;;  %v7113_v25 = vmax.f32 %v6955_v17, 0.0 }
 0x814   :  { %v6704_v6 = vadd.f32 %v6703_v23, %v10834_v62  ;;  %v6961_v7 = vadd.f32 %v6960_v24, %v10834_v62  ;;  %v6857_v11 = vmax.f32 %v6700_v16, 0.0  ;;  %v7114_v18 = vmax.f32 %v6957_v29, 0.0 }
 0x815   :  { %v6858_v35 = vmax.f32 %v6702_v21, 0.0  ;;  %v7115_v48 = vmax.f32 %v6959_v31, 0.0 }
 0x816   :  { %v6859_v2 = vmax.f32 %v6704_v6, 0.0  ;;  %v7116_v3 = vmax.f32 %v6961_v7, 0.0 }
 0x817   :  { %v7177_v45 = vpack.c.bf16 %v6858_v35, %v6856_v32  ;;  %v7538_v46 = vpack.c.bf16 %v7115_v48, %v7113_v25 }
 0x818   :  { %v7178_v42 = vpack.c.bf16 %v6859_v2, %v6857_v11  ;;  %v7539_v43 = vpack.c.bf16 %v7116_v3, %v7114_v18  ;;  %v6707_v53 = vpop.f32.mrb[196].mxu0  ;;  %v6964_v54 = vpop.f32.mrb[196].mxu1 }
 0x819   :  { %v6708_v55 = vadd.f32 %v6707_v53, %v10831_v26  ;;  %v6965_v0 = vadd.f32 %v6964_v54, %v10831_v26  ;;  %v6709_v52 = vpop.f32.mrb[197].mxu0  ;;  %v6966_v56 = vpop.f32.mrb[197].mxu1 }
 0x81a   :  { %v6710_v44 = vadd.f32 %v6709_v52, %v10834_v62  ;;  %v6967_v57 = vadd.f32 %v6966_v56, %v10834_v62  ;;  %v6711_v41 = vpop.f32.mrb[198].mxu0  ;;  %v6968_v34 = vpop.f32.mrb[198].mxu1  ;;  %7376 = vmatprep.mubr.bf16.mxu0 %v7178_v42  ;;  %7737 = vmatprep.mubr.bf16.mxu1 %v7539_v43 }
 0x81b   :  { %v6712_v58 = vadd.f32 %v6711_v41, %v10831_v26  ;;  %v6969_v59 = vadd.f32 %v6968_v34, %v10831_v26  ;;  %v6713_v27 = vpop.f32.mrb[199].mxu0  ;;  %v6970_v28 = vpop.f32.mrb[199].mxu1  ;;  %7377 = vmatmul.mubr.bf16.vlgmr.msra.gmra.mrb[0].mxu0 %v7177_v45  ;;  %7738 = vmatmul.mubr.bf16.vlgmr.msra.gmra.mrb[0].mxu1 %v7538_v46  ;;  %v6860_v1 = vmax.f32 %v6708_v55, 0.0  ;;  %v7117_v4 = vmax.f32 %v6965_v0, 0.0 }
 0x81c   :  { %v6714_v5 = vadd.f32 %v6713_v27, %v10834_v62  ;;  %v6971_v8 = vadd.f32 %v6970_v28, %v10834_v62  ;;  %v6861_v15 = vmax.f32 %v6710_v44, 0.0  ;;  %v7118_v60 = vmax.f32 %v6967_v57, 0.0 }
 0x81d   :  { %v6862_v9 = vmax.f32 %v6712_v58, 0.0  ;;  %v7119_v14 = vmax.f32 %v6969_v59, 0.0 }
 0x81e   :  { %v6863_v61 = vmax.f32 %v6714_v5, 0.0  ;;  %v7120_v30 = vmax.f32 %v6971_v8, 0.0 }
 0x81f   :  { %v7179_v49 = vpack.c.bf16 %v6862_v9, %v6860_v1  ;;  %v7540_v38 = vpack.c.bf16 %v7119_v14, %v7117_v4 }
 0x820   :  { %v7180_v19 = vpack.c.bf16 %v6863_v61, %v6861_v15  ;;  %v7541_v20 = vpack.c.bf16 %v7120_v30, %v7118_v60  ;;  %v6717_v39 = vpop.f32.mrb[200].mxu0  ;;  %v6974_v50 = vpop.f32.mrb[200].mxu1 }
 0x821   :  { %v6718_v22 = vadd.f32 %v6717_v39, %v10831_v26  ;;  %v6975_v63 = vadd.f32 %v6974_v50, %v10831_v26  ;;  %v6719_v51 = vpop.f32.mrb[201].mxu0  ;;  %v6976_v40 = vpop.f32.mrb[201].mxu1 }
 0x822   :  { %v6720_v33 = vadd.f32 %v6719_v51, %v10834_v62  ;;  %v6977_v47 = vadd.f32 %v6976_v40, %v10834_v62  ;;  %v6721_v12 = vpop.f32.mrb[202].mxu0  ;;  %v6978_v17 = vpop.f32.mrb[202].mxu1  ;;  %7384 = vmatprep.mubr.bf16.mxu0 %v7180_v19  ;;  %7745 = vmatprep.mubr.bf16.mxu1 %v7541_v20 }
 0x823   :  { %v6722_v10 = vadd.f32 %v6721_v12, %v10831_v26  ;;  %v6979_v13 = vadd.f32 %v6978_v17, %v10831_v26  ;;  %v6723_v16 = vpop.f32.mrb[203].mxu0  ;;  %v6980_v29 = vpop.f32.mrb[203].mxu1  ;;  %7385 = vmatmul.mubr.bf16.gmra.mrb[4].mxu0 %v7179_v49  ;;  %7746 = vmatmul.mubr.bf16.gmra.mrb[4].mxu1 %v7540_v38  ;;  %v6864_v21 = vmax.f32 %v6718_v22, 0.0  ;;  %v7121_v31 = vmax.f32 %v6975_v63, 0.0 }
 0x824   :  { %v6724_v36 = vadd.f32 %v6723_v16, %v10834_v62  ;;  %v6981_v37 = vadd.f32 %v6980_v29, %v10834_v62  ;;  %v6865_v6 = vmax.f32 %v6720_v33, 0.0  ;;  %v7122_v7 = vmax.f32 %v6977_v47, 0.0 }
 0x825   :  { %v6866_v23 = vmax.f32 %v6722_v10, 0.0  ;;  %v7123_v24 = vmax.f32 %v6979_v13, 0.0 }
 0x826   :  { %v6867_v32 = vmax.f32 %v6724_v36, 0.0  ;;  %v7124_v25 = vmax.f32 %v6981_v37, 0.0 }
 0x827   :  { %v7181_v35 = vpack.c.bf16 %v6866_v23, %v6864_v21  ;;  %v7542_v48 = vpack.c.bf16 %v7123_v24, %v7121_v31 }
 0x828   :  { %v7182_v11 = vpack.c.bf16 %v6867_v32, %v6865_v6  ;;  %v7543_v18 = vpack.c.bf16 %v7124_v25, %v7122_v7  ;;  %v6727_v2 = vpop.f32.mrb[204].mxu0  ;;  %v6984_v3 = vpop.f32.mrb[204].mxu1 }
 0x829   :  { %v6728_v45 = vadd.f32 %v6727_v2, %v10831_v26  ;;  %v6985_v46 = vadd.f32 %v6984_v3, %v10831_v26  ;;  %v6729_v42 = vpop.f32.mrb[205].mxu0  ;;  %v6986_v43 = vpop.f32.mrb[205].mxu1 }
 0x82a   :  { %v6730_v53 = vadd.f32 %v6729_v42, %v10834_v62  ;;  %v6987_v54 = vadd.f32 %v6986_v43, %v10834_v62  ;;  %v6731_v55 = vpop.f32.mrb[206].mxu0  ;;  %v6988_v0 = vpop.f32.mrb[206].mxu1  ;;  %7392 = vmatprep.mubr.bf16.mxu0 %v7182_v11  ;;  %7753 = vmatprep.mubr.bf16.mxu1 %v7543_v18 }
 0x82b   :  { %v6732_v52 = vadd.f32 %v6731_v55, %v10831_v26  ;;  %v6989_v56 = vadd.f32 %v6988_v0, %v10831_v26  ;;  %v6733_v44 = vpop.f32.mrb[207].mxu0  ;;  %v6990_v57 = vpop.f32.mrb[207].mxu1  ;;  %7393 = vmatmul.mubr.bf16.gmra.mrb[8].mxu0 %v7181_v35  ;;  %7754 = vmatmul.mubr.bf16.gmra.mrb[8].mxu1 %v7542_v48  ;;  %v6868_v58 = vmax.f32 %v6728_v45, 0.0  ;;  %v7125_v59 = vmax.f32 %v6985_v46, 0.0 }
 0x82c   :  { %v6734_v41 = vadd.f32 %v6733_v44, %v10834_v62  ;;  %v6991_v34 = vadd.f32 %v6990_v57, %v10834_v62  ;;  %v6869_v5 = vmax.f32 %v6730_v53, 0.0  ;;  %v7126_v8 = vmax.f32 %v6987_v54, 0.0 }
 0x82d   :  { %v6870_v27 = vmax.f32 %v6732_v52, 0.0  ;;  %v7127_v28 = vmax.f32 %v6989_v56, 0.0 }
 0x82e   :  { %v6871_v1 = vmax.f32 %v6734_v41, 0.0  ;;  %v7128_v4 = vmax.f32 %v6991_v34, 0.0 }
 0x82f   :  { %v7183_v9 = vpack.c.bf16 %v6870_v27, %v6868_v58  ;;  %v7544_v14 = vpack.c.bf16 %v7127_v28, %v7125_v59 }
 0x830   :  { %v7184_v15 = vpack.c.bf16 %v6871_v1, %v6869_v5  ;;  %v7545_v60 = vpack.c.bf16 %v7128_v4, %v7126_v8  ;;  %v6737_v61 = vpop.f32.mrb[208].mxu0  ;;  %v6994_v30 = vpop.f32.mrb[208].mxu1 }
 0x831   :  { %v6738_v49 = vadd.f32 %v6737_v61, %v10831_v26  ;;  %v6995_v38 = vadd.f32 %v6994_v30, %v10831_v26  ;;  %v6739_v19 = vpop.f32.mrb[209].mxu0  ;;  %v6996_v20 = vpop.f32.mrb[209].mxu1 }
 0x832   :  { %v6740_v39 = vadd.f32 %v6739_v19, %v10834_v62  ;;  %v6997_v50 = vadd.f32 %v6996_v20, %v10834_v62  ;;  %v6741_v22 = vpop.f32.mrb[210].mxu0  ;;  %v6998_v63 = vpop.f32.mrb[210].mxu1  ;;  %7400 = vmatprep.mubr.bf16.mxu0 %v7184_v15  ;;  %7761 = vmatprep.mubr.bf16.mxu1 %v7545_v60 }
 0x833   :  { %v6742_v51 = vadd.f32 %v6741_v22, %v10831_v26  ;;  %v6999_v40 = vadd.f32 %v6998_v63, %v10831_v26  ;;  %v6743_v33 = vpop.f32.mrb[211].mxu0  ;;  %v7000_v47 = vpop.f32.mrb[211].mxu1  ;;  %7401 = vmatmul.mubr.bf16.gmra.mrb[12].mxu0 %v7183_v9  ;;  %7762 = vmatmul.mubr.bf16.gmra.mrb[12].mxu1 %v7544_v14  ;;  %v6872_v10 = vmax.f32 %v6738_v49, 0.0  ;;  %v7129_v13 = vmax.f32 %v6995_v38, 0.0 }
 0x834   :  { %v6744_v12 = vadd.f32 %v6743_v33, %v10834_v62  ;;  %v7001_v17 = vadd.f32 %v7000_v47, %v10834_v62  ;;  %v6873_v36 = vmax.f32 %v6740_v39, 0.0  ;;  %v7130_v37 = vmax.f32 %v6997_v50, 0.0 }
 0x835   :  { %v6874_v16 = vmax.f32 %v6742_v51, 0.0  ;;  %v7131_v29 = vmax.f32 %v6999_v40, 0.0 }
 0x836   :  { %v6875_v21 = vmax.f32 %v6744_v12, 0.0  ;;  %v7132_v31 = vmax.f32 %v7001_v17, 0.0 }
 0x837   :  { %v7185_v23 = vpack.c.bf16 %v6874_v16, %v6872_v10  ;;  %v7546_v24 = vpack.c.bf16 %v7131_v29, %v7129_v13 }
 0x838   :  { %v7186_v6 = vpack.c.bf16 %v6875_v21, %v6873_v36  ;;  %v7547_v7 = vpack.c.bf16 %v7132_v31, %v7130_v37  ;;  %v6747_v32 = vpop.f32.mrb[212].mxu0  ;;  %v7004_v25 = vpop.f32.mrb[212].mxu1 }
 0x839   :  { %v6748_v35 = vadd.f32 %v6747_v32, %v10831_v26  ;;  %v7005_v48 = vadd.f32 %v7004_v25, %v10831_v26  ;;  %v6749_v11 = vpop.f32.mrb[213].mxu0  ;;  %v7006_v18 = vpop.f32.mrb[213].mxu1 }
 0x83a   :  { %v6750_v2 = vadd.f32 %v6749_v11, %v10834_v62  ;;  %v7007_v3 = vadd.f32 %v7006_v18, %v10834_v62  ;;  %v6751_v45 = vpop.f32.mrb[214].mxu0  ;;  %v7008_v46 = vpop.f32.mrb[214].mxu1  ;;  %7408 = vmatprep.mubr.bf16.mxu0 %v7186_v6  ;;  %7769 = vmatprep.mubr.bf16.mxu1 %v7547_v7 }
 0x83b   :  { %v6752_v42 = vadd.f32 %v6751_v45, %v10831_v26  ;;  %v7009_v43 = vadd.f32 %v7008_v46, %v10831_v26  ;;  %v6753_v53 = vpop.f32.mrb[215].mxu0  ;;  %v7010_v54 = vpop.f32.mrb[215].mxu1  ;;  %7409 = vmatmul.mubr.bf16.gmra.mrb[16].mxu0 %v7185_v23  ;;  %7770 = vmatmul.mubr.bf16.gmra.mrb[16].mxu1 %v7546_v24  ;;  %v6876_v52 = vmax.f32 %v6748_v35, 0.0  ;;  %v7133_v56 = vmax.f32 %v7005_v48, 0.0 }
 0x83c   :  { %v6754_v55 = vadd.f32 %v6753_v53, %v10834_v62  ;;  %v7011_v0 = vadd.f32 %v7010_v54, %v10834_v62  ;;  %v6877_v41 = vmax.f32 %v6750_v2, 0.0  ;;  %v7134_v34 = vmax.f32 %v7007_v3, 0.0 }
 0x83d   :  { %v6878_v44 = vmax.f32 %v6752_v42, 0.0  ;;  %v7135_v57 = vmax.f32 %v7009_v43, 0.0 }
 0x83e   :  { %v6879_v58 = vmax.f32 %v6754_v55, 0.0  ;;  %v7136_v59 = vmax.f32 %v7011_v0, 0.0 }
 0x83f   :  { %v7187_v27 = vpack.c.bf16 %v6878_v44, %v6876_v52  ;;  %v7548_v28 = vpack.c.bf16 %v7135_v57, %v7133_v56 }
 0x840   :  { %v7188_v5 = vpack.c.bf16 %v6879_v58, %v6877_v41  ;;  %v7549_v8 = vpack.c.bf16 %v7136_v59, %v7134_v34  ;;  %v6757_v1 = vpop.f32.mrb[216].mxu0  ;;  %v7014_v4 = vpop.f32.mrb[216].mxu1 }
 0x841   :  { %v6758_v9 = vadd.f32 %v6757_v1, %v10831_v26  ;;  %v7015_v14 = vadd.f32 %v7014_v4, %v10831_v26  ;;  %v6759_v15 = vpop.f32.mrb[217].mxu0  ;;  %v7016_v60 = vpop.f32.mrb[217].mxu1 }
 0x842   :  { %v6760_v61 = vadd.f32 %v6759_v15, %v10834_v62  ;;  %v7017_v30 = vadd.f32 %v7016_v60, %v10834_v62  ;;  %v6761_v49 = vpop.f32.mrb[218].mxu0  ;;  %v7018_v38 = vpop.f32.mrb[218].mxu1  ;;  %7416 = vmatprep.mubr.bf16.mxu0 %v7188_v5  ;;  %7777 = vmatprep.mubr.bf16.mxu1 %v7549_v8 }
 0x843   :  { %v6762_v19 = vadd.f32 %v6761_v49, %v10831_v26  ;;  %v7019_v20 = vadd.f32 %v7018_v38, %v10831_v26  ;;  %v6763_v39 = vpop.f32.mrb[219].mxu0  ;;  %v7020_v50 = vpop.f32.mrb[219].mxu1  ;;  %7417 = vmatmul.mubr.bf16.gmra.mrb[20].mxu0 %v7187_v27  ;;  %7778 = vmatmul.mubr.bf16.gmra.mrb[20].mxu1 %v7548_v28  ;;  %v6880_v51 = vmax.f32 %v6758_v9, 0.0  ;;  %v7137_v40 = vmax.f32 %v7015_v14, 0.0 }
 0x844   :  { %v6764_v22 = vadd.f32 %v6763_v39, %v10834_v62  ;;  %v7021_v63 = vadd.f32 %v7020_v50, %v10834_v62  ;;  %v6881_v12 = vmax.f32 %v6760_v61, 0.0  ;;  %v7138_v17 = vmax.f32 %v7017_v30, 0.0 }
 0x845   :  { %v6882_v33 = vmax.f32 %v6762_v19, 0.0  ;;  %v7139_v47 = vmax.f32 %v7019_v20, 0.0 }
 0x846   :  { %v6883_v10 = vmax.f32 %v6764_v22, 0.0  ;;  %v7140_v13 = vmax.f32 %v7021_v63, 0.0 }
 0x847   :  { %v7189_v16 = vpack.c.bf16 %v6882_v33, %v6880_v51  ;;  %v7550_v29 = vpack.c.bf16 %v7139_v47, %v7137_v40 }
 0x848   :  { %v7190_v36 = vpack.c.bf16 %v6883_v10, %v6881_v12  ;;  %v7551_v37 = vpack.c.bf16 %v7140_v13, %v7138_v17  ;;  %v6767_v21 = vpop.f32.mrb[220].mxu0  ;;  %v7024_v31 = vpop.f32.mrb[220].mxu1 }
 0x849   :  { %v6768_v23 = vadd.f32 %v6767_v21, %v10831_v26  ;;  %v7025_v24 = vadd.f32 %v7024_v31, %v10831_v26  ;;  %v6769_v6 = vpop.f32.mrb[221].mxu0  ;;  %v7026_v7 = vpop.f32.mrb[221].mxu1 }
 0x84a   :  { %v6770_v32 = vadd.f32 %v6769_v6, %v10834_v62  ;;  %v7027_v25 = vadd.f32 %v7026_v7, %v10834_v62  ;;  %v6771_v35 = vpop.f32.mrb[222].mxu0  ;;  %v7028_v48 = vpop.f32.mrb[222].mxu1  ;;  %7424 = vmatprep.mubr.bf16.mxu0 %v7190_v36  ;;  %7785 = vmatprep.mubr.bf16.mxu1 %v7551_v37 }
 0x84b   :  { %v6772_v11 = vadd.f32 %v6771_v35, %v10831_v26  ;;  %v7029_v18 = vadd.f32 %v7028_v48, %v10831_v26  ;;  %v6773_v2 = vpop.f32.mrb[223].mxu0  ;;  %v7030_v3 = vpop.f32.mrb[223].mxu1  ;;  %7425 = vmatmul.mubr.bf16.gmra.mrb[24].mxu0 %v7189_v16  ;;  %7786 = vmatmul.mubr.bf16.gmra.mrb[24].mxu1 %v7550_v29  ;;  %v6884_v42 = vmax.f32 %v6768_v23, 0.0  ;;  %v7141_v43 = vmax.f32 %v7025_v24, 0.0 }
 0x84c   :  { %v6774_v45 = vadd.f32 %v6773_v2, %v10834_v62  ;;  %v7031_v46 = vadd.f32 %v7030_v3, %v10834_v62  ;;  %v6885_v55 = vmax.f32 %v6770_v32, 0.0  ;;  %v7142_v0 = vmax.f32 %v7027_v25, 0.0 }
 0x84d   :  { %v6886_v53 = vmax.f32 %v6772_v11, 0.0  ;;  %v7143_v54 = vmax.f32 %v7029_v18, 0.0 }
 0x84e   :  { %v6887_v52 = vmax.f32 %v6774_v45, 0.0  ;;  %v7144_v56 = vmax.f32 %v7031_v46, 0.0 }
 0x84f   :  { %v7191_v44 = vpack.c.bf16 %v6886_v53, %v6884_v42  ;;  %v7552_v57 = vpack.c.bf16 %v7143_v54, %v7141_v43 }
 0x850   :  { %v7192_v41 = vpack.c.bf16 %v6887_v52, %v6885_v55  ;;  %v7553_v34 = vpack.c.bf16 %v7144_v56, %v7142_v0  ;;  %v6777_v58 = vpop.f32.mrb[224].mxu0  ;;  %v7034_v59 = vpop.f32.mrb[224].mxu1 }
 0x851   :  { %v6778_v27 = vadd.f32 %v6777_v58, %v10831_v26  ;;  %v7035_v28 = vadd.f32 %v7034_v59, %v10831_v26  ;;  %v6779_v5 = vpop.f32.mrb[225].mxu0  ;;  %v7036_v8 = vpop.f32.mrb[225].mxu1 }
 0x852   :  { %v6780_v1 = vadd.f32 %v6779_v5, %v10834_v62  ;;  %v7037_v4 = vadd.f32 %v7036_v8, %v10834_v62  ;;  %v6781_v9 = vpop.f32.mrb[226].mxu0  ;;  %v7038_v14 = vpop.f32.mrb[226].mxu1  ;;  %7432 = vmatprep.mubr.bf16.mxu0 %v7192_v41  ;;  %7793 = vmatprep.mubr.bf16.mxu1 %v7553_v34 }
 0x853   :  { %v6782_v15 = vadd.f32 %v6781_v9, %v10831_v26  ;;  %v7039_v60 = vadd.f32 %v7038_v14, %v10831_v26  ;;  %v6783_v61 = vpop.f32.mrb[227].mxu0  ;;  %v7040_v30 = vpop.f32.mrb[227].mxu1  ;;  %7433 = vmatmul.mubr.bf16.gmra.mrb[28].mxu0 %v7191_v44  ;;  %7794 = vmatmul.mubr.bf16.gmra.mrb[28].mxu1 %v7552_v57  ;;  %v6888_v19 = vmax.f32 %v6778_v27, 0.0  ;;  %v7145_v20 = vmax.f32 %v7035_v28, 0.0 }
 0x854   :  { %v6784_v49 = vadd.f32 %v6783_v61, %v10834_v62  ;;  %v7041_v38 = vadd.f32 %v7040_v30, %v10834_v62  ;;  %v6889_v22 = vmax.f32 %v6780_v1, 0.0  ;;  %v7146_v63 = vmax.f32 %v7037_v4, 0.0 }
 0x855   :  { %v6890_v39 = vmax.f32 %v6782_v15, 0.0  ;;  %v7147_v50 = vmax.f32 %v7039_v60, 0.0 }
 0x856   :  { %v6891_v51 = vmax.f32 %v6784_v49, 0.0  ;;  %v7148_v40 = vmax.f32 %v7041_v38, 0.0 }
 0x857   :  { %v7193_v33 = vpack.c.bf16 %v6890_v39, %v6888_v19  ;;  %v7554_v47 = vpack.c.bf16 %v7147_v50, %v7145_v20 }
 0x858   :  { %v7194_v12 = vpack.c.bf16 %v6891_v51, %v6889_v22  ;;  %v7555_v17 = vpack.c.bf16 %v7148_v40, %v7146_v63  ;;  %v6787_v10 = vpop.f32.mrb[228].mxu0  ;;  %v7044_v13 = vpop.f32.mrb[228].mxu1 }
 0x859   :  { %v6788_v16 = vadd.f32 %v6787_v10, %v10831_v26  ;;  %v7045_v29 = vadd.f32 %v7044_v13, %v10831_v26  ;;  %v6789_v36 = vpop.f32.mrb[229].mxu0  ;;  %v7046_v37 = vpop.f32.mrb[229].mxu1 }
 0x85a   :  { %v6790_v21 = vadd.f32 %v6789_v36, %v10834_v62  ;;  %v7047_v31 = vadd.f32 %v7046_v37, %v10834_v62  ;;  %v6791_v23 = vpop.f32.mrb[230].mxu0  ;;  %v7048_v24 = vpop.f32.mrb[230].mxu1  ;;  %7440 = vmatprep.mubr.bf16.mxu0 %v7194_v12  ;;  %7801 = vmatprep.mubr.bf16.mxu1 %v7555_v17 }
 0x85b   :  { %v6792_v6 = vadd.f32 %v6791_v23, %v10831_v26  ;;  %v7049_v7 = vadd.f32 %v7048_v24, %v10831_v26  ;;  %v6793_v32 = vpop.f32.mrb[231].mxu0  ;;  %v7050_v25 = vpop.f32.mrb[231].mxu1  ;;  %7441 = vmatmul.mubr.bf16.gmra.mrb[32].mxu0 %v7193_v33  ;;  %7802 = vmatmul.mubr.bf16.gmra.mrb[32].mxu1 %v7554_v47  ;;  %v6892_v11 = vmax.f32 %v6788_v16, 0.0  ;;  %v7149_v18 = vmax.f32 %v7045_v29, 0.0 }
 0x85c   :  { %v6794_v35 = vadd.f32 %v6793_v32, %v10834_v62  ;;  %v7051_v48 = vadd.f32 %v7050_v25, %v10834_v62  ;;  %v6893_v45 = vmax.f32 %v6790_v21, 0.0  ;;  %v7150_v46 = vmax.f32 %v7047_v31, 0.0 }
 0x85d   :  { %v6894_v2 = vmax.f32 %v6792_v6, 0.0  ;;  %v7151_v3 = vmax.f32 %v7049_v7, 0.0 }
 0x85e   :  { %v6895_v42 = vmax.f32 %v6794_v35, 0.0  ;;  %v7152_v43 = vmax.f32 %v7051_v48, 0.0 }
 0x85f   :  { %v7195_v53 = vpack.c.bf16 %v6894_v2, %v6892_v11  ;;  %v7556_v54 = vpack.c.bf16 %v7151_v3, %v7149_v18 }
 0x860   :  { %v7196_v55 = vpack.c.bf16 %v6895_v42, %v6893_v45  ;;  %v7557_v0 = vpack.c.bf16 %v7152_v43, %v7150_v46  ;;  %v6797_v52 = vpop.f32.mrb[232].mxu0  ;;  %v7054_v56 = vpop.f32.mrb[232].mxu1 }
 0x861   :  { %v6798_v44 = vadd.f32 %v6797_v52, %v10831_v26  ;;  %v7055_v57 = vadd.f32 %v7054_v56, %v10831_v26  ;;  %v6799_v41 = vpop.f32.mrb[233].mxu0  ;;  %v7056_v34 = vpop.f32.mrb[233].mxu1 }
 0x862   :  { %v6800_v58 = vadd.f32 %v6799_v41, %v10834_v62  ;;  %v7057_v59 = vadd.f32 %v7056_v34, %v10834_v62  ;;  %v6801_v27 = vpop.f32.mrb[234].mxu0  ;;  %v7058_v28 = vpop.f32.mrb[234].mxu1  ;;  %7448 = vmatprep.mubr.bf16.mxu0 %v7196_v55  ;;  %7809 = vmatprep.mubr.bf16.mxu1 %v7557_v0 }
 0x863   :  { %v6802_v5 = vadd.f32 %v6801_v27, %v10831_v26  ;;  %v7059_v8 = vadd.f32 %v7058_v28, %v10831_v26  ;;  %v6803_v1 = vpop.f32.mrb[235].mxu0  ;;  %v7060_v4 = vpop.f32.mrb[235].mxu1  ;;  %7449 = vmatmul.mubr.bf16.gmra.mrb[36].mxu0 %v7195_v53  ;;  %7810 = vmatmul.mubr.bf16.gmra.mrb[36].mxu1 %v7556_v54  ;;  %v6896_v15 = vmax.f32 %v6798_v44, 0.0  ;;  %v7153_v60 = vmax.f32 %v7055_v57, 0.0 }
 0x864   :  { %v6804_v9 = vadd.f32 %v6803_v1, %v10834_v62  ;;  %v7061_v14 = vadd.f32 %v7060_v4, %v10834_v62  ;;  %v6897_v49 = vmax.f32 %v6800_v58, 0.0  ;;  %v7154_v38 = vmax.f32 %v7057_v59, 0.0 }
 0x865   :  { %v6898_v61 = vmax.f32 %v6802_v5, 0.0  ;;  %v7155_v30 = vmax.f32 %v7059_v8, 0.0 }
 0x866   :  { %v6899_v19 = vmax.f32 %v6804_v9, 0.0  ;;  %v7156_v20 = vmax.f32 %v7061_v14, 0.0 }
 0x867   :  { %v7197_v39 = vpack.c.bf16 %v6898_v61, %v6896_v15  ;;  %v7558_v50 = vpack.c.bf16 %v7155_v30, %v7153_v60 }
 0x868   :  { %v7198_v22 = vpack.c.bf16 %v6899_v19, %v6897_v49  ;;  %v7559_v63 = vpack.c.bf16 %v7156_v20, %v7154_v38  ;;  %v6807_v51 = vpop.f32.mrb[236].mxu0  ;;  %v7064_v40 = vpop.f32.mrb[236].mxu1 }
 0x869   :  { %v6808_v33 = vadd.f32 %v6807_v51, %v10831_v26  ;;  %v7065_v47 = vadd.f32 %v7064_v40, %v10831_v26  ;;  %v6809_v12 = vpop.f32.mrb[237].mxu0  ;;  %v7066_v17 = vpop.f32.mrb[237].mxu1 }
 0x86a   :  { %v6810_v10 = vadd.f32 %v6809_v12, %v10834_v62  ;;  %v7067_v13 = vadd.f32 %v7066_v17, %v10834_v62  ;;  %v6811_v16 = vpop.f32.mrb[238].mxu0  ;;  %v7068_v29 = vpop.f32.mrb[238].mxu1  ;;  %7456 = vmatprep.mubr.bf16.mxu0 %v7198_v22  ;;  %7817 = vmatprep.mubr.bf16.mxu1 %v7559_v63 }
 0x86b   :  { %v6812_v36 = vadd.f32 %v6811_v16, %v10831_v26  ;;  %v7069_v37 = vadd.f32 %v7068_v29, %v10831_v26  ;;  %v6813_v21 = vpop.f32.mrb[239].mxu0  ;;  %v7070_v31 = vpop.f32.mrb[239].mxu1  ;;  %7457 = vmatmul.mubr.bf16.gmra.mrb[40].mxu0 %v7197_v39  ;;  %7818 = vmatmul.mubr.bf16.gmra.mrb[40].mxu1 %v7558_v50  ;;  %v6900_v6 = vmax.f32 %v6808_v33, 0.0  ;;  %v7157_v7 = vmax.f32 %v7065_v47, 0.0 }
 0x86c   :  { %v6814_v23 = vadd.f32 %v6813_v21, %v10834_v62  ;;  %v7071_v24 = vadd.f32 %v7070_v31, %v10834_v62  ;;  %v6901_v35 = vmax.f32 %v6810_v10, 0.0  ;;  %v7158_v48 = vmax.f32 %v7067_v13, 0.0 }
 0x86d   :  { %v6902_v32 = vmax.f32 %v6812_v36, 0.0  ;;  %v7159_v25 = vmax.f32 %v7069_v37, 0.0 }
 0x86e   :  { %v6903_v11 = vmax.f32 %v6814_v23, 0.0  ;;  %v7160_v18 = vmax.f32 %v7071_v24, 0.0 }
 0x86f   :  { %v7199_v2 = vpack.c.bf16 %v6902_v32, %v6900_v6  ;;  %v7560_v3 = vpack.c.bf16 %v7159_v25, %v7157_v7 }
 0x870   :  { %v7200_v45 = vpack.c.bf16 %v6903_v11, %v6901_v35  ;;  %v7561_v46 = vpack.c.bf16 %v7160_v18, %v7158_v48  ;;  %v6817_v42 = vpop.f32.mrb[240].mxu0  ;;  %v7074_v43 = vpop.f32.mrb[240].mxu1 }
 0x871   :  { %v6818_v53 = vadd.f32 %v6817_v42, %v10831_v26  ;;  %v7075_v54 = vadd.f32 %v7074_v43, %v10831_v26  ;;  %v6819_v55 = vpop.f32.mrb[241].mxu0  ;;  %v7076_v0 = vpop.f32.mrb[241].mxu1 }
 0x872   :  { %v6820_v52 = vadd.f32 %v6819_v55, %v10834_v62  ;;  %v7077_v56 = vadd.f32 %v7076_v0, %v10834_v62  ;;  %v6821_v44 = vpop.f32.mrb[242].mxu0  ;;  %v7078_v57 = vpop.f32.mrb[242].mxu1  ;;  %7464 = vmatprep.mubr.bf16.mxu0 %v7200_v45  ;;  %7825 = vmatprep.mubr.bf16.mxu1 %v7561_v46 }
 0x873   :  { %v6822_v41 = vadd.f32 %v6821_v44, %v10831_v26  ;;  %v7079_v34 = vadd.f32 %v7078_v57, %v10831_v26  ;;  %v6823_v58 = vpop.f32.mrb[243].mxu0  ;;  %v7080_v59 = vpop.f32.mrb[243].mxu1  ;;  %7465 = vmatmul.mubr.bf16.gmra.mrb[44].mxu0 %v7199_v2  ;;  %7826 = vmatmul.mubr.bf16.gmra.mrb[44].mxu1 %v7560_v3  ;;  %v6904_v5 = vmax.f32 %v6818_v53, 0.0  ;;  %v7161_v8 = vmax.f32 %v7075_v54, 0.0 }
 0x874   :  { %v6824_v27 = vadd.f32 %v6823_v58, %v10834_v62  ;;  %v7081_v28 = vadd.f32 %v7080_v59, %v10834_v62  ;;  %v6905_v9 = vmax.f32 %v6820_v52, 0.0  ;;  %v7162_v14 = vmax.f32 %v7077_v56, 0.0 }
 0x875   :  { %v6906_v1 = vmax.f32 %v6822_v41, 0.0  ;;  %v7163_v4 = vmax.f32 %v7079_v34, 0.0 }
 0x876   :  { %v6907_v15 = vmax.f32 %v6824_v27, 0.0  ;;  %v7164_v60 = vmax.f32 %v7081_v28, 0.0 }
 0x877   :  { %v7201_v61 = vpack.c.bf16 %v6906_v1, %v6904_v5  ;;  %v7562_v30 = vpack.c.bf16 %v7163_v4, %v7161_v8 }
 0x878   :  { %v7202_v49 = vpack.c.bf16 %v6907_v15, %v6905_v9  ;;  %v7563_v38 = vpack.c.bf16 %v7164_v60, %v7162_v14  ;;  %v6827_v19 = vpop.f32.mrb[244].mxu0  ;;  %v7084_v20 = vpop.f32.mrb[244].mxu1 }
 0x879   :  { %v6828_v39 = vadd.f32 %v6827_v19, %v10831_v26  ;;  %v7085_v50 = vadd.f32 %v7084_v20, %v10831_v26  ;;  %v6829_v22 = vpop.f32.mrb[245].mxu0  ;;  %v7086_v63 = vpop.f32.mrb[245].mxu1 }
 0x87a   :  { %v6830_v51 = vadd.f32 %v6829_v22, %v10834_v62  ;;  %v7087_v40 = vadd.f32 %v7086_v63, %v10834_v62  ;;  %v6831_v33 = vpop.f32.mrb[246].mxu0  ;;  %v7088_v47 = vpop.f32.mrb[246].mxu1  ;;  %7472 = vmatprep.mubr.bf16.mxu0 %v7202_v49  ;;  %7833 = vmatprep.mubr.bf16.mxu1 %v7563_v38 }
 0x87b   :  { %v6832_v12 = vadd.f32 %v6831_v33, %v10831_v26  ;;  %v7089_v17 = vadd.f32 %v7088_v47, %v10831_v26  ;;  %v6833_v10 = vpop.f32.mrb[247].mxu0  ;;  %v7090_v13 = vpop.f32.mrb[247].mxu1  ;;  %7473 = vmatmul.mubr.bf16.gmra.mrb[48].mxu0 %v7201_v61  ;;  %7834 = vmatmul.mubr.bf16.gmra.mrb[48].mxu1 %v7562_v30  ;;  %v6908_v36 = vmax.f32 %v6828_v39, 0.0  ;;  %v7165_v37 = vmax.f32 %v7085_v50, 0.0 }
 0x87c   :  { %v6834_v16 = vadd.f32 %v6833_v10, %v10834_v62  ;;  %v7091_v29 = vadd.f32 %v7090_v13, %v10834_v62  ;;  %v6909_v23 = vmax.f32 %v6830_v51, 0.0  ;;  %v7166_v24 = vmax.f32 %v7087_v40, 0.0 }
 0x87d   :  { %v6910_v21 = vmax.f32 %v6832_v12, 0.0  ;;  %v7167_v31 = vmax.f32 %v7089_v17, 0.0 }
 0x87e   :  { %v6911_v6 = vmax.f32 %v6834_v16, 0.0  ;;  %v7168_v7 = vmax.f32 %v7091_v29, 0.0 }
 0x87f   :  { %v7203_v32 = vpack.c.bf16 %v6910_v21, %v6908_v36  ;;  %v7564_v25 = vpack.c.bf16 %v7167_v31, %v7165_v37 }
 0x880   :  { %v7204_v35 = vpack.c.bf16 %v6911_v6, %v6909_v23  ;;  %v7565_v48 = vpack.c.bf16 %v7168_v7, %v7166_v24  ;;  %v6837_v11 = vpop.f32.mrb[248].mxu0  ;;  %v7094_v18 = vpop.f32.mrb[248].mxu1 }
 0x881   :  { %v6838_v2 = vadd.f32 %v6837_v11, %v10831_v26  ;;  %v7095_v3 = vadd.f32 %v7094_v18, %v10831_v26  ;;  %v6839_v45 = vpop.f32.mrb[249].mxu0  ;;  %v7096_v46 = vpop.f32.mrb[249].mxu1 }
 0x882   :  { %v6840_v42 = vadd.f32 %v6839_v45, %v10834_v62  ;;  %v7097_v43 = vadd.f32 %v7096_v46, %v10834_v62  ;;  %v6841_v53 = vpop.f32.mrb[250].mxu0  ;;  %v7098_v54 = vpop.f32.mrb[250].mxu1  ;;  %7480 = vmatprep.mubr.bf16.mxu0 %v7204_v35  ;;  %7841 = vmatprep.mubr.bf16.mxu1 %v7565_v48 }
 0x883   :  { %v6842_v55 = vadd.f32 %v6841_v53, %v10831_v26  ;;  %v7099_v0 = vadd.f32 %v7098_v54, %v10831_v26  ;;  %v6843_v52 = vpop.f32.mrb[251].mxu0  ;;  %v7100_v56 = vpop.f32.mrb[251].mxu1  ;;  %7481 = vmatmul.mubr.bf16.gmra.mrb[52].mxu0 %v7203_v32  ;;  %7842 = vmatmul.mubr.bf16.gmra.mrb[52].mxu1 %v7564_v25  ;;  %v6912_v41 = vmax.f32 %v6838_v2, 0.0  ;;  %v7169_v34 = vmax.f32 %v7095_v3, 0.0 }
 0x884   :  { %v6844_v44 = vadd.f32 %v6843_v52, %v10834_v62  ;;  %v7101_v57 = vadd.f32 %v7100_v56, %v10834_v62  ;;  %v6913_v27 = vmax.f32 %v6840_v42, 0.0  ;;  %v7170_v28 = vmax.f32 %v7097_v43, 0.0 }
 0x885   :  { %v6914_v58 = vmax.f32 %v6842_v55, 0.0  ;;  %v7171_v59 = vmax.f32 %v7099_v0, 0.0 }
 0x886   :  { %v6915_v5 = vmax.f32 %v6844_v44, 0.0  ;;  %v7172_v8 = vmax.f32 %v7101_v57, 0.0 }
 0x887   :  { %v7205_v1 = vpack.c.bf16 %v6914_v58, %v6912_v41  ;;  %v7566_v4 = vpack.c.bf16 %v7171_v59, %v7169_v34 }
 0x888   :  { %v7206_v9 = vpack.c.bf16 %v6915_v5, %v6913_v27  ;;  %v7567_v14 = vpack.c.bf16 %v7172_v8, %v7170_v28  ;;  %v6847_v15 = vpop.f32.mrb[252].mxu0  ;;  %v7104_v60 = vpop.f32.mrb[252].mxu1 }
 0x889   :  { %v6848_v61 = vadd.f32 %v6847_v15, %v10831_v26  ;;  %v7105_v30 = vadd.f32 %v7104_v60, %v10831_v26  ;;  %v6849_v49 = vpop.f32.mrb[253].mxu0  ;;  %v7106_v38 = vpop.f32.mrb[253].mxu1 }
 0x88a   :  { %v6850_v19 = vadd.f32 %v6849_v49, %v10834_v62  ;;  %v7107_v20 = vadd.f32 %v7106_v38, %v10834_v62  ;;  %v6851_v39 = vpop.f32.mrb[254].mxu0  ;;  %v7108_v50 = vpop.f32.mrb[254].mxu1  ;;  %7488 = vmatprep.mubr.bf16.mxu0 %v7206_v9  ;;  %7849 = vmatprep.mubr.bf16.mxu1 %v7567_v14 }
 0x88b   :  { %v6852_v22 = vadd.f32 %v6851_v39, %v10831_v26  ;;  %v7109_v63 = vadd.f32 %v7108_v50, %v10831_v26  ;;  %v6853_v51 = vpop.f32.mrb[255].mxu0  ;;  %v7110_v40 = vpop.f32.mrb[255].mxu1  ;;  %7489 = vmatmul.mubr.bf16.gmra.mrb[56].mxu0 %v7205_v1  ;;  %7850 = vmatmul.mubr.bf16.gmra.mrb[56].mxu1 %v7566_v4  ;;  %v6916_v12 = vmax.f32 %v6848_v61, 0.0  ;;  %v7173_v17 = vmax.f32 %v7105_v30, 0.0 }
 0x88c   :  { %v6854_v33 = vadd.f32 %v6853_v51, %v10834_v62  ;;  %v7111_v47 = vadd.f32 %v7110_v40, %v10834_v62  ;;  %v6917_v16 = vmax.f32 %v6850_v19, 0.0  ;;  %v7174_v29 = vmax.f32 %v7107_v20, 0.0  ;;  %v10967_v62 = vld [vmem:[%s11330_s7] ss:$0 sm:$0xff] }
 0x88d   :  { %v6918_v10 = vmax.f32 %v6852_v22, 0.0  ;;  %v7175_v13 = vmax.f32 %v7109_v63, 0.0 }
 0x88e   :  { %v6919_v36 = vmax.f32 %v6854_v33, 0.0  ;;  %v7176_v37 = vmax.f32 %v7111_v47, 0.0 }
 0x88f   :  { %v7207_v21 = vpack.c.bf16 %v6918_v10, %v6916_v12  ;;  %v7568_v31 = vpack.c.bf16 %v7175_v13, %v7173_v17 }
 0x890   :  { %v7208_v23 = vpack.c.bf16 %v6919_v36, %v6917_v16  ;;  %v7569_v26 = vpack.c.bf16 %v7176_v37, %v7174_v29 }
 0x892   :  { %7496 = vmatprep.mubr.bf16.mxu0 %v7208_v23  ;;  %7857 = vmatprep.mubr.bf16.mxu1 %v7569_v26 }
 0x893   :  { %7497 = vmatmul.mubr.bf16.gmra.mrb[60].mxu0 %v7207_v21  ;;  %7858 = vmatmul.mubr.bf16.gmra.mrb[60].mxu1 %v7568_v31 }
 0x8ee   :  { %v8246_v24 = vpop.f32.mrb[0].mxu0  ;;  %v8358_v6 = vpop.f32.mrb[0].mxu1 }
 0x8ef   :  { %v8247_v7 = vpop.f32.mrb[1].mxu0  ;;  %v8359_v32 = vpop.f32.mrb[1].mxu1 }
 0x8f0   :  { %v8248_v25 = vadd.f32 %v8247_v7, %v8246_v24  ;;  %v8360_v35 = vadd.f32 %v8359_v32, %v8358_v6  ;;  %v8249_v48 = vpop.f32.mrb[2].mxu0  ;;  %v8361_v11 = vpop.f32.mrb[2].mxu1 }
 0x8f1   :  { %v8250_v18 = vpop.f32.mrb[3].mxu0  ;;  %v8362_v2 = vpop.f32.mrb[3].mxu1 }
 0x8f2   :  { %v7379_v3 = vadd.f32 %v8248_v25, %v10967_v62  ;;  %v7740_v45 = vadd.f32 %v8360_v35, %v10967_v62  ;;  %v8251_v46 = vadd.f32 %v8250_v18, %v8249_v48  ;;  %v8363_v42 = vadd.f32 %v8362_v2, %v8361_v11 }
 0x8f4   :  { %7506 = vst.msk [vmem:[%s11331_s25] sm:$0xff] %vm7505_vm0, %v7379_v3  ;;  %7866 = vst.msk [vmem:[%s11331_s25 + $0x100] sm:$0xff] %vm7505_vm0, %v7740_v45  ;;  %v7382_v43 = vadd.f32 %v8251_v46, %v10967_v62  ;;  %v7743_v53 = vadd.f32 %v8363_v42, %v10967_v62 }
 0x8f6   :  { %7507 = vst.msk [vmem:[%s11331_s25 + $0x8] sm:$0xff] %vm7505_vm0, %v7382_v43  ;;  %7867 = vst.msk [vmem:[%s11331_s25 + $0x108] sm:$0xff] %vm7505_vm0, %v7743_v53  ;;  %v8252_v54 = vpop.f32.mrb[4].mxu0  ;;  %v8364_v55 = vpop.f32.mrb[4].mxu1 }
 0x8f7   :  { %v8253_v0 = vpop.f32.mrb[5].mxu0  ;;  %v8365_v52 = vpop.f32.mrb[5].mxu1 }
 0x8f8   :  { %v8254_v56 = vadd.f32 %v8253_v0, %v8252_v54  ;;  %v8366_v44 = vadd.f32 %v8365_v52, %v8364_v55  ;;  %v8255_v57 = vpop.f32.mrb[6].mxu0  ;;  %v8367_v41 = vpop.f32.mrb[6].mxu1 }
 0x8f9   :  { %v8256_v34 = vpop.f32.mrb[7].mxu0  ;;  %v8368_v58 = vpop.f32.mrb[7].mxu1 }
 0x8fa   :  { %v7387_v59 = vadd.f32 %v8254_v56, %v10967_v62  ;;  %v7748_v27 = vadd.f32 %v8366_v44, %v10967_v62  ;;  %v8257_v28 = vadd.f32 %v8256_v34, %v8255_v57  ;;  %v8369_v5 = vadd.f32 %v8368_v58, %v8367_v41 }
 0x8fc   :  { %7508 = vst.msk [vmem:[%s11331_s25 + $0x10] sm:$0xff] %vm7505_vm0, %v7387_v59  ;;  %7868 = vst.msk [vmem:[%s11331_s25 + $0x110] sm:$0xff] %vm7505_vm0, %v7748_v27  ;;  %v7390_v8 = vadd.f32 %v8257_v28, %v10967_v62  ;;  %v7751_v1 = vadd.f32 %v8369_v5, %v10967_v62 }
 0x8fe   :  { %7509 = vst.msk [vmem:[%s11331_s25 + $0x18] sm:$0xff] %vm7505_vm0, %v7390_v8  ;;  %7869 = vst.msk [vmem:[%s11331_s25 + $0x118] sm:$0xff] %vm7505_vm0, %v7751_v1  ;;  %v8258_v4 = vpop.f32.mrb[8].mxu0  ;;  %v8370_v9 = vpop.f32.mrb[8].mxu1 }
 0x8ff   :  { %v8259_v14 = vpop.f32.mrb[9].mxu0  ;;  %v8371_v15 = vpop.f32.mrb[9].mxu1 }
 0x900   :  { %v8260_v60 = vadd.f32 %v8259_v14, %v8258_v4  ;;  %v8372_v61 = vadd.f32 %v8371_v15, %v8370_v9  ;;  %v8261_v30 = vpop.f32.mrb[10].mxu0  ;;  %v8373_v49 = vpop.f32.mrb[10].mxu1 }
 0x901   :  { %v8262_v38 = vpop.f32.mrb[11].mxu0  ;;  %v8374_v19 = vpop.f32.mrb[11].mxu1 }
 0x902   :  { %v7395_v20 = vadd.f32 %v8260_v60, %v10967_v62  ;;  %v7756_v39 = vadd.f32 %v8372_v61, %v10967_v62  ;;  %v8263_v50 = vadd.f32 %v8262_v38, %v8261_v30  ;;  %v8375_v22 = vadd.f32 %v8374_v19, %v8373_v49 }
 0x904   :  { %7510 = vst.msk [vmem:[%s11331_s25 + $0x20] sm:$0xff] %vm7505_vm0, %v7395_v20  ;;  %7870 = vst.msk [vmem:[%s11331_s25 + $0x120] sm:$0xff] %vm7505_vm0, %v7756_v39  ;;  %v7398_v63 = vadd.f32 %v8263_v50, %v10967_v62  ;;  %v7759_v51 = vadd.f32 %v8375_v22, %v10967_v62 }
 0x906   :  { %7511 = vst.msk [vmem:[%s11331_s25 + $0x28] sm:$0xff] %vm7505_vm0, %v7398_v63  ;;  %7871 = vst.msk [vmem:[%s11331_s25 + $0x128] sm:$0xff] %vm7505_vm0, %v7759_v51  ;;  %v8264_v40 = vpop.f32.mrb[12].mxu0  ;;  %v8376_v33 = vpop.f32.mrb[12].mxu1 }
 0x907   :  { %v8265_v47 = vpop.f32.mrb[13].mxu0  ;;  %v8377_v12 = vpop.f32.mrb[13].mxu1 }
 0x908   :  { %v8266_v17 = vadd.f32 %v8265_v47, %v8264_v40  ;;  %v8378_v10 = vadd.f32 %v8377_v12, %v8376_v33  ;;  %v8267_v13 = vpop.f32.mrb[14].mxu0  ;;  %v8379_v16 = vpop.f32.mrb[14].mxu1 }
 0x909   :  { %v8268_v29 = vpop.f32.mrb[15].mxu0  ;;  %v8380_v36 = vpop.f32.mrb[15].mxu1 }
 0x90a   :  { %v7403_v37 = vadd.f32 %v8266_v17, %v10967_v62  ;;  %v7764_v21 = vadd.f32 %v8378_v10, %v10967_v62  ;;  %v8269_v31 = vadd.f32 %v8268_v29, %v8267_v13  ;;  %v8381_v23 = vadd.f32 %v8380_v36, %v8379_v16 }
 0x90c   :  { %7512 = vst.msk [vmem:[%s11331_s25 + $0x30] sm:$0xff] %vm7505_vm0, %v7403_v37  ;;  %7872 = vst.msk [vmem:[%s11331_s25 + $0x130] sm:$0xff] %vm7505_vm0, %v7764_v21  ;;  %v7406_v26 = vadd.f32 %v8269_v31, %v10967_v62  ;;  %v7767_v24 = vadd.f32 %v8381_v23, %v10967_v62 }
 0x90e   :  { %7513 = vst.msk [vmem:[%s11331_s25 + $0x38] sm:$0xff] %vm7505_vm0, %v7406_v26  ;;  %7873 = vst.msk [vmem:[%s11331_s25 + $0x138] sm:$0xff] %vm7505_vm0, %v7767_v24  ;;  %v8270_v6 = vpop.f32.mrb[16].mxu0  ;;  %v8382_v7 = vpop.f32.mrb[16].mxu1 }
 0x90f   :  { %v8271_v32 = vpop.f32.mrb[17].mxu0  ;;  %v8383_v25 = vpop.f32.mrb[17].mxu1 }
 0x910   :  { %v8272_v35 = vadd.f32 %v8271_v32, %v8270_v6  ;;  %v8384_v48 = vadd.f32 %v8383_v25, %v8382_v7  ;;  %v8273_v11 = vpop.f32.mrb[18].mxu0  ;;  %v8385_v18 = vpop.f32.mrb[18].mxu1 }
 0x911   :  { %v8274_v2 = vpop.f32.mrb[19].mxu0  ;;  %v8386_v3 = vpop.f32.mrb[19].mxu1 }
 0x912   :  { %v7411_v45 = vadd.f32 %v8272_v35, %v10967_v62  ;;  %v7772_v46 = vadd.f32 %v8384_v48, %v10967_v62  ;;  %v8275_v42 = vadd.f32 %v8274_v2, %v8273_v11  ;;  %v8387_v43 = vadd.f32 %v8386_v3, %v8385_v18 }
 0x914   :  { %7514 = vst.msk [vmem:[%s11331_s25 + $0x40] sm:$0xff] %vm7505_vm0, %v7411_v45  ;;  %7874 = vst.msk [vmem:[%s11331_s25 + $0x140] sm:$0xff] %vm7505_vm0, %v7772_v46  ;;  %v7414_v53 = vadd.f32 %v8275_v42, %v10967_v62  ;;  %v7775_v54 = vadd.f32 %v8387_v43, %v10967_v62 }
 0x916   :  { %7515 = vst.msk [vmem:[%s11331_s25 + $0x48] sm:$0xff] %vm7505_vm0, %v7414_v53  ;;  %7875 = vst.msk [vmem:[%s11331_s25 + $0x148] sm:$0xff] %vm7505_vm0, %v7775_v54  ;;  %v8276_v55 = vpop.f32.mrb[20].mxu0  ;;  %v8388_v0 = vpop.f32.mrb[20].mxu1 }
 0x917   :  { %v8277_v52 = vpop.f32.mrb[21].mxu0  ;;  %v8389_v56 = vpop.f32.mrb[21].mxu1 }
 0x918   :  { %v8278_v44 = vadd.f32 %v8277_v52, %v8276_v55  ;;  %v8390_v57 = vadd.f32 %v8389_v56, %v8388_v0  ;;  %v8279_v41 = vpop.f32.mrb[22].mxu0  ;;  %v8391_v34 = vpop.f32.mrb[22].mxu1 }
 0x919   :  { %v8280_v58 = vpop.f32.mrb[23].mxu0  ;;  %v8392_v59 = vpop.f32.mrb[23].mxu1 }
 0x91a   :  { %v7419_v27 = vadd.f32 %v8278_v44, %v10967_v62  ;;  %v7780_v28 = vadd.f32 %v8390_v57, %v10967_v62  ;;  %v8281_v5 = vadd.f32 %v8280_v58, %v8279_v41  ;;  %v8393_v8 = vadd.f32 %v8392_v59, %v8391_v34 }
 0x91c   :  { %7516 = vst.msk [vmem:[%s11331_s25 + $0x50] sm:$0xff] %vm7505_vm0, %v7419_v27  ;;  %7876 = vst.msk [vmem:[%s11331_s25 + $0x150] sm:$0xff] %vm7505_vm0, %v7780_v28  ;;  %v7422_v1 = vadd.f32 %v8281_v5, %v10967_v62  ;;  %v7783_v4 = vadd.f32 %v8393_v8, %v10967_v62 }
 0x91e   :  { %7517 = vst.msk [vmem:[%s11331_s25 + $0x58] sm:$0xff] %vm7505_vm0, %v7422_v1  ;;  %7877 = vst.msk [vmem:[%s11331_s25 + $0x158] sm:$0xff] %vm7505_vm0, %v7783_v4  ;;  %v8282_v9 = vpop.f32.mrb[24].mxu0  ;;  %v8394_v14 = vpop.f32.mrb[24].mxu1 }
 0x91f   :  { %v8283_v15 = vpop.f32.mrb[25].mxu0  ;;  %v8395_v60 = vpop.f32.mrb[25].mxu1 }
 0x920   :  { %v8284_v61 = vadd.f32 %v8283_v15, %v8282_v9  ;;  %v8396_v30 = vadd.f32 %v8395_v60, %v8394_v14  ;;  %v8285_v49 = vpop.f32.mrb[26].mxu0  ;;  %v8397_v38 = vpop.f32.mrb[26].mxu1 }
 0x921   :  { %v8286_v19 = vpop.f32.mrb[27].mxu0  ;;  %v8398_v20 = vpop.f32.mrb[27].mxu1 }
 0x922   :  { %v7427_v39 = vadd.f32 %v8284_v61, %v10967_v62  ;;  %v7788_v50 = vadd.f32 %v8396_v30, %v10967_v62  ;;  %v8287_v22 = vadd.f32 %v8286_v19, %v8285_v49  ;;  %v8399_v63 = vadd.f32 %v8398_v20, %v8397_v38 }
 0x924   :  { %7518 = vst.msk [vmem:[%s11331_s25 + $0x60] sm:$0xff] %vm7505_vm0, %v7427_v39  ;;  %7878 = vst.msk [vmem:[%s11331_s25 + $0x160] sm:$0xff] %vm7505_vm0, %v7788_v50  ;;  %v7430_v51 = vadd.f32 %v8287_v22, %v10967_v62  ;;  %v7791_v40 = vadd.f32 %v8399_v63, %v10967_v62 }
 0x926   :  { %7519 = vst.msk [vmem:[%s11331_s25 + $0x68] sm:$0xff] %vm7505_vm0, %v7430_v51  ;;  %7879 = vst.msk [vmem:[%s11331_s25 + $0x168] sm:$0xff] %vm7505_vm0, %v7791_v40  ;;  %v8288_v33 = vpop.f32.mrb[28].mxu0  ;;  %v8400_v47 = vpop.f32.mrb[28].mxu1 }
 0x927   :  { %v8289_v12 = vpop.f32.mrb[29].mxu0  ;;  %v8401_v17 = vpop.f32.mrb[29].mxu1 }
 0x928   :  { %v8290_v10 = vadd.f32 %v8289_v12, %v8288_v33  ;;  %v8402_v13 = vadd.f32 %v8401_v17, %v8400_v47  ;;  %v8291_v16 = vpop.f32.mrb[30].mxu0  ;;  %v8403_v29 = vpop.f32.mrb[30].mxu1 }
 0x929   :  { %v8292_v36 = vpop.f32.mrb[31].mxu0  ;;  %v8404_v37 = vpop.f32.mrb[31].mxu1 }
 0x92a   :  { %v7435_v21 = vadd.f32 %v8290_v10, %v10967_v62  ;;  %v7796_v31 = vadd.f32 %v8402_v13, %v10967_v62  ;;  %v8293_v23 = vadd.f32 %v8292_v36, %v8291_v16  ;;  %v8405_v26 = vadd.f32 %v8404_v37, %v8403_v29 }
 0x92c   :  { %7520 = vst.msk [vmem:[%s11331_s25 + $0x70] sm:$0xff] %vm7505_vm0, %v7435_v21  ;;  %7880 = vst.msk [vmem:[%s11331_s25 + $0x170] sm:$0xff] %vm7505_vm0, %v7796_v31  ;;  %v7438_v24 = vadd.f32 %v8293_v23, %v10967_v62  ;;  %v7799_v6 = vadd.f32 %v8405_v26, %v10967_v62 }
 0x92e   :  { %7521 = vst.msk [vmem:[%s11331_s25 + $0x78] sm:$0xff] %vm7505_vm0, %v7438_v24  ;;  %7881 = vst.msk [vmem:[%s11331_s25 + $0x178] sm:$0xff] %vm7505_vm0, %v7799_v6  ;;  %v8294_v7 = vpop.f32.mrb[32].mxu0  ;;  %v8406_v32 = vpop.f32.mrb[32].mxu1 }
 0x92f   :  { %v8295_v25 = vpop.f32.mrb[33].mxu0  ;;  %v8407_v35 = vpop.f32.mrb[33].mxu1 }
 0x930   :  { %v8296_v48 = vadd.f32 %v8295_v25, %v8294_v7  ;;  %v8408_v11 = vadd.f32 %v8407_v35, %v8406_v32  ;;  %v8297_v18 = vpop.f32.mrb[34].mxu0  ;;  %v8409_v2 = vpop.f32.mrb[34].mxu1 }
 0x931   :  { %v8298_v3 = vpop.f32.mrb[35].mxu0  ;;  %v8410_v45 = vpop.f32.mrb[35].mxu1 }
 0x932   :  { %v7443_v46 = vadd.f32 %v8296_v48, %v10967_v62  ;;  %v7804_v42 = vadd.f32 %v8408_v11, %v10967_v62  ;;  %v8299_v43 = vadd.f32 %v8298_v3, %v8297_v18  ;;  %v8411_v53 = vadd.f32 %v8410_v45, %v8409_v2 }
 0x934   :  { %7522 = vst.msk [vmem:[%s11331_s25 + $0x80] sm:$0xff] %vm7505_vm0, %v7443_v46  ;;  %7882 = vst.msk [vmem:[%s11331_s25 + $0x180] sm:$0xff] %vm7505_vm0, %v7804_v42  ;;  %v7446_v54 = vadd.f32 %v8299_v43, %v10967_v62  ;;  %v7807_v55 = vadd.f32 %v8411_v53, %v10967_v62 }
 0x936   :  { %7523 = vst.msk [vmem:[%s11331_s25 + $0x88] sm:$0xff] %vm7505_vm0, %v7446_v54  ;;  %7883 = vst.msk [vmem:[%s11331_s25 + $0x188] sm:$0xff] %vm7505_vm0, %v7807_v55  ;;  %v8300_v0 = vpop.f32.mrb[36].mxu0  ;;  %v8412_v52 = vpop.f32.mrb[36].mxu1 }
 0x937   :  { %v8301_v56 = vpop.f32.mrb[37].mxu0  ;;  %v8413_v44 = vpop.f32.mrb[37].mxu1 }
 0x938   :  { %v8302_v57 = vadd.f32 %v8301_v56, %v8300_v0  ;;  %v8414_v41 = vadd.f32 %v8413_v44, %v8412_v52  ;;  %v8303_v34 = vpop.f32.mrb[38].mxu0  ;;  %v8415_v58 = vpop.f32.mrb[38].mxu1 }
 0x939   :  { %v8304_v59 = vpop.f32.mrb[39].mxu0  ;;  %v8416_v27 = vpop.f32.mrb[39].mxu1 }
 0x93a   :  { %v7451_v28 = vadd.f32 %v8302_v57, %v10967_v62  ;;  %v7812_v5 = vadd.f32 %v8414_v41, %v10967_v62  ;;  %v8305_v8 = vadd.f32 %v8304_v59, %v8303_v34  ;;  %v8417_v1 = vadd.f32 %v8416_v27, %v8415_v58 }
 0x93c   :  { %7524 = vst.msk [vmem:[%s11331_s25 + $0x90] sm:$0xff] %vm7505_vm0, %v7451_v28  ;;  %7884 = vst.msk [vmem:[%s11331_s25 + $0x190] sm:$0xff] %vm7505_vm0, %v7812_v5  ;;  %v7454_v4 = vadd.f32 %v8305_v8, %v10967_v62  ;;  %v7815_v9 = vadd.f32 %v8417_v1, %v10967_v62 }
 0x93e   :  { %7525 = vst.msk [vmem:[%s11331_s25 + $0x98] sm:$0xff] %vm7505_vm0, %v7454_v4  ;;  %7885 = vst.msk [vmem:[%s11331_s25 + $0x198] sm:$0xff] %vm7505_vm0, %v7815_v9  ;;  %v8306_v14 = vpop.f32.mrb[40].mxu0  ;;  %v8418_v15 = vpop.f32.mrb[40].mxu1 }
 0x93f   :  { %v8307_v60 = vpop.f32.mrb[41].mxu0  ;;  %v8419_v61 = vpop.f32.mrb[41].mxu1 }
 0x940   :  { %v8308_v30 = vadd.f32 %v8307_v60, %v8306_v14  ;;  %v8420_v49 = vadd.f32 %v8419_v61, %v8418_v15  ;;  %v8309_v38 = vpop.f32.mrb[42].mxu0  ;;  %v8421_v19 = vpop.f32.mrb[42].mxu1 }
 0x941   :  { %v8310_v20 = vpop.f32.mrb[43].mxu0  ;;  %v8422_v39 = vpop.f32.mrb[43].mxu1 }
 0x942   :  { %v7459_v50 = vadd.f32 %v8308_v30, %v10967_v62  ;;  %v7820_v22 = vadd.f32 %v8420_v49, %v10967_v62  ;;  %v8311_v63 = vadd.f32 %v8310_v20, %v8309_v38  ;;  %v8423_v51 = vadd.f32 %v8422_v39, %v8421_v19 }
 0x944   :  { %7526 = vst.msk [vmem:[%s11331_s25 + $0xa0] sm:$0xff] %vm7505_vm0, %v7459_v50  ;;  %7886 = vst.msk [vmem:[%s11331_s25 + $0x1a0] sm:$0xff] %vm7505_vm0, %v7820_v22  ;;  %v7462_v40 = vadd.f32 %v8311_v63, %v10967_v62  ;;  %v7823_v33 = vadd.f32 %v8423_v51, %v10967_v62 }
 0x946   :  { %7527 = vst.msk [vmem:[%s11331_s25 + $0xa8] sm:$0xff] %vm7505_vm0, %v7462_v40  ;;  %7887 = vst.msk [vmem:[%s11331_s25 + $0x1a8] sm:$0xff] %vm7505_vm0, %v7823_v33  ;;  %v8312_v47 = vpop.f32.mrb[44].mxu0  ;;  %v8424_v12 = vpop.f32.mrb[44].mxu1 }
 0x947   :  { %v8313_v17 = vpop.f32.mrb[45].mxu0  ;;  %v8425_v10 = vpop.f32.mrb[45].mxu1 }
 0x948   :  { %v8314_v13 = vadd.f32 %v8313_v17, %v8312_v47  ;;  %v8426_v16 = vadd.f32 %v8425_v10, %v8424_v12  ;;  %v8315_v29 = vpop.f32.mrb[46].mxu0  ;;  %v8427_v36 = vpop.f32.mrb[46].mxu1 }
 0x949   :  { %v8316_v37 = vpop.f32.mrb[47].mxu0  ;;  %v8428_v21 = vpop.f32.mrb[47].mxu1 }
 0x94a   :  { %v7467_v31 = vadd.f32 %v8314_v13, %v10967_v62  ;;  %v7828_v23 = vadd.f32 %v8426_v16, %v10967_v62  ;;  %v8317_v26 = vadd.f32 %v8316_v37, %v8315_v29  ;;  %v8429_v24 = vadd.f32 %v8428_v21, %v8427_v36 }
 0x94c   :  { %7528 = vst.msk [vmem:[%s11331_s25 + $0xb0] sm:$0xff] %vm7505_vm0, %v7467_v31  ;;  %7888 = vst.msk [vmem:[%s11331_s25 + $0x1b0] sm:$0xff] %vm7505_vm0, %v7828_v23  ;;  %v7470_v6 = vadd.f32 %v8317_v26, %v10967_v62  ;;  %v7831_v7 = vadd.f32 %v8429_v24, %v10967_v62 }
 0x94e   :  { %7529 = vst.msk [vmem:[%s11331_s25 + $0xb8] sm:$0xff] %vm7505_vm0, %v7470_v6  ;;  %7889 = vst.msk [vmem:[%s11331_s25 + $0x1b8] sm:$0xff] %vm7505_vm0, %v7831_v7  ;;  %v8318_v32 = vpop.f32.mrb[48].mxu0  ;;  %v8430_v25 = vpop.f32.mrb[48].mxu1 }
 0x94f   :  { %v8319_v35 = vpop.f32.mrb[49].mxu0  ;;  %v8431_v48 = vpop.f32.mrb[49].mxu1 }
 0x950   :  { %v8320_v11 = vadd.f32 %v8319_v35, %v8318_v32  ;;  %v8432_v18 = vadd.f32 %v8431_v48, %v8430_v25  ;;  %v8321_v2 = vpop.f32.mrb[50].mxu0  ;;  %v8433_v3 = vpop.f32.mrb[50].mxu1 }
 0x951   :  { %v8322_v45 = vpop.f32.mrb[51].mxu0  ;;  %v8434_v46 = vpop.f32.mrb[51].mxu1 }
 0x952   :  { %v7475_v42 = vadd.f32 %v8320_v11, %v10967_v62  ;;  %v7836_v43 = vadd.f32 %v8432_v18, %v10967_v62  ;;  %v8323_v53 = vadd.f32 %v8322_v45, %v8321_v2  ;;  %v8435_v54 = vadd.f32 %v8434_v46, %v8433_v3 }
 0x954   :  { %7530 = vst.msk [vmem:[%s11331_s25 + $0xc0] sm:$0xff] %vm7505_vm0, %v7475_v42  ;;  %7890 = vst.msk [vmem:[%s11331_s25 + $0x1c0] sm:$0xff] %vm7505_vm0, %v7836_v43  ;;  %v7478_v55 = vadd.f32 %v8323_v53, %v10967_v62  ;;  %v7839_v0 = vadd.f32 %v8435_v54, %v10967_v62 }
 0x956   :  { %7531 = vst.msk [vmem:[%s11331_s25 + $0xc8] sm:$0xff] %vm7505_vm0, %v7478_v55  ;;  %7891 = vst.msk [vmem:[%s11331_s25 + $0x1c8] sm:$0xff] %vm7505_vm0, %v7839_v0  ;;  %v8324_v52 = vpop.f32.mrb[52].mxu0  ;;  %v8436_v56 = vpop.f32.mrb[52].mxu1 }
 0x957   :  { %v8325_v44 = vpop.f32.mrb[53].mxu0  ;;  %v8437_v57 = vpop.f32.mrb[53].mxu1 }
 0x958   :  { %v8326_v41 = vadd.f32 %v8325_v44, %v8324_v52  ;;  %v8438_v34 = vadd.f32 %v8437_v57, %v8436_v56  ;;  %v8327_v58 = vpop.f32.mrb[54].mxu0  ;;  %v8439_v59 = vpop.f32.mrb[54].mxu1 }
 0x959   :  { %v8328_v27 = vpop.f32.mrb[55].mxu0  ;;  %v8440_v28 = vpop.f32.mrb[55].mxu1 }
 0x95a   :  { %v7483_v5 = vadd.f32 %v8326_v41, %v10967_v62  ;;  %v7844_v8 = vadd.f32 %v8438_v34, %v10967_v62  ;;  %v8329_v1 = vadd.f32 %v8328_v27, %v8327_v58  ;;  %v8441_v4 = vadd.f32 %v8440_v28, %v8439_v59 }
 0x95c   :  { %7532 = vst.msk [vmem:[%s11331_s25 + $0xd0] sm:$0xff] %vm7505_vm0, %v7483_v5  ;;  %7892 = vst.msk [vmem:[%s11331_s25 + $0x1d0] sm:$0xff] %vm7505_vm0, %v7844_v8  ;;  %v7486_v9 = vadd.f32 %v8329_v1, %v10967_v62  ;;  %v7847_v14 = vadd.f32 %v8441_v4, %v10967_v62 }
 0x95e   :  { %7533 = vst.msk [vmem:[%s11331_s25 + $0xd8] sm:$0xff] %vm7505_vm0, %v7486_v9  ;;  %7893 = vst.msk [vmem:[%s11331_s25 + $0x1d8] sm:$0xff] %vm7505_vm0, %v7847_v14  ;;  %v8330_v15 = vpop.f32.mrb[56].mxu0  ;;  %v8442_v60 = vpop.f32.mrb[56].mxu1 }
 0x95f   :  { %v8331_v61 = vpop.f32.mrb[57].mxu0  ;;  %v8443_v30 = vpop.f32.mrb[57].mxu1 }
 0x960   :  { %v8332_v49 = vadd.f32 %v8331_v61, %v8330_v15  ;;  %v8444_v38 = vadd.f32 %v8443_v30, %v8442_v60  ;;  %v8333_v19 = vpop.f32.mrb[58].mxu0  ;;  %v8445_v20 = vpop.f32.mrb[58].mxu1 }
 0x961   :  { %v8334_v39 = vpop.f32.mrb[59].mxu0  ;;  %v8446_v50 = vpop.f32.mrb[59].mxu1 }
 0x962   :  { %v7491_v22 = vadd.f32 %v8332_v49, %v10967_v62  ;;  %v7852_v63 = vadd.f32 %v8444_v38, %v10967_v62  ;;  %v8335_v51 = vadd.f32 %v8334_v39, %v8333_v19  ;;  %v8447_v40 = vadd.f32 %v8446_v50, %v8445_v20 }
 0x964   :  { %7534 = vst.msk [vmem:[%s11331_s25 + $0xe0] sm:$0xff] %vm7505_vm0, %v7491_v22  ;;  %7894 = vst.msk [vmem:[%s11331_s25 + $0x1e0] sm:$0xff] %vm7505_vm0, %v7852_v63  ;;  %v7494_v33 = vadd.f32 %v8335_v51, %v10967_v62  ;;  %v7855_v47 = vadd.f32 %v8447_v40, %v10967_v62 }
 0x966   :  { %7535 = vst.msk [vmem:[%s11331_s25 + $0xe8] sm:$0xff] %vm7505_vm0, %v7494_v33  ;;  %7895 = vst.msk [vmem:[%s11331_s25 + $0x1e8] sm:$0xff] %vm7505_vm0, %v7855_v47  ;;  %v8336_v12 = vpop.f32.mrb[60].mxu0  ;;  %v8448_v17 = vpop.f32.mrb[60].mxu1 }
 0x967   :  { %v8337_v10 = vpop.f32.mrb[61].mxu0  ;;  %v8449_v13 = vpop.f32.mrb[61].mxu1 }
 0x968   :  { %v8338_v16 = vadd.f32 %v8337_v10, %v8336_v12  ;;  %v8450_v29 = vadd.f32 %v8449_v13, %v8448_v17  ;;  %v8339_v36 = vpop.f32.mrb[62].mxu0  ;;  %v8451_v37 = vpop.f32.mrb[62].mxu1 }
 0x969   :  { %v8340_v21 = vpop.f32.mrb[63].mxu0  ;;  %v8452_v31 = vpop.f32.mrb[63].mxu1 }
 0x96a   :  { %v7499_v23 = vadd.f32 %v8338_v16, %v10967_v62  ;;  %v7860_v26 = vadd.f32 %v8450_v29, %v10967_v62  ;;  %v8341_v24 = vadd.f32 %v8340_v21, %v8339_v36  ;;  %v8453_v6 = vadd.f32 %v8452_v31, %v8451_v37 }
 0x96c   :  { %7536 = vst.msk [vmem:[%s11331_s25 + $0xf0] sm:$0xff] %vm7505_vm0, %v7499_v23  ;;  %7896 = vst.msk [vmem:[%s11331_s25 + $0x1f0] sm:$0xff] %vm7505_vm0, %v7860_v26  ;;  %v7502_v7 = vadd.f32 %v8341_v24, %v10967_v62  ;;  %v7863_v32 = vadd.f32 %v8453_v6, %v10967_v62 }
 0x96e   :  { %7537 = vst.msk [vmem:[%s11331_s25 + $0xf8] sm:$0xff] %vm7505_vm0, %v7502_v7  ;;  %7897 = vst.msk [vmem:[%s11331_s25 + $0x1f8] sm:$0xff] %vm7505_vm0, %v7863_v32 }
 0x96f   :  { %7902 = vsyncpa [#allocation3], 1 }
 0x970   :  { %7903 = vsyncpa [#allocation5], 1 }
 0x971   :  { %7904 = vsyncpa [#allocation8], 1 }
 0x972   :  { %7905 = vsyncpa [#allocation11], 1 }
 0x973   :  { %7906 = vsyncpa [#allocation14], 1 }
 0x974   :  { %7907 = vsyncpa [#allocation17], 1 }

</bundles_post_ra>
